<compile_context>
chip_gen: v7x
topology: tpu7x:2x2x1
jax: 0.10.0
libtpu: 0.0.40
codegen_flags: <defaults>
</compile_context>

<pallas_src>
import functools

import jax
import jax.numpy as jnp
from jax.experimental import pallas as pl
from jax.experimental.pallas import tpu as pltpu


# ----------------------------------------------------------------------------- utils
def _round_up(x, m):
    return (x + m - 1) // m * m


def _pick_tk(K, max_blocks=4):
    """Largest multiple of 128 that divides round_up(K,128) with <= max_blocks*128 size."""
    m = _round_up(K, 128) // 128
    best = 1
    for d in range(1, max_blocks + 1):
        if m % d == 0:
            best = d
    return best * 128


# ----------------------------------------------------------------------------- fused conv matmul
# C = A @ B, epilogue: y = C*scale + shift (+ residual) (+ relu), accumulated in f32.
def _conv_matmul_kernel(a_ref, b_ref, s_ref, t_ref, *rest, relu):
    if len(rest) == 3:
        r_ref, o_ref, acc_ref = rest
    else:
        r_ref = None
        o_ref, acc_ref = rest

    @pl.when(pl.program_id(2) == 0)
    def _():
        acc_ref[...] = jnp.zeros_like(acc_ref)

    acc_ref[...] += jnp.dot(a_ref[...], b_ref[...], preferred_element_type=jnp.float32)

    @pl.when(pl.program_id(2) == pl.num_programs(2) - 1)
    def _():
        y = acc_ref[...] * s_ref[...] + t_ref[...]
        if r_ref is not None:
            y = y + r_ref[...]
        if relu:
            y = jnp.maximum(y, 0.0)
        o_ref[...] = y.astype(o_ref.dtype)


def conv_bn_matmul(a, b, scale, shift, residual=None, relu=True):
    """(M,K)@(K,N) with fused per-column BN affine / residual / relu epilogue."""
    M, K = a.shape
    K2, N = b.shape
    assert K == K2
    # Adaptive tiles: avoid padding tiny M/K/N up to huge fixed tiles.
    tm = min(128, _round_up(M, 8))
    tn = min(256, _round_up(N, 128))
    tk = _pick_tk(K)
    Mp, Np, Kp = _round_up(M, tm), _round_up(N, tn), _round_up(K, tk)

    a_p = jnp.pad(a, ((0, Mp - M), (0, Kp - K))).astype(jnp.bfloat16)
    b_p = jnp.pad(b, ((0, Kp - K), (0, Np - N))).astype(jnp.bfloat16)
    s_p = jnp.pad(scale.reshape(1, N).astype(jnp.float32), ((0, 0), (0, Np - N)))
    t_p = jnp.pad(shift.reshape(1, N).astype(jnp.float32), ((0, 0), (0, Np - N)))

    in_specs = [
        pl.BlockSpec((tm, tk), lambda i, j, k: (i, k)),
        pl.BlockSpec((tk, tn), lambda i, j, k: (k, j)),
        pl.BlockSpec((1, tn), lambda i, j, k: (0, j)),
        pl.BlockSpec((1, tn), lambda i, j, k: (0, j)),
    ]
    args = [a_p, b_p, s_p, t_p]
    if residual is not None:
        r_p = jnp.pad(residual.astype(jnp.float32), ((0, Mp - M), (0, Np - N)))
        in_specs.append(pl.BlockSpec((tm, tn), lambda i, j, k: (i, j)))
        args.append(r_p)

    out = pl.pallas_call(
        functools.partial(_conv_matmul_kernel, relu=relu),
        out_shape=jax.ShapeDtypeStruct((Mp, Np), jnp.float32),
        grid_spec=pltpu.PrefetchScalarGridSpec(
            num_scalar_prefetch=0,
            grid=(Mp // tm, Np // tn, Kp // tk),
            in_specs=in_specs,
            out_specs=pl.BlockSpec((tm, tn), lambda i, j, k: (i, j)),
            scratch_shapes=[pltpu.VMEM((tm, tn), jnp.float32)],
        ),
        compiler_params=pltpu.CompilerParams(
            dimension_semantics=("parallel", "parallel", "arbitrary")
        ),
    )(*args)
    return out[:M, :N]


# ----------------------------------------------------------------------------- conv2d (+BN fused)
def conv2d_bn(x, w, scale, shift, stride, pad, relu=True, residual=None):
    """x: (B,H,W,Cin) NHWC ; w: (Cout,Cin,kh,kw) PyTorch layout ; bias-free (ResNet)."""
    Cout, Cin, kh, kw = w.shape
    B, H, W, _ = x.shape
    Ho = (H + 2 * pad - kh) // stride + 1
    Wo = (W + 2 * pad - kw) // stride + 1

    if kh == 1 and kw == 1 and pad == 0:
        # 1x1 conv: no im2col expansion at all.
        patches = x[:, ::stride, ::stride, :].reshape(B * Ho * Wo, Cin)
    else:
        # im2col in bf16 (halves the window-intermediate HBM traffic); XLA glue only.
        xb = x.astype(jnp.bfloat16)
        xp = jnp.pad(xb, ((0, 0), (pad, pad), (pad, pad), (0, 0)))
        cols = [
            xp[:, i:i + stride * Ho:stride, j:j + stride * Wo:stride, :]
            for i in range(kh) for j in range(kw)
        ]
        patches = jnp.concatenate(cols, axis=-1).reshape(B * Ho * Wo, kh * kw * Cin)

    wm = jnp.transpose(w, (2, 3, 1, 0)).reshape(kh * kw * Cin, Cout)
    res2 = None if residual is None else residual.reshape(B * Ho * Wo, Cout)
    out = conv_bn_matmul(patches, wm, scale, shift, residual=res2, relu=relu)
    return out.reshape(B, Ho, Wo, Cout)


# ----------------------------------------------------------------------------- maxpool (XLA-fused)
def maxpool_3x3_s2_p1(x):
    """Incremental max over the 9 shifted views; XLA fuses it, no 9x HBM intermediate."""
    B, H, W, C = x.shape
    Ho = (H + 2 - 3) // 2 + 1
    Wo = (W + 2 - 3) // 2 + 1
    xp = jnp.pad(x, ((0, 0), (1, 1), (1, 1), (0, 0)), constant_values=-jnp.inf)
    out = None
    for i in range(3):
        for j in range(3):
            win = xp[:, i:i + 2 * Ho:2, j:j + 2 * Wo:2, :]
            out = win if out is None else jnp.maximum(out, win)
    return out


# ----------------------------------------------------------------------------- ResNet18 feature extractor
def basic_block(x, p, stride, downsample):
    if downsample:
        identity = conv2d_bn(x, p["down_w"], p["down_scale"], p["down_shift"],
                             stride=stride, pad=0, relu=False)
    else:
        identity = x
    out = conv2d_bn(x, p["conv1_w"], p["bn1_scale"], p["bn1_shift"],
                    stride=stride, pad=1, relu=True)
    # bn2 + residual add + relu fused into the conv2 matmul epilogue.
    out = conv2d_bn(out, p["conv2_w"], p["bn2_scale"], p["bn2_shift"],
                    stride=1, pad=1, relu=True, residual=identity)
    return out


def resnet18_feature_map(img_nchw, p):
    x = jnp.transpose(img_nchw, (0, 2, 3, 1))  # NCHW -> NHWC
    x = conv2d_bn(x, p["conv1_w"], p["bn1_scale"], p["bn1_shift"],
                  stride=2, pad=3, relu=True)
    x = maxpool_3x3_s2_p1(x)
    for li, layer in enumerate(p["layers"]):
        for bi, blk in enumerate(layer):
            stride = 2 if (li > 0 and bi == 0) else 1
            downsample = li > 0 and bi == 0
            x = basic_block(x, blk, stride, downsample)
    return x  # (B, h, w, 512); avg-pool fused into the head kernel


# ----------------------------------------------------------------------------- LSTM kernel
def _lstm_kernel(x_ref, wih_ref, whh_ref, b_ref, h_out_ref, xp_ref, *, batch, hidden_pad):
    TB, E = x_ref.shape
    T = TB // batch
    Hp = hidden_pad

    # Hoisted input projection: one matmul for all timesteps (off the serial path).
    proj = (jnp.dot(x_ref[...], wih_ref[...], preferred_element_type=jnp.float32)
            + b_ref[...])                                  # (T*B, 4*Hp)
    for t in range(T):                                     # static scatter into (T,B,4*Hp)
        xp_ref[t] = proj[t * batch:(t + 1) * batch, :]

    def step(t, carry):
        h, c = carry
        gates = xp_ref[t] + jnp.dot(h, whh_ref[...], preferred_element_type=jnp.float32)
        # Hp is a multiple of 128 -> every gate slice is lane-tile aligned.
        i = jax.nn.sigmoid(gates[:, 0 * Hp:1 * Hp])
        f = jax.nn.sigmoid(gates[:, 1 * Hp:2 * Hp])
        g = jnp.tanh(gates[:, 2 * Hp:3 * Hp])
        o = jax.nn.sigmoid(gates[:, 3 * Hp:4 * Hp])
        c = f * c + i * g
        h = o * jnp.tanh(c)
        return h, c

    h0 = jnp.zeros((batch, Hp), jnp.float32)
    c0 = jnp.zeros((batch, Hp), jnp.float32)
    h, _ = jax.lax.fori_loop(0, T, step, (h0, c0))
    h_out_ref[...] = h


def lstm_last_hidden(emb_tbe, w_ih_p, w_hh_p, bias_p):
    T, B, E = emb_tbe.shape
    Hp = w_hh_p.shape[0]
    x_flat = emb_tbe.reshape(T * B, E)
    return pl.pallas_call(
        functools.partial(_lstm_kernel, batch=B, hidden_pad=Hp),
        out_shape=jax.ShapeDtypeStruct((B, Hp), jnp.float32),
        scratch_shapes=[pltpu.VMEM((T, B, 4 * Hp), jnp.float32)],
    )(x_flat, w_ih_p, w_hh_p, bias_p)   # (B, Hp), columns >= hidden_dim are exactly 0


# ----------------------------------------------------------------------------- fused head kernel
def _head_kernel(feat_ref, txt_ref, w1i_ref, w1t_ref, b1_ref, w2_ref, b2_ref, o_ref):
    img = jnp.mean(feat_ref[...], axis=1)                  # global average pool (B, 512)
    x = (jnp.dot(img, w1i_ref[...], preferred_element_type=jnp.float32)
         + jnp.dot(txt_ref[...], w1t_ref[...], preferred_element_type=jnp.float32)
         + b1_ref[...])
    x = jnp.maximum(x, 0.0)
    # TODO(synk): dropout is identity (inference/eval semantics).
    o_ref[...] = (jnp.dot(x, w2_ref[...], preferred_element_type=jnp.float32)
                  + b2_ref[...])


def fused_head(feat_map, txt, head):
    B, H, W, C = feat_map.shape
    feat = feat_map.reshape(B, H * W, C)
    ncls_p = head["w2_p"].shape[1]
    out = pl.pallas_call(
        _head_kernel,
        out_shape=jax.ShapeDtypeStruct((B, ncls_p), jnp.float32),
    )(feat, txt, head["w1_img"], head["w1_txt"], head["b1"], head["w2_p"], head["b2_p"])
    return out


# ----------------------------------------------------------------------------- full forward
def multimodal_classifier_forward(params, num_classes, image_nchw, text_seq):
    feat_map = resnet18_feature_map(image_nchw, params["cnn"])            # (B,h,w,512)

    emb = params["embedding"][text_seq]                                    # (B,T,E) gather (glue)
    emb = jnp.transpose(emb, (1, 0, 2)).astype(jnp.float32)                # (T,B,E)
    lstm = params["lstm"]
    text_features = lstm_last_hidden(emb, lstm["w_ih_p"], lstm["w_hh_p"], lstm["bias_p"])

    logits_p = fused_head(feat_map, text_features, params["head"])         # (B, 128-padded)
    return logits_p[:, :num_classes]


# ----------------------------------------------------------------------------- deterministic param init
def init_params(key, vocab_size, embed_dim, hidden_dim, num_classes):
    keys = iter(jax.random.split(key, 256))

    def nrm(shape, scale):
        return jax.random.normal(next(keys), shape, jnp.float32) * scale

    def conv_w(cout, cin, k):
        fan_in = cin * k * k
        return nrm((cout, cin, k, k), (2.0 / fan_in) ** 0.5)

    def bn(c):
        gamma = 1.0 + 0.1 * nrm((c,), 1.0)
        beta = 0.1 * nrm((c,), 1.0)
        mean = 0.1 * nrm((c,), 1.0)
        var = jnp.abs(1.0 + 0.1 * nrm((c,), 1.0))
        scale = gamma / jnp.sqrt(var + 1e-5)
        shift = beta - mean * scale
        return scale, shift

    def block_params(cin, cout, downsample):
        p = {"conv1_w": conv_w(cout, cin, 3), "conv2_w": conv_w(cout, cout, 3)}
        p["bn1_scale"], p["bn1_shift"] = bn(cout)
        p["bn2_scale"], p["bn2_shift"] = bn(cout)
        if downsample:
            p["down_w"] = conv_w(cout, cin, 1)
            p["down_scale"], p["down_shift"] = bn(cout)
        return p

    cnn = {"conv1_w": conv_w(64, 3, 7)}
    cnn["bn1_scale"], cnn["bn1_shift"] = bn(64)
    layers, cin = [], 64
    for li, cout in enumerate([64, 128, 256, 512]):
        blocks = []
        for bi in range(2):
            downsample = li > 0 and bi == 0
            blocks.append(block_params(cin if bi == 0 else cout, cout, downsample))
        layers.append(blocks)
        cin = cout
    cnn["layers"] = layers

    emb = nrm((vocab_size, embed_dim), 1.0)
    emb = emb.at[0].set(0.0)  # padding_idx=0

    # --- LSTM weights, padded so each gate spans a whole 128-lane tile ---------------
    Hp = _round_up(hidden_dim, 128)
    s = 1.0 / (hidden_dim ** 0.5)
    w_ih = nrm((4 * hidden_dim, embed_dim), s)      # PyTorch layout (4H, E), gates i,f,g,o
    w_hh = nrm((4 * hidden_dim, hidden_dim), s)
    b_ih = nrm((4 * hidden_dim,), s)
    b_hh = nrm((4 * hidden_dim,), s)

    def pad_gate_cols(w):                           # (4H, D) -> (D, 4*Hp), zero-padded
        w4 = w.reshape(4, hidden_dim, -1)
        w4 = jnp.pad(w4, ((0, 0), (0, Hp - hidden_dim), (0, 0)))
        return jnp.transpose(w4, (2, 0, 1)).reshape(-1, 4 * Hp)

    w_ih_p = pad_gate_cols(w_ih)                                            # (E, 4Hp)
    w_hh_p = jnp.pad(pad_gate_cols(w_hh), ((0, Hp - hidden_dim), (0, 0)))   # (Hp, 4Hp)
    bias4 = (b_ih + b_hh).reshape(4, hidden_dim)
    bias_p = jnp.pad(bias4, ((0, 0), (0, Hp - hidden_dim))).reshape(1, 4 * Hp)

    # --- fused head: fc1 split into image/text halves, fc2 padded to lane-dense ------
    img_feat_dim = 512
    fc1_w = nrm((128, img_feat_dim + hidden_dim), (1.0 / (img_feat_dim + hidden_dim)) ** 0.5)
    fc1_b = nrm((128,), 0.01)
    fc2_w = nrm((num_classes, 128), (1.0 / 128) ** 0.5)
    fc2_b = nrm((num_classes,), 0.01)
    ncls_p = _round_up(num_classes, 128)
    head = {
        "w1_img": fc1_w[:, :img_feat_dim].T,                                          # (512,128)
        "w1_txt": jnp.pad(fc1_w[:, img_feat_dim:].T, ((0, Hp - hidden_dim), (0, 0))),  # (Hp,128)
        "b1": fc1_b.reshape(1, 128),
        "w2_p": jnp.pad(fc2_w.T, ((0, 0), (0, ncls_p - num_classes))),                 # (128,ncls_p)
        "b2_p": jnp.pad(fc2_b.reshape(1, -1), ((0, 0), (0, ncls_p - num_classes))),
    }

    return {
        "cnn": cnn,
        "embedding": emb,
        "lstm": {"w_ih_p": w_ih_p, "w_hh_p": w_hh_p, "bias_p": bias_p},
        "head": head,
    }


# ----------------------------------------------------------------------------- main
if __name__ == "__main__":
    vocab_size, embed_dim, hidden_dim, num_classes = 50, 32, 64, 1
    batch, seq_len, img_hw = 2, 8, 32

    root = jax.random.PRNGKey(0)
    pkey, ikey, tkey = jax.random.split(root, 3)

    params = init_params(pkey, vocab_size, embed_dim, hidden_dim, num_classes)
    image = jax.random.normal(ikey, (batch, 3, img_hw, img_hw), jnp.float32)   # NCHW like PyTorch
    text_seq = jax.random.randint(tkey, (batch, seq_len), 0, vocab_size, dtype=jnp.int32)

    fwd = jax.jit(functools.partial(multimodal_classifier_forward, params, num_classes))
    logits = fwd(image, text_seq)
    jax.block_until_ready(logits)
    assert logits.shape == (batch, num_classes)
    assert bool(jnp.all(jnp.isfinite(logits)))
    print("KERNEL_OK")
</pallas_src>

<mosaic_0001>
module attributes {stable_mosaic.version = 11 : i64} {
  func.func @_conv_matmul_kernel(%arg0: i32, %arg1: i32, %arg2: i32, %arg3: memref<128x256xbf16, #tpu.memory_space<vmem>>, %arg4: memref<256x128xbf16, #tpu.memory_space<vmem>>, %arg5: memref<1x128xf32, #tpu.memory_space<vmem>>, %arg6: memref<1x128xf32, #tpu.memory_space<vmem>>, %arg7: memref<128x128xf32, #tpu.memory_space<vmem>>, %arg8: memref<128x128xf32, #tpu.memory_space<vmem>>) attributes {dimension_semantics = [#tpu.dimension_semantics<parallel>, #tpu.dimension_semantics<parallel>, #tpu.dimension_semantics<arbitrary>], iteration_bounds = array<i64: 4, 1, 1>, scalar_prefetch = 0 : i64, scratch_operands = 1 : i64, tpu.core_type = #tpu.core_type<tc>, window_params = [{transform_indices = @transform_0, window_bounds = array<i64: 128, 256>}, {transform_indices = @transform_1, window_bounds = array<i64: 256, 128>}, {transform_indices = @transform_2, window_bounds = array<i64: 1, 128>}, {transform_indices = @transform_3, window_bounds = array<i64: 1, 128>}, {transform_indices = @transform_4, window_bounds = array<i64: 128, 128>}]} {
    %c0_i32 = arith.constant 0 : i32
    %0 = arith.cmpi eq, %arg2, %c0_i32 : i32
    %1 = arith.extui %0 : i1 to i32
    %c0_i32_0 = arith.constant 0 : i32
    %2 = arith.cmpi ne, %1, %c0_i32_0 : i32
    scf.if %2 {
      %cst_10 = arith.constant 0.000000e+00 : f32
      %12 = vector.broadcast %cst_10 : f32 to vector<128x128xf32>
      %c0_11 = arith.constant 0 : index
      %c0_12 = arith.constant 0 : index
      %13 = vector.load %arg8[%c0_11, %c0_12] : memref<128x128xf32, #tpu.memory_space<vmem>>, vector<128x128xf32>
      tpu.vector_store %arg8[%c0_11, %c0_12], %12 {strides = array<i32>} : memref<128x128xf32, #tpu.memory_space<vmem>>, vector<128x128xf32>,
    } else {
    }
    %c0 = arith.constant 0 : index
    %c0_1 = arith.constant 0 : index
    %3 = vector.load %arg8[%c0, %c0_1] : memref<128x128xf32, #tpu.memory_space<vmem>>, vector<128x128xf32>
    %c0_2 = arith.constant 0 : index
    %c0_3 = arith.constant 0 : index
    %4 = vector.load %arg3[%c0_2, %c0_3] : memref<128x256xbf16, #tpu.memory_space<vmem>>, vector<128x256xbf16>
    %c0_4 = arith.constant 0 : index
    %c0_5 = arith.constant 0 : index
    %5 = vector.load %arg4[%c0_4, %c0_5] : memref<256x128xbf16, #tpu.memory_space<vmem>>, vector<256x128xbf16>
    %cst = arith.constant dense<0.000000e+00> : vector<128x128xf32>
    %6 = tpu.matmul %4, %5, %cst {dimension_numbers = #tpu.dot_dimension_numbers<[1], [0], [0], [1], [0, 0, 1, 1], [], []>} : vector<128x256xbf16>, vector<256x128xbf16>, vector<128x128xf32> -> vector<128x128xf32>
    %7 = arith.addf %3, %6 : vector<128x128xf32>
    %c0_6 = arith.constant 0 : index
    %c0_7 = arith.constant 0 : index
    %8 = vector.load %arg8[%c0_6, %c0_7] : memref<128x128xf32, #tpu.memory_space<vmem>>, vector<128x128xf32>
    tpu.vector_store %arg8[%c0_6, %c0_7], %7 {strides = array<i32>} : memref<128x128xf32, #tpu.memory_space<vmem>>, vector<128x128xf32>,
    %c0_i32_8 = arith.constant 0 : i32
    %9 = arith.cmpi eq, %arg2, %c0_i32_8 : i32
    %10 = arith.extui %9 : i1 to i32
    %c0_i32_9 = arith.constant 0 : i32
    %11 = arith.cmpi ne, %10, %c0_i32_9 : i32
    scf.if %11 {
      %c0_10 = arith.constant 0 : index
      %c0_11 = arith.constant 0 : index
      %12 = vector.load %arg8[%c0_10, %c0_11] : memref<128x128xf32, #tpu.memory_space<vmem>>, vector<128x128xf32>
      %c0_12 = arith.constant 0 : index
      %c0_13 = arith.constant 0 : index
      %13 = vector.load %arg5[%c0_12, %c0_13] : memref<1x128xf32, #tpu.memory_space<vmem>>, vector<1x128xf32>
      %14 = vector.broadcast %13 : vector<1x128xf32> to vector<128x128xf32>
      %15 = arith.mulf %12, %14 : vector<128x128xf32>
      %c0_14 = arith.constant 0 : index
      %c0_15 = arith.constant 0 : index
      %16 = vector.load %arg6[%c0_14, %c0_15] : memref<1x128xf32, #tpu.memory_space<vmem>>, vector<1x128xf32>
      %17 = vector.broadcast %16 : vector<1x128xf32> to vector<128x128xf32>
      %18 = arith.addf %15, %17 : vector<128x128xf32>
      %cst_16 = arith.constant 0.000000e+00 : f32
      %19 = vector.broadcast %cst_16 : f32 to vector<128x128xf32>
      %20 = arith.maximumf %18, %19 : vector<128x128xf32>
      %c0_17 = arith.constant 0 : index
      %c0_18 = arith.constant 0 : index
      %21 = vector.load %arg7[%c0_17, %c0_18] : memref<128x128xf32, #tpu.memory_space<vmem>>, vector<128x128xf32>
      tpu.vector_store %arg7[%c0_17, %c0_18], %20 {strides = array<i32>} : memref<128x128xf32, #tpu.memory_space<vmem>>, vector<128x128xf32>,
    } else {
    }
    return
  }
  func.func @transform_0(%arg0: i32, %arg1: i32, %arg2: i32) -> (i32, i32) {
    %c0_i32 = arith.constant 0 : i32
    return %arg0, %arg2 : i32, i32
  }
  func.func @transform_1(%arg0: i32, %arg1: i32, %arg2: i32) -> (i32, i32) {
    %c0_i32 = arith.constant 0 : i32
    return %arg2, %arg1 : i32, i32
  }
  func.func @transform_2(%arg0: i32, %arg1: i32, %arg2: i32) -> (i32, i32) {
    %c0_i32 = arith.constant 0 : i32
    %c0_i32_0 = arith.constant 0 : i32
    return %c0_i32, %arg1 : i32, i32
  }
  func.func @transform_3(%arg0: i32, %arg1: i32, %arg2: i32) -> (i32, i32) {
    %c0_i32 = arith.constant 0 : i32
    %c0_i32_0 = arith.constant 0 : i32
    return %c0_i32, %arg1 : i32, i32
  }
  func.func @transform_4(%arg0: i32, %arg1: i32, %arg2: i32) -> (i32, i32) {
    %c0_i32 = arith.constant 0 : i32
    return %arg0, %arg1 : i32, i32
  }
}

module attributes {stable_mosaic.version = 11 : i64} {
  func.func @_conv_matmul_kernel(%arg0: i32, %arg1: i32, %arg2: i32, %arg3: memref<128x128xbf16, #tpu.memory_space<vmem>>, %arg4: memref<128x128xbf16, #tpu.memory_space<vmem>>, %arg5: memref<1x128xf32, #tpu.memory_space<vmem>>, %arg6: memref<1x128xf32, #tpu.memory_space<vmem>>, %arg7: memref<128x128xf32, #tpu.memory_space<vmem>>, %arg8: memref<128x128xf32, #tpu.memory_space<vmem>>) attributes {dimension_semantics = [#tpu.dimension_semantics<parallel>, #tpu.dimension_semantics<parallel>, #tpu.dimension_semantics<arbitrary>], iteration_bounds = array<i64: 1, 1, 5>, scalar_prefetch = 0 : i64, scratch_operands = 1 : i64, tpu.core_type = #tpu.core_type<tc>, window_params = [{transform_indices = @transform_0, window_bounds = array<i64: 128, 128>}, {transform_indices = @transform_1, window_bounds = array<i64: 128, 128>}, {transform_indices = @transform_2, window_bounds = array<i64: 1, 128>}, {transform_indices = @transform_3, window_bounds = array<i64: 1, 128>}, {transform_indices = @transform_4, window_bounds = array<i64: 128, 128>}]} {
    %c0_i32 = arith.constant 0 : i32
    %0 = arith.cmpi eq, %arg2, %c0_i32 : i32
    %1 = arith.extui %0 : i1 to i32
    %c0_i32_0 = arith.constant 0 : i32
    %2 = arith.cmpi ne, %1, %c0_i32_0 : i32
    scf.if %2 {
      %cst_9 = arith.constant 0.000000e+00 : f32
      %12 = vector.broadcast %cst_9 : f32 to vector<128x128xf32>
      %c0_10 = arith.constant 0 : index
      %c0_11 = arith.constant 0 : index
      %13 = vector.load %arg8[%c0_10, %c0_11] : memref<128x128xf32, #tpu.memory_space<vmem>>, vector<128x128xf32>
      tpu.vector_store %arg8[%c0_10, %c0_11], %12 {strides = array<i32>} : memref<128x128xf32, #tpu.memory_space<vmem>>, vector<128x128xf32>,
    } else {
    }
    %c0 = arith.constant 0 : index
    %c0_1 = arith.constant 0 : index
    %3 = vector.load %arg8[%c0, %c0_1] : memref<128x128xf32, #tpu.memory_space<vmem>>, vector<128x128xf32>
    %c0_2 = arith.constant 0 : index
    %c0_3 = arith.constant 0 : index
    %4 = vector.load %arg3[%c0_2, %c0_3] : memref<128x128xbf16, #tpu.memory_space<vmem>>, vector<128x128xbf16>
    %c0_4 = arith.constant 0 : index
    %c0_5 = arith.constant 0 : index
    %5 = vector.load %arg4[%c0_4, %c0_5] : memref<128x128xbf16, #tpu.memory_space<vmem>>, vector<128x128xbf16>
    %cst = arith.constant dense<0.000000e+00> : vector<128x128xf32>
    %6 = tpu.matmul %4, %5, %cst {dimension_numbers = #tpu.dot_dimension_numbers<[1], [0], [0], [1], [0, 0, 1, 1], [], []>} : vector<128x128xbf16>, vector<128x128xbf16>, vector<128x128xf32> -> vector<128x128xf32>
    %7 = arith.addf %3, %6 : vector<128x128xf32>
    %c0_6 = arith.constant 0 : index
    %c0_7 = arith.constant 0 : index
    %8 = vector.load %arg8[%c0_6, %c0_7] : memref<128x128xf32, #tpu.memory_space<vmem>>, vector<128x128xf32>
    tpu.vector_store %arg8[%c0_6, %c0_7], %7 {strides = array<i32>} : memref<128x128xf32, #tpu.memory_space<vmem>>, vector<128x128xf32>,
    %c4_i32 = arith.constant 4 : i32
    %9 = arith.cmpi eq, %arg2, %c4_i32 : i32
    %10 = arith.extui %9 : i1 to i32
    %c0_i32_8 = arith.constant 0 : i32
    %11 = arith.cmpi ne, %10, %c0_i32_8 : i32
    scf.if %11 {
      %c0_9 = arith.constant 0 : index
      %c0_10 = arith.constant 0 : index
      %12 = vector.load %arg8[%c0_9, %c0_10] : memref<128x128xf32, #tpu.memory_space<vmem>>, vector<128x128xf32>
      %c0_11 = arith.constant 0 : index
      %c0_12 = arith.constant 0 : index
      %13 = vector.load %arg5[%c0_11, %c0_12] : memref<1x128xf32, #tpu.memory_space<vmem>>, vector<1x128xf32>
      %14 = vector.broadcast %13 : vector<1x128xf32> to vector<128x128xf32>
      %15 = arith.mulf %12, %14 : vector<128x128xf32>
      %c0_13 = arith.constant 0 : index
      %c0_14 = arith.constant 0 : index
      %16 = vector.load %arg6[%c0_13, %c0_14] : memref<1x128xf32, #tpu.memory_space<vmem>>, vector<1x128xf32>
      %17 = vector.broadcast %16 : vector<1x128xf32> to vector<128x128xf32>
      %18 = arith.addf %15, %17 : vector<128x128xf32>
      %cst_15 = arith.constant 0.000000e+00 : f32
      %19 = vector.broadcast %cst_15 : f32 to vector<128x128xf32>
      %20 = arith.maximumf %18, %19 : vector<128x128xf32>
      %c0_16 = arith.constant 0 : index
      %c0_17 = arith.constant 0 : index
      %21 = vector.load %arg7[%c0_16, %c0_17] : memref<128x128xf32, #tpu.memory_space<vmem>>, vector<128x128xf32>
      tpu.vector_store %arg7[%c0_16, %c0_17], %20 {strides = array<i32>} : memref<128x128xf32, #tpu.memory_space<vmem>>, vector<128x128xf32>,
    } else {
    }
    return
  }
  func.func @transform_0(%arg0: i32, %arg1: i32, %arg2: i32) -> (i32, i32) {
    %c0_i32 = arith.constant 0 : i32
    return %arg0, %arg2 : i32, i32
  }
  func.func @transform_1(%arg0: i32, %arg1: i32, %arg2: i32) -> (i32, i32) {
    %c0_i32 = arith.constant 0 : i32
    return %arg2, %arg1 : i32, i32
  }
  func.func @transform_2(%arg0: i32, %arg1: i32, %arg2: i32) -> (i32, i32) {
    %c0_i32 = arith.constant 0 : i32
    %c0_i32_0 = arith.constant 0 : i32
    return %c0_i32, %arg1 : i32, i32
  }
  func.func @transform_3(%arg0: i32, %arg1: i32, %arg2: i32) -> (i32, i32) {
    %c0_i32 = arith.constant 0 : i32
    %c0_i32_0 = arith.constant 0 : i32
    return %c0_i32, %arg1 : i32, i32
  }
  func.func @transform_4(%arg0: i32, %arg1: i32, %arg2: i32) -> (i32, i32) {
    %c0_i32 = arith.constant 0 : i32
    return %arg0, %arg1 : i32, i32
  }
}

module attributes {stable_mosaic.version = 11 : i64} {
  func.func @_conv_matmul_kernel(%arg0: i32, %arg1: i32, %arg2: i32, %arg3: memref<128x128xbf16, #tpu.memory_space<vmem>>, %arg4: memref<128x128xbf16, #tpu.memory_space<vmem>>, %arg5: memref<1x128xf32, #tpu.memory_space<vmem>>, %arg6: memref<1x128xf32, #tpu.memory_space<vmem>>, %arg7: memref<128x128xf32, #tpu.memory_space<vmem>>, %arg8: memref<128x128xf32, #tpu.memory_space<vmem>>, %arg9: memref<128x128xf32, #tpu.memory_space<vmem>>) attributes {dimension_semantics = [#tpu.dimension_semantics<parallel>, #tpu.dimension_semantics<parallel>, #tpu.dimension_semantics<arbitrary>], iteration_bounds = array<i64: 1, 1, 5>, scalar_prefetch = 0 : i64, scratch_operands = 1 : i64, tpu.core_type = #tpu.core_type<tc>, window_params = [{transform_indices = @transform_0, window_bounds = array<i64: 128, 128>}, {transform_indices = @transform_1, window_bounds = array<i64: 128, 128>}, {transform_indices = @transform_2, window_bounds = array<i64: 1, 128>}, {transform_indices = @transform_3, window_bounds = array<i64: 1, 128>}, {transform_indices = @transform_4, window_bounds = array<i64: 128, 128>}, {transform_indices = @transform_5, window_bounds = array<i64: 128, 128>}]} {
    %c0_i32 = arith.constant 0 : i32
    %0 = arith.cmpi eq, %arg2, %c0_i32 : i32
    %1 = arith.extui %0 : i1 to i32
    %c0_i32_0 = arith.constant 0 : i32
    %2 = arith.cmpi ne, %1, %c0_i32_0 : i32
    scf.if %2 {
      %cst_9 = arith.constant 0.000000e+00 : f32
      %12 = vector.broadcast %cst_9 : f32 to vector<128x128xf32>
      %c0_10 = arith.constant 0 : index
      %c0_11 = arith.constant 0 : index
      %13 = vector.load %arg9[%c0_10, %c0_11] : memref<128x128xf32, #tpu.memory_space<vmem>>, vector<128x128xf32>
      tpu.vector_store %arg9[%c0_10, %c0_11], %12 {strides = array<i32>} : memref<128x128xf32, #tpu.memory_space<vmem>>, vector<128x128xf32>,
    } else {
    }
    %c0 = arith.constant 0 : index
    %c0_1 = arith.constant 0 : index
    %3 = vector.load %arg9[%c0, %c0_1] : memref<128x128xf32, #tpu.memory_space<vmem>>, vector<128x128xf32>
    %c0_2 = arith.constant 0 : index
    %c0_3 = arith.constant 0 : index
    %4 = vector.load %arg3[%c0_2, %c0_3] : memref<128x128xbf16, #tpu.memory_space<vmem>>, vector<128x128xbf16>
    %c0_4 = arith.constant 0 : index
    %c0_5 = arith.constant 0 : index
    %5 = vector.load %arg4[%c0_4, %c0_5] : memref<128x128xbf16, #tpu.memory_space<vmem>>, vector<128x128xbf16>
    %cst = arith.constant dense<0.000000e+00> : vector<128x128xf32>
    %6 = tpu.matmul %4, %5, %cst {dimension_numbers = #tpu.dot_dimension_numbers<[1], [0], [0], [1], [0, 0, 1, 1], [], []>} : vector<128x128xbf16>, vector<128x128xbf16>, vector<128x128xf32> -> vector<128x128xf32>
    %7 = arith.addf %3, %6 : vector<128x128xf32>
    %c0_6 = arith.constant 0 : index
    %c0_7 = arith.constant 0 : index
    %8 = vector.load %arg9[%c0_6, %c0_7] : memref<128x128xf32, #tpu.memory_space<vmem>>, vector<128x128xf32>
    tpu.vector_store %arg9[%c0_6, %c0_7], %7 {strides = array<i32>} : memref<128x128xf32, #tpu.memory_space<vmem>>, vector<128x128xf32>,
    %c4_i32 = arith.constant 4 : i32
    %9 = arith.cmpi eq, %arg2, %c4_i32 : i32
    %10 = arith.extui %9 : i1 to i32
    %c0_i32_8 = arith.constant 0 : i32
    %11 = arith.cmpi ne, %10, %c0_i32_8 : i32
    scf.if %11 {
      %c0_9 = arith.constant 0 : index
      %c0_10 = arith.constant 0 : index
      %12 = vector.load %arg9[%c0_9, %c0_10] : memref<128x128xf32, #tpu.memory_space<vmem>>, vector<128x128xf32>
      %c0_11 = arith.constant 0 : index
      %c0_12 = arith.constant 0 : index
      %13 = vector.load %arg5[%c0_11, %c0_12] : memref<1x128xf32, #tpu.memory_space<vmem>>, vector<1x128xf32>
      %14 = vector.broadcast %13 : vector<1x128xf32> to vector<128x128xf32>
      %15 = arith.mulf %12, %14 : vector<128x128xf32>
      %c0_13 = arith.constant 0 : index
      %c0_14 = arith.constant 0 : index
      %16 = vector.load %arg6[%c0_13, %c0_14] : memref<1x128xf32, #tpu.memory_space<vmem>>, vector<1x128xf32>
      %17 = vector.broadcast %16 : vector<1x128xf32> to vector<128x128xf32>
      %18 = arith.addf %15, %17 : vector<128x128xf32>
      %c0_15 = arith.constant 0 : index
      %c0_16 = arith.constant 0 : index
      %19 = vector.load %arg7[%c0_15, %c0_16] : memref<128x128xf32, #tpu.memory_space<vmem>>, vector<128x128xf32>
      %20 = arith.addf %18, %19 : vector<128x128xf32>
      %cst_17 = arith.constant 0.000000e+00 : f32
      %21 = vector.broadcast %cst_17 : f32 to vector<128x128xf32>
      %22 = arith.maximumf %20, %21 : vector<128x128xf32>
      %c0_18 = arith.constant 0 : index
      %c0_19 = arith.constant 0 : index
      %23 = vector.load %arg8[%c0_18, %c0_19] : memref<128x128xf32, #tpu.memory_space<vmem>>, vector<128x128xf32>
      tpu.vector_store %arg8[%c0_18, %c0_19], %22 {strides = array<i32>} : memref<128x128xf32, #tpu.memory_space<vmem>>, vector<128x128xf32>,
    } else {
    }
    return
  }
  func.func @transform_0(%arg0: i32, %arg1: i32, %arg2: i32) -> (i32, i32) {
    %c0_i32 = arith.constant 0 : i32
    return %arg0, %arg2 : i32, i32
  }
  func.func @transform_1(%arg0: i32, %arg1: i32, %arg2: i32) -> (i32, i32) {
    %c0_i32 = arith.constant 0 : i32
    return %arg2, %arg1 : i32, i32
  }
  func.func @transform_2(%arg0: i32, %arg1: i32, %arg2: i32) -> (i32, i32) {
    %c0_i32 = arith.constant 0 : i32
    %c0_i32_0 = arith.constant 0 : i32
    return %c0_i32, %arg1 : i32, i32
  }
  func.func @transform_3(%arg0: i32, %arg1: i32, %arg2: i32) -> (i32, i32) {
    %c0_i32 = arith.constant 0 : i32
    %c0_i32_0 = arith.constant 0 : i32
    return %c0_i32, %arg1 : i32, i32
  }
  func.func @transform_4(%arg0: i32, %arg1: i32, %arg2: i32) -> (i32, i32) {
    %c0_i32 = arith.constant 0 : i32
    return %arg0, %arg1 : i32, i32
  }
  func.func @transform_5(%arg0: i32, %arg1: i32, %arg2: i32) -> (i32, i32) {
    %c0_i32 = arith.constant 0 : i32
    return %arg0, %arg1 : i32, i32
  }
}

module attributes {stable_mosaic.version = 11 : i64} {
  func.func @_conv_matmul_kernel(%arg0: i32, %arg1: i32, %arg2: i32, %arg3: memref<32x128xbf16, #tpu.memory_space<vmem>>, %arg4: memref<128x128xbf16, #tpu.memory_space<vmem>>, %arg5: memref<1x128xf32, #tpu.memory_space<vmem>>, %arg6: memref<1x128xf32, #tpu.memory_space<vmem>>, %arg7: memref<32x128xf32, #tpu.memory_space<vmem>>, %arg8: memref<32x128xf32, #tpu.memory_space<vmem>>) attributes {dimension_semantics = [#tpu.dimension_semantics<parallel>, #tpu.dimension_semantics<parallel>, #tpu.dimension_semantics<arbitrary>], iteration_bounds = array<i64: 1, 1, 5>, scalar_prefetch = 0 : i64, scratch_operands = 1 : i64, tpu.core_type = #tpu.core_type<tc>, window_params = [{transform_indices = @transform_0, window_bounds = array<i64: 32, 128>}, {transform_indices = @transform_1, window_bounds = array<i64: 128, 128>}, {transform_indices = @transform_2, window_bounds = array<i64: 1, 128>}, {transform_indices = @transform_3, window_bounds = array<i64: 1, 128>}, {transform_indices = @transform_4, window_bounds = array<i64: 32, 128>}]} {
    %c0_i32 = arith.constant 0 : i32
    %0 = arith.cmpi eq, %arg2, %c0_i32 : i32
    %1 = arith.extui %0 : i1 to i32
    %c0_i32_0 = arith.constant 0 : i32
    %2 = arith.cmpi ne, %1, %c0_i32_0 : i32
    scf.if %2 {
      %cst_9 = arith.constant 0.000000e+00 : f32
      %12 = vector.broadcast %cst_9 : f32 to vector<32x128xf32>
      %c0_10 = arith.constant 0 : index
      %c0_11 = arith.constant 0 : index
      %13 = vector.load %arg8[%c0_10, %c0_11] : memref<32x128xf32, #tpu.memory_space<vmem>>, vector<32x128xf32>
      tpu.vector_store %arg8[%c0_10, %c0_11], %12 {strides = array<i32>} : memref<32x128xf32, #tpu.memory_space<vmem>>, vector<32x128xf32>,
    } else {
    }
    %c0 = arith.constant 0 : index
    %c0_1 = arith.constant 0 : index
    %3 = vector.load %arg8[%c0, %c0_1] : memref<32x128xf32, #tpu.memory_space<vmem>>, vector<32x128xf32>
    %c0_2 = arith.constant 0 : index
    %c0_3 = arith.constant 0 : index
    %4 = vector.load %arg3[%c0_2, %c0_3] : memref<32x128xbf16, #tpu.memory_space<vmem>>, vector<32x128xbf16>
    %c0_4 = arith.constant 0 : index
    %c0_5 = arith.constant 0 : index
    %5 = vector.load %arg4[%c0_4, %c0_5] : memref<128x128xbf16, #tpu.memory_space<vmem>>, vector<128x128xbf16>
    %cst = arith.constant dense<0.000000e+00> : vector<32x128xf32>
    %6 = tpu.matmul %4, %5, %cst {dimension_numbers = #tpu.dot_dimension_numbers<[1], [0], [0], [1], [0, 0, 1, 1], [], []>} : vector<32x128xbf16>, vector<128x128xbf16>, vector<32x128xf32> -> vector<32x128xf32>
    %7 = arith.addf %3, %6 : vector<32x128xf32>
    %c0_6 = arith.constant 0 : index
    %c0_7 = arith.constant 0 : index
    %8 = vector.load %arg8[%c0_6, %c0_7] : memref<32x128xf32, #tpu.memory_space<vmem>>, vector<32x128xf32>
    tpu.vector_store %arg8[%c0_6, %c0_7], %7 {strides = array<i32>} : memref<32x128xf32, #tpu.memory_space<vmem>>, vector<32x128xf32>,
    %c4_i32 = arith.constant 4 : i32
    %9 = arith.cmpi eq, %arg2, %c4_i32 : i32
    %10 = arith.extui %9 : i1 to i32
    %c0_i32_8 = arith.constant 0 : i32
    %11 = arith.cmpi ne, %10, %c0_i32_8 : i32
    scf.if %11 {
      %c0_9 = arith.constant 0 : index
      %c0_10 = arith.constant 0 : index
      %12 = vector.load %arg8[%c0_9, %c0_10] : memref<32x128xf32, #tpu.memory_space<vmem>>, vector<32x128xf32>
      %c0_11 = arith.constant 0 : index
      %c0_12 = arith.constant 0 : index
      %13 = vector.load %arg5[%c0_11, %c0_12] : memref<1x128xf32, #tpu.memory_space<vmem>>, vector<1x128xf32>
      %14 = vector.broadcast %13 : vector<1x128xf32> to vector<32x128xf32>
      %15 = arith.mulf %12, %14 : vector<32x128xf32>
      %c0_13 = arith.constant 0 : index
      %c0_14 = arith.constant 0 : index
      %16 = vector.load %arg6[%c0_13, %c0_14] : memref<1x128xf32, #tpu.memory_space<vmem>>, vector<1x128xf32>
      %17 = vector.broadcast %16 : vector<1x128xf32> to vector<32x128xf32>
      %18 = arith.addf %15, %17 : vector<32x128xf32>
      %cst_15 = arith.constant 0.000000e+00 : f32
      %19 = vector.broadcast %cst_15 : f32 to vector<32x128xf32>
      %20 = arith.maximumf %18, %19 : vector<32x128xf32>
      %c0_16 = arith.constant 0 : index
      %c0_17 = arith.constant 0 : index
      %21 = vector.load %arg7[%c0_16, %c0_17] : memref<32x128xf32, #tpu.memory_space<vmem>>, vector<32x128xf32>
      tpu.vector_store %arg7[%c0_16, %c0_17], %20 {strides = array<i32>} : memref<32x128xf32, #tpu.memory_space<vmem>>, vector<32x128xf32>,
    } else {
    }
    return
  }
  func.func @transform_0(%arg0: i32, %arg1: i32, %arg2: i32) -> (i32, i32) {
    %c0_i32 = arith.constant 0 : i32
    return %arg0, %arg2 : i32, i32
  }
  func.func @transform_1(%arg0: i32, %arg1: i32, %arg2: i32) -> (i32, i32) {
    %c0_i32 = arith.constant 0 : i32
    return %arg2, %arg1 : i32, i32
  }
  func.func @transform_2(%arg0: i32, %arg1: i32, %arg2: i32) -> (i32, i32) {
    %c0_i32 = arith.constant 0 : i32
    %c0_i32_0 = arith.constant 0 : i32
    return %c0_i32, %arg1 : i32, i32
  }
  func.func @transform_3(%arg0: i32, %arg1: i32, %arg2: i32) -> (i32, i32) {
    %c0_i32 = arith.constant 0 : i32
    %c0_i32_0 = arith.constant 0 : i32
    return %c0_i32, %arg1 : i32, i32
  }
  func.func @transform_4(%arg0: i32, %arg1: i32, %arg2: i32) -> (i32, i32) {
    %c0_i32 = arith.constant 0 : i32
    return %arg0, %arg1 : i32, i32
  }
}

module attributes {stable_mosaic.version = 11 : i64} {
  func.func @_conv_matmul_kernel(%arg0: i32, %arg1: i32, %arg2: i32, %arg3: memref<32x384xbf16, #tpu.memory_space<vmem>>, %arg4: memref<384x128xbf16, #tpu.memory_space<vmem>>, %arg5: memref<1x128xf32, #tpu.memory_space<vmem>>, %arg6: memref<1x128xf32, #tpu.memory_space<vmem>>, %arg7: memref<32x128xf32, #tpu.memory_space<vmem>>, %arg8: memref<32x128xf32, #tpu.memory_space<vmem>>) attributes {dimension_semantics = [#tpu.dimension_semantics<parallel>, #tpu.dimension_semantics<parallel>, #tpu.dimension_semantics<arbitrary>], iteration_bounds = array<i64: 1, 1, 3>, scalar_prefetch = 0 : i64, scratch_operands = 1 : i64, tpu.core_type = #tpu.core_type<tc>, window_params = [{transform_indices = @transform_0, window_bounds = array<i64: 32, 384>}, {transform_indices = @transform_1, window_bounds = array<i64: 384, 128>}, {transform_indices = @transform_2, window_bounds = array<i64: 1, 128>}, {transform_indices = @transform_3, window_bounds = array<i64: 1, 128>}, {transform_indices = @transform_4, window_bounds = array<i64: 32, 128>}]} {
    %c0_i32 = arith.constant 0 : i32
    %0 = arith.cmpi eq, %arg2, %c0_i32 : i32
    %1 = arith.extui %0 : i1 to i32
    %c0_i32_0 = arith.constant 0 : i32
    %2 = arith.cmpi ne, %1, %c0_i32_0 : i32
    scf.if %2 {
      %cst_9 = arith.constant 0.000000e+00 : f32
      %12 = vector.broadcast %cst_9 : f32 to vector<32x128xf32>
      %c0_10 = arith.constant 0 : index
      %c0_11 = arith.constant 0 : index
      %13 = vector.load %arg8[%c0_10, %c0_11] : memref<32x128xf32, #tpu.memory_space<vmem>>, vector<32x128xf32>
      tpu.vector_store %arg8[%c0_10, %c0_11], %12 {strides = array<i32>} : memref<32x128xf32, #tpu.memory_space<vmem>>, vector<32x128xf32>,
    } else {
    }
    %c0 = arith.constant 0 : index
    %c0_1 = arith.constant 0 : index
    %3 = vector.load %arg8[%c0, %c0_1] : memref<32x128xf32, #tpu.memory_space<vmem>>, vector<32x128xf32>
    %c0_2 = arith.constant 0 : index
    %c0_3 = arith.constant 0 : index
    %4 = vector.load %arg3[%c0_2, %c0_3] : memref<32x384xbf16, #tpu.memory_space<vmem>>, vector<32x384xbf16>
    %c0_4 = arith.constant 0 : index
    %c0_5 = arith.constant 0 : index
    %5 = vector.load %arg4[%c0_4, %c0_5] : memref<384x128xbf16, #tpu.memory_space<vmem>>, vector<384x128xbf16>
    %cst = arith.constant dense<0.000000e+00> : vector<32x128xf32>
    %6 = tpu.matmul %4, %5, %cst {dimension_numbers = #tpu.dot_dimension_numbers<[1], [0], [0], [1], [0, 0, 1, 1], [], []>} : vector<32x384xbf16>, vector<384x128xbf16>, vector<32x128xf32> -> vector<32x128xf32>
    %7 = arith.addf %3, %6 : vector<32x128xf32>
    %c0_6 = arith.constant 0 : index
    %c0_7 = arith.constant 0 : index
    %8 = vector.load %arg8[%c0_6, %c0_7] : memref<32x128xf32, #tpu.memory_space<vmem>>, vector<32x128xf32>
    tpu.vector_store %arg8[%c0_6, %c0_7], %7 {strides = array<i32>} : memref<32x128xf32, #tpu.memory_space<vmem>>, vector<32x128xf32>,
    %c2_i32 = arith.constant 2 : i32
    %9 = arith.cmpi eq, %arg2, %c2_i32 : i32
    %10 = arith.extui %9 : i1 to i32
    %c0_i32_8 = arith.constant 0 : i32
    %11 = arith.cmpi ne, %10, %c0_i32_8 : i32
    scf.if %11 {
      %c0_9 = arith.constant 0 : index
      %c0_10 = arith.constant 0 : index
      %12 = vector.load %arg8[%c0_9, %c0_10] : memref<32x128xf32, #tpu.memory_space<vmem>>, vector<32x128xf32>
      %c0_11 = arith.constant 0 : index
      %c0_12 = arith.constant 0 : index
      %13 = vector.load %arg5[%c0_11, %c0_12] : memref<1x128xf32, #tpu.memory_space<vmem>>, vector<1x128xf32>
      %14 = vector.broadcast %13 : vector<1x128xf32> to vector<32x128xf32>
      %15 = arith.mulf %12, %14 : vector<32x128xf32>
      %c0_13 = arith.constant 0 : index
      %c0_14 = arith.constant 0 : index
      %16 = vector.load %arg6[%c0_13, %c0_14] : memref<1x128xf32, #tpu.memory_space<vmem>>, vector<1x128xf32>
      %17 = vector.broadcast %16 : vector<1x128xf32> to vector<32x128xf32>
      %18 = arith.addf %15, %17 : vector<32x128xf32>
      %cst_15 = arith.constant 0.000000e+00 : f32
      %19 = vector.broadcast %cst_15 : f32 to vector<32x128xf32>
      %20 = arith.maximumf %18, %19 : vector<32x128xf32>
      %c0_16 = arith.constant 0 : index
      %c0_17 = arith.constant 0 : index
      %21 = vector.load %arg7[%c0_16, %c0_17] : memref<32x128xf32, #tpu.memory_space<vmem>>, vector<32x128xf32>
      tpu.vector_store %arg7[%c0_16, %c0_17], %20 {strides = array<i32>} : memref<32x128xf32, #tpu.memory_space<vmem>>, vector<32x128xf32>,
    } else {
    }
    return
  }
  func.func @transform_0(%arg0: i32, %arg1: i32, %arg2: i32) -> (i32, i32) {
    %c0_i32 = arith.constant 0 : i32
    return %arg0, %arg2 : i32, i32
  }
  func.func @transform_1(%arg0: i32, %arg1: i32, %arg2: i32) -> (i32, i32) {
    %c0_i32 = arith.constant 0 : i32
    return %arg2, %arg1 : i32, i32
  }
  func.func @transform_2(%arg0: i32, %arg1: i32, %arg2: i32) -> (i32, i32) {
    %c0_i32 = arith.constant 0 : i32
    %c0_i32_0 = arith.constant 0 : i32
    return %c0_i32, %arg1 : i32, i32
  }
  func.func @transform_3(%arg0: i32, %arg1: i32, %arg2: i32) -> (i32, i32) {
    %c0_i32 = arith.constant 0 : i32
    %c0_i32_0 = arith.constant 0 : i32
    return %c0_i32, %arg1 : i32, i32
  }
  func.func @transform_4(%arg0: i32, %arg1: i32, %arg2: i32) -> (i32, i32) {
    %c0_i32 = arith.constant 0 : i32
    return %arg0, %arg1 : i32, i32
  }
}

module attributes {stable_mosaic.version = 11 : i64} {
  func.func @_conv_matmul_kernel(%arg0: i32, %arg1: i32, %arg2: i32, %arg3: memref<32x128xbf16, #tpu.memory_space<vmem>>, %arg4: memref<128x128xbf16, #tpu.memory_space<vmem>>, %arg5: memref<1x128xf32, #tpu.memory_space<vmem>>, %arg6: memref<1x128xf32, #tpu.memory_space<vmem>>, %arg7: memref<32x128xf32, #tpu.memory_space<vmem>>, %arg8: memref<32x128xf32, #tpu.memory_space<vmem>>) attributes {dimension_semantics = [#tpu.dimension_semantics<parallel>, #tpu.dimension_semantics<parallel>, #tpu.dimension_semantics<arbitrary>], iteration_bounds = array<i64: 1, 1, 1>, scalar_prefetch = 0 : i64, scratch_operands = 1 : i64, tpu.core_type = #tpu.core_type<tc>, window_params = [{transform_indices = @transform_0, window_bounds = array<i64: 32, 128>}, {transform_indices = @transform_1, window_bounds = array<i64: 128, 128>}, {transform_indices = @transform_2, window_bounds = array<i64: 1, 128>}, {transform_indices = @transform_3, window_bounds = array<i64: 1, 128>}, {transform_indices = @transform_4, window_bounds = array<i64: 32, 128>}]} {
    %c0_i32 = arith.constant 0 : i32
    %0 = arith.cmpi eq, %arg2, %c0_i32 : i32
    %1 = arith.extui %0 : i1 to i32
    %c0_i32_0 = arith.constant 0 : i32
    %2 = arith.cmpi ne, %1, %c0_i32_0 : i32
    scf.if %2 {
      %cst_10 = arith.constant 0.000000e+00 : f32
      %12 = vector.broadcast %cst_10 : f32 to vector<32x128xf32>
      %c0_11 = arith.constant 0 : index
      %c0_12 = arith.constant 0 : index
      %13 = vector.load %arg8[%c0_11, %c0_12] : memref<32x128xf32, #tpu.memory_space<vmem>>, vector<32x128xf32>
      tpu.vector_store %arg8[%c0_11, %c0_12], %12 {strides = array<i32>} : memref<32x128xf32, #tpu.memory_space<vmem>>, vector<32x128xf32>,
    } else {
    }
    %c0 = arith.constant 0 : index
    %c0_1 = arith.constant 0 : index
    %3 = vector.load %arg8[%c0, %c0_1] : memref<32x128xf32, #tpu.memory_space<vmem>>, vector<32x128xf32>
    %c0_2 = arith.constant 0 : index
    %c0_3 = arith.constant 0 : index
    %4 = vector.load %arg3[%c0_2, %c0_3] : memref<32x128xbf16, #tpu.memory_space<vmem>>, vector<32x128xbf16>
    %c0_4 = arith.constant 0 : index
    %c0_5 = arith.constant 0 : index
    %5 = vector.load %arg4[%c0_4, %c0_5] : memref<128x128xbf16, #tpu.memory_space<vmem>>, vector<128x128xbf16>
    %cst = arith.constant dense<0.000000e+00> : vector<32x128xf32>
    %6 = tpu.matmul %4, %5, %cst {dimension_numbers = #tpu.dot_dimension_numbers<[1], [0], [0], [1], [0, 0, 1, 1], [], []>} : vector<32x128xbf16>, vector<128x128xbf16>, vector<32x128xf32> -> vector<32x128xf32>
    %7 = arith.addf %3, %6 : vector<32x128xf32>
    %c0_6 = arith.constant 0 : index
    %c0_7 = arith.constant 0 : index
    %8 = vector.load %arg8[%c0_6, %c0_7] : memref<32x128xf32, #tpu.memory_space<vmem>>, vector<32x128xf32>
    tpu.vector_store %arg8[%c0_6, %c0_7], %7 {strides = array<i32>} : memref<32x128xf32, #tpu.memory_space<vmem>>, vector<32x128xf32>,
    %c0_i32_8 = arith.constant 0 : i32
    %9 = arith.cmpi eq, %arg2, %c0_i32_8 : i32
    %10 = arith.extui %9 : i1 to i32
    %c0_i32_9 = arith.constant 0 : i32
    %11 = arith.cmpi ne, %10, %c0_i32_9 : i32
    scf.if %11 {
      %c0_10 = arith.constant 0 : index
      %c0_11 = arith.constant 0 : index
      %12 = vector.load %arg8[%c0_10, %c0_11] : memref<32x128xf32, #tpu.memory_space<vmem>>, vector<32x128xf32>
      %c0_12 = arith.constant 0 : index
      %c0_13 = arith.constant 0 : index
      %13 = vector.load %arg5[%c0_12, %c0_13] : memref<1x128xf32, #tpu.memory_space<vmem>>, vector<1x128xf32>
      %14 = vector.broadcast %13 : vector<1x128xf32> to vector<32x128xf32>
      %15 = arith.mulf %12, %14 : vector<32x128xf32>
      %c0_14 = arith.constant 0 : index
      %c0_15 = arith.constant 0 : index
      %16 = vector.load %arg6[%c0_14, %c0_15] : memref<1x128xf32, #tpu.memory_space<vmem>>, vector<1x128xf32>
      %17 = vector.broadcast %16 : vector<1x128xf32> to vector<32x128xf32>
      %18 = arith.addf %15, %17 : vector<32x128xf32>
      %c0_16 = arith.constant 0 : index
      %c0_17 = arith.constant 0 : index
      %19 = vector.load %arg7[%c0_16, %c0_17] : memref<32x128xf32, #tpu.memory_space<vmem>>, vector<32x128xf32>
      tpu.vector_store %arg7[%c0_16, %c0_17], %18 {strides = array<i32>} : memref<32x128xf32, #tpu.memory_space<vmem>>, vector<32x128xf32>,
    } else {
    }
    return
  }
  func.func @transform_0(%arg0: i32, %arg1: i32, %arg2: i32) -> (i32, i32) {
    %c0_i32 = arith.constant 0 : i32
    return %arg0, %arg2 : i32, i32
  }
  func.func @transform_1(%arg0: i32, %arg1: i32, %arg2: i32) -> (i32, i32) {
    %c0_i32 = arith.constant 0 : i32
    return %arg2, %arg1 : i32, i32
  }
  func.func @transform_2(%arg0: i32, %arg1: i32, %arg2: i32) -> (i32, i32) {
    %c0_i32 = arith.constant 0 : i32
    %c0_i32_0 = arith.constant 0 : i32
    return %c0_i32, %arg1 : i32, i32
  }
  func.func @transform_3(%arg0: i32, %arg1: i32, %arg2: i32) -> (i32, i32) {
    %c0_i32 = arith.constant 0 : i32
    %c0_i32_0 = arith.constant 0 : i32
    return %c0_i32, %arg1 : i32, i32
  }
  func.func @transform_4(%arg0: i32, %arg1: i32, %arg2: i32) -> (i32, i32) {
    %c0_i32 = arith.constant 0 : i32
    return %arg0, %arg1 : i32, i32
  }
}

module attributes {stable_mosaic.version = 11 : i64} {
  func.func @_conv_matmul_kernel(%arg0: i32, %arg1: i32, %arg2: i32, %arg3: memref<32x384xbf16, #tpu.memory_space<vmem>>, %arg4: memref<384x128xbf16, #tpu.memory_space<vmem>>, %arg5: memref<1x128xf32, #tpu.memory_space<vmem>>, %arg6: memref<1x128xf32, #tpu.memory_space<vmem>>, %arg7: memref<32x128xf32, #tpu.memory_space<vmem>>, %arg8: memref<32x128xf32, #tpu.memory_space<vmem>>, %arg9: memref<32x128xf32, #tpu.memory_space<vmem>>) attributes {dimension_semantics = [#tpu.dimension_semantics<parallel>, #tpu.dimension_semantics<parallel>, #tpu.dimension_semantics<arbitrary>], iteration_bounds = array<i64: 1, 1, 3>, scalar_prefetch = 0 : i64, scratch_operands = 1 : i64, tpu.core_type = #tpu.core_type<tc>, window_params = [{transform_indices = @transform_0, window_bounds = array<i64: 32, 384>}, {transform_indices = @transform_1, window_bounds = array<i64: 384, 128>}, {transform_indices = @transform_2, window_bounds = array<i64: 1, 128>}, {transform_indices = @transform_3, window_bounds = array<i64: 1, 128>}, {transform_indices = @transform_4, window_bounds = array<i64: 32, 128>}, {transform_indices = @transform_5, window_bounds = array<i64: 32, 128>}]} {
    %c0_i32 = arith.constant 0 : i32
    %0 = arith.cmpi eq, %arg2, %c0_i32 : i32
    %1 = arith.extui %0 : i1 to i32
    %c0_i32_0 = arith.constant 0 : i32
    %2 = arith.cmpi ne, %1, %c0_i32_0 : i32
    scf.if %2 {
      %cst_9 = arith.constant 0.000000e+00 : f32
      %12 = vector.broadcast %cst_9 : f32 to vector<32x128xf32>
      %c0_10 = arith.constant 0 : index
      %c0_11 = arith.constant 0 : index
      %13 = vector.load %arg9[%c0_10, %c0_11] : memref<32x128xf32, #tpu.memory_space<vmem>>, vector<32x128xf32>
      tpu.vector_store %arg9[%c0_10, %c0_11], %12 {strides = array<i32>} : memref<32x128xf32, #tpu.memory_space<vmem>>, vector<32x128xf32>,
    } else {
    }
    %c0 = arith.constant 0 : index
    %c0_1 = arith.constant 0 : index
    %3 = vector.load %arg9[%c0, %c0_1] : memref<32x128xf32, #tpu.memory_space<vmem>>, vector<32x128xf32>
    %c0_2 = arith.constant 0 : index
    %c0_3 = arith.constant 0 : index
    %4 = vector.load %arg3[%c0_2, %c0_3] : memref<32x384xbf16, #tpu.memory_space<vmem>>, vector<32x384xbf16>
    %c0_4 = arith.constant 0 : index
    %c0_5 = arith.constant 0 : index
    %5 = vector.load %arg4[%c0_4, %c0_5] : memref<384x128xbf16, #tpu.memory_space<vmem>>, vector<384x128xbf16>
    %cst = arith.constant dense<0.000000e+00> : vector<32x128xf32>
    %6 = tpu.matmul %4, %5, %cst {dimension_numbers = #tpu.dot_dimension_numbers<[1], [0], [0], [1], [0, 0, 1, 1], [], []>} : vector<32x384xbf16>, vector<384x128xbf16>, vector<32x128xf32> -> vector<32x128xf32>
    %7 = arith.addf %3, %6 : vector<32x128xf32>
    %c0_6 = arith.constant 0 : index
    %c0_7 = arith.constant 0 : index
    %8 = vector.load %arg9[%c0_6, %c0_7] : memref<32x128xf32, #tpu.memory_space<vmem>>, vector<32x128xf32>
    tpu.vector_store %arg9[%c0_6, %c0_7], %7 {strides = array<i32>} : memref<32x128xf32, #tpu.memory_space<vmem>>, vector<32x128xf32>,
    %c2_i32 = arith.constant 2 : i32
    %9 = arith.cmpi eq, %arg2, %c2_i32 : i32
    %10 = arith.extui %9 : i1 to i32
    %c0_i32_8 = arith.constant 0 : i32
    %11 = arith.cmpi ne, %10, %c0_i32_8 : i32
    scf.if %11 {
      %c0_9 = arith.constant 0 : index
      %c0_10 = arith.constant 0 : index
      %12 = vector.load %arg9[%c0_9, %c0_10] : memref<32x128xf32, #tpu.memory_space<vmem>>, vector<32x128xf32>
      %c0_11 = arith.constant 0 : index
      %c0_12 = arith.constant 0 : index
      %13 = vector.load %arg5[%c0_11, %c0_12] : memref<1x128xf32, #tpu.memory_space<vmem>>, vector<1x128xf32>
      %14 = vector.broadcast %13 : vector<1x128xf32> to vector<32x128xf32>
      %15 = arith.mulf %12, %14 : vector<32x128xf32>
      %c0_13 = arith.constant 0 : index
      %c0_14 = arith.constant 0 : index
      %16 = vector.load %arg6[%c0_13, %c0_14] : memref<1x128xf32, #tpu.memory_space<vmem>>, vector<1x128xf32>
      %17 = vector.broadcast %16 : vector<1x128xf32> to vector<32x128xf32>
      %18 = arith.addf %15, %17 : vector<32x128xf32>
      %c0_15 = arith.constant 0 : index
      %c0_16 = arith.constant 0 : index
      %19 = vector.load %arg7[%c0_15, %c0_16] : memref<32x128xf32, #tpu.memory_space<vmem>>, vector<32x128xf32>
      %20 = arith.addf %18, %19 : vector<32x128xf32>
      %cst_17 = arith.constant 0.000000e+00 : f32
      %21 = vector.broadcast %cst_17 : f32 to vector<32x128xf32>
      %22 = arith.maximumf %20, %21 : vector<32x128xf32>
      %c0_18 = arith.constant 0 : index
      %c0_19 = arith.constant 0 : index
      %23 = vector.load %arg8[%c0_18, %c0_19] : memref<32x128xf32, #tpu.memory_space<vmem>>, vector<32x128xf32>
      tpu.vector_store %arg8[%c0_18, %c0_19], %22 {strides = array<i32>} : memref<32x128xf32, #tpu.memory_space<vmem>>, vector<32x128xf32>,
    } else {
    }
    return
  }
  func.func @transform_0(%arg0: i32, %arg1: i32, %arg2: i32) -> (i32, i32) {
    %c0_i32 = arith.constant 0 : i32
    return %arg0, %arg2 : i32, i32
  }
  func.func @transform_1(%arg0: i32, %arg1: i32, %arg2: i32) -> (i32, i32) {
    %c0_i32 = arith.constant 0 : i32
    return %arg2, %arg1 : i32, i32
  }
  func.func @transform_2(%arg0: i32, %arg1: i32, %arg2: i32) -> (i32, i32) {
    %c0_i32 = arith.constant 0 : i32
    %c0_i32_0 = arith.constant 0 : i32
    return %c0_i32, %arg1 : i32, i32
  }
  func.func @transform_3(%arg0: i32, %arg1: i32, %arg2: i32) -> (i32, i32) {
    %c0_i32 = arith.constant 0 : i32
    %c0_i32_0 = arith.constant 0 : i32
    return %c0_i32, %arg1 : i32, i32
  }
  func.func @transform_4(%arg0: i32, %arg1: i32, %arg2: i32) -> (i32, i32) {
    %c0_i32 = arith.constant 0 : i32
    return %arg0, %arg1 : i32, i32
  }
  func.func @transform_5(%arg0: i32, %arg1: i32, %arg2: i32) -> (i32, i32) {
    %c0_i32 = arith.constant 0 : i32
    return %arg0, %arg1 : i32, i32
  }
}

module attributes {stable_mosaic.version = 11 : i64} {
  func.func @_conv_matmul_kernel(%arg0: i32, %arg1: i32, %arg2: i32, %arg3: memref<8x384xbf16, #tpu.memory_space<vmem>>, %arg4: memref<384x256xbf16, #tpu.memory_space<vmem>>, %arg5: memref<1x256xf32, #tpu.memory_space<vmem>>, %arg6: memref<1x256xf32, #tpu.memory_space<vmem>>, %arg7: memref<8x256xf32, #tpu.memory_space<vmem>>, %arg8: memref<8x256xf32, #tpu.memory_space<vmem>>) attributes {dimension_semantics = [#tpu.dimension_semantics<parallel>, #tpu.dimension_semantics<parallel>, #tpu.dimension_semantics<arbitrary>], iteration_bounds = array<i64: 1, 1, 3>, scalar_prefetch = 0 : i64, scratch_operands = 1 : i64, tpu.core_type = #tpu.core_type<tc>, window_params = [{transform_indices = @transform_0, window_bounds = array<i64: 8, 384>}, {transform_indices = @transform_1, window_bounds = array<i64: 384, 256>}, {transform_indices = @transform_2, window_bounds = array<i64: 1, 256>}, {transform_indices = @transform_3, window_bounds = array<i64: 1, 256>}, {transform_indices = @transform_4, window_bounds = array<i64: 8, 256>}]} {
    %c0_i32 = arith.constant 0 : i32
    %0 = arith.cmpi eq, %arg2, %c0_i32 : i32
    %1 = arith.extui %0 : i1 to i32
    %c0_i32_0 = arith.constant 0 : i32
    %2 = arith.cmpi ne, %1, %c0_i32_0 : i32
    scf.if %2 {
      %cst_9 = arith.constant 0.000000e+00 : f32
      %12 = vector.broadcast %cst_9 : f32 to vector<8x256xf32>
      %c0_10 = arith.constant 0 : index
      %c0_11 = arith.constant 0 : index
      %13 = vector.load %arg8[%c0_10, %c0_11] : memref<8x256xf32, #tpu.memory_space<vmem>>, vector<8x256xf32>
      tpu.vector_store %arg8[%c0_10, %c0_11], %12 {strides = array<i32>} : memref<8x256xf32, #tpu.memory_space<vmem>>, vector<8x256xf32>,
    } else {
    }
    %c0 = arith.constant 0 : index
    %c0_1 = arith.constant 0 : index
    %3 = vector.load %arg8[%c0, %c0_1] : memref<8x256xf32, #tpu.memory_space<vmem>>, vector<8x256xf32>
    %c0_2 = arith.constant 0 : index
    %c0_3 = arith.constant 0 : index
    %4 = vector.load %arg3[%c0_2, %c0_3] : memref<8x384xbf16, #tpu.memory_space<vmem>>, vector<8x384xbf16>
    %c0_4 = arith.constant 0 : index
    %c0_5 = arith.constant 0 : index
    %5 = vector.load %arg4[%c0_4, %c0_5] : memref<384x256xbf16, #tpu.memory_space<vmem>>, vector<384x256xbf16>
    %cst = arith.constant dense<0.000000e+00> : vector<8x256xf32>
    %6 = tpu.matmul %4, %5, %cst {dimension_numbers = #tpu.dot_dimension_numbers<[1], [0], [0], [1], [0, 0, 1, 1], [], []>} : vector<8x384xbf16>, vector<384x256xbf16>, vector<8x256xf32> -> vector<8x256xf32>
    %7 = arith.addf %3, %6 : vector<8x256xf32>
    %c0_6 = arith.constant 0 : index
    %c0_7 = arith.constant 0 : index
    %8 = vector.load %arg8[%c0_6, %c0_7] : memref<8x256xf32, #tpu.memory_space<vmem>>, vector<8x256xf32>
    tpu.vector_store %arg8[%c0_6, %c0_7], %7 {strides = array<i32>} : memref<8x256xf32, #tpu.memory_space<vmem>>, vector<8x256xf32>,
    %c2_i32 = arith.constant 2 : i32
    %9 = arith.cmpi eq, %arg2, %c2_i32 : i32
    %10 = arith.extui %9 : i1 to i32
    %c0_i32_8 = arith.constant 0 : i32
    %11 = arith.cmpi ne, %10, %c0_i32_8 : i32
    scf.if %11 {
      %c0_9 = arith.constant 0 : index
      %c0_10 = arith.constant 0 : index
      %12 = vector.load %arg8[%c0_9, %c0_10] : memref<8x256xf32, #tpu.memory_space<vmem>>, vector<8x256xf32>
      %c0_11 = arith.constant 0 : index
      %c0_12 = arith.constant 0 : index
      %13 = vector.load %arg5[%c0_11, %c0_12] : memref<1x256xf32, #tpu.memory_space<vmem>>, vector<1x256xf32>
      %14 = vector.broadcast %13 : vector<1x256xf32> to vector<8x256xf32>
      %15 = arith.mulf %12, %14 : vector<8x256xf32>
      %c0_13 = arith.constant 0 : index
      %c0_14 = arith.constant 0 : index
      %16 = vector.load %arg6[%c0_13, %c0_14] : memref<1x256xf32, #tpu.memory_space<vmem>>, vector<1x256xf32>
      %17 = vector.broadcast %16 : vector<1x256xf32> to vector<8x256xf32>
      %18 = arith.addf %15, %17 : vector<8x256xf32>
      %cst_15 = arith.constant 0.000000e+00 : f32
      %19 = vector.broadcast %cst_15 : f32 to vector<8x256xf32>
      %20 = arith.maximumf %18, %19 : vector<8x256xf32>
      %c0_16 = arith.constant 0 : index
      %c0_17 = arith.constant 0 : index
      %21 = vector.load %arg7[%c0_16, %c0_17] : memref<8x256xf32, #tpu.memory_space<vmem>>, vector<8x256xf32>
      tpu.vector_store %arg7[%c0_16, %c0_17], %20 {strides = array<i32>} : memref<8x256xf32, #tpu.memory_space<vmem>>, vector<8x256xf32>,
    } else {
    }
    return
  }
  func.func @transform_0(%arg0: i32, %arg1: i32, %arg2: i32) -> (i32, i32) {
    %c0_i32 = arith.constant 0 : i32
    return %arg0, %arg2 : i32, i32
  }
  func.func @transform_1(%arg0: i32, %arg1: i32, %arg2: i32) -> (i32, i32) {
    %c0_i32 = arith.constant 0 : i32
    return %arg2, %arg1 : i32, i32
  }
  func.func @transform_2(%arg0: i32, %arg1: i32, %arg2: i32) -> (i32, i32) {
    %c0_i32 = arith.constant 0 : i32
    %c0_i32_0 = arith.constant 0 : i32
    return %c0_i32, %arg1 : i32, i32
  }
  func.func @transform_3(%arg0: i32, %arg1: i32, %arg2: i32) -> (i32, i32) {
    %c0_i32 = arith.constant 0 : i32
    %c0_i32_0 = arith.constant 0 : i32
    return %c0_i32, %arg1 : i32, i32
  }
  func.func @transform_4(%arg0: i32, %arg1: i32, %arg2: i32) -> (i32, i32) {
    %c0_i32 = arith.constant 0 : i32
    return %arg0, %arg1 : i32, i32
  }
}

module attributes {stable_mosaic.version = 11 : i64} {
  func.func @_conv_matmul_kernel(%arg0: i32, %arg1: i32, %arg2: i32, %arg3: memref<8x384xbf16, #tpu.memory_space<vmem>>, %arg4: memref<384x256xbf16, #tpu.memory_space<vmem>>, %arg5: memref<1x256xf32, #tpu.memory_space<vmem>>, %arg6: memref<1x256xf32, #tpu.memory_space<vmem>>, %arg7: memref<8x256xf32, #tpu.memory_space<vmem>>, %arg8: memref<8x256xf32, #tpu.memory_space<vmem>>, %arg9: memref<8x256xf32, #tpu.memory_space<vmem>>) attributes {dimension_semantics = [#tpu.dimension_semantics<parallel>, #tpu.dimension_semantics<parallel>, #tpu.dimension_semantics<arbitrary>], iteration_bounds = array<i64: 1, 1, 6>, scalar_prefetch = 0 : i64, scratch_operands = 1 : i64, tpu.core_type = #tpu.core_type<tc>, window_params = [{transform_indices = @transform_0, window_bounds = array<i64: 8, 384>}, {transform_indices = @transform_1, window_bounds = array<i64: 384, 256>}, {transform_indices = @transform_2, window_bounds = array<i64: 1, 256>}, {transform_indices = @transform_3, window_bounds = array<i64: 1, 256>}, {transform_indices = @transform_4, window_bounds = array<i64: 8, 256>}, {transform_indices = @transform_5, window_bounds = array<i64: 8, 256>}]} {
    %c0_i32 = arith.constant 0 : i32
    %0 = arith.cmpi eq, %arg2, %c0_i32 : i32
    %1 = arith.extui %0 : i1 to i32
    %c0_i32_0 = arith.constant 0 : i32
    %2 = arith.cmpi ne, %1, %c0_i32_0 : i32
    scf.if %2 {
      %cst_9 = arith.constant 0.000000e+00 : f32
      %12 = vector.broadcast %cst_9 : f32 to vector<8x256xf32>
      %c0_10 = arith.constant 0 : index
      %c0_11 = arith.constant 0 : index
      %13 = vector.load %arg9[%c0_10, %c0_11] : memref<8x256xf32, #tpu.memory_space<vmem>>, vector<8x256xf32>
      tpu.vector_store %arg9[%c0_10, %c0_11], %12 {strides = array<i32>} : memref<8x256xf32, #tpu.memory_space<vmem>>, vector<8x256xf32>,
    } else {
    }
    %c0 = arith.constant 0 : index
    %c0_1 = arith.constant 0 : index
    %3 = vector.load %arg9[%c0, %c0_1] : memref<8x256xf32, #tpu.memory_space<vmem>>, vector<8x256xf32>
    %c0_2 = arith.constant 0 : index
    %c0_3 = arith.constant 0 : index
    %4 = vector.load %arg3[%c0_2, %c0_3] : memref<8x384xbf16, #tpu.memory_space<vmem>>, vector<8x384xbf16>
    %c0_4 = arith.constant 0 : index
    %c0_5 = arith.constant 0 : index
    %5 = vector.load %arg4[%c0_4, %c0_5] : memref<384x256xbf16, #tpu.memory_space<vmem>>, vector<384x256xbf16>
    %cst = arith.constant dense<0.000000e+00> : vector<8x256xf32>
    %6 = tpu.matmul %4, %5, %cst {dimension_numbers = #tpu.dot_dimension_numbers<[1], [0], [0], [1], [0, 0, 1, 1], [], []>} : vector<8x384xbf16>, vector<384x256xbf16>, vector<8x256xf32> -> vector<8x256xf32>
    %7 = arith.addf %3, %6 : vector<8x256xf32>
    %c0_6 = arith.constant 0 : index
    %c0_7 = arith.constant 0 : index
    %8 = vector.load %arg9[%c0_6, %c0_7] : memref<8x256xf32, #tpu.memory_space<vmem>>, vector<8x256xf32>
    tpu.vector_store %arg9[%c0_6, %c0_7], %7 {strides = array<i32>} : memref<8x256xf32, #tpu.memory_space<vmem>>, vector<8x256xf32>,
    %c5_i32 = arith.constant 5 : i32
    %9 = arith.cmpi eq, %arg2, %c5_i32 : i32
    %10 = arith.extui %9 : i1 to i32
    %c0_i32_8 = arith.constant 0 : i32
    %11 = arith.cmpi ne, %10, %c0_i32_8 : i32
    scf.if %11 {
      %c0_9 = arith.constant 0 : index
      %c0_10 = arith.constant 0 : index
      %12 = vector.load %arg9[%c0_9, %c0_10] : memref<8x256xf32, #tpu.memory_space<vmem>>, vector<8x256xf32>
      %c0_11 = arith.constant 0 : index
      %c0_12 = arith.constant 0 : index
      %13 = vector.load %arg5[%c0_11, %c0_12] : memref<1x256xf32, #tpu.memory_space<vmem>>, vector<1x256xf32>
      %14 = vector.broadcast %13 : vector<1x256xf32> to vector<8x256xf32>
      %15 = arith.mulf %12, %14 : vector<8x256xf32>
      %c0_13 = arith.constant 0 : index
      %c0_14 = arith.constant 0 : index
      %16 = vector.load %arg6[%c0_13, %c0_14] : memref<1x256xf32, #tpu.memory_space<vmem>>, vector<1x256xf32>
      %17 = vector.broadcast %16 : vector<1x256xf32> to vector<8x256xf32>
      %18 = arith.addf %15, %17 : vector<8x256xf32>
      %c0_15 = arith.constant 0 : index
      %c0_16 = arith.constant 0 : index
      %19 = vector.load %arg7[%c0_15, %c0_16] : memref<8x256xf32, #tpu.memory_space<vmem>>, vector<8x256xf32>
      %20 = arith.addf %18, %19 : vector<8x256xf32>
      %cst_17 = arith.constant 0.000000e+00 : f32
      %21 = vector.broadcast %cst_17 : f32 to vector<8x256xf32>
      %22 = arith.maximumf %20, %21 : vector<8x256xf32>
      %c0_18 = arith.constant 0 : index
      %c0_19 = arith.constant 0 : index
      %23 = vector.load %arg8[%c0_18, %c0_19] : memref<8x256xf32, #tpu.memory_space<vmem>>, vector<8x256xf32>
      tpu.vector_store %arg8[%c0_18, %c0_19], %22 {strides = array<i32>} : memref<8x256xf32, #tpu.memory_space<vmem>>, vector<8x256xf32>,
    } else {
    }
    return
  }
  func.func @transform_0(%arg0: i32, %arg1: i32, %arg2: i32) -> (i32, i32) {
    %c0_i32 = arith.constant 0 : i32
    return %arg0, %arg2 : i32, i32
  }
  func.func @transform_1(%arg0: i32, %arg1: i32, %arg2: i32) -> (i32, i32) {
    %c0_i32 = arith.constant 0 : i32
    return %arg2, %arg1 : i32, i32
  }
  func.func @transform_2(%arg0: i32, %arg1: i32, %arg2: i32) -> (i32, i32) {
    %c0_i32 = arith.constant 0 : i32
    %c0_i32_0 = arith.constant 0 : i32
    return %c0_i32, %arg1 : i32, i32
  }
  func.func @transform_3(%arg0: i32, %arg1: i32, %arg2: i32) -> (i32, i32) {
    %c0_i32 = arith.constant 0 : i32
    %c0_i32_0 = arith.constant 0 : i32
    return %c0_i32, %arg1 : i32, i32
  }
  func.func @transform_4(%arg0: i32, %arg1: i32, %arg2: i32) -> (i32, i32) {
    %c0_i32 = arith.constant 0 : i32
    return %arg0, %arg1 : i32, i32
  }
  func.func @transform_5(%arg0: i32, %arg1: i32, %arg2: i32) -> (i32, i32) {
    %c0_i32 = arith.constant 0 : i32
    return %arg0, %arg1 : i32, i32
  }
}

module attributes {stable_mosaic.version = 11 : i64} {
  func.func @_conv_matmul_kernel(%arg0: i32, %arg1: i32, %arg2: i32, %arg3: memref<8x128xbf16, #tpu.memory_space<vmem>>, %arg4: memref<128x256xbf16, #tpu.memory_space<vmem>>, %arg5: memref<1x256xf32, #tpu.memory_space<vmem>>, %arg6: memref<1x256xf32, #tpu.memory_space<vmem>>, %arg7: memref<8x256xf32, #tpu.memory_space<vmem>>, %arg8: memref<8x256xf32, #tpu.memory_space<vmem>>) attributes {dimension_semantics = [#tpu.dimension_semantics<parallel>, #tpu.dimension_semantics<parallel>, #tpu.dimension_semantics<arbitrary>], iteration_bounds = array<i64: 1, 1, 1>, scalar_prefetch = 0 : i64, scratch_operands = 1 : i64, tpu.core_type = #tpu.core_type<tc>, window_params = [{transform_indices = @transform_0, window_bounds = array<i64: 8, 128>}, {transform_indices = @transform_1, window_bounds = array<i64: 128, 256>}, {transform_indices = @transform_2, window_bounds = array<i64: 1, 256>}, {transform_indices = @transform_3, window_bounds = array<i64: 1, 256>}, {transform_indices = @transform_4, window_bounds = array<i64: 8, 256>}]} {
    %c0_i32 = arith.constant 0 : i32
    %0 = arith.cmpi eq, %arg2, %c0_i32 : i32
    %1 = arith.extui %0 : i1 to i32
    %c0_i32_0 = arith.constant 0 : i32
    %2 = arith.cmpi ne, %1, %c0_i32_0 : i32
    scf.if %2 {
      %cst_10 = arith.constant 0.000000e+00 : f32
      %12 = vector.broadcast %cst_10 : f32 to vector<8x256xf32>
      %c0_11 = arith.constant 0 : index
      %c0_12 = arith.constant 0 : index
      %13 = vector.load %arg8[%c0_11, %c0_12] : memref<8x256xf32, #tpu.memory_space<vmem>>, vector<8x256xf32>
      tpu.vector_store %arg8[%c0_11, %c0_12], %12 {strides = array<i32>} : memref<8x256xf32, #tpu.memory_space<vmem>>, vector<8x256xf32>,
    } else {
    }
    %c0 = arith.constant 0 : index
    %c0_1 = arith.constant 0 : index
    %3 = vector.load %arg8[%c0, %c0_1] : memref<8x256xf32, #tpu.memory_space<vmem>>, vector<8x256xf32>
    %c0_2 = arith.constant 0 : index
    %c0_3 = arith.constant 0 : index
    %4 = vector.load %arg3[%c0_2, %c0_3] : memref<8x128xbf16, #tpu.memory_space<vmem>>, vector<8x128xbf16>
    %c0_4 = arith.constant 0 : index
    %c0_5 = arith.constant 0 : index
    %5 = vector.load %arg4[%c0_4, %c0_5] : memref<128x256xbf16, #tpu.memory_space<vmem>>, vector<128x256xbf16>
    %cst = arith.constant dense<0.000000e+00> : vector<8x256xf32>
    %6 = tpu.matmul %4, %5, %cst {dimension_numbers = #tpu.dot_dimension_numbers<[1], [0], [0], [1], [0, 0, 1, 1], [], []>} : vector<8x128xbf16>, vector<128x256xbf16>, vector<8x256xf32> -> vector<8x256xf32>
    %7 = arith.addf %3, %6 : vector<8x256xf32>
    %c0_6 = arith.constant 0 : index
    %c0_7 = arith.constant 0 : index
    %8 = vector.load %arg8[%c0_6, %c0_7] : memref<8x256xf32, #tpu.memory_space<vmem>>, vector<8x256xf32>
    tpu.vector_store %arg8[%c0_6, %c0_7], %7 {strides = array<i32>} : memref<8x256xf32, #tpu.memory_space<vmem>>, vector<8x256xf32>,
    %c0_i32_8 = arith.constant 0 : i32
    %9 = arith.cmpi eq, %arg2, %c0_i32_8 : i32
    %10 = arith.extui %9 : i1 to i32
    %c0_i32_9 = arith.constant 0 : i32
    %11 = arith.cmpi ne, %10, %c0_i32_9 : i32
    scf.if %11 {
      %c0_10 = arith.constant 0 : index
      %c0_11 = arith.constant 0 : index
      %12 = vector.load %arg8[%c0_10, %c0_11] : memref<8x256xf32, #tpu.memory_space<vmem>>, vector<8x256xf32>
      %c0_12 = arith.constant 0 : index
      %c0_13 = arith.constant 0 : index
      %13 = vector.load %arg5[%c0_12, %c0_13] : memref<1x256xf32, #tpu.memory_space<vmem>>, vector<1x256xf32>
      %14 = vector.broadcast %13 : vector<1x256xf32> to vector<8x256xf32>
      %15 = arith.mulf %12, %14 : vector<8x256xf32>
      %c0_14 = arith.constant 0 : index
      %c0_15 = arith.constant 0 : index
      %16 = vector.load %arg6[%c0_14, %c0_15] : memref<1x256xf32, #tpu.memory_space<vmem>>, vector<1x256xf32>
      %17 = vector.broadcast %16 : vector<1x256xf32> to vector<8x256xf32>
      %18 = arith.addf %15, %17 : vector<8x256xf32>
      %c0_16 = arith.constant 0 : index
      %c0_17 = arith.constant 0 : index
      %19 = vector.load %arg7[%c0_16, %c0_17] : memref<8x256xf32, #tpu.memory_space<vmem>>, vector<8x256xf32>
      tpu.vector_store %arg7[%c0_16, %c0_17], %18 {strides = array<i32>} : memref<8x256xf32, #tpu.memory_space<vmem>>, vector<8x256xf32>,
    } else {
    }
    return
  }
  func.func @transform_0(%arg0: i32, %arg1: i32, %arg2: i32) -> (i32, i32) {
    %c0_i32 = arith.constant 0 : i32
    return %arg0, %arg2 : i32, i32
  }
  func.func @transform_1(%arg0: i32, %arg1: i32, %arg2: i32) -> (i32, i32) {
    %c0_i32 = arith.constant 0 : i32
    return %arg2, %arg1 : i32, i32
  }
  func.func @transform_2(%arg0: i32, %arg1: i32, %arg2: i32) -> (i32, i32) {
    %c0_i32 = arith.constant 0 : i32
    %c0_i32_0 = arith.constant 0 : i32
    return %c0_i32, %arg1 : i32, i32
  }
  func.func @transform_3(%arg0: i32, %arg1: i32, %arg2: i32) -> (i32, i32) {
    %c0_i32 = arith.constant 0 : i32
    %c0_i32_0 = arith.constant 0 : i32
    return %c0_i32, %arg1 : i32, i32
  }
  func.func @transform_4(%arg0: i32, %arg1: i32, %arg2: i32) -> (i32, i32) {
    %c0_i32 = arith.constant 0 : i32
    return %arg0, %arg1 : i32, i32
  }
}

module attributes {stable_mosaic.version = 11 : i64} {
  func.func @_conv_matmul_kernel(%arg0: i32, %arg1: i32, %arg2: i32, %arg3: memref<8x384xbf16, #tpu.memory_space<vmem>>, %arg4: memref<384x256xbf16, #tpu.memory_space<vmem>>, %arg5: memref<1x256xf32, #tpu.memory_space<vmem>>, %arg6: memref<1x256xf32, #tpu.memory_space<vmem>>, %arg7: memref<8x256xf32, #tpu.memory_space<vmem>>, %arg8: memref<8x256xf32, #tpu.memory_space<vmem>>) attributes {dimension_semantics = [#tpu.dimension_semantics<parallel>, #tpu.dimension_semantics<parallel>, #tpu.dimension_semantics<arbitrary>], iteration_bounds = array<i64: 1, 1, 6>, scalar_prefetch = 0 : i64, scratch_operands = 1 : i64, tpu.core_type = #tpu.core_type<tc>, window_params = [{transform_indices = @transform_0, window_bounds = array<i64: 8, 384>}, {transform_indices = @transform_1, window_bounds = array<i64: 384, 256>}, {transform_indices = @transform_2, window_bounds = array<i64: 1, 256>}, {transform_indices = @transform_3, window_bounds = array<i64: 1, 256>}, {transform_indices = @transform_4, window_bounds = array<i64: 8, 256>}]} {
    %c0_i32 = arith.constant 0 : i32
    %0 = arith.cmpi eq, %arg2, %c0_i32 : i32
    %1 = arith.extui %0 : i1 to i32
    %c0_i32_0 = arith.constant 0 : i32
    %2 = arith.cmpi ne, %1, %c0_i32_0 : i32
    scf.if %2 {
      %cst_9 = arith.constant 0.000000e+00 : f32
      %12 = vector.broadcast %cst_9 : f32 to vector<8x256xf32>
      %c0_10 = arith.constant 0 : index
      %c0_11 = arith.constant 0 : index
      %13 = vector.load %arg8[%c0_10, %c0_11] : memref<8x256xf32, #tpu.memory_space<vmem>>, vector<8x256xf32>
      tpu.vector_store %arg8[%c0_10, %c0_11], %12 {strides = array<i32>} : memref<8x256xf32, #tpu.memory_space<vmem>>, vector<8x256xf32>,
    } else {
    }
    %c0 = arith.constant 0 : index
    %c0_1 = arith.constant 0 : index
    %3 = vector.load %arg8[%c0, %c0_1] : memref<8x256xf32, #tpu.memory_space<vmem>>, vector<8x256xf32>
    %c0_2 = arith.constant 0 : index
    %c0_3 = arith.constant 0 : index
    %4 = vector.load %arg3[%c0_2, %c0_3] : memref<8x384xbf16, #tpu.memory_space<vmem>>, vector<8x384xbf16>
    %c0_4 = arith.constant 0 : index
    %c0_5 = arith.constant 0 : index
    %5 = vector.load %arg4[%c0_4, %c0_5] : memref<384x256xbf16, #tpu.memory_space<vmem>>, vector<384x256xbf16>
    %cst = arith.constant dense<0.000000e+00> : vector<8x256xf32>
    %6 = tpu.matmul %4, %5, %cst {dimension_numbers = #tpu.dot_dimension_numbers<[1], [0], [0], [1], [0, 0, 1, 1], [], []>} : vector<8x384xbf16>, vector<384x256xbf16>, vector<8x256xf32> -> vector<8x256xf32>
    %7 = arith.addf %3, %6 : vector<8x256xf32>
    %c0_6 = arith.constant 0 : index
    %c0_7 = arith.constant 0 : index
    %8 = vector.load %arg8[%c0_6, %c0_7] : memref<8x256xf32, #tpu.memory_space<vmem>>, vector<8x256xf32>
    tpu.vector_store %arg8[%c0_6, %c0_7], %7 {strides = array<i32>} : memref<8x256xf32, #tpu.memory_space<vmem>>, vector<8x256xf32>,
    %c5_i32 = arith.constant 5 : i32
    %9 = arith.cmpi eq, %arg2, %c5_i32 : i32
    %10 = arith.extui %9 : i1 to i32
    %c0_i32_8 = arith.constant 0 : i32
    %11 = arith.cmpi ne, %10, %c0_i32_8 : i32
    scf.if %11 {
      %c0_9 = arith.constant 0 : index
      %c0_10 = arith.constant 0 : index
      %12 = vector.load %arg8[%c0_9, %c0_10] : memref<8x256xf32, #tpu.memory_space<vmem>>, vector<8x256xf32>
      %c0_11 = arith.constant 0 : index
      %c0_12 = arith.constant 0 : index
      %13 = vector.load %arg5[%c0_11, %c0_12] : memref<1x256xf32, #tpu.memory_space<vmem>>, vector<1x256xf32>
      %14 = vector.broadcast %13 : vector<1x256xf32> to vector<8x256xf32>
      %15 = arith.mulf %12, %14 : vector<8x256xf32>
      %c0_13 = arith.constant 0 : index
      %c0_14 = arith.constant 0 : index
      %16 = vector.load %arg6[%c0_13, %c0_14] : memref<1x256xf32, #tpu.memory_space<vmem>>, vector<1x256xf32>
      %17 = vector.broadcast %16 : vector<1x256xf32> to vector<8x256xf32>
      %18 = arith.addf %15, %17 : vector<8x256xf32>
      %cst_15 = arith.constant 0.000000e+00 : f32
      %19 = vector.broadcast %cst_15 : f32 to vector<8x256xf32>
      %20 = arith.maximumf %18, %19 : vector<8x256xf32>
      %c0_16 = arith.constant 0 : index
      %c0_17 = arith.constant 0 : index
      %21 = vector.load %arg7[%c0_16, %c0_17] : memref<8x256xf32, #tpu.memory_space<vmem>>, vector<8x256xf32>
      tpu.vector_store %arg7[%c0_16, %c0_17], %20 {strides = array<i32>} : memref<8x256xf32, #tpu.memory_space<vmem>>, vector<8x256xf32>,
    } else {
    }
    return
  }
  func.func @transform_0(%arg0: i32, %arg1: i32, %arg2: i32) -> (i32, i32) {
    %c0_i32 = arith.constant 0 : i32
    return %arg0, %arg2 : i32, i32
  }
  func.func @transform_1(%arg0: i32, %arg1: i32, %arg2: i32) -> (i32, i32) {
    %c0_i32 = arith.constant 0 : i32
    return %arg2, %arg1 : i32, i32
  }
  func.func @transform_2(%arg0: i32, %arg1: i32, %arg2: i32) -> (i32, i32) {
    %c0_i32 = arith.constant 0 : i32
    %c0_i32_0 = arith.constant 0 : i32
    return %c0_i32, %arg1 : i32, i32
  }
  func.func @transform_3(%arg0: i32, %arg1: i32, %arg2: i32) -> (i32, i32) {
    %c0_i32 = arith.constant 0 : i32
    %c0_i32_0 = arith.constant 0 : i32
    return %c0_i32, %arg1 : i32, i32
  }
  func.func @transform_4(%arg0: i32, %arg1: i32, %arg2: i32) -> (i32, i32) {
    %c0_i32 = arith.constant 0 : i32
    return %arg0, %arg1 : i32, i32
  }
}

module attributes {stable_mosaic.version = 11 : i64} {
  func.func @_conv_matmul_kernel(%arg0: i32, %arg1: i32, %arg2: i32, %arg3: memref<8x384xbf16, #tpu.memory_space<vmem>>, %arg4: memref<384x256xbf16, #tpu.memory_space<vmem>>, %arg5: memref<1x256xf32, #tpu.memory_space<vmem>>, %arg6: memref<1x256xf32, #tpu.memory_space<vmem>>, %arg7: memref<8x256xf32, #tpu.memory_space<vmem>>, %arg8: memref<8x256xf32, #tpu.memory_space<vmem>>) attributes {dimension_semantics = [#tpu.dimension_semantics<parallel>, #tpu.dimension_semantics<parallel>, #tpu.dimension_semantics<arbitrary>], iteration_bounds = array<i64: 1, 2, 6>, scalar_prefetch = 0 : i64, scratch_operands = 1 : i64, tpu.core_type = #tpu.core_type<tc>, window_params = [{transform_indices = @transform_0, window_bounds = array<i64: 8, 384>}, {transform_indices = @transform_1, window_bounds = array<i64: 384, 256>}, {transform_indices = @transform_2, window_bounds = array<i64: 1, 256>}, {transform_indices = @transform_3, window_bounds = array<i64: 1, 256>}, {transform_indices = @transform_4, window_bounds = array<i64: 8, 256>}]} {
    %c0_i32 = arith.constant 0 : i32
    %0 = arith.cmpi eq, %arg2, %c0_i32 : i32
    %1 = arith.extui %0 : i1 to i32
    %c0_i32_0 = arith.constant 0 : i32
    %2 = arith.cmpi ne, %1, %c0_i32_0 : i32
    scf.if %2 {
      %cst_9 = arith.constant 0.000000e+00 : f32
      %12 = vector.broadcast %cst_9 : f32 to vector<8x256xf32>
      %c0_10 = arith.constant 0 : index
      %c0_11 = arith.constant 0 : index
      %13 = vector.load %arg8[%c0_10, %c0_11] : memref<8x256xf32, #tpu.memory_space<vmem>>, vector<8x256xf32>
      tpu.vector_store %arg8[%c0_10, %c0_11], %12 {strides = array<i32>} : memref<8x256xf32, #tpu.memory_space<vmem>>, vector<8x256xf32>,
    } else {
    }
    %c0 = arith.constant 0 : index
    %c0_1 = arith.constant 0 : index
    %3 = vector.load %arg8[%c0, %c0_1] : memref<8x256xf32, #tpu.memory_space<vmem>>, vector<8x256xf32>
    %c0_2 = arith.constant 0 : index
    %c0_3 = arith.constant 0 : index
    %4 = vector.load %arg3[%c0_2, %c0_3] : memref<8x384xbf16, #tpu.memory_space<vmem>>, vector<8x384xbf16>
    %c0_4 = arith.constant 0 : index
    %c0_5 = arith.constant 0 : index
    %5 = vector.load %arg4[%c0_4, %c0_5] : memref<384x256xbf16, #tpu.memory_space<vmem>>, vector<384x256xbf16>
    %cst = arith.constant dense<0.000000e+00> : vector<8x256xf32>
    %6 = tpu.matmul %4, %5, %cst {dimension_numbers = #tpu.dot_dimension_numbers<[1], [0], [0], [1], [0, 0, 1, 1], [], []>} : vector<8x384xbf16>, vector<384x256xbf16>, vector<8x256xf32> -> vector<8x256xf32>
    %7 = arith.addf %3, %6 : vector<8x256xf32>
    %c0_6 = arith.constant 0 : index
    %c0_7 = arith.constant 0 : index
    %8 = vector.load %arg8[%c0_6, %c0_7] : memref<8x256xf32, #tpu.memory_space<vmem>>, vector<8x256xf32>
    tpu.vector_store %arg8[%c0_6, %c0_7], %7 {strides = array<i32>} : memref<8x256xf32, #tpu.memory_space<vmem>>, vector<8x256xf32>,
    %c5_i32 = arith.constant 5 : i32
    %9 = arith.cmpi eq, %arg2, %c5_i32 : i32
    %10 = arith.extui %9 : i1 to i32
    %c0_i32_8 = arith.constant 0 : i32
    %11 = arith.cmpi ne, %10, %c0_i32_8 : i32
    scf.if %11 {
      %c0_9 = arith.constant 0 : index
      %c0_10 = arith.constant 0 : index
      %12 = vector.load %arg8[%c0_9, %c0_10] : memref<8x256xf32, #tpu.memory_space<vmem>>, vector<8x256xf32>
      %c0_11 = arith.constant 0 : index
      %c0_12 = arith.constant 0 : index
      %13 = vector.load %arg5[%c0_11, %c0_12] : memref<1x256xf32, #tpu.memory_space<vmem>>, vector<1x256xf32>
      %14 = vector.broadcast %13 : vector<1x256xf32> to vector<8x256xf32>
      %15 = arith.mulf %12, %14 : vector<8x256xf32>
      %c0_13 = arith.constant 0 : index
      %c0_14 = arith.constant 0 : index
      %16 = vector.load %arg6[%c0_13, %c0_14] : memref<1x256xf32, #tpu.memory_space<vmem>>, vector<1x256xf32>
      %17 = vector.broadcast %16 : vector<1x256xf32> to vector<8x256xf32>
      %18 = arith.addf %15, %17 : vector<8x256xf32>
      %cst_15 = arith.constant 0.000000e+00 : f32
      %19 = vector.broadcast %cst_15 : f32 to vector<8x256xf32>
      %20 = arith.maximumf %18, %19 : vector<8x256xf32>
      %c0_16 = arith.constant 0 : index
      %c0_17 = arith.constant 0 : index
      %21 = vector.load %arg7[%c0_16, %c0_17] : memref<8x256xf32, #tpu.memory_space<vmem>>, vector<8x256xf32>
      tpu.vector_store %arg7[%c0_16, %c0_17], %20 {strides = array<i32>} : memref<8x256xf32, #tpu.memory_space<vmem>>, vector<8x256xf32>,
    } else {
    }
    return
  }
  func.func @transform_0(%arg0: i32, %arg1: i32, %arg2: i32) -> (i32, i32) {
    %c0_i32 = arith.constant 0 : i32
    return %arg0, %arg2 : i32, i32
  }
  func.func @transform_1(%arg0: i32, %arg1: i32, %arg2: i32) -> (i32, i32) {
    %c0_i32 = arith.constant 0 : i32
    return %arg2, %arg1 : i32, i32
  }
  func.func @transform_2(%arg0: i32, %arg1: i32, %arg2: i32) -> (i32, i32) {
    %c0_i32 = arith.constant 0 : i32
    %c0_i32_0 = arith.constant 0 : i32
    return %c0_i32, %arg1 : i32, i32
  }
  func.func @transform_3(%arg0: i32, %arg1: i32, %arg2: i32) -> (i32, i32) {
    %c0_i32 = arith.constant 0 : i32
    %c0_i32_0 = arith.constant 0 : i32
    return %c0_i32, %arg1 : i32, i32
  }
  func.func @transform_4(%arg0: i32, %arg1: i32, %arg2: i32) -> (i32, i32) {
    %c0_i32 = arith.constant 0 : i32
    return %arg0, %arg1 : i32, i32
  }
}

module attributes {stable_mosaic.version = 11 : i64} {
  func.func @_conv_matmul_kernel(%arg0: i32, %arg1: i32, %arg2: i32, %arg3: memref<8x256xbf16, #tpu.memory_space<vmem>>, %arg4: memref<256x256xbf16, #tpu.memory_space<vmem>>, %arg5: memref<1x256xf32, #tpu.memory_space<vmem>>, %arg6: memref<1x256xf32, #tpu.memory_space<vmem>>, %arg7: memref<8x256xf32, #tpu.memory_space<vmem>>, %arg8: memref<8x256xf32, #tpu.memory_space<vmem>>) attributes {dimension_semantics = [#tpu.dimension_semantics<parallel>, #tpu.dimension_semantics<parallel>, #tpu.dimension_semantics<arbitrary>], iteration_bounds = array<i64: 1, 2, 1>, scalar_prefetch = 0 : i64, scratch_operands = 1 : i64, tpu.core_type = #tpu.core_type<tc>, window_params = [{transform_indices = @transform_0, window_bounds = array<i64: 8, 256>}, {transform_indices = @transform_1, window_bounds = array<i64: 256, 256>}, {transform_indices = @transform_2, window_bounds = array<i64: 1, 256>}, {transform_indices = @transform_3, window_bounds = array<i64: 1, 256>}, {transform_indices = @transform_4, window_bounds = array<i64: 8, 256>}]} {
    %c0_i32 = arith.constant 0 : i32
    %0 = arith.cmpi eq, %arg2, %c0_i32 : i32
    %1 = arith.extui %0 : i1 to i32
    %c0_i32_0 = arith.constant 0 : i32
    %2 = arith.cmpi ne, %1, %c0_i32_0 : i32
    scf.if %2 {
      %cst_10 = arith.constant 0.000000e+00 : f32
      %12 = vector.broadcast %cst_10 : f32 to vector<8x256xf32>
      %c0_11 = arith.constant 0 : index
      %c0_12 = arith.constant 0 : index
      %13 = vector.load %arg8[%c0_11, %c0_12] : memref<8x256xf32, #tpu.memory_space<vmem>>, vector<8x256xf32>
      tpu.vector_store %arg8[%c0_11, %c0_12], %12 {strides = array<i32>} : memref<8x256xf32, #tpu.memory_space<vmem>>, vector<8x256xf32>,
    } else {
    }
    %c0 = arith.constant 0 : index
    %c0_1 = arith.constant 0 : index
    %3 = vector.load %arg8[%c0, %c0_1] : memref<8x256xf32, #tpu.memory_space<vmem>>, vector<8x256xf32>
    %c0_2 = arith.constant 0 : index
    %c0_3 = arith.constant 0 : index
    %4 = vector.load %arg3[%c0_2, %c0_3] : memref<8x256xbf16, #tpu.memory_space<vmem>>, vector<8x256xbf16>
    %c0_4 = arith.constant 0 : index
    %c0_5 = arith.constant 0 : index
    %5 = vector.load %arg4[%c0_4, %c0_5] : memref<256x256xbf16, #tpu.memory_space<vmem>>, vector<256x256xbf16>
    %cst = arith.constant dense<0.000000e+00> : vector<8x256xf32>
    %6 = tpu.matmul %4, %5, %cst {dimension_numbers = #tpu.dot_dimension_numbers<[1], [0], [0], [1], [0, 0, 1, 1], [], []>} : vector<8x256xbf16>, vector<256x256xbf16>, vector<8x256xf32> -> vector<8x256xf32>
    %7 = arith.addf %3, %6 : vector<8x256xf32>
    %c0_6 = arith.constant 0 : index
    %c0_7 = arith.constant 0 : index
    %8 = vector.load %arg8[%c0_6, %c0_7] : memref<8x256xf32, #tpu.memory_space<vmem>>, vector<8x256xf32>
    tpu.vector_store %arg8[%c0_6, %c0_7], %7 {strides = array<i32>} : memref<8x256xf32, #tpu.memory_space<vmem>>, vector<8x256xf32>,
    %c0_i32_8 = arith.constant 0 : i32
    %9 = arith.cmpi eq, %arg2, %c0_i32_8 : i32
    %10 = arith.extui %9 : i1 to i32
    %c0_i32_9 = arith.constant 0 : i32
    %11 = arith.cmpi ne, %10, %c0_i32_9 : i32
    scf.if %11 {
      %c0_10 = arith.constant 0 : index
      %c0_11 = arith.constant 0 : index
      %12 = vector.load %arg8[%c0_10, %c0_11] : memref<8x256xf32, #tpu.memory_space<vmem>>, vector<8x256xf32>
      %c0_12 = arith.constant 0 : index
      %c0_13 = arith.constant 0 : index
      %13 = vector.load %arg5[%c0_12, %c0_13] : memref<1x256xf32, #tpu.memory_space<vmem>>, vector<1x256xf32>
      %14 = vector.broadcast %13 : vector<1x256xf32> to vector<8x256xf32>
      %15 = arith.mulf %12, %14 : vector<8x256xf32>
      %c0_14 = arith.constant 0 : index
      %c0_15 = arith.constant 0 : index
      %16 = vector.load %arg6[%c0_14, %c0_15] : memref<1x256xf32, #tpu.memory_space<vmem>>, vector<1x256xf32>
      %17 = vector.broadcast %16 : vector<1x256xf32> to vector<8x256xf32>
      %18 = arith.addf %15, %17 : vector<8x256xf32>
      %c0_16 = arith.constant 0 : index
      %c0_17 = arith.constant 0 : index
      %19 = vector.load %arg7[%c0_16, %c0_17] : memref<8x256xf32, #tpu.memory_space<vmem>>, vector<8x256xf32>
      tpu.vector_store %arg7[%c0_16, %c0_17], %18 {strides = array<i32>} : memref<8x256xf32, #tpu.memory_space<vmem>>, vector<8x256xf32>,
    } else {
    }
    return
  }
  func.func @transform_0(%arg0: i32, %arg1: i32, %arg2: i32) -> (i32, i32) {
    %c0_i32 = arith.constant 0 : i32
    return %arg0, %arg2 : i32, i32
  }
  func.func @transform_1(%arg0: i32, %arg1: i32, %arg2: i32) -> (i32, i32) {
    %c0_i32 = arith.constant 0 : i32
    return %arg2, %arg1 : i32, i32
  }
  func.func @transform_2(%arg0: i32, %arg1: i32, %arg2: i32) -> (i32, i32) {
    %c0_i32 = arith.constant 0 : i32
    %c0_i32_0 = arith.constant 0 : i32
    return %c0_i32, %arg1 : i32, i32
  }
  func.func @transform_3(%arg0: i32, %arg1: i32, %arg2: i32) -> (i32, i32) {
    %c0_i32 = arith.constant 0 : i32
    %c0_i32_0 = arith.constant 0 : i32
    return %c0_i32, %arg1 : i32, i32
  }
  func.func @transform_4(%arg0: i32, %arg1: i32, %arg2: i32) -> (i32, i32) {
    %c0_i32 = arith.constant 0 : i32
    return %arg0, %arg1 : i32, i32
  }
}

module attributes {stable_mosaic.version = 11 : i64} {
  func.func @_conv_matmul_kernel(%arg0: i32, %arg1: i32, %arg2: i32, %arg3: memref<8x512xbf16, #tpu.memory_space<vmem>>, %arg4: memref<512x256xbf16, #tpu.memory_space<vmem>>, %arg5: memref<1x256xf32, #tpu.memory_space<vmem>>, %arg6: memref<1x256xf32, #tpu.memory_space<vmem>>, %arg7: memref<8x256xf32, #tpu.memory_space<vmem>>, %arg8: memref<8x256xf32, #tpu.memory_space<vmem>>, %arg9: memref<8x256xf32, #tpu.memory_space<vmem>>) attributes {dimension_semantics = [#tpu.dimension_semantics<parallel>, #tpu.dimension_semantics<parallel>, #tpu.dimension_semantics<arbitrary>], iteration_bounds = array<i64: 1, 2, 9>, scalar_prefetch = 0 : i64, scratch_operands = 1 : i64, tpu.core_type = #tpu.core_type<tc>, window_params = [{transform_indices = @transform_0, window_bounds = array<i64: 8, 512>}, {transform_indices = @transform_1, window_bounds = array<i64: 512, 256>}, {transform_indices = @transform_2, window_bounds = array<i64: 1, 256>}, {transform_indices = @transform_3, window_bounds = array<i64: 1, 256>}, {transform_indices = @transform_4, window_bounds = array<i64: 8, 256>}, {transform_indices = @transform_5, window_bounds = array<i64: 8, 256>}]} {
    %c0_i32 = arith.constant 0 : i32
    %0 = arith.cmpi eq, %arg2, %c0_i32 : i32
    %1 = arith.extui %0 : i1 to i32
    %c0_i32_0 = arith.constant 0 : i32
    %2 = arith.cmpi ne, %1, %c0_i32_0 : i32
    scf.if %2 {
      %cst_9 = arith.constant 0.000000e+00 : f32
      %12 = vector.broadcast %cst_9 : f32 to vector<8x256xf32>
      %c0_10 = arith.constant 0 : index
      %c0_11 = arith.constant 0 : index
      %13 = vector.load %arg9[%c0_10, %c0_11] : memref<8x256xf32, #tpu.memory_space<vmem>>, vector<8x256xf32>
      tpu.vector_store %arg9[%c0_10, %c0_11], %12 {strides = array<i32>} : memref<8x256xf32, #tpu.memory_space<vmem>>, vector<8x256xf32>,
    } else {
    }
    %c0 = arith.constant 0 : index
    %c0_1 = arith.constant 0 : index
    %3 = vector.load %arg9[%c0, %c0_1] : memref<8x256xf32, #tpu.memory_space<vmem>>, vector<8x256xf32>
    %c0_2 = arith.constant 0 : index
    %c0_3 = arith.constant 0 : index
    %4 = vector.load %arg3[%c0_2, %c0_3] : memref<8x512xbf16, #tpu.memory_space<vmem>>, vector<8x512xbf16>
    %c0_4 = arith.constant 0 : index
    %c0_5 = arith.constant 0 : index
    %5 = vector.load %arg4[%c0_4, %c0_5] : memref<512x256xbf16, #tpu.memory_space<vmem>>, vector<512x256xbf16>
    %cst = arith.constant dense<0.000000e+00> : vector<8x256xf32>
    %6 = tpu.matmul %4, %5, %cst {dimension_numbers = #tpu.dot_dimension_numbers<[1], [0], [0], [1], [0, 0, 1, 1], [], []>} : vector<8x512xbf16>, vector<512x256xbf16>, vector<8x256xf32> -> vector<8x256xf32>
    %7 = arith.addf %3, %6 : vector<8x256xf32>
    %c0_6 = arith.constant 0 : index
    %c0_7 = arith.constant 0 : index
    %8 = vector.load %arg9[%c0_6, %c0_7] : memref<8x256xf32, #tpu.memory_space<vmem>>, vector<8x256xf32>
    tpu.vector_store %arg9[%c0_6, %c0_7], %7 {strides = array<i32>} : memref<8x256xf32, #tpu.memory_space<vmem>>, vector<8x256xf32>,
    %c8_i32 = arith.constant 8 : i32
    %9 = arith.cmpi eq, %arg2, %c8_i32 : i32
    %10 = arith.extui %9 : i1 to i32
    %c0_i32_8 = arith.constant 0 : i32
    %11 = arith.cmpi ne, %10, %c0_i32_8 : i32
    scf.if %11 {
      %c0_9 = arith.constant 0 : index
      %c0_10 = arith.constant 0 : index
      %12 = vector.load %arg9[%c0_9, %c0_10] : memref<8x256xf32, #tpu.memory_space<vmem>>, vector<8x256xf32>
      %c0_11 = arith.constant 0 : index
      %c0_12 = arith.constant 0 : index
      %13 = vector.load %arg5[%c0_11, %c0_12] : memref<1x256xf32, #tpu.memory_space<vmem>>, vector<1x256xf32>
      %14 = vector.broadcast %13 : vector<1x256xf32> to vector<8x256xf32>
      %15 = arith.mulf %12, %14 : vector<8x256xf32>
      %c0_13 = arith.constant 0 : index
      %c0_14 = arith.constant 0 : index
      %16 = vector.load %arg6[%c0_13, %c0_14] : memref<1x256xf32, #tpu.memory_space<vmem>>, vector<1x256xf32>
      %17 = vector.broadcast %16 : vector<1x256xf32> to vector<8x256xf32>
      %18 = arith.addf %15, %17 : vector<8x256xf32>
      %c0_15 = arith.constant 0 : index
      %c0_16 = arith.constant 0 : index
      %19 = vector.load %arg7[%c0_15, %c0_16] : memref<8x256xf32, #tpu.memory_space<vmem>>, vector<8x256xf32>
      %20 = arith.addf %18, %19 : vector<8x256xf32>
      %cst_17 = arith.constant 0.000000e+00 : f32
      %21 = vector.broadcast %cst_17 : f32 to vector<8x256xf32>
      %22 = arith.maximumf %20, %21 : vector<8x256xf32>
      %c0_18 = arith.constant 0 : index
      %c0_19 = arith.constant 0 : index
      %23 = vector.load %arg8[%c0_18, %c0_19] : memref<8x256xf32, #tpu.memory_space<vmem>>, vector<8x256xf32>
      tpu.vector_store %arg8[%c0_18, %c0_19], %22 {strides = array<i32>} : memref<8x256xf32, #tpu.memory_space<vmem>>, vector<8x256xf32>,
    } else {
    }
    return
  }
  func.func @transform_0(%arg0: i32, %arg1: i32, %arg2: i32) -> (i32, i32) {
    %c0_i32 = arith.constant 0 : i32
    return %arg0, %arg2 : i32, i32
  }
  func.func @transform_1(%arg0: i32, %arg1: i32, %arg2: i32) -> (i32, i32) {
    %c0_i32 = arith.constant 0 : i32
    return %arg2, %arg1 : i32, i32
  }
  func.func @transform_2(%arg0: i32, %arg1: i32, %arg2: i32) -> (i32, i32) {
    %c0_i32 = arith.constant 0 : i32
    %c0_i32_0 = arith.constant 0 : i32
    return %c0_i32, %arg1 : i32, i32
  }
  func.func @transform_3(%arg0: i32, %arg1: i32, %arg2: i32) -> (i32, i32) {
    %c0_i32 = arith.constant 0 : i32
    %c0_i32_0 = arith.constant 0 : i32
    return %c0_i32, %arg1 : i32, i32
  }
  func.func @transform_4(%arg0: i32, %arg1: i32, %arg2: i32) -> (i32, i32) {
    %c0_i32 = arith.constant 0 : i32
    return %arg0, %arg1 : i32, i32
  }
  func.func @transform_5(%arg0: i32, %arg1: i32, %arg2: i32) -> (i32, i32) {
    %c0_i32 = arith.constant 0 : i32
    return %arg0, %arg1 : i32, i32
  }
}

module attributes {stable_mosaic.version = 11 : i64} {
  func.func @_conv_matmul_kernel(%arg0: i32, %arg1: i32, %arg2: i32, %arg3: memref<8x512xbf16, #tpu.memory_space<vmem>>, %arg4: memref<512x256xbf16, #tpu.memory_space<vmem>>, %arg5: memref<1x256xf32, #tpu.memory_space<vmem>>, %arg6: memref<1x256xf32, #tpu.memory_space<vmem>>, %arg7: memref<8x256xf32, #tpu.memory_space<vmem>>, %arg8: memref<8x256xf32, #tpu.memory_space<vmem>>) attributes {dimension_semantics = [#tpu.dimension_semantics<parallel>, #tpu.dimension_semantics<parallel>, #tpu.dimension_semantics<arbitrary>], iteration_bounds = array<i64: 1, 2, 9>, scalar_prefetch = 0 : i64, scratch_operands = 1 : i64, tpu.core_type = #tpu.core_type<tc>, window_params = [{transform_indices = @transform_0, window_bounds = array<i64: 8, 512>}, {transform_indices = @transform_1, window_bounds = array<i64: 512, 256>}, {transform_indices = @transform_2, window_bounds = array<i64: 1, 256>}, {transform_indices = @transform_3, window_bounds = array<i64: 1, 256>}, {transform_indices = @transform_4, window_bounds = array<i64: 8, 256>}]} {
    %c0_i32 = arith.constant 0 : i32
    %0 = arith.cmpi eq, %arg2, %c0_i32 : i32
    %1 = arith.extui %0 : i1 to i32
    %c0_i32_0 = arith.constant 0 : i32
    %2 = arith.cmpi ne, %1, %c0_i32_0 : i32
    scf.if %2 {
      %cst_9 = arith.constant 0.000000e+00 : f32
      %12 = vector.broadcast %cst_9 : f32 to vector<8x256xf32>
      %c0_10 = arith.constant 0 : index
      %c0_11 = arith.constant 0 : index
      %13 = vector.load %arg8[%c0_10, %c0_11] : memref<8x256xf32, #tpu.memory_space<vmem>>, vector<8x256xf32>
      tpu.vector_store %arg8[%c0_10, %c0_11], %12 {strides = array<i32>} : memref<8x256xf32, #tpu.memory_space<vmem>>, vector<8x256xf32>,
    } else {
    }
    %c0 = arith.constant 0 : index
    %c0_1 = arith.constant 0 : index
    %3 = vector.load %arg8[%c0, %c0_1] : memref<8x256xf32, #tpu.memory_space<vmem>>, vector<8x256xf32>
    %c0_2 = arith.constant 0 : index
    %c0_3 = arith.constant 0 : index
    %4 = vector.load %arg3[%c0_2, %c0_3] : memref<8x512xbf16, #tpu.memory_space<vmem>>, vector<8x512xbf16>
    %c0_4 = arith.constant 0 : index
    %c0_5 = arith.constant 0 : index
    %5 = vector.load %arg4[%c0_4, %c0_5] : memref<512x256xbf16, #tpu.memory_space<vmem>>, vector<512x256xbf16>
    %cst = arith.constant dense<0.000000e+00> : vector<8x256xf32>
    %6 = tpu.matmul %4, %5, %cst {dimension_numbers = #tpu.dot_dimension_numbers<[1], [0], [0], [1], [0, 0, 1, 1], [], []>} : vector<8x512xbf16>, vector<512x256xbf16>, vector<8x256xf32> -> vector<8x256xf32>
    %7 = arith.addf %3, %6 : vector<8x256xf32>
    %c0_6 = arith.constant 0 : index
    %c0_7 = arith.constant 0 : index
    %8 = vector.load %arg8[%c0_6, %c0_7] : memref<8x256xf32, #tpu.memory_space<vmem>>, vector<8x256xf32>
    tpu.vector_store %arg8[%c0_6, %c0_7], %7 {strides = array<i32>} : memref<8x256xf32, #tpu.memory_space<vmem>>, vector<8x256xf32>,
    %c8_i32 = arith.constant 8 : i32
    %9 = arith.cmpi eq, %arg2, %c8_i32 : i32
    %10 = arith.extui %9 : i1 to i32
    %c0_i32_8 = arith.constant 0 : i32
    %11 = arith.cmpi ne, %10, %c0_i32_8 : i32
    scf.if %11 {
      %c0_9 = arith.constant 0 : index
      %c0_10 = arith.constant 0 : index
      %12 = vector.load %arg8[%c0_9, %c0_10] : memref<8x256xf32, #tpu.memory_space<vmem>>, vector<8x256xf32>
      %c0_11 = arith.constant 0 : index
      %c0_12 = arith.constant 0 : index
      %13 = vector.load %arg5[%c0_11, %c0_12] : memref<1x256xf32, #tpu.memory_space<vmem>>, vector<1x256xf32>
      %14 = vector.broadcast %13 : vector<1x256xf32> to vector<8x256xf32>
      %15 = arith.mulf %12, %14 : vector<8x256xf32>
      %c0_13 = arith.constant 0 : index
      %c0_14 = arith.constant 0 : index
      %16 = vector.load %arg6[%c0_13, %c0_14] : memref<1x256xf32, #tpu.memory_space<vmem>>, vector<1x256xf32>
      %17 = vector.broadcast %16 : vector<1x256xf32> to vector<8x256xf32>
      %18 = arith.addf %15, %17 : vector<8x256xf32>
      %cst_15 = arith.constant 0.000000e+00 : f32
      %19 = vector.broadcast %cst_15 : f32 to vector<8x256xf32>
      %20 = arith.maximumf %18, %19 : vector<8x256xf32>
      %c0_16 = arith.constant 0 : index
      %c0_17 = arith.constant 0 : index
      %21 = vector.load %arg7[%c0_16, %c0_17] : memref<8x256xf32, #tpu.memory_space<vmem>>, vector<8x256xf32>
      tpu.vector_store %arg7[%c0_16, %c0_17], %20 {strides = array<i32>} : memref<8x256xf32, #tpu.memory_space<vmem>>, vector<8x256xf32>,
    } else {
    }
    return
  }
  func.func @transform_0(%arg0: i32, %arg1: i32, %arg2: i32) -> (i32, i32) {
    %c0_i32 = arith.constant 0 : i32
    return %arg0, %arg2 : i32, i32
  }
  func.func @transform_1(%arg0: i32, %arg1: i32, %arg2: i32) -> (i32, i32) {
    %c0_i32 = arith.constant 0 : i32
    return %arg2, %arg1 : i32, i32
  }
  func.func @transform_2(%arg0: i32, %arg1: i32, %arg2: i32) -> (i32, i32) {
    %c0_i32 = arith.constant 0 : i32
    %c0_i32_0 = arith.constant 0 : i32
    return %c0_i32, %arg1 : i32, i32
  }
  func.func @transform_3(%arg0: i32, %arg1: i32, %arg2: i32) -> (i32, i32) {
    %c0_i32 = arith.constant 0 : i32
    %c0_i32_0 = arith.constant 0 : i32
    return %c0_i32, %arg1 : i32, i32
  }
  func.func @transform_4(%arg0: i32, %arg1: i32, %arg2: i32) -> (i32, i32) {
    %c0_i32 = arith.constant 0 : i32
    return %arg0, %arg1 : i32, i32
  }
}

module attributes {stable_mosaic.version = 11 : i64} {
  func.func @_head_kernel(%arg0: memref<2x1x512xf32, #tpu.memory_space<vmem>>, %arg1: memref<2x128xf32, #tpu.memory_space<vmem>>, %arg2: memref<512x128xf32, #tpu.memory_space<vmem>>, %arg3: memref<128x128xf32, #tpu.memory_space<vmem>>, %arg4: memref<1x128xf32, #tpu.memory_space<vmem>>, %arg5: memref<128x128xf32, #tpu.memory_space<vmem>>, %arg6: memref<1x128xf32, #tpu.memory_space<vmem>>, %arg7: memref<2x128xf32, #tpu.memory_space<vmem>>) attributes {dimension_semantics = [], scalar_prefetch = 0 : i64, scratch_operands = 0 : i64, tpu.core_type = #tpu.core_type<tc>} {
    %c0 = arith.constant 0 : index
    %c0_0 = arith.constant 0 : index
    %c0_1 = arith.constant 0 : index
    %0 = vector.load %arg0[%c0, %c0_0, %c0_1] : memref<2x1x512xf32, #tpu.memory_space<vmem>>, vector<2x1x512xf32>
    %cst = arith.constant dense<0.000000e+00> : vector<2x512xf32>
    %1 = vector.multi_reduction <add>, %0, %cst [1] : vector<2x1x512xf32> to vector<2x512xf32>
    %cst_2 = arith.constant 1.000000e+00 : f32
    %2 = vector.broadcast %cst_2 : f32 to vector<2x512xf32>
    %3 = arith.divf %1, %2 : vector<2x512xf32>
    %c0_3 = arith.constant 0 : index
    %c0_4 = arith.constant 0 : index
    %4 = vector.load %arg2[%c0_3, %c0_4] : memref<512x128xf32, #tpu.memory_space<vmem>>, vector<512x128xf32>
    %cst_5 = arith.constant dense<0.000000e+00> : vector<2x128xf32>
    %5 = tpu.matmul %3, %4, %cst_5 {dimension_numbers = #tpu.dot_dimension_numbers<[1], [0], [0], [1], [0, 0, 1, 1], [], []>} : vector<2x512xf32>, vector<512x128xf32>, vector<2x128xf32> -> vector<2x128xf32>
    %c0_6 = arith.constant 0 : index
    %c0_7 = arith.constant 0 : index
    %6 = vector.load %arg1[%c0_6, %c0_7] : memref<2x128xf32, #tpu.memory_space<vmem>>, vector<2x128xf32>
    %c0_8 = arith.constant 0 : index
    %c0_9 = arith.constant 0 : index
    %7 = vector.load %arg3[%c0_8, %c0_9] : memref<128x128xf32, #tpu.memory_space<vmem>>, vector<128x128xf32>
    %cst_10 = arith.constant dense<0.000000e+00> : vector<2x128xf32>
    %8 = tpu.matmul %6, %7, %cst_10 {dimension_numbers = #tpu.dot_dimension_numbers<[1], [0], [0], [1], [0, 0, 1, 1], [], []>} : vector<2x128xf32>, vector<128x128xf32>, vector<2x128xf32> -> vector<2x128xf32>
    %9 = arith.addf %5, %8 : vector<2x128xf32>
    %c0_11 = arith.constant 0 : index
    %c0_12 = arith.constant 0 : index
    %10 = vector.load %arg4[%c0_11, %c0_12] : memref<1x128xf32, #tpu.memory_space<vmem>>, vector<1x128xf32>
    %11 = vector.broadcast %10 : vector<1x128xf32> to vector<2x128xf32>
    %12 = arith.addf %9, %11 : vector<2x128xf32>
    %cst_13 = arith.constant 0.000000e+00 : f32
    %13 = vector.broadcast %cst_13 : f32 to vector<2x128xf32>
    %14 = arith.maximumf %12, %13 : vector<2x128xf32>
    %c0_14 = arith.constant 0 : index
    %c0_15 = arith.constant 0 : index
    %15 = vector.load %arg5[%c0_14, %c0_15] : memref<128x128xf32, #tpu.memory_space<vmem>>, vector<128x128xf32>
    %cst_16 = arith.constant dense<0.000000e+00> : vector<2x128xf32>
    %16 = tpu.matmul %14, %15, %cst_16 {dimension_numbers = #tpu.dot_dimension_numbers<[1], [0], [0], [1], [0, 0, 1, 1], [], []>} : vector<2x128xf32>, vector<128x128xf32>, vector<2x128xf32> -> vector<2x128xf32>
    %c0_17 = arith.constant 0 : index
    %c0_18 = arith.constant 0 : index
    %17 = vector.load %arg6[%c0_17, %c0_18] : memref<1x128xf32, #tpu.memory_space<vmem>>, vector<1x128xf32>
    %18 = vector.broadcast %17 : vector<1x128xf32> to vector<2x128xf32>
    %19 = arith.addf %16, %18 : vector<2x128xf32>
    %c0_19 = arith.constant 0 : index
    %c0_20 = arith.constant 0 : index
    %20 = vector.load %arg7[%c0_19, %c0_20] : memref<2x128xf32, #tpu.memory_space<vmem>>, vector<2x128xf32>
    tpu.vector_store %arg7[%c0_19, %c0_20], %19 {strides = array<i32>} : memref<2x128xf32, #tpu.memory_space<vmem>>, vector<2x128xf32>,
    return
  }
}

module attributes {stable_mosaic.version = 11 : i64} {
  func.func @_lstm_kernel(%arg0: memref<16x32xf32, #tpu.memory_space<vmem>>, %arg1: memref<32x512xf32, #tpu.memory_space<vmem>>, %arg2: memref<128x512xf32, #tpu.memory_space<vmem>>, %arg3: memref<1x512xf32, #tpu.memory_space<vmem>>, %arg4: memref<2x128xf32, #tpu.memory_space<vmem>>, %arg5: memref<8x2x512xf32, #tpu.memory_space<vmem>>) attributes {dimension_semantics = [], scalar_prefetch = 0 : i64, scratch_operands = 1 : i64, tpu.core_type = #tpu.core_type<tc>} {
    %c0 = arith.constant 0 : index
    %c0_0 = arith.constant 0 : index
    %0 = vector.load %arg0[%c0, %c0_0] : memref<16x32xf32, #tpu.memory_space<vmem>>, vector<16x32xf32>
    %c0_1 = arith.constant 0 : index
    %c0_2 = arith.constant 0 : index
    %1 = vector.load %arg1[%c0_1, %c0_2] : memref<32x512xf32, #tpu.memory_space<vmem>>, vector<32x512xf32>
    %cst = arith.constant dense<0.000000e+00> : vector<16x512xf32>
    %2 = tpu.matmul %0, %1, %cst {dimension_numbers = #tpu.dot_dimension_numbers<[1], [0], [0], [1], [0, 0, 1, 1], [], []>} : vector<16x32xf32>, vector<32x512xf32>, vector<16x512xf32> -> vector<16x512xf32>
    %c0_3 = arith.constant 0 : index
    %c0_4 = arith.constant 0 : index
    %3 = vector.load %arg3[%c0_3, %c0_4] : memref<1x512xf32, #tpu.memory_space<vmem>>, vector<1x512xf32>
    %4 = vector.broadcast %3 : vector<1x512xf32> to vector<16x512xf32>
    %5 = arith.addf %2, %4 : vector<16x512xf32>
    %6 = vector.extract_strided_slice %5 {offsets = [0, 0], sizes = [2, 512], strides = [1, 1]} : vector<16x512xf32> to vector<2x512xf32>
    %c0_5 = arith.constant 0 : index
    %c0_6 = arith.constant 0 : index
    %c0_7 = arith.constant 0 : index
    %7 = vector.load %arg5[%c0_5, %c0_6, %c0_7] : memref<8x2x512xf32, #tpu.memory_space<vmem>>, vector<1x2x512xf32>
    %8 = vector.shape_cast %7 : vector<1x2x512xf32> to vector<2x512xf32>
    %9 = vector.shape_cast %6 : vector<2x512xf32> to vector<1x2x512xf32>
    tpu.vector_store %arg5[%c0_5, %c0_6, %c0_7], %9 {strides = array<i32>} : memref<8x2x512xf32, #tpu.memory_space<vmem>>, vector<1x2x512xf32>,
    %10 = vector.extract_strided_slice %5 {offsets = [2, 0], sizes = [2, 512], strides = [1, 1]} : vector<16x512xf32> to vector<2x512xf32>
    %c1 = arith.constant 1 : index
    %c0_8 = arith.constant 0 : index
    %c0_9 = arith.constant 0 : index
    %11 = vector.load %arg5[%c1, %c0_8, %c0_9] : memref<8x2x512xf32, #tpu.memory_space<vmem>>, vector<1x2x512xf32>
    %12 = vector.shape_cast %11 : vector<1x2x512xf32> to vector<2x512xf32>
    %13 = vector.shape_cast %10 : vector<2x512xf32> to vector<1x2x512xf32>
    tpu.vector_store %arg5[%c1, %c0_8, %c0_9], %13 {strides = array<i32>} : memref<8x2x512xf32, #tpu.memory_space<vmem>>, vector<1x2x512xf32>,
    %14 = vector.extract_strided_slice %5 {offsets = [4, 0], sizes = [2, 512], strides = [1, 1]} : vector<16x512xf32> to vector<2x512xf32>
    %c2 = arith.constant 2 : index
    %c0_10 = arith.constant 0 : index
    %c0_11 = arith.constant 0 : index
    %15 = vector.load %arg5[%c2, %c0_10, %c0_11] : memref<8x2x512xf32, #tpu.memory_space<vmem>>, vector<1x2x512xf32>
    %16 = vector.shape_cast %15 : vector<1x2x512xf32> to vector<2x512xf32>
    %17 = vector.shape_cast %14 : vector<2x512xf32> to vector<1x2x512xf32>
    tpu.vector_store %arg5[%c2, %c0_10, %c0_11], %17 {strides = array<i32>} : memref<8x2x512xf32, #tpu.memory_space<vmem>>, vector<1x2x512xf32>,
    %18 = vector.extract_strided_slice %5 {offsets = [6, 0], sizes = [2, 512], strides = [1, 1]} : vector<16x512xf32> to vector<2x512xf32>
    %c3 = arith.constant 3 : index
    %c0_12 = arith.constant 0 : index
    %c0_13 = arith.constant 0 : index
    %19 = vector.load %arg5[%c3, %c0_12, %c0_13] : memref<8x2x512xf32, #tpu.memory_space<vmem>>, vector<1x2x512xf32>
    %20 = vector.shape_cast %19 : vector<1x2x512xf32> to vector<2x512xf32>
    %21 = vector.shape_cast %18 : vector<2x512xf32> to vector<1x2x512xf32>
    tpu.vector_store %arg5[%c3, %c0_12, %c0_13], %21 {strides = array<i32>} : memref<8x2x512xf32, #tpu.memory_space<vmem>>, vector<1x2x512xf32>,
    %22 = vector.extract_strided_slice %5 {offsets = [8, 0], sizes = [2, 512], strides = [1, 1]} : vector<16x512xf32> to vector<2x512xf32>
    %c4 = arith.constant 4 : index
    %c0_14 = arith.constant 0 : index
    %c0_15 = arith.constant 0 : index
    %23 = vector.load %arg5[%c4, %c0_14, %c0_15] : memref<8x2x512xf32, #tpu.memory_space<vmem>>, vector<1x2x512xf32>
    %24 = vector.shape_cast %23 : vector<1x2x512xf32> to vector<2x512xf32>
    %25 = vector.shape_cast %22 : vector<2x512xf32> to vector<1x2x512xf32>
    tpu.vector_store %arg5[%c4, %c0_14, %c0_15], %25 {strides = array<i32>} : memref<8x2x512xf32, #tpu.memory_space<vmem>>, vector<1x2x512xf32>,
    %26 = vector.extract_strided_slice %5 {offsets = [10, 0], sizes = [2, 512], strides = [1, 1]} : vector<16x512xf32> to vector<2x512xf32>
    %c5 = arith.constant 5 : index
    %c0_16 = arith.constant 0 : index
    %c0_17 = arith.constant 0 : index
    %27 = vector.load %arg5[%c5, %c0_16, %c0_17] : memref<8x2x512xf32, #tpu.memory_space<vmem>>, vector<1x2x512xf32>
    %28 = vector.shape_cast %27 : vector<1x2x512xf32> to vector<2x512xf32>
    %29 = vector.shape_cast %26 : vector<2x512xf32> to vector<1x2x512xf32>
    tpu.vector_store %arg5[%c5, %c0_16, %c0_17], %29 {strides = array<i32>} : memref<8x2x512xf32, #tpu.memory_space<vmem>>, vector<1x2x512xf32>,
    %30 = vector.extract_strided_slice %5 {offsets = [12, 0], sizes = [2, 512], strides = [1, 1]} : vector<16x512xf32> to vector<2x512xf32>
    %c6 = arith.constant 6 : index
    %c0_18 = arith.constant 0 : index
    %c0_19 = arith.constant 0 : index
    %31 = vector.load %arg5[%c6, %c0_18, %c0_19] : memref<8x2x512xf32, #tpu.memory_space<vmem>>, vector<1x2x512xf32>
    %32 = vector.shape_cast %31 : vector<1x2x512xf32> to vector<2x512xf32>
    %33 = vector.shape_cast %30 : vector<2x512xf32> to vector<1x2x512xf32>
    tpu.vector_store %arg5[%c6, %c0_18, %c0_19], %33 {strides = array<i32>} : memref<8x2x512xf32, #tpu.memory_space<vmem>>, vector<1x2x512xf32>,
    %34 = vector.extract_strided_slice %5 {offsets = [14, 0], sizes = [2, 512], strides = [1, 1]} : vector<16x512xf32> to vector<2x512xf32>
    %c7 = arith.constant 7 : index
    %c0_20 = arith.constant 0 : index
    %c0_21 = arith.constant 0 : index
    %35 = vector.load %arg5[%c7, %c0_20, %c0_21] : memref<8x2x512xf32, #tpu.memory_space<vmem>>, vector<1x2x512xf32>
    %36 = vector.shape_cast %35 : vector<1x2x512xf32> to vector<2x512xf32>
    %37 = vector.shape_cast %34 : vector<2x512xf32> to vector<1x2x512xf32>
    tpu.vector_store %arg5[%c7, %c0_20, %c0_21], %37 {strides = array<i32>} : memref<8x2x512xf32, #tpu.memory_space<vmem>>, vector<1x2x512xf32>,
    %cst_22 = arith.constant 0.000000e+00 : f32
    %38 = vector.broadcast %cst_22 : f32 to vector<2x128xf32>
    %cst_23 = arith.constant 0.000000e+00 : f32
    %39 = vector.broadcast %cst_23 : f32 to vector<2x128xf32>
    %c0_i32 = arith.constant 0 : i32
    %c8_i32 = arith.constant 8 : i32
    %40 = arith.addi %c0_i32, %c8_i32 : i32
    %c1_i32 = arith.constant 1 : i32
    %41:2 = scf.for %arg6 = %c0_i32 to %40 step %c1_i32 iter_args(%arg7 = %38, %arg8 = %39) -> (vector<2x128xf32>, vector<2x128xf32>)  : i32 {
      %43 = arith.index_cast %arg6 : i32 to index
      %c0_27 = arith.constant 0 : index
      %c0_28 = arith.constant 0 : index
      %44 = vector.load %arg5[%43, %c0_27, %c0_28] : memref<8x2x512xf32, #tpu.memory_space<vmem>>, vector<1x2x512xf32>
      %45 = vector.shape_cast %44 : vector<1x2x512xf32> to vector<2x512xf32>
      %c0_29 = arith.constant 0 : index
      %c0_30 = arith.constant 0 : index
      %46 = vector.load %arg2[%c0_29, %c0_30] : memref<128x512xf32, #tpu.memory_space<vmem>>, vector<128x512xf32>
      %cst_31 = arith.constant dense<0.000000e+00> : vector<2x512xf32>
      %47 = tpu.matmul %arg7, %46, %cst_31 {dimension_numbers = #tpu.dot_dimension_numbers<[1], [0], [0], [1], [0, 0, 1, 1], [], []>} : vector<2x128xf32>, vector<128x512xf32>, vector<2x512xf32> -> vector<2x512xf32>
      %48 = arith.addf %45, %47 : vector<2x512xf32>
      %49 = vector.extract_strided_slice %48 {offsets = [0, 0], sizes = [2, 128], strides = [1, 1]} : vector<2x512xf32> to vector<2x128xf32>
      %50 = arith.negf %49 : vector<2x128xf32>
      %51 = math.exp %50 : vector<2x128xf32>
      %cst_32 = arith.constant 1.000000e+00 : f32
      %52 = vector.broadcast %cst_32 : f32 to vector<2x128xf32>
      %53 = arith.addf %52, %51 : vector<2x128xf32>
      %54 = arith.divf %52, %53 : vector<2x128xf32>
      %55 = vector.extract_strided_slice %48 {offsets = [0, 128], sizes = [2, 128], strides = [1, 1]} : vector<2x512xf32> to vector<2x128xf32>
      %56 = arith.negf %55 : vector<2x128xf32>
      %57 = math.exp %56 : vector<2x128xf32>
      %cst_33 = arith.constant 1.000000e+00 : f32
      %58 = vector.broadcast %cst_33 : f32 to vector<2x128xf32>
      %59 = arith.addf %58, %57 : vector<2x128xf32>
      %60 = arith.divf %58, %59 : vector<2x128xf32>
      %61 = vector.extract_strided_slice %48 {offsets = [0, 256], sizes = [2, 128], strides = [1, 1]} : vector<2x512xf32> to vector<2x128xf32>
      %62 = math.tanh %61 : vector<2x128xf32>
      %63 = vector.extract_strided_slice %48 {offsets = [0, 384], sizes = [2, 128], strides = [1, 1]} : vector<2x512xf32> to vector<2x128xf32>
      %64 = arith.negf %63 : vector<2x128xf32>
      %65 = math.exp %64 : vector<2x128xf32>
      %cst_34 = arith.constant 1.000000e+00 : f32
      %66 = vector.broadcast %cst_34 : f32 to vector<2x128xf32>
      %67 = arith.addf %66, %65 : vector<2x128xf32>
      %68 = arith.divf %66, %67 : vector<2x128xf32>
      %69 = arith.mulf %60, %arg8 : vector<2x128xf32>
      %70 = arith.mulf %54, %62 : vector<2x128xf32>
      %71 = arith.addf %69, %70 : vector<2x128xf32>
      %72 = math.tanh %71 : vector<2x128xf32>
      %73 = arith.mulf %68, %72 : vector<2x128xf32>
      scf.yield %73, %71 : vector<2x128xf32>, vector<2x128xf32>
    }
    %c8_i32_24 = arith.constant 8 : i32
    %c0_25 = arith.constant 0 : index
    %c0_26 = arith.constant 0 : index
    %42 = vector.load %arg4[%c0_25, %c0_26] : memref<2x128xf32, #tpu.memory_space<vmem>>, vector<2x128xf32>
    tpu.vector_store %arg4[%c0_25, %c0_26], %41#0 {strides = array<i32>} : memref<2x128xf32, #tpu.memory_space<vmem>>, vector<2x128xf32>,
    return
  }
}

</mosaic_0001>

<bundles_post_ra>
// kernel: multimodal_classifier_forward.22
= control target key start
LH: loop header
LB: loop body
LE: loop exit
PB: predicated region body
PF: predicated region fallthrough
CT: control target
= control target key end

     0   :  { %s1164_s15 = smov 0   ;;  %s1166_s16 = smov 0   ;;  %s1330_s0 = inlined_call_operand.vmem [shape: bf16[512,256], index: 0, kind: input, shape index: {}]   ;;  %s1331_s1 = inlined_call_operand.vmem [shape: bf16[256,128], index: 1, kind: input, shape index: {}]   ;;  %s1332_s2 = inlined_call_operand.vmem [shape: f32[1,128], index: 2, kind: input, shape index: {}]   ;;  %s1333_s3 = inlined_call_operand.vmem [shape: f32[1,128], index: 3, kind: input, shape index: {}]   ;;  %s1334_s4 = inlined_call_operand.vmem [shape: f32[512,128], index: 4, kind: output, shape index: {}]  }
   0x1   :  { %s1168_s17 = smov 0  }
   0x2 LB: > { %s33_s18 = sadd.s32 1, %s1133_s16  ;;  %p928_p0 = scmp.ge.s32.totalorder %s1137_s17, 1  ;;  %s1137_s17 = sphi %s1168_s17, %s14_s17   ;;  %s1133_s16 = sphi %s1166_s16, %s1336_s16   ;;  %s1129_s15 = sphi %s1164_s15, %s1335_s15  }
   0x3   : > { %p35_p1 = scmp.ge.s32.totalorder %s33_s18, 4  ;;  %p224_p2 = scmp.lt.s32.totalorder %s1137_s17, 5 }
   0x5   : > { %s1338_s18 = smov (%p35_p1, %s33_s18), 0  ;;  %p225_p3 = pnand %p928_p0, %p224_p2 }
   0x6   : > { %v1075_v0 = vld [vmem:[%s1331_s1 + $0x40] sm:$0xff] (!%p225_p3)   ;;  %s929_s21 = sshll.u32 (!%p225_p3), %s1129_s15, 4  ;;  %v1077_v2 = vld [vmem:[%s1331_s1 + $0x48] sm:$0xff] (!%p225_p3)   ;;  %v1079_v4 = vld [vmem:[%s1331_s1 + $0x50] sm:$0xff] (!%p225_p3)  }
   0x7   : > { %228 = sbr.rel (%p225_p3) target bundleno = 288 (0x120), region = 36  ;;  %v1076_v1 = vld [vmem:[%s1331_s1] sm:$0xff] (!%p225_p3)   ;;  %971 = vmatprep.subr.bf16.mxu0 (!%p225_p3), %v1075_v0  ;;  %1035 = vmatprep.subr.bf16.mxu1 (!%p225_p3), %v1075_v0  ;;  %v1078_v3 = vld [vmem:[%s1331_s1 + $0x8] sm:$0xff] (!%p225_p3)   ;;  %p274_p4 = scmp.lt.s32.totalorder (!%p225_p3), %s929_s21, 63  ;;  %v1080_v5 = vld [vmem:[%s1331_s1 + $0x10] sm:$0xff] (!%p225_p3)  }
   0x8   : > { %972 = vmatpush3.bf16.msra.mxu0 (!%p225_p3), %v1076_v1  ;;  %1043 = vmatpush3.bf16.msra.mxu1 (!%p225_p3), %v1076_v1  ;;  %v1081_v6 = vld [vmem:[%s1331_s1 + $0x58] sm:$0xff] (!%p225_p3)   ;;  %v1083_v8 = vld [vmem:[%s1331_s1 + $0x60] sm:$0xff] (!%p225_p3)   ;;  %v1085_v10 = vld [vmem:[%s1331_s1 + $0x68] sm:$0xff] (!%p225_p3)  }
   0x9   : > { %973 = vmatprep.subr.bf16.mxu0 (!%p225_p3), %v1077_v2  ;;  %1036 = vmatprep.subr.bf16.mxu1 (!%p225_p3), %v1077_v2  ;;  %v1082_v7 = vld [vmem:[%s1331_s1 + $0x18] sm:$0xff] (!%p225_p3)   ;;  %v1084_v9 = vld [vmem:[%s1331_s1 + $0x20] sm:$0xff] (!%p225_p3)   ;;  %v1086_v13 = vld [vmem:[%s1331_s1 + $0x28] sm:$0xff] (!%p225_p3)  }
   0xa   : > { %v1087_v14 = vld [vmem:[%s1331_s1 + $0x70] sm:$0xff] (!%p225_p3)   ;;  %v1089_v16 = vld [vmem:[%s1331_s1 + $0x78] sm:$0xff] (!%p225_p3)   ;;  %v1259_v35 = vld [vmem:[%s1332_s2] ss:$0 sm:$0xff] (!%p225_p3) }
   0xb   : > { %v1088_v15 = vld [vmem:[%s1331_s1 + $0x30] sm:$0xff] (!%p225_p3)   ;;  %v1090_v17 = vld [vmem:[%s1331_s1 + $0x38] sm:$0xff] (!%p225_p3)   ;;  %v1264_v41 = vld [vmem:[%s1333_s3] ss:$0 sm:$0xff] (!%p225_p3) }
   0xc   : > { %974 = vmatpush3.bf16.msra.mxu0 (!%p225_p3), %v1078_v3  ;;  %1044 = vmatpush3.bf16.msra.mxu1 (!%p225_p3), %v1078_v3 }
   0xd   : > { %975 = vmatprep.subr.bf16.mxu0 (!%p225_p3), %v1079_v4  ;;  %1037 = vmatprep.subr.bf16.mxu1 (!%p225_p3), %v1079_v4 }
   0xe   : > { %s1340_s21 = smov (!%p274_p4, %s929_s21), 63 }
   0xf   : > { %s970_s10 = sshll.u32 %s1340_s21, 3 }
  0x10   : > { %976 = vmatpush3.bf16.msra.mxu0 %v1080_v5  ;;  %1045 = vmatpush3.bf16.msra.mxu1 %v1080_v5  ;;  %s1217_s15 = scalar_lea.vmem %s1330_s0, %s970_s10 }
  0x11   : > { %977 = vmatprep.subr.bf16.mxu0 %v1081_v6  ;;  %1038 = vmatprep.subr.bf16.mxu1 %v1081_v6  ;;  %v1093_v11 = vld [vmem:[%s1217_s15 + $0x4] ss:$8 sps:$4 sm:$0xff]   ;;  %v1091_v18 = vld [vmem:[%s1217_s15] ss:$8 sps:$4 sm:$0xff]   ;;  %v1097_v20 = vld [vmem:[%s1217_s15 + $0x14] ss:$8 sps:$4 sm:$0xff]  }
  0x12   : > { %v1096_v12 = vld [vmem:[%s1217_s15 + $0x44] ss:$8 sps:$4 sm:$0xff]   ;;  %601 = vmatprep.mubr.bf16.mxu0 %v1093_v11  ;;  %v1094_v19 = vld [vmem:[%s1217_s15 + $0x40] ss:$8 sps:$4 sm:$0xff]   ;;  %v1099_v21 = vld [vmem:[%s1217_s15 + $0x54] ss:$8 sps:$4 sm:$0xff]  }
  0x13   : > { %633 = vmatprep.mubr.bf16.mxu1 %v1096_v12  ;;  %v1101_v22 = vld [vmem:[%s1217_s15 + $0x10] ss:$8 sps:$4 sm:$0xff]   ;;  %v1103_v24 = vld [vmem:[%s1217_s15 + $0x24] ss:$8 sps:$4 sm:$0xff]   ;;  %v1107_v26 = vld [vmem:[%s1217_s15 + $0x20] ss:$8 sps:$4 sm:$0xff]  }
  0x14   : > { %978 = vmatpush3.bf16.msra.mxu0 %v1082_v7  ;;  %1046 = vmatpush3.bf16.msra.mxu1 %v1082_v7  ;;  %v1102_v23 = vld [vmem:[%s1217_s15 + $0x50] ss:$8 sps:$4 sm:$0xff]   ;;  %v1105_v25 = vld [vmem:[%s1217_s15 + $0x64] ss:$8 sps:$4 sm:$0xff]   ;;  %v1108_v27 = vld [vmem:[%s1217_s15 + $0x60] ss:$8 sps:$4 sm:$0xff]  }
  0x15   : > { %979 = vmatprep.subr.bf16.mxu0 %v1083_v8  ;;  %1039 = vmatprep.subr.bf16.mxu1 %v1083_v8  ;;  %v1109_v28 = vld [vmem:[%s1217_s15 + $0x34] ss:$8 sps:$4 sm:$0xff]   ;;  %v1113_v30 = vld [vmem:[%s1217_s15 + $0x30] ss:$8 sps:$4 sm:$0xff]  }
  0x16   : > { %v1111_v29 = vld [vmem:[%s1217_s15 + $0x74] ss:$8 sps:$4 sm:$0xff]   ;;  %v1114_v31 = vld [vmem:[%s1217_s15 + $0x70] ss:$8 sps:$4 sm:$0xff]   ;;  %s1277_s15 = scalar_lea.vmem %s1334_s4, %s970_s10 }
  0x18   : > { %980 = vmatpush3.bf16.msra.mxu0 %v1084_v9  ;;  %1047 = vmatpush3.bf16.msra.mxu1 %v1084_v9 }
  0x19   : > { %981 = vmatprep.subr.bf16.mxu0 %v1085_v10  ;;  %1040 = vmatprep.subr.bf16.mxu1 %v1085_v10 }
  0x1c   : > { %982 = vmatpush3.bf16.msra.mxu0 %v1086_v13  ;;  %1048 = vmatpush3.bf16.msra.mxu1 %v1086_v13 }
  0x1d   : > { %983 = vmatprep.subr.bf16.mxu0 %v1087_v14  ;;  %1041 = vmatprep.subr.bf16.mxu1 %v1087_v14 }
  0x20   : > { %984 = vmatpush3.bf16.msra.mxu0 %v1088_v15  ;;  %1049 = vmatpush3.bf16.msra.mxu1 %v1088_v15 }
  0x21   : > { %985 = vmatprep.subr.bf16.mxu0 %v1089_v16  ;;  %1042 = vmatprep.subr.bf16.mxu1 %v1089_v16 }
  0x24   : > { %986 = vmatpush3.bf16.msra.mxu0 %v1090_v17  ;;  %1050 = vmatpush3.bf16.msra.mxu1 %v1090_v17 }
  0x27   : > { %602 = vmatmul.mubr.bf16.vlgmr.msra.gmra.mrb[0].mxu0 %v1091_v18  ;;  %634 = vmatmul.mubr.bf16.vlgmr.msra.gmra.mrb[0].mxu1 %v1094_v19 }
  0x28   : > { %609 = vmatprep.mubr.bf16.mxu0 %v1097_v20  ;;  %641 = vmatprep.mubr.bf16.mxu1 %v1099_v21 }
  0x2f   : > { %610 = vmatmul.mubr.bf16.gmra.mrb[4].mxu0 %v1101_v22  ;;  %642 = vmatmul.mubr.bf16.gmra.mrb[4].mxu1 %v1102_v23 }
  0x30   : > { %617 = vmatprep.mubr.bf16.mxu0 %v1103_v24  ;;  %649 = vmatprep.mubr.bf16.mxu1 %v1105_v25 }
  0x37   : > { %618 = vmatmul.mubr.bf16.gmra.mrb[8].mxu0 %v1107_v26  ;;  %650 = vmatmul.mubr.bf16.gmra.mrb[8].mxu1 %v1108_v27 }
  0x38   : > { %625 = vmatprep.mubr.bf16.mxu0 %v1109_v28  ;;  %657 = vmatprep.mubr.bf16.mxu1 %v1111_v29 }
  0x3f   : > { %626 = vmatmul.mubr.bf16.gmra.mrb[12].mxu0 %v1113_v30  ;;  %658 = vmatmul.mubr.bf16.gmra.mrb[12].mxu1 %v1114_v31 }
  0xfa   : > { %v987_v32 = vpop.f32.mrb[0].mxu0  ;;  %v1011_v33 = vpop.f32.mrb[0].mxu1 }
  0xfb   : > { %v988_v34 = vpop.f32.mrb[1].mxu0  ;;  %v1012_v36 = vpop.f32.mrb[1].mxu1 }
  0xfc   : > { %v989_v37 = vadd.f32 %v988_v34, %v987_v32  ;;  %v1013_v38 = vadd.f32 %v1012_v36, %v1011_v33  ;;  %v990_v39 = vpop.f32.mrb[2].mxu0  ;;  %v1014_v40 = vpop.f32.mrb[2].mxu1 }
  0xfd   : > { %v991_v42 = vpop.f32.mrb[3].mxu0  ;;  %v1015_v43 = vpop.f32.mrb[3].mxu1 }
  0xfe   : > { %v724_v44 = vmul.f32 %v989_v37, %v1259_v35  ;;  %v732_v45 = vmul.f32 %v1013_v38, %v1259_v35  ;;  %v992_v46 = vadd.f32 %v991_v42, %v990_v39  ;;  %v1016_v47 = vadd.f32 %v1015_v43, %v1014_v40 }
 0x100   : > { %v747_v48 = vadd.f32 %v1264_v41, %v724_v44  ;;  %v755_v49 = vadd.f32 %v1264_v41, %v732_v45  ;;  %v725_v50 = vmul.f32 %v992_v46, %v1259_v35  ;;  %v733_v51 = vmul.f32 %v1016_v47, %v1259_v35 }
 0x102   : > { %v763_v52 = vmax.f32 %v747_v48, 0.0  ;;  %v771_v53 = vmax.f32 %v755_v49, 0.0  ;;  %v748_v54 = vadd.f32 %v1264_v41, %v725_v50  ;;  %v756_v55 = vadd.f32 %v1264_v41, %v733_v51  ;;  %v993_v56 = vpop.f32.mrb[4].mxu0  ;;  %v1017_v57 = vpop.f32.mrb[4].mxu1 }
 0x103   : > { %v994_v58 = vpop.f32.mrb[5].mxu0  ;;  %v1018_v59 = vpop.f32.mrb[5].mxu1 }
 0x104   : > { %779 = vst [vmem:[%s1277_s15] sm:$0xff] %v763_v52  ;;  %787 = vst [vmem:[%s1277_s15 + $0x40] sm:$0xff] %v771_v53  ;;  %v764_v60 = vmax.f32 %v748_v54, 0.0  ;;  %v772_v61 = vmax.f32 %v756_v55, 0.0  ;;  %v995_v62 = vadd.f32 %v994_v58, %v993_v56  ;;  %v1019_v63 = vadd.f32 %v1018_v59, %v1017_v57  ;;  %v996_v0 = vpop.f32.mrb[6].mxu0  ;;  %v1020_v1 = vpop.f32.mrb[6].mxu1 }
 0x105   : > { %v997_v2 = vpop.f32.mrb[7].mxu0  ;;  %v1021_v3 = vpop.f32.mrb[7].mxu1 }
 0x106   : > { %780 = vst [vmem:[%s1277_s15 + $0x8] sm:$0xff] %v764_v60  ;;  %788 = vst [vmem:[%s1277_s15 + $0x48] sm:$0xff] %v772_v61  ;;  %v726_v4 = vmul.f32 %v995_v62, %v1259_v35  ;;  %v734_v5 = vmul.f32 %v1019_v63, %v1259_v35  ;;  %v998_v6 = vadd.f32 %v997_v2, %v996_v0 }
 0x107   : > { %v1022_v7 = vadd.f32 %v1021_v3, %v1020_v1 }
 0x108   : > { %v749_v8 = vadd.f32 %v1264_v41, %v726_v4  ;;  %v757_v9 = vadd.f32 %v1264_v41, %v734_v5  ;;  %v727_v10 = vmul.f32 %v998_v6, %v1259_v35 }
 0x109   : > { %v735_v11 = vmul.f32 %v1022_v7, %v1259_v35 }
 0x10a   : > { %v765_v12 = vmax.f32 %v749_v8, 0.0  ;;  %v773_v13 = vmax.f32 %v757_v9, 0.0  ;;  %v750_v14 = vadd.f32 %v1264_v41, %v727_v10  ;;  %v999_v16 = vpop.f32.mrb[8].mxu0  ;;  %v1023_v17 = vpop.f32.mrb[8].mxu1 }
 0x10b   : > { %v758_v15 = vadd.f32 %v1264_v41, %v735_v11  ;;  %v1000_v18 = vpop.f32.mrb[9].mxu0  ;;  %v1024_v19 = vpop.f32.mrb[9].mxu1 }
 0x10c   : > { %781 = vst [vmem:[%s1277_s15 + $0x10] sm:$0xff] %v765_v12  ;;  %789 = vst [vmem:[%s1277_s15 + $0x50] sm:$0xff] %v773_v13  ;;  %v766_v20 = vmax.f32 %v750_v14, 0.0  ;;  %v1001_v22 = vadd.f32 %v1000_v18, %v999_v16  ;;  %v1025_v23 = vadd.f32 %v1024_v19, %v1023_v17  ;;  %v1002_v24 = vpop.f32.mrb[10].mxu0  ;;  %v1026_v25 = vpop.f32.mrb[10].mxu1 }
 0x10d   : > { %v774_v21 = vmax.f32 %v758_v15, 0.0  ;;  %v1003_v26 = vpop.f32.mrb[11].mxu0  ;;  %v1027_v27 = vpop.f32.mrb[11].mxu1 }
 0x10e   : > { %782 = vst [vmem:[%s1277_s15 + $0x18] sm:$0xff] %v766_v20  ;;  %v728_v28 = vmul.f32 %v1001_v22, %v1259_v35  ;;  %v736_v29 = vmul.f32 %v1025_v23, %v1259_v35  ;;  %v1004_v30 = vadd.f32 %v1003_v26, %v1002_v24  ;;  %v1028_v31 = vadd.f32 %v1027_v27, %v1026_v25 }
 0x10f   : > { %790 = vst [vmem:[%s1277_s15 + $0x58] sm:$0xff] %v774_v21 }
 0x110   : > { %v751_v32 = vadd.f32 %v1264_v41, %v728_v28  ;;  %v759_v33 = vadd.f32 %v1264_v41, %v736_v29  ;;  %v729_v34 = vmul.f32 %v1004_v30, %v1259_v35  ;;  %v737_v36 = vmul.f32 %v1028_v31, %v1259_v35 }
 0x112   : > { %v767_v37 = vmax.f32 %v751_v32, 0.0  ;;  %v775_v38 = vmax.f32 %v759_v33, 0.0  ;;  %v752_v39 = vadd.f32 %v1264_v41, %v729_v34  ;;  %v760_v40 = vadd.f32 %v1264_v41, %v737_v36  ;;  %v1005_v42 = vpop.f32.mrb[12].mxu0  ;;  %v1029_v43 = vpop.f32.mrb[12].mxu1 }
 0x113   : > { %v1006_v44 = vpop.f32.mrb[13].mxu0  ;;  %v1030_v45 = vpop.f32.mrb[13].mxu1 }
 0x114   : > { %783 = vst [vmem:[%s1277_s15 + $0x20] sm:$0xff] %v767_v37  ;;  %791 = vst [vmem:[%s1277_s15 + $0x60] sm:$0xff] %v775_v38  ;;  %v768_v46 = vmax.f32 %v752_v39, 0.0  ;;  %v776_v47 = vmax.f32 %v760_v40, 0.0  ;;  %v1007_v48 = vadd.f32 %v1006_v44, %v1005_v42  ;;  %v1031_v49 = vadd.f32 %v1030_v45, %v1029_v43  ;;  %v1008_v50 = vpop.f32.mrb[14].mxu0  ;;  %v1032_v51 = vpop.f32.mrb[14].mxu1 }
 0x115   : > { %v1009_v52 = vpop.f32.mrb[15].mxu0  ;;  %v1033_v53 = vpop.f32.mrb[15].mxu1 }
 0x116   : > { %784 = vst [vmem:[%s1277_s15 + $0x28] sm:$0xff] %v768_v46  ;;  %792 = vst [vmem:[%s1277_s15 + $0x68] sm:$0xff] %v776_v47  ;;  %v730_v54 = vmul.f32 %v1007_v48, %v1259_v35  ;;  %v738_v55 = vmul.f32 %v1031_v49, %v1259_v35  ;;  %v1010_v56 = vadd.f32 %v1009_v52, %v1008_v50 }
 0x117   : > { %v1034_v57 = vadd.f32 %v1033_v53, %v1032_v51 }
 0x118   : > { %v753_v58 = vadd.f32 %v1264_v41, %v730_v54  ;;  %v761_v59 = vadd.f32 %v1264_v41, %v738_v55  ;;  %v731_v60 = vmul.f32 %v1010_v56, %v1259_v35 }
 0x119   : > { %v739_v61 = vmul.f32 %v1034_v57, %v1259_v35 }
 0x11a   : > { %v769_v62 = vmax.f32 %v753_v58, 0.0  ;;  %v777_v63 = vmax.f32 %v761_v59, 0.0  ;;  %v754_v0 = vadd.f32 %v1264_v41, %v731_v60 }
 0x11b   : > { %v762_v1 = vadd.f32 %v1264_v41, %v739_v61 }
 0x11c   : > { %785 = vst [vmem:[%s1277_s15 + $0x30] sm:$0xff] %v769_v62  ;;  %793 = vst [vmem:[%s1277_s15 + $0x70] sm:$0xff] %v777_v63  ;;  %v770_v2 = vmax.f32 %v754_v0, 0.0 }
 0x11d   : > { %v778_v3 = vmax.f32 %v762_v1, 0.0 }
 0x11e   : > { %786 = vst [vmem:[%s1277_s15 + $0x38] sm:$0xff] %v770_v2 }
 0x11f   : > { %794 = vst [vmem:[%s1277_s15 + $0x78] sm:$0xff] %v778_v3 }
 0x120 PF: > { %s14_s17 = sadd.s32 1, %s1137_s17   ;;  %s1335_s15 = smov %s1133_s16 }
 0x121   : > { %p11_p5 = scmp.ge.s32.totalorder %s14_s17, 6   ;;  %s1336_s16 = smov %s1338_s18 }
 0x123   :  { %13 = sbr.rel (!%p11_p5) target bundleno = 2 (0x2), region = 83 }

// kernel: multimodal_classifier_forward.24
= control target key start
LH: loop header
LB: loop body
LE: loop exit
PB: predicated region body
PF: predicated region fallthrough
CT: control target
= control target key end

     0   :  { %s1246_s18 = smov 0   ;;  %s1248_s19 = smov 0   ;;  %s1489_s0 = inlined_call_operand.vmem [shape: bf16[128,640], index: 0, kind: input, shape index: {}]   ;;  %s1490_s1 = inlined_call_operand.vmem [shape: bf16[640,128], index: 1, kind: input, shape index: {}]   ;;  %s1491_s2 = inlined_call_operand.vmem [shape: f32[1,128], index: 2, kind: input, shape index: {}]   ;;  %s1492_s3 = inlined_call_operand.vmem [shape: f32[1,128], index: 3, kind: input, shape index: {}]   ;;  %s1493_s4 = inlined_call_operand.vmem [shape: f32[128,128], index: 4, kind: input, shape index: {}]   ;;  %s1494_s5 = inlined_call_operand.vmem [shape: f32[128,128], index: 5, kind: output, shape index: {}]  }
   0x1   :  { %s1250_s20 = smov 0   ;;  %s1252_s21 = smov 0  }
   0x2   :  { %s1254_s22 = smov 0  }
   0x3 LB: > { %s27_s23 = sadd.s32 1, %s1209_s21  ;;  %p50_p1 = scmp.ne.s32.totalorder %s1201_s19, %s1197_s18  ;;  %s1213_s22 = sphi %s1254_s22, %s15_s22   ;;  %s1209_s21 = sphi %s1252_s21, %s1498_s21   ;;  %s1205_s20 = sphi %s1250_s20, %s1497_s20   ;;  %s1201_s19 = sphi %s1248_s19, %s1496_s19   ;;  %s1197_s18 = sphi %s1246_s18, %s1495_s18  }
   0x4   : > { %p28_p0 = scmp.ge.s32.totalorder %s27_s23, 5  ;;  %p51_p2 = scmp.eq.s32.totalorder %s1213_s22, 0 }
   0x5   : > { %s43_s25 = sadd.s32 1, %s1201_s19  ;;  %p1023_p5 = scmp.ge.s32.totalorder %s1213_s22, 5 }
   0x6   : > { %s1500_s23 = smov (%p28_p0, %s27_s23), 0  ;;  %p52_p3 = por %p51_p2, %p50_p1 }
   0x7   : > { %s39_s24 = ssub.s32 %s1209_s21, %s1500_s23  ;;  %236 = sbr.rel (%p1023_p5) target bundleno = 28 (0x1c), region = 28 }
   0x8   : > { %p41_p4 = scmp.eq.s32.totalorder %s39_s24, 0 }
   0xa   : > { %s1281_s26 = scalar_select %p41_p4, %s1201_s19, %s43_s25  }
   0xe   : > { %239 = sbr.rel (!%p52_p3) target bundleno = 28 (0x1c), region = 32  ;;  %s241_s27 = sand.u32 (%p52_p3), 1, %s1201_s19  }
   0xf   : > { %s1025_s28 = sshll.u32 (%p52_p3), %s1209_s21, 2  ;;  %s1024_s29 = sshll.u32 (%p52_p3), %s241_s27, 6 }
  0x10   : > { %s1289_s7 = scalar_lea.vmem (%p52_p3), %s1489_s0, %s1025_s28  ;;  %s243_s8 = scalar_lea.vmem (%p52_p3), [#allocation3], %s1024_s29 }
  0x11   : > { %v264_v0 = vld [vmem:[%s1289_s7] sm:$0xf] (%p52_p3)  ;;  %v266_v1 = vld [vmem:[%s1289_s7 + $0x14] sm:$0xf] (%p52_p3)  ;;  %v268_v2 = vld [vmem:[%s1289_s7 + $0x28] sm:$0xf] (%p52_p3) }
  0x12   : > { %265 = vst [vmem:[%s243_s8] sm:$0xf] (%p52_p3), %v264_v0  ;;  %267 = vst [vmem:[%s243_s8 + $0x4] sm:$0xf] (%p52_p3), %v266_v1  ;;  %v270_v3 = vld [vmem:[%s1289_s7 + $0x3c] sm:$0xf] (%p52_p3) }
  0x13   : > { %v272_v4 = vld [vmem:[%s1289_s7 + $0x50] sm:$0xf] (%p52_p3)  ;;  %269 = vst [vmem:[%s243_s8 + $0x8] sm:$0xf] (%p52_p3), %v268_v2  ;;  %271 = vst [vmem:[%s243_s8 + $0xc] sm:$0xf] (%p52_p3), %v270_v3 }
  0x14   : > { %273 = vst [vmem:[%s243_s8 + $0x10] sm:$0xf] (%p52_p3), %v272_v4  ;;  %v274_v5 = vld [vmem:[%s1289_s7 + $0x64] sm:$0xf] (%p52_p3)  ;;  %v276_v6 = vld [vmem:[%s1289_s7 + $0x78] sm:$0xf] (%p52_p3) }
  0x15   : > { %v278_v7 = vld [vmem:[%s1289_s7 + $0x8c] sm:$0xf]  ;;  %275 = vst [vmem:[%s243_s8 + $0x14] sm:$0xf] %v274_v5  ;;  %277 = vst [vmem:[%s243_s8 + $0x18] sm:$0xf] %v276_v6 }
  0x16   : > { %279 = vst [vmem:[%s243_s8 + $0x1c] sm:$0xf] %v278_v7  ;;  %v280_v8 = vld [vmem:[%s1289_s7 + $0xa0] sm:$0xf]  ;;  %v282_v9 = vld [vmem:[%s1289_s7 + $0xb4] sm:$0xf] }
  0x17   : > { %v284_v10 = vld [vmem:[%s1289_s7 + $0xc8] sm:$0xf]  ;;  %281 = vst [vmem:[%s243_s8 + $0x20] sm:$0xf] %v280_v8  ;;  %283 = vst [vmem:[%s243_s8 + $0x24] sm:$0xf] %v282_v9 }
  0x18   : > { %285 = vst [vmem:[%s243_s8 + $0x28] sm:$0xf] %v284_v10  ;;  %v286_v11 = vld [vmem:[%s1289_s7 + $0xdc] sm:$0xf]  ;;  %v288_v12 = vld [vmem:[%s1289_s7 + $0xf0] sm:$0xf] }
  0x19   : > { %v290_v13 = vld [vmem:[%s1289_s7 + $0x104] sm:$0xf]  ;;  %287 = vst [vmem:[%s243_s8 + $0x2c] sm:$0xf] %v286_v11  ;;  %289 = vst [vmem:[%s243_s8 + $0x30] sm:$0xf] %v288_v12 }
  0x1a   : > { %291 = vst [vmem:[%s243_s8 + $0x34] sm:$0xf] %v290_v13  ;;  %v292_v14 = vld [vmem:[%s1289_s7 + $0x118] sm:$0xf]  ;;  %v294_v15 = vld [vmem:[%s1289_s7 + $0x12c] sm:$0xf] }
  0x1b   : > { %293 = vst [vmem:[%s243_s8 + $0x38] sm:$0xf] %v292_v14  ;;  %295 = vst [vmem:[%s243_s8 + $0x3c] sm:$0xf] %v294_v15 }
  0x1c PF: > { %p1026_p6 = scmp.ge.s32.totalorder %s1213_s22, 1  ;;  %p361_p7 = scmp.lt.s32.totalorder %s1213_s22, 6 }
  0x1e   : > { %p362_p8 = pnand %p1026_p6, %p361_p7 }
  0x1f   : > { %s368_s9 = sand.u32 (!%p362_p8), 1, %s1197_s18   ;;  %s1028_s10 = sshll.u32 (!%p362_p8), %s1205_s20, 4 }
  0x20   : > { %365 = sbr.rel (%p362_p8) target bundleno = 326 (0x146), region = 77  ;;  %s1027_s11 = sshll.u32 (!%p362_p8), %s368_s9, 6 }
  0x21   : > { %p422_p9 = scmp.lt.s32.totalorder (!%p362_p8), %s1028_s10, 79  ;;  %s1316_s16 = scalar_lea.vmem (!%p362_p8), [#allocation3], %s1027_s11 }
  0x22   : > { %p1030_p10 = scmp.ne.s32.totalorder (!%p362_p8), %s1205_s20, 0 }
  0x27   : > { %s1502_s10 = smov (!%p422_p9, %s1028_s10), 79  ;;  %458 = sbr.rel (%p1030_p10) target bundleno = 49 (0x31), region = 85 }
  0x28   : > { %s1029_s12 = sshll.u32 %s1502_s10, 2  ;;  %v1215_v16 = vmov (!%p1030_p10), 0.0  }
  0x29   : > { %s1314_s15 = scalar_lea.vmem %s1490_s1, %s1029_s12  ;;  %459 = vst [vmem:[#allocation2] sm:$0xff] (!%p1030_p10), %v1215_v16  ;;  %460 = vst [vmem:[#allocation2 + $0x8] sm:$0xff] (!%p1030_p10), %v1215_v16 }
  0x2a   : > { %461 = vst [vmem:[#allocation2 + $0x10] sm:$0xff] (!%p1030_p10), %v1215_v16  ;;  %462 = vst [vmem:[#allocation2 + $0x18] sm:$0xff] (!%p1030_p10), %v1215_v16 }
  0x2b   : > { %463 = vst [vmem:[#allocation2 + $0x20] sm:$0xff] (!%p1030_p10), %v1215_v16  ;;  %464 = vst [vmem:[#allocation2 + $0x28] sm:$0xff] (!%p1030_p10), %v1215_v16 }
  0x2c   : > { %465 = vst [vmem:[#allocation2 + $0x30] sm:$0xff] (!%p1030_p10), %v1215_v16  ;;  %466 = vst [vmem:[#allocation2 + $0x38] sm:$0xff] (!%p1030_p10), %v1215_v16 }
  0x2d   : > { %467 = vst [vmem:[#allocation2 + $0x40] sm:$0xff] (!%p1030_p10), %v1215_v16  ;;  %468 = vst [vmem:[#allocation2 + $0x48] sm:$0xff] (!%p1030_p10), %v1215_v16 }
  0x2e   : > { %469 = vst [vmem:[#allocation2 + $0x50] sm:$0xff] %v1215_v16  ;;  %470 = vst [vmem:[#allocation2 + $0x58] sm:$0xff] %v1215_v16 }
  0x2f   : > { %471 = vst [vmem:[#allocation2 + $0x60] sm:$0xff] %v1215_v16  ;;  %472 = vst [vmem:[#allocation2 + $0x68] sm:$0xff] %v1215_v16 }
  0x30   : > { %473 = vst [vmem:[#allocation2 + $0x70] sm:$0xff] %v1215_v16  ;;  %474 = vst [vmem:[#allocation2 + $0x78] sm:$0xff] %v1215_v16 }
  0x31 PF: > { %v1159_v17 = vld [vmem:[%s1314_s15] sm:$0xff]   ;;  %v1160_v18 = vld [vmem:[%s1314_s15 + $0x8] sm:$0xff]   ;;  %v1161_v19 = vld [vmem:[%s1314_s15 + $0x10] sm:$0xff]   ;;  %p1047_p11 = scmp.ne.s32.totalorder %s1205_s20, 4 }
  0x32   : > { %1070 = vmatprep.subr.bf16.mxu0 %v1159_v17  ;;  %1102 = vmatprep.subr.bf16.mxu1 %v1159_v17  ;;  %v1162_v20 = vld [vmem:[%s1314_s15 + $0x18] sm:$0xff]   ;;  %v1167_v21 = vld [vmem:[%s1316_s16] sm:$0xff]   ;;  %v1164_v24 = vld [vmem:[%s1314_s15 + $0x28] sm:$0xff]  }
  0x33   : > { %1071 = vmatpush3.bf16.msra.mxu0 %v1159_v17  ;;  %1110 = vmatpush3.bf16.msra.mxu1 %v1159_v17  ;;  %v1168_v22 = vld [vmem:[%s1316_s16 + $0x20] sm:$0xff]   ;;  %v1165_v25 = vld [vmem:[%s1314_s15 + $0x30] sm:$0xff]   ;;  %v1166_v26 = vld [vmem:[%s1314_s15 + $0x38] sm:$0xff]  }
  0x34   : > { %1072 = vmatprep.subr.bf16.mxu0 %v1160_v18  ;;  %1103 = vmatprep.subr.bf16.mxu1 %v1160_v18  ;;  %v1163_v23 = vld [vmem:[%s1314_s15 + $0x20] sm:$0xff]   ;;  %v1169_v27 = vld [vmem:[%s1316_s16 + $0x8] sm:$0xff]   ;;  %v1171_v29 = vld [vmem:[%s1316_s16 + $0x10] sm:$0xff]  }
  0x35   : > { %1086 = vmatprep.mubr.bf16.mxu0 %v1167_v21  ;;  %1094 = vmatprep.mubr.bf16.mxu1 %v1168_v22  ;;  %v1170_v28 = vld [vmem:[%s1316_s16 + $0x28] sm:$0xff]   ;;  %v1172_v30 = vld [vmem:[%s1316_s16 + $0x30] sm:$0xff]   ;;  %v1173_v31 = vld [vmem:[%s1316_s16 + $0x18] sm:$0xff]  }
  0x36   : > { %v1174_v32 = vld [vmem:[%s1316_s16 + $0x38] sm:$0xff]   ;;  %v477_v33 = vld [vmem:[#allocation2 + $0x10] sm:$0xff]  ;;  %v475_v35 = vld [vmem:[#allocation2] sm:$0xff] }
  0x37   : > { %1073 = vmatpush3.bf16.msra.mxu0 %v1160_v18  ;;  %1111 = vmatpush3.bf16.msra.mxu1 %v1160_v18  ;;  %v485_v34 = vld [vmem:[#allocation2 + $0x50] sm:$0xff]  ;;  %v483_v36 = vld [vmem:[#allocation2 + $0x40] sm:$0xff]  ;;  %v478_v39 = vld [vmem:[#allocation2 + $0x18] sm:$0xff] }
  0x38   : > { %1074 = vmatprep.subr.bf16.mxu0 %v1161_v19  ;;  %1104 = vmatprep.subr.bf16.mxu1 %v1161_v19  ;;  %v486_v40 = vld [vmem:[#allocation2 + $0x58] sm:$0xff]  ;;  %v476_v45 = vld [vmem:[#allocation2 + $0x8] sm:$0xff]  ;;  %v481_v57 = vld [vmem:[#allocation2 + $0x30] sm:$0xff] }
  0x39   : > { %v484_v46 = vld [vmem:[#allocation2 + $0x48] sm:$0xff]  ;;  %v489_v58 = vld [vmem:[#allocation2 + $0x70] sm:$0xff]  ;;  %v479_v59 = vld [vmem:[#allocation2 + $0x20] sm:$0xff] }
  0x3a   : > { %v487_v60 = vld [vmem:[#allocation2 + $0x60] sm:$0xff]  ;;  %v482_v63 = vld [vmem:[#allocation2 + $0x38] sm:$0xff]  ;;  %v480_v5 = vld [vmem:[#allocation2 + $0x28] sm:$0xff] }
  0x3b   : > { %1075 = vmatpush3.bf16.msra.mxu0 %v1161_v19  ;;  %1112 = vmatpush3.bf16.msra.mxu1 %v1161_v19  ;;  %v490_v0 = vld [vmem:[#allocation2 + $0x78] sm:$0xff]  ;;  %v488_v6 = vld [vmem:[#allocation2 + $0x68] sm:$0xff]  ;;  %v1339_v18 = vld [vmem:[%s1491_s2] ss:$0 sm:$0xff] (!%p1047_p11) }
  0x3c   : > { %1076 = vmatprep.subr.bf16.mxu0 %v1162_v20  ;;  %1105 = vmatprep.subr.bf16.mxu1 %v1162_v20  ;;  %v1344_v19 = vld [vmem:[%s1492_s3] ss:$0 sm:$0xff] (!%p1047_p11) }
  0x3d   : > { %v814_v22 = vld [vmem:[%s1493_s4] sm:$0xff] (!%p1047_p11) }
  0x3f   : > { %1077 = vmatpush3.bf16.msra.mxu0 %v1162_v20  ;;  %1113 = vmatpush3.bf16.msra.mxu1 %v1162_v20 }
  0x40   : > { %1078 = vmatprep.subr.bf16.mxu0 %v1163_v23  ;;  %1106 = vmatprep.subr.bf16.mxu1 %v1163_v23 }
  0x43   : > { %1079 = vmatpush3.bf16.msra.mxu0 %v1163_v23  ;;  %1114 = vmatpush3.bf16.msra.mxu1 %v1163_v23 }
  0x44   : > { %1080 = vmatprep.subr.bf16.mxu0 %v1164_v24  ;;  %1107 = vmatprep.subr.bf16.mxu1 %v1164_v24 }
  0x47   : > { %1081 = vmatpush3.bf16.msra.mxu0 %v1164_v24  ;;  %1115 = vmatpush3.bf16.msra.mxu1 %v1164_v24 }
  0x48   : > { %1082 = vmatprep.subr.bf16.mxu0 %v1165_v25  ;;  %1108 = vmatprep.subr.bf16.mxu1 %v1165_v25 }
  0x4b   : > { %1083 = vmatpush3.bf16.msra.mxu0 %v1165_v25  ;;  %1116 = vmatpush3.bf16.msra.mxu1 %v1165_v25 }
  0x4c   : > { %1084 = vmatprep.subr.bf16.mxu0 %v1166_v26  ;;  %1109 = vmatprep.subr.bf16.mxu1 %v1166_v26 }
  0x4f   : > { %1085 = vmatpush3.bf16.msra.mxu0 %v1166_v26  ;;  %1117 = vmatpush3.bf16.msra.mxu1 %v1166_v26 }
  0x52   : > { %1087 = vmatmul.mubr.bf16.vlgmr.msra.gmra.mrb[0].mxu0 %v1169_v27  ;;  %1095 = vmatmul.mubr.bf16.vlgmr.msra.gmra.mrb[0].mxu1 %v1170_v28  ;;  %v815_v27 = vld [vmem:[%s1493_s4 + $0x8] sm:$0xff] (!%p1047_p11) }
  0x53   : > { %1090 = vmatprep.mubr.bf16.mxu0 %v1171_v29  ;;  %1098 = vmatprep.mubr.bf16.mxu1 %v1172_v30  ;;  %v816_v29 = vld [vmem:[%s1493_s4 + $0x10] sm:$0xff] (!%p1047_p11) }
  0x5a   : > { %1091 = vmatmul.mubr.bf16.gmra.mrb[4].mxu0 %v1173_v31  ;;  %1099 = vmatmul.mubr.bf16.gmra.mrb[4].mxu1 %v1174_v32 }
 0x125   : > { %v1088_v37 = vpop.f32.mrb[0].mxu0  ;;  %v1096_v38 = vpop.f32.mrb[0].mxu1 }
 0x126   : > { %v718_v41 = vadd.f32 %v1088_v37, %v477_v33  ;;  %v726_v42 = vadd.f32 %v1096_v38, %v485_v34  ;;  %v653_v43 = vpop.f32.mrb[1].mxu0  ;;  %v685_v44 = vpop.f32.mrb[1].mxu1  ;;  %v817_v33 = vld [vmem:[%s1493_s4 + $0x18] sm:$0xff] (!%p1047_p11) }
 0x127   : > { %v716_v47 = vadd.f32 %v653_v43, %v475_v35  ;;  %v724_v48 = vadd.f32 %v685_v44, %v483_v36  ;;  %v1089_v49 = vpop.f32.mrb[2].mxu0  ;;  %v1097_v50 = vpop.f32.mrb[2].mxu1 }
 0x128   : > { %734 = vst [vmem:[#allocation2 + $0x10] sm:$0xff] %v718_v41  ;;  %742 = vst [vmem:[#allocation2 + $0x50] sm:$0xff] %v726_v42  ;;  %v719_v51 = vadd.f32 %v1089_v49, %v478_v39  ;;  %v727_v52 = vadd.f32 %v1097_v50, %v486_v40  ;;  %v656_v53 = vpop.f32.mrb[3].mxu0  ;;  %v688_v54 = vpop.f32.mrb[3].mxu1  ;;  %v818_v40 = vld [vmem:[%s1493_s4 + $0x20] sm:$0xff] (!%p1047_p11) }
 0x129   : > { %732 = vst [vmem:[#allocation2] sm:$0xff] %v716_v47  ;;  %740 = vst [vmem:[#allocation2 + $0x40] sm:$0xff] %v724_v48  ;;  %v717_v55 = vadd.f32 %v656_v53, %v476_v45  ;;  %v725_v56 = vadd.f32 %v688_v54, %v484_v46  ;;  %v819_v45 = vld [vmem:[%s1493_s4 + $0x28] sm:$0xff] (!%p1047_p11)  ;;  %v820_v53 = vld [vmem:[%s1493_s4 + $0x30] sm:$0xff] (!%p1047_p11) }
 0x12a   : > { %735 = vst [vmem:[#allocation2 + $0x18] sm:$0xff] %v719_v51  ;;  %743 = vst [vmem:[#allocation2 + $0x58] sm:$0xff] %v727_v52  ;;  %v821_v54 = vld [vmem:[%s1493_s4 + $0x38] sm:$0xff] (!%p1047_p11) }
 0x12b   : > { %733 = vst [vmem:[#allocation2 + $0x8] sm:$0xff] %v717_v55  ;;  %741 = vst [vmem:[#allocation2 + $0x48] sm:$0xff] %v725_v56 }
 0x12d   : > { %v1092_v61 = vpop.f32.mrb[4].mxu0  ;;  %v1100_v62 = vpop.f32.mrb[4].mxu1  ;;  %751 = sbr.rel (%p1047_p11) target bundleno = 326 (0x146), region = 89 }
 0x12e   : > { %v722_v1 = vadd.f32 %v1092_v61, %v481_v57  ;;  %v730_v2 = vadd.f32 %v1100_v62, %v489_v58  ;;  %v669_v3 = vpop.f32.mrb[5].mxu0  ;;  %v701_v4 = vpop.f32.mrb[5].mxu1 }
 0x12f   : > { %v720_v7 = vadd.f32 %v669_v3, %v479_v59  ;;  %v728_v8 = vadd.f32 %v701_v4, %v487_v60  ;;  %v1093_v9 = vpop.f32.mrb[6].mxu0  ;;  %v1101_v10 = vpop.f32.mrb[6].mxu1  ;;  %v754_v24 = vld [vmem:[#allocation2 + $0x10] sm:$0xff] (!%p1047_p11) }
 0x130   : > { %738 = vst [vmem:[#allocation2 + $0x30] sm:$0xff] %v722_v1  ;;  %746 = vst [vmem:[#allocation2 + $0x70] sm:$0xff] %v730_v2  ;;  %v723_v11 = vadd.f32 %v1093_v9, %v482_v63  ;;  %v731_v12 = vadd.f32 %v1101_v10, %v490_v0  ;;  %v672_v13 = vpop.f32.mrb[7].mxu0  ;;  %v704_v14 = vpop.f32.mrb[7].mxu1  ;;  %v752_v17 = vld [vmem:[#allocation2] sm:$0xff] (!%p1047_p11)  ;;  %v777_v28 = vmul.f32 (!%p1047_p11), %v1339_v18, %v754_v24  ;;  %v762_v60 = vld [vmem:[#allocation2 + $0x50] sm:$0xff] (!%p1047_p11) }
 0x131   : > { %736 = vst [vmem:[#allocation2 + $0x20] sm:$0xff] %v720_v7  ;;  %744 = vst [vmem:[#allocation2 + $0x60] sm:$0xff] %v728_v8  ;;  %v721_v15 = vadd.f32 %v672_v13, %v480_v5  ;;  %v729_v16 = vadd.f32 %v704_v14, %v488_v6  ;;  %v775_v20 = vmul.f32 (!%p1047_p11), %v1339_v18, %v752_v17  ;;  %v755_v25 = vld [vmem:[#allocation2 + $0x18] sm:$0xff] (!%p1047_p11)  ;;  %v760_v48 = vld [vmem:[#allocation2 + $0x40] sm:$0xff] (!%p1047_p11) }
 0x132   : > { %739 = vst [vmem:[#allocation2 + $0x38] sm:$0xff] %v723_v11  ;;  %747 = vst [vmem:[#allocation2 + $0x78] sm:$0xff] %v731_v12  ;;  %v753_v21 = vld [vmem:[#allocation2 + $0x8] sm:$0xff] (!%p1047_p11)  ;;  %v778_v30 = vmul.f32 (!%p1047_p11), %v1339_v18, %v755_v25  ;;  %v800_v38 = vadd.f32 (!%p1047_p11), %v1344_v19, %v777_v28  ;;  %v763_v61 = vld [vmem:[#allocation2 + $0x58] sm:$0xff] (!%p1047_p11)  ;;  %v783_v1 = vmul.f32 (!%p1047_p11), %v1339_v18, %v760_v48 }
 0x133   : > { %737 = vst [vmem:[#allocation2 + $0x28] sm:$0xff] %v721_v15  ;;  %745 = vst [vmem:[#allocation2 + $0x68] sm:$0xff] %v729_v16  ;;  %v776_v23 = vmul.f32 (!%p1047_p11), %v1339_v18, %v753_v21  ;;  %v798_v26 = vadd.f32 (!%p1047_p11), %v1344_v19, %v775_v20  ;;  %v761_v55 = vld [vmem:[#allocation2 + $0x48] sm:$0xff] (!%p1047_p11)  ;;  %v822_v6 = vld [vmem:[%s1493_s4 + $0x40] sm:$0xff] (!%p1047_p11)  ;;  %v785_v12 = vmul.f32 (!%p1047_p11), %v1339_v18, %v762_v60 }
 0x134   : > { %v801_v39 = vadd.f32 %v1344_v19, %v778_v30  ;;  %v832_v50 = vadd.f32 %v816_v29, %v800_v38  ;;  %v784_v7 = vmul.f32 %v1339_v18, %v761_v55  ;;  %v806_v10 = vadd.f32 %v1344_v19, %v783_v1  ;;  %v823_v11 = vld [vmem:[%s1493_s4 + $0x48] sm:$0xff]  ;;  %v824_v21 = vld [vmem:[%s1493_s4 + $0x50] sm:$0xff] }
 0x135   : > { %v799_v32 = vadd.f32 %v1344_v19, %v776_v23  ;;  %v830_v37 = vadd.f32 %v814_v22, %v798_v26  ;;  %v786_v13 = vmul.f32 %v1339_v18, %v763_v61  ;;  %v825_v22 = vld [vmem:[%s1493_s4 + $0x58] sm:$0xff]  ;;  %v808_v25 = vadd.f32 %v1344_v19, %v785_v12  ;;  %v828_v38 = vld [vmem:[%s1493_s4 + $0x70] sm:$0xff] }
 0x136   : > { %v833_v51 = vadd.f32 %v817_v33, %v801_v39  ;;  %v848_v62 = vmax.f32 %v832_v50, 0.0  ;;  %v807_v20 = vadd.f32 %v1344_v19, %v784_v7  ;;  %v838_v24 = vadd.f32 %v822_v6, %v806_v10  ;;  %v829_v39 = vld [vmem:[%s1493_s4 + $0x78] sm:$0xff] }
 0x137   : > { %v758_v36 = vld [vmem:[#allocation2 + $0x30] sm:$0xff]  ;;  %v831_v43 = vadd.f32 %v815_v27, %v799_v32  ;;  %v846_v49 = vmax.f32 %v830_v37, 0.0  ;;  %v809_v26 = vadd.f32 %v1344_v19, %v786_v13  ;;  %v826_v27 = vld [vmem:[%s1493_s4 + $0x60] sm:$0xff] }
 0x138   : > { %v756_v31 = vld [vmem:[#allocation2 + $0x20] sm:$0xff]  ;;  %v781_v46 = vmul.f32 %v1339_v18, %v758_v36  ;;  %v849_v63 = vmax.f32 %v833_v51, 0.0  ;;  %864 = vst [vmem:[%s1494_s5 + $0x10] sm:$0xff] %v848_v62  ;;  %v766_v14 = vld [vmem:[#allocation2 + $0x70] sm:$0xff]  ;;  %v839_v29 = vadd.f32 %v823_v11, %v807_v20 }
 0x139   : > { %v779_v34 = vmul.f32 %v1339_v18, %v756_v31  ;;  %v759_v42 = vld [vmem:[#allocation2 + $0x38] sm:$0xff]  ;;  %v847_v56 = vmax.f32 %v831_v43, 0.0  ;;  %862 = vst [vmem:[%s1494_s5] sm:$0xff] %v846_v49  ;;  %v764_v2 = vld [vmem:[#allocation2 + $0x60] sm:$0xff]  ;;  %v827_v31 = vld [vmem:[%s1493_s4 + $0x68] sm:$0xff]  ;;  %v789_v32 = vmul.f32 %v1339_v18, %v766_v14  ;;  %v841_v36 = vadd.f32 %v825_v22, %v809_v26 }
 0x13a   : > { %v757_v35 = vld [vmem:[#allocation2 + $0x28] sm:$0xff]  ;;  %v782_v47 = vmul.f32 %v1339_v18, %v759_v42  ;;  %v804_v58 = vadd.f32 %v1344_v19, %v781_v46  ;;  %865 = vst [vmem:[%s1494_s5 + $0x18] sm:$0xff] %v849_v63  ;;  %v767_v15 = vld [vmem:[#allocation2 + $0x78] sm:$0xff]  ;;  %v787_v23 = vmul.f32 %v1339_v18, %v764_v2 }
 0x13b   : > { %v780_v41 = vmul.f32 %v1339_v18, %v757_v35  ;;  %v802_v44 = vadd.f32 %v1344_v19, %v779_v34  ;;  %863 = vst [vmem:[%s1494_s5 + $0x8] sm:$0xff] %v847_v56  ;;  %v765_v8 = vld [vmem:[#allocation2 + $0x68] sm:$0xff]  ;;  %v790_v33 = vmul.f32 %v1339_v18, %v767_v15  ;;  %v854_v34 = vmax.f32 %v838_v24, 0.0 }
 0x13c   : > { %v805_v59 = vadd.f32 %v1344_v19, %v782_v47  ;;  %v836_v4 = vadd.f32 %v820_v53, %v804_v58  ;;  %v788_v28 = vmul.f32 %v1339_v18, %v765_v8  ;;  %v810_v30 = vadd.f32 %v1344_v19, %v787_v23 }
 0x13d   : > { %v803_v52 = vadd.f32 %v1344_v19, %v780_v41  ;;  %v834_v57 = vadd.f32 %v818_v40, %v802_v44  ;;  %v840_v35 = vadd.f32 %v824_v21, %v808_v25  ;;  %v855_v40 = vmax.f32 %v839_v29, 0.0  ;;  %870 = vst [vmem:[%s1494_s5 + $0x40] sm:$0xff] %v854_v34 }
 0x13e   : > { %v837_v5 = vadd.f32 %v821_v54, %v805_v59  ;;  %v852_v16 = vmax.f32 %v836_v4, 0.0  ;;  %v811_v37 = vadd.f32 %v1344_v19, %v788_v28  ;;  %v842_v41 = vadd.f32 %v826_v27, %v810_v30 }
 0x13f   : > { %v835_v0 = vadd.f32 %v819_v45, %v803_v52  ;;  %v850_v3 = vmax.f32 %v834_v57, 0.0  ;;  %v812_v42 = vadd.f32 %v1344_v19, %v789_v32  ;;  %v813_v43 = vadd.f32 %v1344_v19, %v790_v33  ;;  %871 = vst [vmem:[%s1494_s5 + $0x48] sm:$0xff] %v855_v40 }
 0x140   : > { %v853_v17 = vmax.f32 %v837_v5, 0.0  ;;  %868 = vst [vmem:[%s1494_s5 + $0x30] sm:$0xff] %v852_v16  ;;  %v856_v18 = vmax.f32 %v840_v35, 0.0  ;;  %v857_v44 = vmax.f32 %v841_v36, 0.0  ;;  %v843_v45 = vadd.f32 %v827_v31, %v811_v37 }
 0x141   : > { %v851_v9 = vmax.f32 %v835_v0, 0.0  ;;  %866 = vst [vmem:[%s1494_s5 + $0x20] sm:$0xff] %v850_v3  ;;  %v858_v46 = vmax.f32 %v842_v41, 0.0  ;;  %v844_v47 = vadd.f32 %v828_v38, %v812_v42  ;;  %v845_v48 = vadd.f32 %v829_v39, %v813_v43 }
 0x142   : > { %869 = vst [vmem:[%s1494_s5 + $0x38] sm:$0xff] %v853_v17  ;;  %872 = vst [vmem:[%s1494_s5 + $0x50] sm:$0xff] %v856_v18  ;;  %v859_v19 = vmax.f32 %v843_v45, 0.0 }
 0x143   : > { %867 = vst [vmem:[%s1494_s5 + $0x28] sm:$0xff] %v851_v9  ;;  %873 = vst [vmem:[%s1494_s5 + $0x58] sm:$0xff] %v857_v44  ;;  %v860_v49 = vmax.f32 %v844_v47, 0.0  ;;  %v861_v50 = vmax.f32 %v845_v48, 0.0 }
 0x144   : > { %874 = vst [vmem:[%s1494_s5 + $0x60] sm:$0xff] %v858_v46  ;;  %875 = vst [vmem:[%s1494_s5 + $0x68] sm:$0xff] %v859_v19 }
 0x145   : > { %876 = vst [vmem:[%s1494_s5 + $0x70] sm:$0xff] %v860_v49  ;;  %877 = vst [vmem:[%s1494_s5 + $0x78] sm:$0xff] %v861_v50 }
 0x146 PF: > { %s15_s22 = sadd.s32 1, %s1213_s22   ;;  %s1495_s18 = smov %s1201_s19 }
 0x147   : > { %p12_p12 = scmp.ge.s32.totalorder %s15_s22, 7   ;;  %s1496_s19 = smov %s1281_s26 }
 0x148   : > { %s1497_s20 = smov %s1209_s21  ;;  %s1498_s21 = smov %s1500_s23 }
 0x149   :  { %14 = sbr.rel (!%p12_p12) target bundleno = 3 (0x3), region = 136 }

// kernel: multimodal_classifier_forward.23
= control target key start
LH: loop header
LB: loop body
LE: loop exit
PB: predicated region body
PF: predicated region fallthrough
CT: control target
= control target key end

     0   :  { %s1130_s15 = smov 0   ;;  %s1132_s16 = smov 0   ;;  %s1307_s0 = inlined_call_operand.vmem [shape: bf16[128,640], index: 0, kind: input, shape index: {}]   ;;  %s1308_s1 = inlined_call_operand.vmem [shape: bf16[640,128], index: 1, kind: input, shape index: {}]   ;;  %s1309_s2 = inlined_call_operand.vmem [shape: f32[1,128], index: 2, kind: input, shape index: {}]   ;;  %s1310_s3 = inlined_call_operand.vmem [shape: f32[1,128], index: 3, kind: input, shape index: {}]   ;;  %s1311_s4 = inlined_call_operand.vmem [shape: f32[128,128], index: 4, kind: output, shape index: {}]  }
   0x1   :  { %s1134_s17 = smov 0   ;;  %s1136_s18 = smov 0  }
   0x2   :  { %s1138_s19 = smov 0  }
   0x3 LB: > { %s26_s20 = sadd.s32 1, %s1098_s18  ;;  %p49_p1 = scmp.ne.s32.totalorder %s1090_s16, %s1086_s15  ;;  %s1102_s19 = sphi %s1138_s19, %s14_s19   ;;  %s1098_s18 = sphi %s1136_s18, %s1315_s18   ;;  %s1094_s17 = sphi %s1134_s17, %s1314_s17   ;;  %s1090_s16 = sphi %s1132_s16, %s1313_s16   ;;  %s1086_s15 = sphi %s1130_s15, %s1312_s15  }
   0x4   : > { %p27_p0 = scmp.ge.s32.totalorder %s26_s20, 5  ;;  %p50_p2 = scmp.eq.s32.totalorder %s1102_s19, 0 }
   0x5   : > { %s42_s22 = sadd.s32 1, %s1090_s16  ;;  %p912_p5 = scmp.ge.s32.totalorder %s1102_s19, 5 }
   0x6   : > { %s1317_s20 = smov (%p27_p0, %s26_s20), 0  ;;  %p51_p3 = por %p50_p2, %p49_p1 }
   0x7   : > { %s38_s21 = ssub.s32 %s1098_s18, %s1317_s20  ;;  %195 = sbr.rel (%p912_p5) target bundleno = 28 (0x1c), region = 24 }
   0x8   : > { %p40_p4 = scmp.eq.s32.totalorder %s38_s21, 0 }
   0xa   : > { %s1165_s23 = scalar_select %p40_p4, %s1090_s16, %s42_s22  }
   0xe   : > { %198 = sbr.rel (!%p51_p3) target bundleno = 28 (0x1c), region = 28  ;;  %s200_s24 = sand.u32 (%p51_p3), 1, %s1090_s16  }
   0xf   : > { %s914_s25 = sshll.u32 (%p51_p3), %s1098_s18, 2  ;;  %s913_s26 = sshll.u32 (%p51_p3), %s200_s24, 6 }
  0x10   : > { %s1173_s29 = scalar_lea.vmem (%p51_p3), %s1307_s0, %s914_s25  ;;  %s202_s30 = scalar_lea.vmem (%p51_p3), [#allocation3], %s913_s26 }
  0x11   : > { %v223_v0 = vld [vmem:[%s1173_s29] sm:$0xf] (%p51_p3)  ;;  %v225_v1 = vld [vmem:[%s1173_s29 + $0x14] sm:$0xf] (%p51_p3)  ;;  %v227_v2 = vld [vmem:[%s1173_s29 + $0x28] sm:$0xf] (%p51_p3) }
  0x12   : > { %224 = vst [vmem:[%s202_s30] sm:$0xf] (%p51_p3), %v223_v0  ;;  %226 = vst [vmem:[%s202_s30 + $0x4] sm:$0xf] (%p51_p3), %v225_v1  ;;  %v229_v3 = vld [vmem:[%s1173_s29 + $0x3c] sm:$0xf] (%p51_p3) }
  0x13   : > { %v231_v4 = vld [vmem:[%s1173_s29 + $0x50] sm:$0xf] (%p51_p3)  ;;  %228 = vst [vmem:[%s202_s30 + $0x8] sm:$0xf] (%p51_p3), %v227_v2  ;;  %230 = vst [vmem:[%s202_s30 + $0xc] sm:$0xf] (%p51_p3), %v229_v3 }
  0x14   : > { %232 = vst [vmem:[%s202_s30 + $0x10] sm:$0xf] (%p51_p3), %v231_v4  ;;  %v233_v5 = vld [vmem:[%s1173_s29 + $0x64] sm:$0xf] (%p51_p3)  ;;  %v235_v6 = vld [vmem:[%s1173_s29 + $0x78] sm:$0xf] (%p51_p3) }
  0x15   : > { %v237_v7 = vld [vmem:[%s1173_s29 + $0x8c] sm:$0xf]  ;;  %234 = vst [vmem:[%s202_s30 + $0x14] sm:$0xf] %v233_v5  ;;  %236 = vst [vmem:[%s202_s30 + $0x18] sm:$0xf] %v235_v6 }
  0x16   : > { %238 = vst [vmem:[%s202_s30 + $0x1c] sm:$0xf] %v237_v7  ;;  %v239_v8 = vld [vmem:[%s1173_s29 + $0xa0] sm:$0xf]  ;;  %v241_v9 = vld [vmem:[%s1173_s29 + $0xb4] sm:$0xf] }
  0x17   : > { %v243_v10 = vld [vmem:[%s1173_s29 + $0xc8] sm:$0xf]  ;;  %240 = vst [vmem:[%s202_s30 + $0x20] sm:$0xf] %v239_v8  ;;  %242 = vst [vmem:[%s202_s30 + $0x24] sm:$0xf] %v241_v9 }
  0x18   : > { %244 = vst [vmem:[%s202_s30 + $0x28] sm:$0xf] %v243_v10  ;;  %v245_v11 = vld [vmem:[%s1173_s29 + $0xdc] sm:$0xf]  ;;  %v247_v12 = vld [vmem:[%s1173_s29 + $0xf0] sm:$0xf] }
  0x19   : > { %v249_v13 = vld [vmem:[%s1173_s29 + $0x104] sm:$0xf]  ;;  %246 = vst [vmem:[%s202_s30 + $0x2c] sm:$0xf] %v245_v11  ;;  %248 = vst [vmem:[%s202_s30 + $0x30] sm:$0xf] %v247_v12 }
  0x1a   : > { %250 = vst [vmem:[%s202_s30 + $0x34] sm:$0xf] %v249_v13  ;;  %v251_v14 = vld [vmem:[%s1173_s29 + $0x118] sm:$0xf]  ;;  %v253_v15 = vld [vmem:[%s1173_s29 + $0x12c] sm:$0xf] }
  0x1b   : > { %252 = vst [vmem:[%s202_s30 + $0x38] sm:$0xf] %v251_v14  ;;  %254 = vst [vmem:[%s202_s30 + $0x3c] sm:$0xf] %v253_v15 }
  0x1c PF: > { %p915_p6 = scmp.ge.s32.totalorder %s1102_s19, 1  ;;  %p320_p7 = scmp.lt.s32.totalorder %s1102_s19, 6 }
  0x1e   : > { %p321_p8 = pnand %p915_p6, %p320_p7 }
  0x1f   : > { %s327_s5 = sand.u32 (!%p321_p8), 1, %s1086_s15   ;;  %s917_s6 = sshll.u32 (!%p321_p8), %s1094_s17, 4 }
  0x20   : > { %324 = sbr.rel (%p321_p8) target bundleno = 323 (0x143), region = 73  ;;  %s916_s7 = sshll.u32 (!%p321_p8), %s327_s5, 6 }
  0x21   : > { %p371_p9 = scmp.lt.s32.totalorder (!%p321_p8), %s917_s6, 79  ;;  %s1200_s12 = scalar_lea.vmem (!%p321_p8), [#allocation3], %s916_s7 }
  0x22   : > { %p919_p10 = scmp.ne.s32.totalorder (!%p321_p8), %s1094_s17, 0 }
  0x27   : > { %s1319_s6 = smov (!%p371_p9, %s917_s6), 79  ;;  %398 = sbr.rel (%p919_p10) target bundleno = 49 (0x31), region = 81 }
  0x28   : > { %s918_s8 = sshll.u32 %s1319_s6, 2  ;;  %v1104_v16 = vmov (!%p919_p10), 0.0  }
  0x29   : > { %s1198_s11 = scalar_lea.vmem %s1308_s1, %s918_s8  ;;  %399 = vst [vmem:[#allocation2] sm:$0xff] (!%p919_p10), %v1104_v16  ;;  %400 = vst [vmem:[#allocation2 + $0x8] sm:$0xff] (!%p919_p10), %v1104_v16 }
  0x2a   : > { %401 = vst [vmem:[#allocation2 + $0x10] sm:$0xff] (!%p919_p10), %v1104_v16  ;;  %402 = vst [vmem:[#allocation2 + $0x18] sm:$0xff] (!%p919_p10), %v1104_v16 }
  0x2b   : > { %403 = vst [vmem:[#allocation2 + $0x20] sm:$0xff] (!%p919_p10), %v1104_v16  ;;  %404 = vst [vmem:[#allocation2 + $0x28] sm:$0xff] (!%p919_p10), %v1104_v16 }
  0x2c   : > { %405 = vst [vmem:[#allocation2 + $0x30] sm:$0xff] (!%p919_p10), %v1104_v16  ;;  %406 = vst [vmem:[#allocation2 + $0x38] sm:$0xff] (!%p919_p10), %v1104_v16 }
  0x2d   : > { %407 = vst [vmem:[#allocation2 + $0x40] sm:$0xff] (!%p919_p10), %v1104_v16  ;;  %408 = vst [vmem:[#allocation2 + $0x48] sm:$0xff] (!%p919_p10), %v1104_v16 }
  0x2e   : > { %409 = vst [vmem:[#allocation2 + $0x50] sm:$0xff] %v1104_v16  ;;  %410 = vst [vmem:[#allocation2 + $0x58] sm:$0xff] %v1104_v16 }
  0x2f   : > { %411 = vst [vmem:[#allocation2 + $0x60] sm:$0xff] %v1104_v16  ;;  %412 = vst [vmem:[#allocation2 + $0x68] sm:$0xff] %v1104_v16 }
  0x30   : > { %413 = vst [vmem:[#allocation2 + $0x70] sm:$0xff] %v1104_v16  ;;  %414 = vst [vmem:[#allocation2 + $0x78] sm:$0xff] %v1104_v16 }
  0x31 PF: > { %v1048_v17 = vld [vmem:[%s1198_s11] sm:$0xff]   ;;  %v1049_v18 = vld [vmem:[%s1198_s11 + $0x8] sm:$0xff]   ;;  %v1050_v19 = vld [vmem:[%s1198_s11 + $0x10] sm:$0xff]   ;;  %p936_p11 = scmp.ne.s32.totalorder %s1094_s17, 4 }
  0x32   : > { %959 = vmatprep.subr.bf16.mxu0 %v1048_v17  ;;  %991 = vmatprep.subr.bf16.mxu1 %v1048_v17  ;;  %v1051_v20 = vld [vmem:[%s1198_s11 + $0x18] sm:$0xff]   ;;  %v1056_v21 = vld [vmem:[%s1200_s12] sm:$0xff]   ;;  %v1053_v24 = vld [vmem:[%s1198_s11 + $0x28] sm:$0xff]  }
  0x33   : > { %960 = vmatpush3.bf16.msra.mxu0 %v1048_v17  ;;  %999 = vmatpush3.bf16.msra.mxu1 %v1048_v17  ;;  %v1057_v22 = vld [vmem:[%s1200_s12 + $0x20] sm:$0xff]   ;;  %v1054_v25 = vld [vmem:[%s1198_s11 + $0x30] sm:$0xff]   ;;  %v1055_v26 = vld [vmem:[%s1198_s11 + $0x38] sm:$0xff]  }
  0x34   : > { %961 = vmatprep.subr.bf16.mxu0 %v1049_v18  ;;  %992 = vmatprep.subr.bf16.mxu1 %v1049_v18  ;;  %v1052_v23 = vld [vmem:[%s1198_s11 + $0x20] sm:$0xff]   ;;  %v1058_v27 = vld [vmem:[%s1200_s12 + $0x8] sm:$0xff]   ;;  %v1060_v29 = vld [vmem:[%s1200_s12 + $0x10] sm:$0xff]  }
  0x35   : > { %975 = vmatprep.mubr.bf16.mxu0 %v1056_v21  ;;  %983 = vmatprep.mubr.bf16.mxu1 %v1057_v22  ;;  %v1059_v28 = vld [vmem:[%s1200_s12 + $0x28] sm:$0xff]   ;;  %v1061_v30 = vld [vmem:[%s1200_s12 + $0x30] sm:$0xff]   ;;  %v1062_v31 = vld [vmem:[%s1200_s12 + $0x18] sm:$0xff]  }
  0x36   : > { %v1063_v32 = vld [vmem:[%s1200_s12 + $0x38] sm:$0xff]   ;;  %v417_v33 = vld [vmem:[#allocation2 + $0x10] sm:$0xff]  ;;  %v415_v35 = vld [vmem:[#allocation2] sm:$0xff] }
  0x37   : > { %962 = vmatpush3.bf16.msra.mxu0 %v1049_v18  ;;  %1000 = vmatpush3.bf16.msra.mxu1 %v1049_v18  ;;  %v425_v34 = vld [vmem:[#allocation2 + $0x50] sm:$0xff]  ;;  %v423_v36 = vld [vmem:[#allocation2 + $0x40] sm:$0xff]  ;;  %v418_v39 = vld [vmem:[#allocation2 + $0x18] sm:$0xff] }
  0x38   : > { %963 = vmatprep.subr.bf16.mxu0 %v1050_v19  ;;  %993 = vmatprep.subr.bf16.mxu1 %v1050_v19  ;;  %v426_v40 = vld [vmem:[#allocation2 + $0x58] sm:$0xff]  ;;  %v416_v45 = vld [vmem:[#allocation2 + $0x8] sm:$0xff]  ;;  %v421_v57 = vld [vmem:[#allocation2 + $0x30] sm:$0xff] }
  0x39   : > { %v424_v46 = vld [vmem:[#allocation2 + $0x48] sm:$0xff]  ;;  %v429_v58 = vld [vmem:[#allocation2 + $0x70] sm:$0xff]  ;;  %v419_v59 = vld [vmem:[#allocation2 + $0x20] sm:$0xff] }
  0x3a   : > { %v427_v60 = vld [vmem:[#allocation2 + $0x60] sm:$0xff]  ;;  %v422_v63 = vld [vmem:[#allocation2 + $0x38] sm:$0xff]  ;;  %v420_v5 = vld [vmem:[#allocation2 + $0x28] sm:$0xff] }
  0x3b   : > { %964 = vmatpush3.bf16.msra.mxu0 %v1050_v19  ;;  %1001 = vmatpush3.bf16.msra.mxu1 %v1050_v19  ;;  %v430_v0 = vld [vmem:[#allocation2 + $0x78] sm:$0xff]  ;;  %v428_v6 = vld [vmem:[#allocation2 + $0x68] sm:$0xff]  ;;  %v937_v18 = vld [vmem:[%s1309_s2] ss:$0 sm:$0xff] (!%p936_p11) }
  0x3c   : > { %965 = vmatprep.subr.bf16.mxu0 %v1051_v20  ;;  %994 = vmatprep.subr.bf16.mxu1 %v1051_v20  ;;  %v1226_v19 = vld [vmem:[%s1310_s3] ss:$0 sm:$0xff] (!%p936_p11) }
  0x3f   : > { %966 = vmatpush3.bf16.msra.mxu0 %v1051_v20  ;;  %1002 = vmatpush3.bf16.msra.mxu1 %v1051_v20 }
  0x40   : > { %967 = vmatprep.subr.bf16.mxu0 %v1052_v23  ;;  %995 = vmatprep.subr.bf16.mxu1 %v1052_v23 }
  0x43   : > { %968 = vmatpush3.bf16.msra.mxu0 %v1052_v23  ;;  %1003 = vmatpush3.bf16.msra.mxu1 %v1052_v23 }
  0x44   : > { %969 = vmatprep.subr.bf16.mxu0 %v1053_v24  ;;  %996 = vmatprep.subr.bf16.mxu1 %v1053_v24 }
  0x47   : > { %970 = vmatpush3.bf16.msra.mxu0 %v1053_v24  ;;  %1004 = vmatpush3.bf16.msra.mxu1 %v1053_v24 }
  0x48   : > { %971 = vmatprep.subr.bf16.mxu0 %v1054_v25  ;;  %997 = vmatprep.subr.bf16.mxu1 %v1054_v25 }
  0x4b   : > { %972 = vmatpush3.bf16.msra.mxu0 %v1054_v25  ;;  %1005 = vmatpush3.bf16.msra.mxu1 %v1054_v25 }
  0x4c   : > { %973 = vmatprep.subr.bf16.mxu0 %v1055_v26  ;;  %998 = vmatprep.subr.bf16.mxu1 %v1055_v26 }
  0x4f   : > { %974 = vmatpush3.bf16.msra.mxu0 %v1055_v26  ;;  %1006 = vmatpush3.bf16.msra.mxu1 %v1055_v26 }
  0x52   : > { %976 = vmatmul.mubr.bf16.vlgmr.msra.gmra.mrb[0].mxu0 %v1058_v27  ;;  %984 = vmatmul.mubr.bf16.vlgmr.msra.gmra.mrb[0].mxu1 %v1059_v28 }
  0x53   : > { %979 = vmatprep.mubr.bf16.mxu0 %v1060_v29  ;;  %987 = vmatprep.mubr.bf16.mxu1 %v1061_v30 }
  0x5a   : > { %980 = vmatmul.mubr.bf16.gmra.mrb[4].mxu0 %v1062_v31  ;;  %988 = vmatmul.mubr.bf16.gmra.mrb[4].mxu1 %v1063_v32 }
 0x125   : > { %v977_v37 = vpop.f32.mrb[0].mxu0  ;;  %v985_v38 = vpop.f32.mrb[0].mxu1 }
 0x126   : > { %v658_v41 = vadd.f32 %v977_v37, %v417_v33  ;;  %v666_v42 = vadd.f32 %v985_v38, %v425_v34  ;;  %v593_v43 = vpop.f32.mrb[1].mxu0  ;;  %v625_v44 = vpop.f32.mrb[1].mxu1 }
 0x127   : > { %v656_v47 = vadd.f32 %v593_v43, %v415_v35  ;;  %v664_v48 = vadd.f32 %v625_v44, %v423_v36  ;;  %v978_v49 = vpop.f32.mrb[2].mxu0  ;;  %v986_v50 = vpop.f32.mrb[2].mxu1 }
 0x128   : > { %674 = vst [vmem:[#allocation2 + $0x10] sm:$0xff] %v658_v41  ;;  %682 = vst [vmem:[#allocation2 + $0x50] sm:$0xff] %v666_v42  ;;  %v659_v51 = vadd.f32 %v978_v49, %v418_v39  ;;  %v667_v52 = vadd.f32 %v986_v50, %v426_v40  ;;  %v596_v53 = vpop.f32.mrb[3].mxu0  ;;  %v628_v54 = vpop.f32.mrb[3].mxu1 }
 0x129   : > { %672 = vst [vmem:[#allocation2] sm:$0xff] %v656_v47  ;;  %680 = vst [vmem:[#allocation2 + $0x40] sm:$0xff] %v664_v48  ;;  %v657_v55 = vadd.f32 %v596_v53, %v416_v45  ;;  %v665_v56 = vadd.f32 %v628_v54, %v424_v46 }
 0x12a   : > { %675 = vst [vmem:[#allocation2 + $0x18] sm:$0xff] %v659_v51  ;;  %683 = vst [vmem:[#allocation2 + $0x58] sm:$0xff] %v667_v52 }
 0x12b   : > { %673 = vst [vmem:[#allocation2 + $0x8] sm:$0xff] %v657_v55  ;;  %681 = vst [vmem:[#allocation2 + $0x48] sm:$0xff] %v665_v56 }
 0x12d   : > { %v981_v61 = vpop.f32.mrb[4].mxu0  ;;  %v989_v62 = vpop.f32.mrb[4].mxu1  ;;  %691 = sbr.rel (%p936_p11) target bundleno = 323 (0x143), region = 85 }
 0x12e   : > { %v662_v1 = vadd.f32 %v981_v61, %v421_v57  ;;  %v670_v2 = vadd.f32 %v989_v62, %v429_v58  ;;  %v609_v3 = vpop.f32.mrb[5].mxu0  ;;  %v641_v4 = vpop.f32.mrb[5].mxu1 }
 0x12f   : > { %v660_v7 = vadd.f32 %v609_v3, %v419_v59  ;;  %v668_v8 = vadd.f32 %v641_v4, %v427_v60  ;;  %v982_v9 = vpop.f32.mrb[6].mxu0  ;;  %v990_v10 = vpop.f32.mrb[6].mxu1  ;;  %v694_v22 = vld [vmem:[#allocation2 + $0x10] sm:$0xff] (!%p936_p11) }
 0x130   : > { %678 = vst [vmem:[#allocation2 + $0x30] sm:$0xff] %v662_v1  ;;  %686 = vst [vmem:[#allocation2 + $0x70] sm:$0xff] %v670_v2  ;;  %v663_v11 = vadd.f32 %v982_v9, %v422_v63  ;;  %v671_v12 = vadd.f32 %v990_v10, %v430_v0  ;;  %v612_v13 = vpop.f32.mrb[7].mxu0  ;;  %v644_v14 = vpop.f32.mrb[7].mxu1  ;;  %v692_v17 = vld [vmem:[#allocation2] sm:$0xff] (!%p936_p11)  ;;  %v717_v25 = vmul.f32 (!%p936_p11), %v937_v18, %v694_v22  ;;  %v702_v45 = vld [vmem:[#allocation2 + $0x50] sm:$0xff] (!%p936_p11) }
 0x131   : > { %676 = vst [vmem:[#allocation2 + $0x20] sm:$0xff] %v660_v7  ;;  %684 = vst [vmem:[#allocation2 + $0x60] sm:$0xff] %v668_v8  ;;  %v661_v15 = vadd.f32 %v612_v13, %v420_v5  ;;  %v669_v16 = vadd.f32 %v644_v14, %v428_v6  ;;  %v715_v20 = vmul.f32 (!%p936_p11), %v937_v18, %v692_v17  ;;  %v695_v23 = vld [vmem:[#allocation2 + $0x18] sm:$0xff] (!%p936_p11)  ;;  %v700_v39 = vld [vmem:[#allocation2 + $0x40] sm:$0xff] (!%p936_p11) }
 0x132   : > { %679 = vst [vmem:[#allocation2 + $0x38] sm:$0xff] %v663_v11  ;;  %687 = vst [vmem:[#allocation2 + $0x78] sm:$0xff] %v671_v12  ;;  %v693_v21 = vld [vmem:[#allocation2 + $0x8] sm:$0xff] (!%p936_p11)  ;;  %v718_v26 = vmul.f32 (!%p936_p11), %v937_v18, %v695_v23  ;;  %v740_v36 = vadd.f32 (!%p936_p11), %v1226_v19, %v717_v25  ;;  %v703_v46 = vld [vmem:[#allocation2 + $0x58] sm:$0xff] (!%p936_p11)  ;;  %v723_v57 = vmul.f32 (!%p936_p11), %v937_v18, %v700_v39 }
 0x133   : > { %677 = vst [vmem:[#allocation2 + $0x28] sm:$0xff] %v661_v15  ;;  %685 = vst [vmem:[#allocation2 + $0x68] sm:$0xff] %v669_v16  ;;  %v716_v24 = vmul.f32 (!%p936_p11), %v937_v18, %v693_v21  ;;  %v738_v30 = vadd.f32 (!%p936_p11), %v1226_v19, %v715_v20  ;;  %v701_v44 = vld [vmem:[#allocation2 + $0x48] sm:$0xff] (!%p936_p11)  ;;  %v725_v61 = vmul.f32 (!%p936_p11), %v937_v18, %v702_v45 }
 0x134   : > { %v741_v37 = vadd.f32 %v1226_v19, %v718_v26  ;;  %v756_v48 = vmax.f32 %v740_v36, 0.0  ;;  %v724_v60 = vmul.f32 %v937_v18, %v701_v44  ;;  %v726_v62 = vmul.f32 %v937_v18, %v703_v46 }
 0x135   : > { %v739_v35 = vadd.f32 %v1226_v19, %v716_v24  ;;  %v754_v40 = vmax.f32 %v738_v30, 0.0  ;;  %v746_v63 = vadd.f32 %v1226_v19, %v723_v57  ;;  %v748_v4 = vadd.f32 %v1226_v19, %v725_v61 }
 0x136   : > { %v757_v49 = vmax.f32 %v741_v37, 0.0  ;;  %772 = vst [vmem:[%s1311_s4 + $0x10] sm:$0xff] %v756_v48  ;;  %v747_v3 = vadd.f32 %v1226_v19, %v724_v60  ;;  %v749_v5 = vadd.f32 %v1226_v19, %v726_v62 }
 0x137   : > { %v698_v29 = vld [vmem:[#allocation2 + $0x30] sm:$0xff]  ;;  %v755_v47 = vmax.f32 %v739_v35, 0.0  ;;  %770 = vst [vmem:[%s1311_s4] sm:$0xff] %v754_v40  ;;  %v762_v7 = vmax.f32 %v746_v63, 0.0  ;;  %v764_v12 = vmax.f32 %v748_v4, 0.0 }
 0x138   : > { %v696_v27 = vld [vmem:[#allocation2 + $0x20] sm:$0xff]  ;;  %v721_v33 = vmul.f32 %v937_v18, %v698_v29  ;;  %v706_v53 = vld [vmem:[#allocation2 + $0x70] sm:$0xff]  ;;  %773 = vst [vmem:[%s1311_s4 + $0x18] sm:$0xff] %v757_v49  ;;  %v763_v11 = vmax.f32 %v747_v3, 0.0  ;;  %v765_v13 = vmax.f32 %v749_v5, 0.0 }
 0x139   : > { %v719_v31 = vmul.f32 %v937_v18, %v696_v27  ;;  %v699_v34 = vld [vmem:[#allocation2 + $0x38] sm:$0xff]  ;;  %v704_v51 = vld [vmem:[#allocation2 + $0x60] sm:$0xff]  ;;  %771 = vst [vmem:[%s1311_s4 + $0x8] sm:$0xff] %v755_v47  ;;  %v729_v2 = vmul.f32 %v937_v18, %v706_v53  ;;  %778 = vst [vmem:[%s1311_s4 + $0x40] sm:$0xff] %v762_v7 }
 0x13a   : > { %v697_v28 = vld [vmem:[#allocation2 + $0x28] sm:$0xff]  ;;  %v722_v38 = vmul.f32 %v937_v18, %v699_v34  ;;  %v744_v43 = vadd.f32 %v1226_v19, %v721_v33  ;;  %v707_v58 = vld [vmem:[#allocation2 + $0x78] sm:$0xff]  ;;  %v727_v0 = vmul.f32 %v937_v18, %v704_v51  ;;  %779 = vst [vmem:[%s1311_s4 + $0x48] sm:$0xff] %v763_v11  ;;  %780 = vst [vmem:[%s1311_s4 + $0x50] sm:$0xff] %v764_v12 }
 0x13b   : > { %v720_v32 = vmul.f32 %v937_v18, %v697_v28  ;;  %v742_v41 = vadd.f32 %v1226_v19, %v719_v31  ;;  %v705_v52 = vld [vmem:[#allocation2 + $0x68] sm:$0xff]  ;;  %v730_v6 = vmul.f32 %v937_v18, %v707_v58  ;;  %v752_v10 = vadd.f32 %v1226_v19, %v729_v2  ;;  %781 = vst [vmem:[%s1311_s4 + $0x58] sm:$0xff] %v765_v13 }
 0x13c   : > { %v745_v50 = vadd.f32 %v1226_v19, %v722_v38  ;;  %v760_v56 = vmax.f32 %v744_v43, 0.0  ;;  %v728_v1 = vmul.f32 %v937_v18, %v705_v52  ;;  %v750_v8 = vadd.f32 %v1226_v19, %v727_v0 }
 0x13d   : > { %v743_v42 = vadd.f32 %v1226_v19, %v720_v32  ;;  %v758_v54 = vmax.f32 %v742_v41, 0.0  ;;  %v753_v14 = vadd.f32 %v1226_v19, %v730_v6  ;;  %v768_v17 = vmax.f32 %v752_v10, 0.0 }
 0x13e   : > { %v761_v59 = vmax.f32 %v745_v50, 0.0  ;;  %776 = vst [vmem:[%s1311_s4 + $0x30] sm:$0xff] %v760_v56  ;;  %v751_v9 = vadd.f32 %v1226_v19, %v728_v1  ;;  %v766_v15 = vmax.f32 %v750_v8, 0.0 }
 0x13f   : > { %v759_v55 = vmax.f32 %v743_v42, 0.0  ;;  %774 = vst [vmem:[%s1311_s4 + $0x20] sm:$0xff] %v758_v54  ;;  %v769_v18 = vmax.f32 %v753_v14, 0.0  ;;  %784 = vst [vmem:[%s1311_s4 + $0x70] sm:$0xff] %v768_v17 }
 0x140   : > { %777 = vst [vmem:[%s1311_s4 + $0x38] sm:$0xff] %v761_v59  ;;  %v767_v16 = vmax.f32 %v751_v9, 0.0  ;;  %782 = vst [vmem:[%s1311_s4 + $0x60] sm:$0xff] %v766_v15 }
 0x141   : > { %775 = vst [vmem:[%s1311_s4 + $0x28] sm:$0xff] %v759_v55  ;;  %785 = vst [vmem:[%s1311_s4 + $0x78] sm:$0xff] %v769_v18 }
 0x142   : > { %783 = vst [vmem:[%s1311_s4 + $0x68] sm:$0xff] %v767_v16 }
 0x143 PF: > { %s14_s19 = sadd.s32 1, %s1102_s19   ;;  %s1312_s15 = smov %s1090_s16 }
 0x144   : > { %p11_p12 = scmp.ge.s32.totalorder %s14_s19, 7   ;;  %s1313_s16 = smov %s1165_s23 }
 0x145   : > { %s1314_s17 = smov %s1098_s18  ;;  %s1315_s18 = smov %s1317_s20 }
 0x146   :  { %13 = sbr.rel (!%p11_p12) target bundleno = 3 (0x3), region = 129 }

// kernel: multimodal_classifier_forward.28
= control target key start
LH: loop header
LB: loop body
LE: loop exit
PB: predicated region body
PF: predicated region fallthrough
CT: control target
= control target key end

     0   :  { %s832_s15 = smov 0   ;;  %s834_s16 = smov 0   ;;  %s934_s0 = inlined_call_operand.vmem [shape: bf16[32,640], index: 0, kind: input, shape index: {}]   ;;  %s935_s1 = inlined_call_operand.vmem [shape: bf16[640,128], index: 1, kind: input, shape index: {}]   ;;  %s936_s2 = inlined_call_operand.vmem [shape: f32[1,128], index: 2, kind: input, shape index: {}]   ;;  %s937_s3 = inlined_call_operand.vmem [shape: f32[1,128], index: 3, kind: input, shape index: {}]   ;;  %s938_s4 = inlined_call_operand.vmem [shape: f32[32,128], index: 4, kind: output, shape index: {}]  }
   0x1   :  { %s836_s17 = smov 0   ;;  %s838_s18 = smov 0  }
   0x2   :  { %s840_s19 = smov 0  }
   0x3 LB: > { %s26_s20 = sadd.s32 1, %s800_s18  ;;  %p49_p1 = scmp.ne.s32.totalorder %s792_s16, %s788_s15  ;;  %s804_s19 = sphi %s840_s19, %s14_s19   ;;  %s800_s18 = sphi %s838_s18, %s942_s18   ;;  %s796_s17 = sphi %s836_s17, %s941_s17   ;;  %s792_s16 = sphi %s834_s16, %s940_s16   ;;  %s788_s15 = sphi %s832_s15, %s939_s15  }
   0x4   : > { %p27_p0 = scmp.ge.s32.totalorder %s26_s20, 5  ;;  %p50_p2 = scmp.eq.s32.totalorder %s804_s19, 0 }
   0x5   : > { %s42_s22 = sadd.s32 1, %s792_s16  ;;  %p660_p5 = scmp.ge.s32.totalorder %s804_s19, 5 }
   0x6   : > { %s944_s20 = smov (%p27_p0, %s26_s20), 0  ;;  %p51_p3 = por %p50_p2, %p49_p1 }
   0x7   : > { %s38_s21 = ssub.s32 %s800_s18, %s944_s20  ;;  %195 = sbr.rel (%p660_p5) target bundleno = 21 (0x15), region = 24 }
   0x8   : > { %p40_p4 = scmp.eq.s32.totalorder %s38_s21, 0 }
   0xa   : > { %s867_s23 = scalar_select %p40_p4, %s792_s16, %s42_s22  }
   0xe   : > { %198 = sbr.rel (!%p51_p3) target bundleno = 21 (0x15), region = 28  ;;  %s200_s24 = sand.u32 (%p51_p3), 1, %s792_s16  }
   0xf   : > { %s662_s25 = sshll.u32 (%p51_p3), %s800_s18, 2  ;;  %s661_s26 = sshll.u32 (%p51_p3), %s200_s24, 4 }
  0x10   : > { %s207_s29 = scalar_lea.vmem (%p51_p3), %s934_s0, %s662_s25  ;;  %s202_s30 = scalar_lea.vmem (%p51_p3), [#allocation3], %s661_s26 }
  0x11   : > { %v223_v0 = vld [vmem:[%s207_s29] sm:$0xf] (%p51_p3)  ;;  %v225_v1 = vld [vmem:[%s207_s29 + $0x14] sm:$0xf] (%p51_p3)  ;;  %v227_v2 = vld [vmem:[%s207_s29 + $0x28] sm:$0xf] (%p51_p3) }
  0x12   : > { %224 = vst [vmem:[%s202_s30] sm:$0xf] (%p51_p3), %v223_v0  ;;  %226 = vst [vmem:[%s202_s30 + $0x4] sm:$0xf] (%p51_p3), %v225_v1  ;;  %v229_v3 = vld [vmem:[%s207_s29 + $0x3c] sm:$0xf] (%p51_p3) }
  0x13   : > { %228 = vst [vmem:[%s202_s30 + $0x8] sm:$0xf] (%p51_p3), %v227_v2  ;;  %230 = vst [vmem:[%s202_s30 + $0xc] sm:$0xf] (%p51_p3), %v229_v3 }
  0x15 PF: > { %p663_p6 = scmp.ge.s32.totalorder %s804_s19, 1  ;;  %p272_p7 = scmp.lt.s32.totalorder %s804_s19, 6 }
  0x17   : > { %p273_p8 = pnand %p663_p6, %p272_p7 }
  0x18   : > { %s279_s5 = sand.u32 (!%p273_p8), 1, %s788_s15   ;;  %s665_s6 = sshll.u32 (!%p273_p8), %s796_s17, 4 }
  0x19   : > { %276 = sbr.rel (%p273_p8) target bundleno = 304 (0x130), region = 73  ;;  %s879_s7 = sshll.u32 (!%p273_p8), %s279_s5, 4 }
  0x1a   : > { %p323_p9 = scmp.lt.s32.totalorder (!%p273_p8), %s665_s6, 79  ;;  %s281_s12 = scalar_lea.vmem (!%p273_p8), [#allocation3], %s879_s7 }
  0x1b   : > { %p667_p10 = scmp.ne.s32.totalorder (!%p273_p8), %s796_s17, 0 }
  0x20   : > { %s946_s6 = smov (!%p323_p9, %s665_s6), 79  ;;  %350 = sbr.rel (%p667_p10) target bundleno = 39 (0x27), region = 81 }
  0x21   : > { %s666_s8 = sshll.u32 %s946_s6, 2  ;;  %v806_v4 = vmov (!%p667_p10), 0.0  }
  0x22   : > { %s884_s11 = scalar_lea.vmem %s935_s1, %s666_s8  ;;  %351 = vst [vmem:[#allocation2] sm:$0xff] (!%p667_p10), %v806_v4  ;;  %352 = vst [vmem:[#allocation2 + $0x8] sm:$0xff] (!%p667_p10), %v806_v4 }
  0x23   : > { %353 = vst [vmem:[#allocation2 + $0x10] sm:$0xff] (!%p667_p10), %v806_v4  ;;  %354 = vst [vmem:[#allocation2 + $0x18] sm:$0xff] (!%p667_p10), %v806_v4 }
  0x27 PF: > { %v756_v5 = vld [vmem:[%s884_s11] sm:$0xff]   ;;  %v757_v6 = vld [vmem:[%s884_s11 + $0x8] sm:$0xff]   ;;  %v758_v7 = vld [vmem:[%s884_s11 + $0x10] sm:$0xff]   ;;  %p678_p11 = scmp.ne.s32.totalorder %s796_s17, 4 }
  0x28   : > { %695 = vmatprep.subr.bf16.mxu0 %v756_v5  ;;  %v759_v8 = vld [vmem:[%s884_s11 + $0x18] sm:$0xff]   ;;  %v764_v9 = vld [vmem:[%s281_s12] sm:$0xff]   ;;  %v761_v11 = vld [vmem:[%s884_s11 + $0x28] sm:$0xff]  }
  0x29   : > { %696 = vmatpush3.bf16.msra.mxu0 %v756_v5  ;;  %711 = vmatprep.mubr.bf16.mxu0 %v764_v9  ;;  %v760_v10 = vld [vmem:[%s884_s11 + $0x20] sm:$0xff]   ;;  %v762_v12 = vld [vmem:[%s884_s11 + $0x30] sm:$0xff]   ;;  %v763_v13 = vld [vmem:[%s884_s11 + $0x38] sm:$0xff]  }
  0x2a   : > { %697 = vmatprep.subr.bf16.mxu0 %v757_v6  ;;  %v765_v14 = vld [vmem:[%s281_s12 + $0x8] sm:$0xff]   ;;  %v357_v15 = vld [vmem:[#allocation2 + $0x10] sm:$0xff]  ;;  %v355_v16 = vld [vmem:[#allocation2] sm:$0xff] }
  0x2b   : > { %v358_v18 = vld [vmem:[#allocation2 + $0x18] sm:$0xff]  ;;  %v356_v21 = vld [vmem:[#allocation2 + $0x8] sm:$0xff]  ;;  %v679_v28 = vld [vmem:[%s936_s2] ss:$0 sm:$0xff] (!%p678_p11) }
  0x2c   : > { %v680_v29 = vld [vmem:[%s937_s3] ss:$0 sm:$0xff] (!%p678_p11) }
  0x2d   : > { %698 = vmatpush3.bf16.msra.mxu0 %v757_v6 }
  0x2e   : > { %699 = vmatprep.subr.bf16.mxu0 %v758_v7 }
  0x31   : > { %700 = vmatpush3.bf16.msra.mxu0 %v758_v7 }
  0x32   : > { %701 = vmatprep.subr.bf16.mxu0 %v759_v8 }
  0x35   : > { %702 = vmatpush3.bf16.msra.mxu0 %v759_v8 }
  0x36   : > { %703 = vmatprep.subr.bf16.mxu0 %v760_v10 }
  0x39   : > { %704 = vmatpush3.bf16.msra.mxu0 %v760_v10 }
  0x3a   : > { %705 = vmatprep.subr.bf16.mxu0 %v761_v11 }
  0x3d   : > { %706 = vmatpush3.bf16.msra.mxu0 %v761_v11 }
  0x3e   : > { %707 = vmatprep.subr.bf16.mxu0 %v762_v12 }
  0x41   : > { %708 = vmatpush3.bf16.msra.mxu0 %v762_v12 }
  0x42   : > { %709 = vmatprep.subr.bf16.mxu0 %v763_v13 }
  0x45   : > { %710 = vmatpush3.bf16.msra.mxu0 %v763_v13 }
  0x48   : > { %712 = vmatmul.mubr.bf16.vlgmr.msra.gmra.mrb[0].mxu0 %v765_v14 }
 0x11b   : > { %v713_v17 = vpop.f32.mrb[0].mxu0  ;;  %499 = sbr.rel (%p678_p11) target bundleno = 304 (0x130), region = 85 }
 0x11c   : > { %v490_v19 = vadd.f32 %v713_v17, %v357_v15  ;;  %v473_v20 = vpop.f32.mrb[1].mxu0 }
 0x11d   : > { %v488_v22 = vadd.f32 %v473_v20, %v355_v16  ;;  %v714_v23 = vpop.f32.mrb[2].mxu0 }
 0x11e   : > { %494 = vst [vmem:[#allocation2 + $0x10] sm:$0xff] %v490_v19  ;;  %v491_v24 = vadd.f32 %v714_v23, %v358_v18  ;;  %v476_v25 = vpop.f32.mrb[3].mxu0 }
 0x11f   : > { %492 = vst [vmem:[#allocation2] sm:$0xff] %v488_v22  ;;  %v489_v26 = vadd.f32 %v476_v25, %v356_v21 }
 0x120   : > { %495 = vst [vmem:[#allocation2 + $0x18] sm:$0xff] %v491_v24 }
 0x121   : > { %493 = vst [vmem:[#allocation2 + $0x8] sm:$0xff] %v489_v26 }
 0x125   : > { %v502_v32 = vld [vmem:[#allocation2 + $0x10] sm:$0xff] }
 0x126   : > { %v500_v27 = vld [vmem:[#allocation2] sm:$0xff]  ;;  %v513_v35 = vmul.f32 %v679_v28, %v502_v32 }
 0x127   : > { %v511_v30 = vmul.f32 %v679_v28, %v500_v27  ;;  %v503_v33 = vld [vmem:[#allocation2 + $0x18] sm:$0xff] }
 0x128   : > { %v501_v31 = vld [vmem:[#allocation2 + $0x8] sm:$0xff]  ;;  %v514_v36 = vmul.f32 %v679_v28, %v503_v33  ;;  %v524_v39 = vadd.f32 %v680_v29, %v513_v35 }
 0x129   : > { %v512_v34 = vmul.f32 %v679_v28, %v501_v31  ;;  %v522_v37 = vadd.f32 %v680_v29, %v511_v30 }
 0x12a   : > { %v525_v40 = vadd.f32 %v680_v29, %v514_v36  ;;  %v528_v43 = vmax.f32 %v524_v39, 0.0 }
 0x12b   : > { %v523_v38 = vadd.f32 %v680_v29, %v512_v34  ;;  %v526_v41 = vmax.f32 %v522_v37, 0.0 }
 0x12c   : > { %v529_v44 = vmax.f32 %v525_v40, 0.0  ;;  %532 = vst [vmem:[%s938_s4 + $0x10] sm:$0xff] %v528_v43 }
 0x12d   : > { %v527_v42 = vmax.f32 %v523_v38, 0.0  ;;  %530 = vst [vmem:[%s938_s4] sm:$0xff] %v526_v41 }
 0x12e   : > { %533 = vst [vmem:[%s938_s4 + $0x18] sm:$0xff] %v529_v44 }
 0x12f   : > { %531 = vst [vmem:[%s938_s4 + $0x8] sm:$0xff] %v527_v42 }
 0x130 PF: > { %s14_s19 = sadd.s32 1, %s804_s19   ;;  %s939_s15 = smov %s792_s16 }
 0x131   : > { %p11_p12 = scmp.ge.s32.totalorder %s14_s19, 7   ;;  %s940_s16 = smov %s867_s23 }
 0x132   : > { %s941_s17 = smov %s800_s18  ;;  %s942_s18 = smov %s944_s20 }
 0x133   :  { %13 = sbr.rel (!%p11_p12) target bundleno = 3 (0x3), region = 129 }

// kernel: multimodal_classifier_forward.27
= control target key start
LH: loop header
LB: loop body
LE: loop exit
PB: predicated region body
PF: predicated region fallthrough
CT: control target
= control target key end

     0   :  { %s329_s1 = inlined_call_operand.vmem [shape: bf16[128,128], index: 1, kind: input, shape index: {}]   ;;  %s330_s0 = inlined_call_operand.vmem [shape: bf16[32,128], index: 0, kind: input, shape index: {}]   ;;  %s331_s2 = inlined_call_operand.vmem [shape: f32[1,128], index: 2, kind: input, shape index: {}]   ;;  %s332_s3 = inlined_call_operand.vmem [shape: f32[1,128], index: 3, kind: input, shape index: {}]   ;;  %s333_s4 = inlined_call_operand.vmem [shape: f32[32,128], index: 4, kind: output, shape index: {}]  }
   0x1   :  { %v246_v0 = vld [vmem:[%s329_s1] sm:$0xff]   ;;  %v247_v1 = vld [vmem:[%s329_s1 + $0x8] sm:$0xff]   ;;  %v248_v2 = vld [vmem:[%s329_s1 + $0x10] sm:$0xff]  }
   0x2   :  { %226 = vmatprep.subr.bf16.mxu0 %v246_v0  ;;  %v249_v3 = vld [vmem:[%s329_s1 + $0x18] sm:$0xff]   ;;  %v254_v4 = vld [vmem:[%s330_s0] sm:$0xff]   ;;  %v251_v6 = vld [vmem:[%s329_s1 + $0x28] sm:$0xff]  }
   0x3   :  { %227 = vmatpush3.bf16.msra.mxu0 %v246_v0  ;;  %242 = vmatprep.mubr.bf16.mxu0 %v254_v4  ;;  %v250_v5 = vld [vmem:[%s329_s1 + $0x20] sm:$0xff]   ;;  %v252_v7 = vld [vmem:[%s329_s1 + $0x30] sm:$0xff]   ;;  %v253_v8 = vld [vmem:[%s329_s1 + $0x38] sm:$0xff]  }
   0x4   :  { %228 = vmatprep.subr.bf16.mxu0 %v247_v1  ;;  %v255_v9 = vld [vmem:[%s330_s0 + $0x8] sm:$0xff]   ;;  %v214_v10 = vld [vmem:[%s331_s2] ss:$0 sm:$0xff] }
   0x5   :  { %v215_v12 = vld [vmem:[%s332_s3] ss:$0 sm:$0xff] }
   0x7   :  { %229 = vmatpush3.bf16.msra.mxu0 %v247_v1 }
   0x8   :  { %230 = vmatprep.subr.bf16.mxu0 %v248_v2 }
   0xb   :  { %231 = vmatpush3.bf16.msra.mxu0 %v248_v2 }
   0xc   :  { %232 = vmatprep.subr.bf16.mxu0 %v249_v3 }
   0xf   :  { %233 = vmatpush3.bf16.msra.mxu0 %v249_v3 }
  0x10   :  { %234 = vmatprep.subr.bf16.mxu0 %v250_v5 }
  0x13   :  { %235 = vmatpush3.bf16.msra.mxu0 %v250_v5 }
  0x14   :  { %236 = vmatprep.subr.bf16.mxu0 %v251_v6 }
  0x17   :  { %237 = vmatpush3.bf16.msra.mxu0 %v251_v6 }
  0x18   :  { %238 = vmatprep.subr.bf16.mxu0 %v252_v7 }
  0x1b   :  { %239 = vmatpush3.bf16.msra.mxu0 %v252_v7 }
  0x1c   :  { %240 = vmatprep.subr.bf16.mxu0 %v253_v8 }
  0x1f   :  { %241 = vmatpush3.bf16.msra.mxu0 %v253_v8 }
  0x22   :  { %243 = vmatmul.mubr.bf16.vlgmr.msra.gmra.mrb[0].mxu0 %v255_v9 }
  0xf5   :  { %v244_v11 = vpop.f32.mrb[0].mxu0 }
  0xf6   :  { %v183_v13 = vmul.f32 %v244_v11, %v214_v10  ;;  %v144_v14 = vpop.f32.mrb[1].mxu0 }
  0xf7   :  { %v181_v15 = vmul.f32 %v214_v10, %v144_v14  ;;  %v245_v16 = vpop.f32.mrb[2].mxu0 }
  0xf8   :  { %v194_v17 = vadd.f32 %v215_v12, %v183_v13  ;;  %v184_v18 = vmul.f32 %v245_v16, %v214_v10  ;;  %v147_v19 = vpop.f32.mrb[3].mxu0 }
  0xf9   :  { %v192_v20 = vadd.f32 %v215_v12, %v181_v15  ;;  %v182_v21 = vmul.f32 %v214_v10, %v147_v19 }
  0xfa   :  { %198 = vst [vmem:[%s333_s4 + $0x10] sm:$0xff] %v194_v17  ;;  %v195_v22 = vadd.f32 %v215_v12, %v184_v18 }
  0xfb   :  { %196 = vst [vmem:[%s333_s4] sm:$0xff] %v192_v20  ;;  %v193_v23 = vadd.f32 %v215_v12, %v182_v21 }
  0xfc   :  { %199 = vst [vmem:[%s333_s4 + $0x18] sm:$0xff] %v195_v22 }
  0xfd   :  { %197 = vst [vmem:[%s333_s4 + $0x8] sm:$0xff] %v193_v23 }

// kernel: multimodal_classifier_forward.30
= control target key start
LH: loop header
LB: loop body
LE: loop exit
PB: predicated region body
PF: predicated region fallthrough
CT: control target
= control target key end

     0   :  { %s1107_s15 = smov 0   ;;  %s1109_s16 = smov 0   ;;  %s1226_s0 = inlined_call_operand.vmem [shape: bf16[32,1152], index: 0, kind: input, shape index: {}]   ;;  %s1227_s1 = inlined_call_operand.vmem [shape: bf16[1152,128], index: 1, kind: input, shape index: {}]   ;;  %s1228_s2 = inlined_call_operand.vmem [shape: f32[1,128], index: 2, kind: input, shape index: {}]   ;;  %s1229_s3 = inlined_call_operand.vmem [shape: f32[1,128], index: 3, kind: input, shape index: {}]   ;;  %s1230_s4 = inlined_call_operand.vmem [shape: f32[32,128], index: 4, kind: output, shape index: {}]  }
   0x1   :  { %s1111_s17 = smov 0   ;;  %s1113_s18 = smov 0  }
   0x2   :  { %s1115_s19 = smov 0  }
   0x3 LB: > { %s26_s20 = sadd.s32 1, %s1075_s18  ;;  %p49_p1 = scmp.ne.s32.totalorder %s1067_s16, %s1063_s15  ;;  %s1079_s19 = sphi %s1115_s19, %s14_s19   ;;  %s1075_s18 = sphi %s1113_s18, %s1234_s18   ;;  %s1071_s17 = sphi %s1111_s17, %s1233_s17   ;;  %s1067_s16 = sphi %s1109_s16, %s1232_s16   ;;  %s1063_s15 = sphi %s1107_s15, %s1231_s15  }
   0x4   : > { %p27_p0 = scmp.ge.s32.totalorder %s26_s20, 3  ;;  %p50_p2 = scmp.eq.s32.totalorder %s1079_s19, 0 }
   0x5   : > { %s42_s22 = sadd.s32 1, %s1067_s16  ;;  %p857_p5 = scmp.ge.s32.totalorder %s1079_s19, 3 }
   0x6   : > { %s1236_s20 = smov (%p27_p0, %s26_s20), 0  ;;  %p51_p3 = por %p50_p2, %p49_p1 }
   0x7   : > { %s38_s21 = ssub.s32 %s1075_s18, %s1236_s20  ;;  %195 = sbr.rel (%p857_p5) target bundleno = 23 (0x17), region = 24 }
   0x8   : > { %p40_p4 = scmp.eq.s32.totalorder %s38_s21, 0 }
   0xa   : > { %s1142_s23 = scalar_select %p40_p4, %s1067_s16, %s42_s22  }
   0xe   : > { %198 = sbr.rel (!%p51_p3) target bundleno = 23 (0x17), region = 28  ;;  %s200_s24 = sand.u32 (%p51_p3), 1, %s1067_s16  }
   0xf   : > { %s907_s25 = smul.u32 (%p51_p3), 12, %s1075_s18 }
  0x10   : > { %s966_s26 = smul.u32 (%p51_p3), 48, %s200_s24 }
  0x11   : > { %s208_s29 = scalar_lea.vmem (%p51_p3), %s1226_s0, %s907_s25 }
  0x12   : > { %v223_v0 = vld [vmem:[%s208_s29] sm:$0xff] (%p51_p3)  ;;  %v227_v2 = vld [vmem:[%s208_s29 + $0x48] sm:$0xff] (%p51_p3)  ;;  %s202_s30 = scalar_lea.vmem (%p51_p3), [#allocation3], %s966_s26  ;;  %v863_v6 = vld [vmem:[%s208_s29 + $0x50] sm:$0xf] (%p51_p3) }
  0x13   : > { %v225_v1 = vld [vmem:[%s208_s29 + $0x24] sm:$0xff] (%p51_p3)  ;;  %224 = vst [vmem:[%s202_s30] sm:$0xff] (%p51_p3), %v223_v0  ;;  %228 = vst [vmem:[%s202_s30 + $0x18] sm:$0xff] (%p51_p3), %v227_v2  ;;  %v229_v3 = vld [vmem:[%s208_s29 + $0x6c] sm:$0xff] (%p51_p3) }
  0x14   : > { %226 = vst [vmem:[%s202_s30 + $0xc] sm:$0xff] (%p51_p3), %v225_v1  ;;  %v859_v4 = vld [vmem:[%s208_s29 + $0x8] sm:$0xf] (%p51_p3)  ;;  %v861_v5 = vld [vmem:[%s208_s29 + $0x2c] sm:$0xf] (%p51_p3)  ;;  %230 = vst [vmem:[%s202_s30 + $0x24] sm:$0xff] (%p51_p3), %v229_v3 }
  0x15   : > { %860 = vst [vmem:[%s202_s30 + $0x8] sm:$0xf] %v859_v4  ;;  %862 = vst [vmem:[%s202_s30 + $0x14] sm:$0xf] %v861_v5  ;;  %v865_v7 = vld [vmem:[%s208_s29 + $0x74] sm:$0xf] }
  0x16   : > { %864 = vst [vmem:[%s202_s30 + $0x20] sm:$0xf] %v863_v6  ;;  %866 = vst [vmem:[%s202_s30 + $0x2c] sm:$0xf] %v865_v7 }
  0x17 PF: > { %p867_p6 = scmp.ge.s32.totalorder %s1079_s19, 1  ;;  %p262_p7 = scmp.lt.s32.totalorder %s1079_s19, 4 }
  0x19   : > { %p263_p8 = pnand %p867_p6, %p262_p7 }
  0x1a   : > { %s269_s5 = sand.u32 (!%p263_p8), 1, %s1063_s15   ;;  %s313_s6 = smul.u32 (!%p263_p8), 48, %s1071_s17 }
  0x1b   : > { %266 = sbr.rel (%p263_p8) target bundleno = 318 (0x13e), region = 58  ;;  %p869_p10 = scmp.ne.s32.totalorder (!%p263_p8), %s1071_s17, 0 }
  0x1c   : > { %s967_s7 = smul.u32 (!%p263_p8), 48, %s269_s5  ;;  %p314_p9 = scmp.lt.s32.totalorder (!%p263_p8), %s313_s6, 143 }
  0x1e   : > { %s1159_s12 = scalar_lea.vmem (!%p263_p8), [#allocation3], %s967_s7 }
  0x22   : > { %s1238_s6 = smov (!%p314_p9, %s313_s6), 143  ;;  %341 = sbr.rel (%p869_p10) target bundleno = 41 (0x29), region = 66 }
  0x23   : > { %s868_s8 = sshll.u32 %s1238_s6, 2  ;;  %v1081_v8 = vmov (!%p869_p10), 0.0  }
  0x24   : > { %s1157_s11 = scalar_lea.vmem %s1227_s1, %s868_s8  ;;  %342 = vst [vmem:[#allocation2] sm:$0xff] (!%p869_p10), %v1081_v8  ;;  %343 = vst [vmem:[#allocation2 + $0x8] sm:$0xff] (!%p869_p10), %v1081_v8 }
  0x25   : > { %344 = vst [vmem:[#allocation2 + $0x10] sm:$0xff] (!%p869_p10), %v1081_v8  ;;  %345 = vst [vmem:[#allocation2 + $0x18] sm:$0xff] (!%p869_p10), %v1081_v8 }
  0x29 PF: > { %v1009_v9 = vld [vmem:[%s1157_s11 + $0x40] sm:$0xff]   ;;  %v1012_v12 = vld [vmem:[%s1157_s11 + $0x48] sm:$0xff]   ;;  %v1015_v15 = vld [vmem:[%s1157_s11 + $0x50] sm:$0xff]   ;;  %p900_p11 = scmp.ne.s32.totalorder %s1071_s17, 2 }
  0x2a   : > { %v1010_v10 = vld [vmem:[%s1157_s11] sm:$0xff]   ;;  %908 = vmatprep.subr.bf16.mxu0 %v1009_v9  ;;  %v1013_v13 = vld [vmem:[%s1157_s11 + $0x8] sm:$0xff]   ;;  %v1016_v16 = vld [vmem:[%s1157_s11 + $0x10] sm:$0xff]  }
  0x2b   : > { %v1011_v11 = vld [vmem:[%s1157_s11 + $0x80] sm:$0xff]   ;;  %909 = vmatpush3.bf16.msra.mxu0 %v1010_v10  ;;  %v1014_v14 = vld [vmem:[%s1157_s11 + $0x88] sm:$0xff]   ;;  %v1017_v17 = vld [vmem:[%s1157_s11 + $0x90] sm:$0xff]  }
  0x2c   : > { %946 = vmatprep.subr.bf16.mxu1 %v1011_v11  ;;  %910 = vmatprep.subr.bf16.mxu0 %v1012_v12  ;;  %v1018_v18 = vld [vmem:[%s1157_s11 + $0x58] sm:$0xff]   ;;  %v1021_v21 = vld [vmem:[%s1157_s11 + $0x60] sm:$0xff]   ;;  %v1024_v24 = vld [vmem:[%s1157_s11 + $0x68] sm:$0xff]  }
  0x2d   : > { %947 = vmatpush3.bf16.msra.mxu1 %v1011_v11  ;;  %v1019_v19 = vld [vmem:[%s1157_s11 + $0x18] sm:$0xff]   ;;  %v1023_v22 = vld [vmem:[%s1157_s11 + $0xa0] sm:$0xff]   ;;  %v1026_v25 = vld [vmem:[%s1157_s11 + $0xa8] sm:$0xff]  }
  0x2e   : > { %948 = vmatprep.subr.bf16.mxu1 %v1014_v14  ;;  %v1020_v20 = vld [vmem:[%s1157_s11 + $0x98] sm:$0xff]   ;;  %v1022_v23 = vld [vmem:[%s1157_s11 + $0x20] sm:$0xff]   ;;  %v1025_v26 = vld [vmem:[%s1157_s11 + $0x28] sm:$0xff]  }
  0x2f   : > { %911 = vmatpush3.bf16.msra.mxu0 %v1013_v13  ;;  %v1027_v27 = vld [vmem:[%s1157_s11 + $0x70] sm:$0xff]   ;;  %v1030_v30 = vld [vmem:[%s1157_s11 + $0x78] sm:$0xff]   ;;  %v346_v45 = vld [vmem:[#allocation2] sm:$0xff] }
  0x30   : > { %912 = vmatprep.subr.bf16.mxu0 %v1015_v15  ;;  %v1028_v28 = vld [vmem:[%s1157_s11 + $0x30] sm:$0xff]   ;;  %v1032_v31 = vld [vmem:[%s1157_s11 + $0xb8] sm:$0xff]   ;;  %v347_v50 = vld [vmem:[#allocation2 + $0x8] sm:$0xff] }
  0x31   : > { %949 = vmatpush3.bf16.msra.mxu1 %v1014_v14  ;;  %v1029_v29 = vld [vmem:[%s1157_s11 + $0xb0] sm:$0xff]   ;;  %v1031_v34 = vld [vmem:[%s1157_s11 + $0x38] sm:$0xff]   ;;  %v901_v4 = vld [vmem:[%s1228_s2] ss:$0 sm:$0xff] (!%p900_p11) }
  0x32   : > { %950 = vmatprep.subr.bf16.mxu1 %v1017_v17  ;;  %v1035_v32 = vld [vmem:[%s1159_s12 + $0x4] ss:$12 sps:$4 sm:$0xff]   ;;  %v1036_v33 = vld [vmem:[%s1159_s12 + $0x8] ss:$12 sps:$4 sm:$0xff]   ;;  %v1033_v35 = vld [vmem:[%s1159_s12] ss:$12 sps:$4 sm:$0xff]  }
  0x33   : > { %913 = vmatpush3.bf16.msra.mxu0 %v1016_v16  ;;  %614 = vmatprep.mubr.bf16.mxu0 %v1035_v32  ;;  %v1038_v36 = vld [vmem:[%s1159_s12 + $0x1c] ss:$12 sps:$4 sm:$0xff]   ;;  %v1037_v37 = vld [vmem:[%s1159_s12 + $0x20] ss:$12 sps:$4 sm:$0xff]   ;;  %v1040_v38 = vld [vmem:[%s1159_s12 + $0x18] ss:$12 sps:$4 sm:$0xff]  }
  0x34   : > { %914 = vmatprep.subr.bf16.mxu0 %v1018_v18  ;;  %962 = vmatprep.mubr.bf16.mxu1 %v1036_v33  ;;  %v348_v59 = vld [vmem:[#allocation2 + $0x10] sm:$0xff]  ;;  %v349_v63 = vld [vmem:[#allocation2 + $0x18] sm:$0xff]  ;;  %v902_v5 = vld [vmem:[%s1229_s3] ss:$0 sm:$0xff] (!%p900_p11) }
  0x35   : > { %951 = vmatpush3.bf16.msra.mxu1 %v1017_v17 }
  0x36   : > { %952 = vmatprep.subr.bf16.mxu1 %v1020_v20 }
  0x37   : > { %915 = vmatpush3.bf16.msra.mxu0 %v1019_v19 }
  0x38   : > { %916 = vmatprep.subr.bf16.mxu0 %v1021_v21 }
  0x39   : > { %953 = vmatpush3.bf16.msra.mxu1 %v1020_v20 }
  0x3a   : > { %954 = vmatprep.subr.bf16.mxu1 %v1023_v22 }
  0x3b   : > { %917 = vmatpush3.bf16.msra.mxu0 %v1022_v23 }
  0x3c   : > { %918 = vmatprep.subr.bf16.mxu0 %v1024_v24 }
  0x3d   : > { %955 = vmatpush3.bf16.msra.mxu1 %v1023_v22 }
  0x3e   : > { %956 = vmatprep.subr.bf16.mxu1 %v1026_v25 }
  0x3f   : > { %919 = vmatpush3.bf16.msra.mxu0 %v1025_v26 }
  0x40   : > { %920 = vmatprep.subr.bf16.mxu0 %v1027_v27 }
  0x41   : > { %957 = vmatpush3.bf16.msra.mxu1 %v1026_v25 }
  0x42   : > { %958 = vmatprep.subr.bf16.mxu1 %v1029_v29 }
  0x43   : > { %921 = vmatpush3.bf16.msra.mxu0 %v1028_v28 }
  0x44   : > { %922 = vmatprep.subr.bf16.mxu0 %v1030_v30 }
  0x45   : > { %959 = vmatpush3.bf16.msra.mxu1 %v1029_v29 }
  0x46   : > { %960 = vmatprep.subr.bf16.mxu1 %v1032_v31 }
  0x47   : > { %923 = vmatpush3.bf16.msra.mxu0 %v1031_v34 }
  0x49   : > { %961 = vmatpush3.bf16.msra.mxu1 %v1032_v31 }
  0x4a   : > { %615 = vmatmul.mubr.bf16.vlgmr.msra.gmra.mrb[0].mxu0 %v1033_v35 }
  0x4b   : > { %622 = vmatprep.mubr.bf16.mxu0 %v1038_v36 }
  0x4c   : > { %963 = vmatmul.mubr.bf16.vlgmr.msra.gmra.mrb[0].mxu1 %v1037_v37 }
  0x52   : > { %623 = vmatmul.mubr.bf16.gmra.mrb[4].mxu0 %v1040_v38 }
 0x11d   : > { %v924_v39 = vpop.f32.mrb[0].mxu0 }
 0x11e   : > { %v925_v40 = vpop.f32.mrb[1].mxu0 }
 0x11f   : > { %v926_v41 = vadd.f32 %v925_v40, %v924_v39  ;;  %v927_v42 = vpop.f32.mrb[2].mxu0  ;;  %v964_v43 = vpop.f32.mrb[0].mxu1 }
 0x120   : > { %v928_v44 = vpop.f32.mrb[3].mxu0  ;;  %v665_v46 = vpop.f32.mrb[1].mxu1 }
 0x121   : > { %v929_v47 = vadd.f32 %v928_v44, %v927_v42  ;;  %v666_v48 = vadd.f32 %v926_v41, %v665_v46  ;;  %v965_v49 = vpop.f32.mrb[2].mxu1 }
 0x122   : > { %v668_v51 = vpop.f32.mrb[3].mxu1 }
 0x123   : > { %v680_v52 = vadd.f32 %v666_v48, %v346_v45  ;;  %v669_v53 = vadd.f32 %v929_v47, %v668_v51 }
 0x125   : > { %684 = vst [vmem:[#allocation2] sm:$0xff] %v680_v52  ;;  %v681_v54 = vadd.f32 %v669_v53, %v347_v50  ;;  %v930_v55 = vpop.f32.mrb[4].mxu0 }
 0x126   : > { %v931_v56 = vpop.f32.mrb[5].mxu0 }
 0x127   : > { %685 = vst [vmem:[#allocation2 + $0x8] sm:$0xff] %v681_v54  ;;  %v932_v57 = vadd.f32 %v931_v56, %v930_v55  ;;  %v933_v58 = vpop.f32.mrb[6].mxu0 }
 0x128   : > { %v934_v60 = vpop.f32.mrb[7].mxu0 }
 0x129   : > { %v674_v61 = vadd.f32 %v964_v43, %v932_v57  ;;  %v935_v62 = vadd.f32 %v934_v60, %v933_v58  ;;  %691 = sbr.rel (%p900_p11) target bundleno = 318 (0x13e), region = 70 }
 0x12b   : > { %v682_v0 = vadd.f32 %v674_v61, %v348_v59  ;;  %v677_v1 = vadd.f32 %v965_v49, %v935_v62 }
 0x12c   : > { %v692_v3 = vld [vmem:[#allocation2] sm:$0xff] (!%p900_p11) }
 0x12d   : > { %686 = vst [vmem:[#allocation2 + $0x10] sm:$0xff] %v682_v0  ;;  %v683_v2 = vadd.f32 %v677_v1, %v349_v63  ;;  %v703_v6 = vmul.f32 (!%p900_p11), %v901_v4, %v692_v3 }
 0x12e   : > { %v693_v7 = vld [vmem:[#allocation2 + $0x8] sm:$0xff] (!%p900_p11) }
 0x12f   : > { %687 = vst [vmem:[#allocation2 + $0x18] sm:$0xff] %v683_v2  ;;  %v704_v10 = vmul.f32 (!%p900_p11), %v901_v4, %v693_v7  ;;  %v714_v13 = vadd.f32 (!%p900_p11), %v902_v5, %v703_v6 }
 0x131   : > { %v715_v14 = vadd.f32 %v902_v5, %v704_v10  ;;  %v718_v17 = vmax.f32 %v714_v13, 0.0 }
 0x133   : > { %v719_v18 = vmax.f32 %v715_v14, 0.0  ;;  %722 = vst [vmem:[%s1230_s4] sm:$0xff] %v718_v17 }
 0x134   : > { %v694_v8 = vld [vmem:[#allocation2 + $0x10] sm:$0xff] }
 0x135   : > { %v705_v11 = vmul.f32 %v901_v4, %v694_v8  ;;  %723 = vst [vmem:[%s1230_s4 + $0x8] sm:$0xff] %v719_v18 }
 0x136   : > { %v695_v9 = vld [vmem:[#allocation2 + $0x18] sm:$0xff] }
 0x137   : > { %v706_v12 = vmul.f32 %v901_v4, %v695_v9  ;;  %v716_v15 = vadd.f32 %v902_v5, %v705_v11 }
 0x139   : > { %v717_v16 = vadd.f32 %v902_v5, %v706_v12  ;;  %v720_v19 = vmax.f32 %v716_v15, 0.0 }
 0x13b   : > { %v721_v20 = vmax.f32 %v717_v16, 0.0  ;;  %724 = vst [vmem:[%s1230_s4 + $0x10] sm:$0xff] %v720_v19 }
 0x13d   : > { %725 = vst [vmem:[%s1230_s4 + $0x18] sm:$0xff] %v721_v20 }
 0x13e PF: > { %s14_s19 = sadd.s32 1, %s1079_s19   ;;  %s1231_s15 = smov %s1067_s16 }
 0x13f   : > { %p11_p12 = scmp.ge.s32.totalorder %s14_s19, 5   ;;  %s1232_s16 = smov %s1142_s23 }
 0x140   : > { %s1233_s17 = smov %s1075_s18  ;;  %s1234_s18 = smov %s1236_s20 }
 0x141   :  { %13 = sbr.rel (!%p11_p12) target bundleno = 3 (0x3), region = 120 }

// kernel: multimodal_classifier_forward.29
= control target key start
LH: loop header
LB: loop body
LE: loop exit
PB: predicated region body
PF: predicated region fallthrough
CT: control target
= control target key end

     0   :  { %s1199_s18 = smov 0   ;;  %s1201_s19 = smov 0   ;;  %s1330_s0 = inlined_call_operand.vmem [shape: bf16[32,1152], index: 0, kind: input, shape index: {}]   ;;  %s1331_s1 = inlined_call_operand.vmem [shape: bf16[1152,128], index: 1, kind: input, shape index: {}]   ;;  %s1332_s2 = inlined_call_operand.vmem [shape: f32[1,128], index: 2, kind: input, shape index: {}]   ;;  %s1333_s3 = inlined_call_operand.vmem [shape: f32[1,128], index: 3, kind: input, shape index: {}]   ;;  %s1334_s4 = inlined_call_operand.vmem [shape: f32[32,128], index: 4, kind: input, shape index: {}]   ;;  %s1335_s5 = inlined_call_operand.vmem [shape: f32[32,128], index: 5, kind: output, shape index: {}]  }
   0x1   :  { %s1203_s20 = smov 0   ;;  %s1205_s21 = smov 0  }
   0x2   :  { %s1207_s22 = smov 0  }
   0x3 LB: > { %s27_s23 = sadd.s32 1, %s1162_s21  ;;  %p50_p1 = scmp.ne.s32.totalorder %s1154_s19, %s1150_s18  ;;  %s1166_s22 = sphi %s1207_s22, %s15_s22   ;;  %s1162_s21 = sphi %s1205_s21, %s1339_s21   ;;  %s1158_s20 = sphi %s1203_s20, %s1338_s20   ;;  %s1154_s19 = sphi %s1201_s19, %s1337_s19   ;;  %s1150_s18 = sphi %s1199_s18, %s1336_s18  }
   0x4   : > { %p28_p0 = scmp.ge.s32.totalorder %s27_s23, 3  ;;  %p51_p2 = scmp.eq.s32.totalorder %s1166_s22, 0 }
   0x5   : > { %s43_s25 = sadd.s32 1, %s1154_s19  ;;  %p944_p5 = scmp.ge.s32.totalorder %s1166_s22, 3 }
   0x6   : > { %s1341_s23 = smov (%p28_p0, %s27_s23), 0  ;;  %p52_p3 = por %p51_p2, %p50_p1 }
   0x7   : > { %s39_s24 = ssub.s32 %s1162_s21, %s1341_s23  ;;  %236 = sbr.rel (%p944_p5) target bundleno = 23 (0x17), region = 28 }
   0x8   : > { %p41_p4 = scmp.eq.s32.totalorder %s39_s24, 0 }
   0xa   : > { %s1234_s26 = scalar_select %p41_p4, %s1154_s19, %s43_s25  }
   0xe   : > { %239 = sbr.rel (!%p52_p3) target bundleno = 23 (0x17), region = 32  ;;  %s241_s27 = sand.u32 (%p52_p3), 1, %s1154_s19  }
   0xf   : > { %s994_s28 = smul.u32 (%p52_p3), 12, %s1162_s21 }
  0x10   : > { %s1053_s29 = smul.u32 (%p52_p3), 48, %s241_s27 }
  0x11   : > { %s249_s7 = scalar_lea.vmem (%p52_p3), %s1330_s0, %s994_s28 }
  0x12   : > { %v264_v0 = vld [vmem:[%s249_s7] sm:$0xff] (%p52_p3)  ;;  %v268_v2 = vld [vmem:[%s249_s7 + $0x48] sm:$0xff] (%p52_p3)  ;;  %s243_s8 = scalar_lea.vmem (%p52_p3), [#allocation3], %s1053_s29  ;;  %v950_v6 = vld [vmem:[%s249_s7 + $0x50] sm:$0xf] (%p52_p3) }
  0x13   : > { %v266_v1 = vld [vmem:[%s249_s7 + $0x24] sm:$0xff] (%p52_p3)  ;;  %265 = vst [vmem:[%s243_s8] sm:$0xff] (%p52_p3), %v264_v0  ;;  %269 = vst [vmem:[%s243_s8 + $0x18] sm:$0xff] (%p52_p3), %v268_v2  ;;  %v270_v3 = vld [vmem:[%s249_s7 + $0x6c] sm:$0xff] (%p52_p3) }
  0x14   : > { %267 = vst [vmem:[%s243_s8 + $0xc] sm:$0xff] (%p52_p3), %v266_v1  ;;  %v946_v4 = vld [vmem:[%s249_s7 + $0x8] sm:$0xf] (%p52_p3)  ;;  %v948_v5 = vld [vmem:[%s249_s7 + $0x2c] sm:$0xf] (%p52_p3)  ;;  %271 = vst [vmem:[%s243_s8 + $0x24] sm:$0xff] (%p52_p3), %v270_v3 }
  0x15   : > { %947 = vst [vmem:[%s243_s8 + $0x8] sm:$0xf] %v946_v4  ;;  %949 = vst [vmem:[%s243_s8 + $0x14] sm:$0xf] %v948_v5  ;;  %v952_v7 = vld [vmem:[%s249_s7 + $0x74] sm:$0xf] }
  0x16   : > { %951 = vst [vmem:[%s243_s8 + $0x20] sm:$0xf] %v950_v6  ;;  %953 = vst [vmem:[%s243_s8 + $0x2c] sm:$0xf] %v952_v7 }
  0x17 PF: > { %p954_p6 = scmp.ge.s32.totalorder %s1166_s22, 1  ;;  %p303_p7 = scmp.lt.s32.totalorder %s1166_s22, 4 }
  0x19   : > { %p304_p8 = pnand %p954_p6, %p303_p7 }
  0x1a   : > { %s310_s9 = sand.u32 (!%p304_p8), 1, %s1150_s18   ;;  %s364_s10 = smul.u32 (!%p304_p8), 48, %s1158_s20 }
  0x1b   : > { %307 = sbr.rel (%p304_p8) target bundleno = 320 (0x140), region = 62  ;;  %p956_p10 = scmp.ne.s32.totalorder (!%p304_p8), %s1158_s20, 0 }
  0x1c   : > { %s1054_s11 = smul.u32 (!%p304_p8), 48, %s310_s9  ;;  %p365_p9 = scmp.lt.s32.totalorder (!%p304_p8), %s364_s10, 143 }
  0x1e   : > { %s1251_s16 = scalar_lea.vmem (!%p304_p8), [#allocation3], %s1054_s11 }
  0x22   : > { %s1343_s10 = smov (!%p365_p9, %s364_s10), 143  ;;  %401 = sbr.rel (%p956_p10) target bundleno = 41 (0x29), region = 70 }
  0x23   : > { %s955_s12 = sshll.u32 %s1343_s10, 2  ;;  %v1168_v8 = vmov (!%p956_p10), 0.0  }
  0x24   : > { %s1249_s15 = scalar_lea.vmem %s1331_s1, %s955_s12  ;;  %402 = vst [vmem:[#allocation2] sm:$0xff] (!%p956_p10), %v1168_v8  ;;  %403 = vst [vmem:[#allocation2 + $0x8] sm:$0xff] (!%p956_p10), %v1168_v8 }
  0x25   : > { %404 = vst [vmem:[#allocation2 + $0x10] sm:$0xff] (!%p956_p10), %v1168_v8  ;;  %405 = vst [vmem:[#allocation2 + $0x18] sm:$0xff] (!%p956_p10), %v1168_v8 }
  0x29 PF: > { %v1096_v9 = vld [vmem:[%s1249_s15 + $0x40] sm:$0xff]   ;;  %v1099_v12 = vld [vmem:[%s1249_s15 + $0x48] sm:$0xff]   ;;  %v1102_v15 = vld [vmem:[%s1249_s15 + $0x50] sm:$0xff]   ;;  %p987_p11 = scmp.ne.s32.totalorder %s1158_s20, 2 }
  0x2a   : > { %v1097_v10 = vld [vmem:[%s1249_s15] sm:$0xff]   ;;  %995 = vmatprep.subr.bf16.mxu0 %v1096_v9  ;;  %v1100_v13 = vld [vmem:[%s1249_s15 + $0x8] sm:$0xff]   ;;  %v1103_v16 = vld [vmem:[%s1249_s15 + $0x10] sm:$0xff]  }
  0x2b   : > { %v1098_v11 = vld [vmem:[%s1249_s15 + $0x80] sm:$0xff]   ;;  %996 = vmatpush3.bf16.msra.mxu0 %v1097_v10  ;;  %v1101_v14 = vld [vmem:[%s1249_s15 + $0x88] sm:$0xff]   ;;  %v1104_v17 = vld [vmem:[%s1249_s15 + $0x90] sm:$0xff]  }
  0x2c   : > { %1033 = vmatprep.subr.bf16.mxu1 %v1098_v11  ;;  %997 = vmatprep.subr.bf16.mxu0 %v1099_v12  ;;  %v1105_v18 = vld [vmem:[%s1249_s15 + $0x58] sm:$0xff]   ;;  %v1108_v21 = vld [vmem:[%s1249_s15 + $0x60] sm:$0xff]   ;;  %v1111_v24 = vld [vmem:[%s1249_s15 + $0x68] sm:$0xff]  }
  0x2d   : > { %1034 = vmatpush3.bf16.msra.mxu1 %v1098_v11  ;;  %v1106_v19 = vld [vmem:[%s1249_s15 + $0x18] sm:$0xff]   ;;  %v1110_v22 = vld [vmem:[%s1249_s15 + $0xa0] sm:$0xff]   ;;  %v1113_v25 = vld [vmem:[%s1249_s15 + $0xa8] sm:$0xff]  }
  0x2e   : > { %1035 = vmatprep.subr.bf16.mxu1 %v1101_v14  ;;  %v1107_v20 = vld [vmem:[%s1249_s15 + $0x98] sm:$0xff]   ;;  %v1109_v23 = vld [vmem:[%s1249_s15 + $0x20] sm:$0xff]   ;;  %v1112_v26 = vld [vmem:[%s1249_s15 + $0x28] sm:$0xff]  }
  0x2f   : > { %998 = vmatpush3.bf16.msra.mxu0 %v1100_v13  ;;  %v1114_v27 = vld [vmem:[%s1249_s15 + $0x70] sm:$0xff]   ;;  %v1117_v30 = vld [vmem:[%s1249_s15 + $0x78] sm:$0xff]   ;;  %v406_v45 = vld [vmem:[#allocation2] sm:$0xff] }
  0x30   : > { %999 = vmatprep.subr.bf16.mxu0 %v1102_v15  ;;  %v1115_v28 = vld [vmem:[%s1249_s15 + $0x30] sm:$0xff]   ;;  %v1119_v31 = vld [vmem:[%s1249_s15 + $0xb8] sm:$0xff]   ;;  %v407_v50 = vld [vmem:[#allocation2 + $0x8] sm:$0xff] }
  0x31   : > { %1036 = vmatpush3.bf16.msra.mxu1 %v1101_v14  ;;  %v1116_v29 = vld [vmem:[%s1249_s15 + $0xb0] sm:$0xff]   ;;  %v1118_v34 = vld [vmem:[%s1249_s15 + $0x38] sm:$0xff]   ;;  %v988_v4 = vld [vmem:[%s1332_s2] ss:$0 sm:$0xff] (!%p987_p11) }
  0x32   : > { %1037 = vmatprep.subr.bf16.mxu1 %v1104_v17  ;;  %v1122_v32 = vld [vmem:[%s1251_s16 + $0x4] ss:$12 sps:$4 sm:$0xff]   ;;  %v1123_v33 = vld [vmem:[%s1251_s16 + $0x8] ss:$12 sps:$4 sm:$0xff]   ;;  %v1120_v35 = vld [vmem:[%s1251_s16] ss:$12 sps:$4 sm:$0xff]  }
  0x33   : > { %1000 = vmatpush3.bf16.msra.mxu0 %v1103_v16  ;;  %674 = vmatprep.mubr.bf16.mxu0 %v1122_v32  ;;  %v1125_v36 = vld [vmem:[%s1251_s16 + $0x1c] ss:$12 sps:$4 sm:$0xff]   ;;  %v1124_v37 = vld [vmem:[%s1251_s16 + $0x20] ss:$12 sps:$4 sm:$0xff]   ;;  %v1127_v38 = vld [vmem:[%s1251_s16 + $0x18] ss:$12 sps:$4 sm:$0xff]  }
  0x34   : > { %1001 = vmatprep.subr.bf16.mxu0 %v1105_v18  ;;  %1049 = vmatprep.mubr.bf16.mxu1 %v1123_v33  ;;  %v408_v59 = vld [vmem:[#allocation2 + $0x10] sm:$0xff]  ;;  %v409_v63 = vld [vmem:[#allocation2 + $0x18] sm:$0xff]  ;;  %v989_v5 = vld [vmem:[%s1333_s3] ss:$0 sm:$0xff] (!%p987_p11) }
  0x35   : > { %1038 = vmatpush3.bf16.msra.mxu1 %v1104_v17  ;;  %v778_v8 = vld [vmem:[%s1334_s4] sm:$0xff] (!%p987_p11)  ;;  %v779_v13 = vld [vmem:[%s1334_s4 + $0x8] sm:$0xff] (!%p987_p11)  ;;  %v780_v17 = vld [vmem:[%s1334_s4 + $0x10] sm:$0xff] (!%p987_p11) }
  0x36   : > { %1039 = vmatprep.subr.bf16.mxu1 %v1107_v20  ;;  %v781_v18 = vld [vmem:[%s1334_s4 + $0x18] sm:$0xff] (!%p987_p11) }
  0x37   : > { %1002 = vmatpush3.bf16.msra.mxu0 %v1106_v19 }
  0x38   : > { %1003 = vmatprep.subr.bf16.mxu0 %v1108_v21 }
  0x39   : > { %1040 = vmatpush3.bf16.msra.mxu1 %v1107_v20 }
  0x3a   : > { %1041 = vmatprep.subr.bf16.mxu1 %v1110_v22 }
  0x3b   : > { %1004 = vmatpush3.bf16.msra.mxu0 %v1109_v23 }
  0x3c   : > { %1005 = vmatprep.subr.bf16.mxu0 %v1111_v24 }
  0x3d   : > { %1042 = vmatpush3.bf16.msra.mxu1 %v1110_v22 }
  0x3e   : > { %1043 = vmatprep.subr.bf16.mxu1 %v1113_v25 }
  0x3f   : > { %1006 = vmatpush3.bf16.msra.mxu0 %v1112_v26 }
  0x40   : > { %1007 = vmatprep.subr.bf16.mxu0 %v1114_v27 }
  0x41   : > { %1044 = vmatpush3.bf16.msra.mxu1 %v1113_v25 }
  0x42   : > { %1045 = vmatprep.subr.bf16.mxu1 %v1116_v29 }
  0x43   : > { %1008 = vmatpush3.bf16.msra.mxu0 %v1115_v28 }
  0x44   : > { %1009 = vmatprep.subr.bf16.mxu0 %v1117_v30 }
  0x45   : > { %1046 = vmatpush3.bf16.msra.mxu1 %v1116_v29 }
  0x46   : > { %1047 = vmatprep.subr.bf16.mxu1 %v1119_v31 }
  0x47   : > { %1010 = vmatpush3.bf16.msra.mxu0 %v1118_v34 }
  0x49   : > { %1048 = vmatpush3.bf16.msra.mxu1 %v1119_v31 }
  0x4a   : > { %675 = vmatmul.mubr.bf16.vlgmr.msra.gmra.mrb[0].mxu0 %v1120_v35 }
  0x4b   : > { %682 = vmatprep.mubr.bf16.mxu0 %v1125_v36 }
  0x4c   : > { %1050 = vmatmul.mubr.bf16.vlgmr.msra.gmra.mrb[0].mxu1 %v1124_v37 }
  0x52   : > { %683 = vmatmul.mubr.bf16.gmra.mrb[4].mxu0 %v1127_v38 }
 0x11d   : > { %v1011_v39 = vpop.f32.mrb[0].mxu0 }
 0x11e   : > { %v1012_v40 = vpop.f32.mrb[1].mxu0 }
 0x11f   : > { %v1013_v41 = vadd.f32 %v1012_v40, %v1011_v39  ;;  %v1014_v42 = vpop.f32.mrb[2].mxu0  ;;  %v1051_v43 = vpop.f32.mrb[0].mxu1 }
 0x120   : > { %v1015_v44 = vpop.f32.mrb[3].mxu0  ;;  %v725_v46 = vpop.f32.mrb[1].mxu1 }
 0x121   : > { %v1016_v47 = vadd.f32 %v1015_v44, %v1014_v42  ;;  %v726_v48 = vadd.f32 %v1013_v41, %v725_v46  ;;  %v1052_v49 = vpop.f32.mrb[2].mxu1 }
 0x122   : > { %v728_v51 = vpop.f32.mrb[3].mxu1 }
 0x123   : > { %v740_v52 = vadd.f32 %v726_v48, %v406_v45  ;;  %v729_v53 = vadd.f32 %v1016_v47, %v728_v51 }
 0x125   : > { %744 = vst [vmem:[#allocation2] sm:$0xff] %v740_v52  ;;  %v741_v54 = vadd.f32 %v729_v53, %v407_v50  ;;  %v1017_v55 = vpop.f32.mrb[4].mxu0 }
 0x126   : > { %v1018_v56 = vpop.f32.mrb[5].mxu0 }
 0x127   : > { %745 = vst [vmem:[#allocation2 + $0x8] sm:$0xff] %v741_v54  ;;  %v1019_v57 = vadd.f32 %v1018_v56, %v1017_v55  ;;  %v1020_v58 = vpop.f32.mrb[6].mxu0 }
 0x128   : > { %v1021_v60 = vpop.f32.mrb[7].mxu0 }
 0x129   : > { %v734_v61 = vadd.f32 %v1051_v43, %v1019_v57  ;;  %v1022_v62 = vadd.f32 %v1021_v60, %v1020_v58  ;;  %751 = sbr.rel (%p987_p11) target bundleno = 320 (0x140), region = 74 }
 0x12b   : > { %v742_v0 = vadd.f32 %v734_v61, %v408_v59  ;;  %v737_v1 = vadd.f32 %v1052_v49, %v1022_v62 }
 0x12c   : > { %v752_v3 = vld [vmem:[#allocation2] sm:$0xff] (!%p987_p11) }
 0x12d   : > { %746 = vst [vmem:[#allocation2 + $0x10] sm:$0xff] %v742_v0  ;;  %v743_v2 = vadd.f32 %v737_v1, %v409_v63  ;;  %v763_v6 = vmul.f32 (!%p987_p11), %v988_v4, %v752_v3 }
 0x12e   : > { %v753_v7 = vld [vmem:[#allocation2 + $0x8] sm:$0xff] (!%p987_p11) }
 0x12f   : > { %747 = vst [vmem:[#allocation2 + $0x18] sm:$0xff] %v743_v2  ;;  %v764_v9 = vmul.f32 (!%p987_p11), %v988_v4, %v753_v7  ;;  %v774_v12 = vadd.f32 (!%p987_p11), %v989_v5, %v763_v6 }
 0x131   : > { %v775_v16 = vadd.f32 %v989_v5, %v764_v9  ;;  %v782_v19 = vadd.f32 %v778_v8, %v774_v12 }
 0x133   : > { %v783_v22 = vadd.f32 %v779_v13, %v775_v16  ;;  %v786_v23 = vmax.f32 %v782_v19, 0.0 }
 0x134   : > { %v754_v10 = vld [vmem:[#allocation2 + $0x10] sm:$0xff] }
 0x135   : > { %v765_v14 = vmul.f32 %v988_v4, %v754_v10  ;;  %v787_v26 = vmax.f32 %v783_v22, 0.0  ;;  %790 = vst [vmem:[%s1335_s5] sm:$0xff] %v786_v23 }
 0x136   : > { %v755_v11 = vld [vmem:[#allocation2 + $0x18] sm:$0xff] }
 0x137   : > { %v766_v15 = vmul.f32 %v988_v4, %v755_v11  ;;  %v776_v20 = vadd.f32 %v989_v5, %v765_v14  ;;  %791 = vst [vmem:[%s1335_s5 + $0x8] sm:$0xff] %v787_v26 }
 0x139   : > { %v777_v21 = vadd.f32 %v989_v5, %v766_v15  ;;  %v784_v24 = vadd.f32 %v780_v17, %v776_v20 }
 0x13b   : > { %v785_v25 = vadd.f32 %v781_v18, %v777_v21  ;;  %v788_v27 = vmax.f32 %v784_v24, 0.0 }
 0x13d   : > { %v789_v28 = vmax.f32 %v785_v25, 0.0  ;;  %792 = vst [vmem:[%s1335_s5 + $0x10] sm:$0xff] %v788_v27 }
 0x13f   : > { %793 = vst [vmem:[%s1335_s5 + $0x18] sm:$0xff] %v789_v28 }
 0x140 PF: > { %s15_s22 = sadd.s32 1, %s1166_s22   ;;  %s1336_s18 = smov %s1154_s19 }
 0x141   : > { %p12_p12 = scmp.ge.s32.totalorder %s15_s22, 5   ;;  %s1337_s19 = smov %s1234_s26 }
 0x142   : > { %s1338_s20 = smov %s1162_s21  ;;  %s1339_s21 = smov %s1341_s23 }
 0x143   :  { %14 = sbr.rel (!%p12_p12) target bundleno = 3 (0x3), region = 127 }

// kernel: multimodal_classifier_forward.33
= control target key start
LH: loop header
LB: loop body
LE: loop exit
PB: predicated region body
PF: predicated region fallthrough
CT: control target
= control target key end

     0   :  { %s1105_s15 = smov 0   ;;  %s1107_s16 = smov 0   ;;  %s1210_s0 = inlined_call_operand.vmem [shape: bf16[8,1152], index: 0, kind: input, shape index: {}]   ;;  %s1211_s1 = inlined_call_operand.vmem [shape: bf16[1152,256], index: 1, kind: input, shape index: {}]   ;;  %s1212_s2 = inlined_call_operand.vmem [shape: f32[1,256], index: 2, kind: input, shape index: {}]   ;;  %s1213_s3 = inlined_call_operand.vmem [shape: f32[1,256], index: 3, kind: input, shape index: {}]   ;;  %s1214_s4 = inlined_call_operand.vmem [shape: f32[8,256], index: 4, kind: output, shape index: {}]  }
   0x1   :  { %s1109_s17 = smov 0  }
   0x2 LB: > { %s26_s18 = sadd.s32 1, %s1072_s16  ;;  %p891_p0 = scmp.ge.s32.totalorder %s1076_s17, 1  ;;  %s1076_s17 = sphi %s1109_s17, %s14_s17   ;;  %s1072_s16 = sphi %s1107_s16, %s1216_s16   ;;  %s1068_s15 = sphi %s1105_s15, %s1215_s15  }
   0x3   : > { %p27_p1 = scmp.ge.s32.totalorder %s26_s18, 3  ;;  %p229_p2 = scmp.lt.s32.totalorder %s1076_s17, 4 }
   0x5   : > { %s1218_s18 = smov (%p27_p1, %s26_s18), 0  ;;  %p230_p3 = pnand %p891_p0, %p229_p2 }
   0x6   : > { %s281_s19 = smul.u32 (!%p230_p3), 3, %s1068_s15  ;;  %p895_p6 = scmp.ne.s32.totalorder (!%p230_p3), %s1068_s15, 0 }
   0x7   : > { %233 = sbr.rel (%p230_p3) target bundleno = 321 (0x141), region = 36 }
   0x8   : > { %s291_s20 = smul.u32 (!%p230_p3), 48, %s1068_s15  ;;  %p284_p4 = scmp.lt.s32.totalorder (!%p230_p3), %s281_s19, 8 }
   0xa   : > { %p293_p5 = scmp.lt.s32.totalorder (!%p230_p3), %s291_s20, 143 }
   0xe   : > { %s1220_s19 = smov (!%p284_p4, %s281_s19), 8  ;;  %s1222_s20 = smov (!%p293_p5, %s291_s20), 143 }
   0xf   : > { %s892_s21 = sshll.u32 %s1220_s19, 2  ;;  %s952_s25 = sshll.u32 %s1222_s20, 3  ;;  %v1078_v0 = vmov (!%p895_p6), 0.0  }
  0x10   : > { %s1130_s24 = scalar_lea.vmem %s1210_s0, %s892_s21  ;;  %s1135_s28 = scalar_lea.vmem %s1211_s1, %s952_s25  ;;  %328 = vst [vmem:[#allocation2] sm:$0xff] (!%p895_p6), %v1078_v0  ;;  %329 = vst [vmem:[#allocation2 + $0x8] sm:$0xff] (!%p895_p6), %v1078_v0 }
  0x11   : > { %327 = sbr.rel (%p895_p6) target bundleno = 24 (0x18), region = 40 }
  0x18 PF: > { %v979_v1 = vld [vmem:[%s1135_s28 + $0x4] ss:$8 sps:$4 sm:$0xff]   ;;  %v981_v2 = vld [vmem:[%s1135_s28] ss:$8 sps:$4 sm:$0xff]   ;;  %v1079_v3 = vmov 0   ;;  %p947_p7 = scmp.ne.s32.totalorder %s1068_s15, 2 }
  0x19   : > { %706 = vmatprep.mubr.bf16.mxu1 %v1079_v3  ;;  %633 = vmatprep.subr.bf16.mxu0 %v979_v1  ;;  %v982_v4 = vld [vmem:[%s1135_s28 + $0x14] ss:$8 sps:$4 sm:$0xff]   ;;  %v984_v5 = vld [vmem:[%s1135_s28 + $0x10] ss:$8 sps:$4 sm:$0xff]   ;;  %v985_v6 = vld [vmem:[%s1135_s28 + $0x24] ss:$8 sps:$4 sm:$0xff]  }
  0x1a   : > { %634 = vmatpush1.bf16.msra.mxu0 %v981_v2  ;;  %v987_v7 = vld [vmem:[%s1135_s28 + $0x20] ss:$8 sps:$4 sm:$0xff]   ;;  %v988_v8 = vld [vmem:[%s1135_s28 + $0x34] ss:$8 sps:$4 sm:$0xff]   ;;  %v990_v9 = vld [vmem:[%s1135_s28 + $0x30] ss:$8 sps:$4 sm:$0xff]  }
  0x1b   : > { %635 = vmatprep.subr.bf16.mxu0 %v982_v4  ;;  %v1003_v10 = vld [vmem:[%s1135_s28 + $0x104] ss:$8 sps:$4 sm:$0xff]   ;;  %v1005_v11 = vld [vmem:[%s1135_s28 + $0x100] ss:$8 sps:$4 sm:$0xff]   ;;  %v1009_v13 = vld [vmem:[%s1135_s28 + $0x114] ss:$8 sps:$4 sm:$0xff]   ;;  %v727_v4 = vlaneseq (!%p947_p7) }
  0x1c   : > { %v991_v12 = vld [vmem:[%s1135_s28 + $0x44] ss:$8 sps:$4 sm:$0xff]   ;;  %674 = vmatprep.subr.bf16.mxu1 %v1003_v10  ;;  %v1011_v14 = vld [vmem:[%s1135_s28 + $0x110] ss:$8 sps:$4 sm:$0xff]   ;;  %v993_v15 = vld [vmem:[%s1135_s28 + $0x40] ss:$8 sps:$4 sm:$0xff]  }
  0x1d   : > { %675 = vmatpush1.bf16.msra.mxu1 %v1005_v11  ;;  %v994_v16 = vld [vmem:[%s1135_s28 + $0x54] ss:$8 sps:$4 sm:$0xff]   ;;  %v1015_v17 = vld [vmem:[%s1135_s28 + $0x124] ss:$8 sps:$4 sm:$0xff]   ;;  %v1017_v18 = vld [vmem:[%s1135_s28 + $0x120] ss:$8 sps:$4 sm:$0xff]  }
  0x1e   : > { %636 = vmatpush1.bf16.msra.mxu0 %v984_v5  ;;  %676 = vmatprep.subr.bf16.mxu1 %v1009_v13  ;;  %v996_v19 = vld [vmem:[%s1135_s28 + $0x50] ss:$8 sps:$4 sm:$0xff]   ;;  %v1021_v20 = vld [vmem:[%s1135_s28 + $0x134] ss:$8 sps:$4 sm:$0xff]   ;;  %v997_v21 = vld [vmem:[%s1135_s28 + $0x64] ss:$8 sps:$4 sm:$0xff]  }
  0x1f   : > { %637 = vmatprep.subr.bf16.mxu0 %v985_v6  ;;  %v1023_v22 = vld [vmem:[%s1135_s28 + $0x130] ss:$8 sps:$4 sm:$0xff]   ;;  %v999_v23 = vld [vmem:[%s1135_s28 + $0x60] ss:$8 sps:$4 sm:$0xff]   ;;  %v1027_v24 = vld [vmem:[%s1135_s28 + $0x144] ss:$8 sps:$4 sm:$0xff]  }
  0x20   : > { %v1000_v25 = vld [vmem:[%s1135_s28 + $0x74] ss:$8 sps:$4 sm:$0xff]   ;;  %v1029_v26 = vld [vmem:[%s1135_s28 + $0x140] ss:$8 sps:$4 sm:$0xff]   ;;  %v1002_v27 = vld [vmem:[%s1135_s28 + $0x70] ss:$8 sps:$4 sm:$0xff]  }
  0x21   : > { %677 = vmatpush1.bf16.msra.mxu1 %v1011_v14  ;;  %v1033_v28 = vld [vmem:[%s1135_s28 + $0x154] ss:$8 sps:$4 sm:$0xff]   ;;  %v1006_v29 = vld [vmem:[%s1135_s28 + $0x84] ss:$8 sps:$4 sm:$0xff]   ;;  %v1035_v30 = vld [vmem:[%s1135_s28 + $0x150] ss:$8 sps:$4 sm:$0xff]  }
  0x22   : > { %638 = vmatpush1.bf16.msra.mxu0 %v987_v7  ;;  %678 = vmatprep.subr.bf16.mxu1 %v1015_v17  ;;  %v1008_v31 = vld [vmem:[%s1135_s28 + $0x80] ss:$8 sps:$4 sm:$0xff]   ;;  %v1039_v32 = vld [vmem:[%s1135_s28 + $0x164] ss:$8 sps:$4 sm:$0xff]   ;;  %v1012_v33 = vld [vmem:[%s1135_s28 + $0x94] ss:$8 sps:$4 sm:$0xff]  }
  0x23   : > { %639 = vmatprep.subr.bf16.mxu0 %v988_v8  ;;  %v332_v34 = vld [vmem:[%s1130_s24] sm:$0xff]  ;;  %v1014_v37 = vld [vmem:[%s1135_s28 + $0x90] ss:$8 sps:$4 sm:$0xff]   ;;  %v1045_v38 = vld [vmem:[%s1135_s28 + $0x174] ss:$8 sps:$4 sm:$0xff]   ;;  %v728_v5 = vshrl.u32 (!%p947_p7), %v727_v4, 7 }
  0x24   : > { %v897_v35 = vcombine.high %v332_v34, %v332_v34  ;;  %v1041_v36 = vld [vmem:[%s1135_s28 + $0x160] ss:$8 sps:$4 sm:$0xff]   ;;  %v1018_v39 = vld [vmem:[%s1135_s28 + $0xa4] ss:$8 sps:$4 sm:$0xff]   ;;  %v1047_v40 = vld [vmem:[%s1135_s28 + $0x170] ss:$8 sps:$4 sm:$0xff]   ;;  %v896_v53 = vcombine.low %v332_v34, %v332_v34 }
  0x25   : > { %679 = vmatpush1.bf16.msra.mxu1 %v1017_v18  ;;  %v1020_v41 = vld [vmem:[%s1135_s28 + $0xa0] ss:$8 sps:$4 sm:$0xff]   ;;  %v1024_v42 = vld [vmem:[%s1135_s28 + $0xb4] ss:$8 sps:$4 sm:$0xff]   ;;  %v1026_v44 = vld [vmem:[%s1135_s28 + $0xb0] ss:$8 sps:$4 sm:$0xff]  }
  0x26   : > { %640 = vmatpush1.bf16.msra.mxu0 %v990_v9  ;;  %680 = vmatprep.subr.bf16.mxu1 %v1021_v20  ;;  %v1051_v43 = vld [vmem:[%s1130_s24 + $0x8] ss:$0 sps:$4 sm:$0xff]   ;;  %v1030_v45 = vld [vmem:[%s1135_s28 + $0xc4] ss:$8 sps:$4 sm:$0xff]   ;;  %v1036_v47 = vld [vmem:[%s1135_s28 + $0xd4] ss:$8 sps:$4 sm:$0xff]  }
  0x27   : > { %641 = vmatprep.subr.bf16.mxu0 %v991_v12  ;;  %665 = vmatprep.mubr.bf16.mxu0 %v897_v35  ;;  %v1032_v46 = vld [vmem:[%s1135_s28 + $0xc0] ss:$8 sps:$4 sm:$0xff]   ;;  %v1038_v48 = vld [vmem:[%s1135_s28 + $0xd0] ss:$8 sps:$4 sm:$0xff]   ;;  %v1042_v49 = vld [vmem:[%s1135_s28 + $0xe4] ss:$8 sps:$4 sm:$0xff]  }
  0x28   : > { %v1044_v50 = vld [vmem:[%s1135_s28 + $0xe0] ss:$8 sps:$4 sm:$0xff]   ;;  %v1048_v51 = vld [vmem:[%s1135_s28 + $0xf4] ss:$8 sps:$4 sm:$0xff]   ;;  %v1050_v52 = vld [vmem:[%s1135_s28 + $0xf0] ss:$8 sps:$4 sm:$0xff]  }
  0x29   : > { %681 = vmatpush1.bf16.msra.mxu1 %v1023_v22  ;;  %v330_v58 = vld [vmem:[#allocation2] sm:$0xff]  ;;  %v331_v61 = vld [vmem:[#allocation2 + $0x8] sm:$0xff]  ;;  %v729_v8 = vsub.s32 (!%p947_p7), 0, %v728_v5  ;;  %v733_v9 = vsub.s32 (!%p947_p7), 1, %v728_v5 }
  0x2a   : > { %642 = vmatpush1.bf16.msra.mxu0 %v993_v15  ;;  %682 = vmatprep.subr.bf16.mxu1 %v1027_v24  ;;  %v725_v6 = vld [vmem:[%s1212_s2] sm:$0x3] (!%p947_p7) }
  0x2b   : > { %643 = vmatprep.subr.bf16.mxu0 %v994_v16  ;;  %v739_v7 = vld [vmem:[%s1213_s3] sm:$0x3] (!%p947_p7)  ;;  %v730_v12 = vrot.slane (!%p947_p7), %v725_v6, %v729_v8  ;;  %v734_v14 = vrot.slane (!%p947_p7), %v725_v6, %v733_v9 }
  0x2c   : > { %v744_v13 = vrot.slane (!%p947_p7), %v739_v7, %v729_v8  ;;  %v748_v15 = vrot.slane (!%p947_p7), %v739_v7, %v733_v9 }
  0x2d   : > { %683 = vmatpush1.bf16.msra.mxu1 %v1029_v26 }
  0x2e   : > { %644 = vmatpush1.bf16.msra.mxu0 %v996_v19  ;;  %684 = vmatprep.subr.bf16.mxu1 %v1033_v28 }
  0x2f   : > { %645 = vmatprep.subr.bf16.mxu0 %v997_v21 }
  0x31   : > { %685 = vmatpush1.bf16.msra.mxu1 %v1035_v30 }
  0x32   : > { %646 = vmatpush1.bf16.msra.mxu0 %v999_v23  ;;  %686 = vmatprep.subr.bf16.mxu1 %v1039_v32 }
  0x33   : > { %647 = vmatprep.subr.bf16.mxu0 %v1000_v25 }
  0x35   : > { %687 = vmatpush1.bf16.msra.mxu1 %v1041_v36 }
  0x36   : > { %648 = vmatpush1.bf16.msra.mxu0 %v1002_v27  ;;  %688 = vmatprep.subr.bf16.mxu1 %v1045_v38 }
  0x37   : > { %649 = vmatprep.subr.bf16.mxu0 %v1006_v29 }
  0x39   : > { %689 = vmatpush1.bf16.msra.mxu1 %v1047_v40 }
  0x3a   : > { %650 = vmatpush1.bf16.msra.mxu0 %v1008_v31 }
  0x3b   : > { %651 = vmatprep.subr.bf16.mxu0 %v1012_v33 }
  0x3c   : > { %707 = vmatmul.mubr.bf16.vlgmr.msra.gmra.mrb[0].mxu1 %v1051_v43 }
  0x3e   : > { %652 = vmatpush1.bf16.msra.mxu0 %v1014_v37 }
  0x3f   : > { %653 = vmatprep.subr.bf16.mxu0 %v1018_v39 }
  0x42   : > { %654 = vmatpush1.bf16.msra.mxu0 %v1020_v41 }
  0x43   : > { %655 = vmatprep.subr.bf16.mxu0 %v1024_v42 }
  0x46   : > { %656 = vmatpush1.bf16.msra.mxu0 %v1026_v44 }
  0x47   : > { %657 = vmatprep.subr.bf16.mxu0 %v1030_v45 }
  0x4a   : > { %658 = vmatpush1.bf16.msra.mxu0 %v1032_v46 }
  0x4b   : > { %659 = vmatprep.subr.bf16.mxu0 %v1036_v47 }
  0x4e   : > { %660 = vmatpush1.bf16.msra.mxu0 %v1038_v48 }
  0x4f   : > { %661 = vmatprep.subr.bf16.mxu0 %v1042_v49 }
  0x52   : > { %662 = vmatpush1.bf16.msra.mxu0 %v1044_v50 }
  0x53   : > { %663 = vmatprep.subr.bf16.mxu0 %v1048_v51 }
  0x56   : > { %664 = vmatpush1.bf16.msra.mxu0 %v1050_v52 }
  0x59   : > { %666 = vmatmul.mubr.bf16.vlgmr.msra.gmra.mrb[0].mxu0 %v896_v53 }
 0x10f   : > { %v708_v54 = vpop.f32.mrb[0].mxu1 }
 0x110   : > { %v710_v55 = vpop.f32.mrb[1].mxu1 }
 0x111   : > { %v712_v56 = vpop.f32.mrb[2].mxu1 }
 0x112   : > { %v713_v57 = vpop.f32.mrb[3].mxu1 }
 0x12c   : > { %v667_v59 = vpop.f32.mrb[0].mxu0  ;;  %722 = sbr.rel (%p947_p7) target bundleno = 321 (0x141), region = 44 }
 0x12d   : > { %v709_v60 = vadd.f32 %v708_v54, %v667_v59  ;;  %v669_v62 = vpop.f32.mrb[1].mxu0 }
 0x12e   : > { %v711_v63 = vadd.f32 %v710_v55, %v669_v62  ;;  %v671_v0 = vpop.f32.mrb[2].mxu0 }
 0x12f   : > { %v715_v1 = vadd.f32 %v709_v60, %v330_v58  ;;  %v672_v2 = vpop.f32.mrb[3].mxu0 }
 0x130   : > { %v716_v3 = vadd.f32 %v711_v63, %v331_v61 }
 0x131   : > { %717 = vst [vmem:[#allocation2] sm:$0xff] %v715_v1 }
 0x132   : > { %718 = vst [vmem:[#allocation2 + $0x8] sm:$0xff] %v716_v3 }
 0x138   : > { %v723_v10 = vld [vmem:[#allocation2] sm:$0xff] }
 0x139   : > { %v724_v11 = vld [vmem:[#allocation2 + $0x8] sm:$0xff]  ;;  %v737_v16 = vmul.f32 %v730_v12, %v723_v10 }
 0x13a   : > { %v738_v17 = vmul.f32 %v734_v14, %v724_v11 }
 0x13b   : > { %v751_v18 = vadd.f32 %v744_v13, %v737_v16 }
 0x13c   : > { %v752_v19 = vadd.f32 %v748_v15, %v738_v17 }
 0x13d   : > { %v753_v20 = vmax.f32 %v751_v18, 0.0 }
 0x13e   : > { %v754_v21 = vmax.f32 %v752_v19, 0.0 }
 0x13f   : > { %755 = vst [vmem:[%s1214_s4] sm:$0xff] %v753_v20 }
 0x140   : > { %756 = vst [vmem:[%s1214_s4 + $0x8] sm:$0xff] %v754_v21 }
 0x141 PF: > { %s14_s17 = sadd.s32 1, %s1076_s17   ;;  %s1215_s15 = smov %s1072_s16 }
 0x142   : > { %p11_p8 = scmp.ge.s32.totalorder %s14_s17, 5   ;;  %s1216_s16 = smov %s1218_s18 }
 0x144   :  { %13 = sbr.rel (!%p11_p8) target bundleno = 2 (0x2), region = 83 }

// kernel: multimodal_classifier_forward.34
= control target key start
LH: loop header
LB: loop body
LE: loop exit
PB: predicated region body
PF: predicated region fallthrough
CT: control target
= control target key end

     0   :  { %s1199_s18 = smov 0   ;;  %s1201_s19 = smov 0   ;;  %s1310_s0 = inlined_call_operand.vmem [shape: bf16[8,2304], index: 0, kind: input, shape index: {}]   ;;  %s1311_s1 = inlined_call_operand.vmem [shape: bf16[2304,256], index: 1, kind: input, shape index: {}]   ;;  %s1312_s2 = inlined_call_operand.vmem [shape: f32[1,256], index: 2, kind: input, shape index: {}]   ;;  %s1313_s3 = inlined_call_operand.vmem [shape: f32[1,256], index: 3, kind: input, shape index: {}]   ;;  %s1314_s4 = inlined_call_operand.vmem [shape: f32[8,256], index: 4, kind: input, shape index: {}]   ;;  %s1315_s5 = inlined_call_operand.vmem [shape: f32[8,256], index: 5, kind: output, shape index: {}]  }
   0x1   :  { %s1203_s20 = smov 0  }
   0x2 LB: > { %s27_s21 = sadd.s32 1, %s1161_s19  ;;  %p980_p0 = scmp.ge.s32.totalorder %s1165_s20, 1  ;;  %s1165_s20 = sphi %s1203_s20, %s15_s20   ;;  %s1161_s19 = sphi %s1201_s19, %s1317_s19   ;;  %s1157_s18 = sphi %s1199_s18, %s1316_s18  }
   0x3   : > { %p28_p1 = scmp.ge.s32.totalorder %s27_s21, 6  ;;  %p271_p2 = scmp.lt.s32.totalorder %s1165_s20, 7 }
   0x5   : > { %s1319_s21 = smov (%p28_p1, %s27_s21), 0  ;;  %p272_p3 = pnand %p980_p0, %p271_p2 }
   0x6   : > { %s334_s22 = smul.u32 (!%p272_p3), 3, %s1157_s18  ;;  %p984_p6 = scmp.ne.s32.totalorder (!%p272_p3), %s1157_s18, 0 }
   0x7   : > { %275 = sbr.rel (%p272_p3) target bundleno = 323 (0x143), region = 40 }
   0x8   : > { %s344_s23 = smul.u32 (!%p272_p3), 48, %s1157_s18  ;;  %p337_p4 = scmp.lt.s32.totalorder (!%p272_p3), %s334_s22, 17 }
   0xa   : > { %p346_p5 = scmp.lt.s32.totalorder (!%p272_p3), %s344_s23, 287 }
   0xe   : > { %s1321_s22 = smov (!%p337_p4, %s334_s22), 17  ;;  %s1323_s23 = smov (!%p346_p5, %s344_s23), 287 }
   0xf   : > { %s981_s24 = sshll.u32 %s1321_s22, 2  ;;  %s1041_s28 = sshll.u32 %s1323_s23, 3  ;;  %v1167_v0 = vmov (!%p984_p6), 0.0  }
  0x10   : > { %s1224_s27 = scalar_lea.vmem %s1310_s0, %s981_s24  ;;  %s1229_s6 = scalar_lea.vmem %s1311_s1, %s1041_s28  ;;  %391 = vst [vmem:[#allocation2] sm:$0xff] (!%p984_p6), %v1167_v0  ;;  %392 = vst [vmem:[#allocation2 + $0x8] sm:$0xff] (!%p984_p6), %v1167_v0 }
  0x11   : > { %390 = sbr.rel (%p984_p6) target bundleno = 24 (0x18), region = 44 }
  0x18 PF: > { %v1068_v1 = vld [vmem:[%s1229_s6 + $0x4] ss:$8 sps:$4 sm:$0xff]   ;;  %v1070_v2 = vld [vmem:[%s1229_s6] ss:$8 sps:$4 sm:$0xff]   ;;  %v1168_v3 = vmov 0   ;;  %p1036_p7 = scmp.ne.s32.totalorder %s1157_s18, 5 }
  0x19   : > { %769 = vmatprep.mubr.bf16.mxu1 %v1168_v3  ;;  %696 = vmatprep.subr.bf16.mxu0 %v1068_v1  ;;  %v1071_v4 = vld [vmem:[%s1229_s6 + $0x14] ss:$8 sps:$4 sm:$0xff]   ;;  %v1073_v5 = vld [vmem:[%s1229_s6 + $0x10] ss:$8 sps:$4 sm:$0xff]   ;;  %v1074_v6 = vld [vmem:[%s1229_s6 + $0x24] ss:$8 sps:$4 sm:$0xff]  }
  0x1a   : > { %697 = vmatpush1.bf16.msra.mxu0 %v1070_v2  ;;  %v1076_v7 = vld [vmem:[%s1229_s6 + $0x20] ss:$8 sps:$4 sm:$0xff]   ;;  %v1077_v8 = vld [vmem:[%s1229_s6 + $0x34] ss:$8 sps:$4 sm:$0xff]   ;;  %v1079_v9 = vld [vmem:[%s1229_s6 + $0x30] ss:$8 sps:$4 sm:$0xff]  }
  0x1b   : > { %698 = vmatprep.subr.bf16.mxu0 %v1071_v4  ;;  %v1092_v10 = vld [vmem:[%s1229_s6 + $0x104] ss:$8 sps:$4 sm:$0xff]   ;;  %v1094_v11 = vld [vmem:[%s1229_s6 + $0x100] ss:$8 sps:$4 sm:$0xff]   ;;  %v1098_v13 = vld [vmem:[%s1229_s6 + $0x114] ss:$8 sps:$4 sm:$0xff]   ;;  %v790_v4 = vlaneseq (!%p1036_p7) }
  0x1c   : > { %v1080_v12 = vld [vmem:[%s1229_s6 + $0x44] ss:$8 sps:$4 sm:$0xff]   ;;  %737 = vmatprep.subr.bf16.mxu1 %v1092_v10  ;;  %v1100_v14 = vld [vmem:[%s1229_s6 + $0x110] ss:$8 sps:$4 sm:$0xff]   ;;  %v1082_v15 = vld [vmem:[%s1229_s6 + $0x40] ss:$8 sps:$4 sm:$0xff]  }
  0x1d   : > { %738 = vmatpush1.bf16.msra.mxu1 %v1094_v11  ;;  %v1083_v16 = vld [vmem:[%s1229_s6 + $0x54] ss:$8 sps:$4 sm:$0xff]   ;;  %v1104_v17 = vld [vmem:[%s1229_s6 + $0x124] ss:$8 sps:$4 sm:$0xff]   ;;  %v1106_v18 = vld [vmem:[%s1229_s6 + $0x120] ss:$8 sps:$4 sm:$0xff]  }
  0x1e   : > { %699 = vmatpush1.bf16.msra.mxu0 %v1073_v5  ;;  %739 = vmatprep.subr.bf16.mxu1 %v1098_v13  ;;  %v1085_v19 = vld [vmem:[%s1229_s6 + $0x50] ss:$8 sps:$4 sm:$0xff]   ;;  %v1110_v20 = vld [vmem:[%s1229_s6 + $0x134] ss:$8 sps:$4 sm:$0xff]   ;;  %v1086_v21 = vld [vmem:[%s1229_s6 + $0x64] ss:$8 sps:$4 sm:$0xff]  }
  0x1f   : > { %700 = vmatprep.subr.bf16.mxu0 %v1074_v6  ;;  %v1112_v22 = vld [vmem:[%s1229_s6 + $0x130] ss:$8 sps:$4 sm:$0xff]   ;;  %v1088_v23 = vld [vmem:[%s1229_s6 + $0x60] ss:$8 sps:$4 sm:$0xff]   ;;  %v1116_v24 = vld [vmem:[%s1229_s6 + $0x144] ss:$8 sps:$4 sm:$0xff]  }
  0x20   : > { %v1089_v25 = vld [vmem:[%s1229_s6 + $0x74] ss:$8 sps:$4 sm:$0xff]   ;;  %v1118_v26 = vld [vmem:[%s1229_s6 + $0x140] ss:$8 sps:$4 sm:$0xff]   ;;  %v1091_v27 = vld [vmem:[%s1229_s6 + $0x70] ss:$8 sps:$4 sm:$0xff]  }
  0x21   : > { %740 = vmatpush1.bf16.msra.mxu1 %v1100_v14  ;;  %v1122_v28 = vld [vmem:[%s1229_s6 + $0x154] ss:$8 sps:$4 sm:$0xff]   ;;  %v1095_v29 = vld [vmem:[%s1229_s6 + $0x84] ss:$8 sps:$4 sm:$0xff]   ;;  %v1124_v30 = vld [vmem:[%s1229_s6 + $0x150] ss:$8 sps:$4 sm:$0xff]  }
  0x22   : > { %701 = vmatpush1.bf16.msra.mxu0 %v1076_v7  ;;  %741 = vmatprep.subr.bf16.mxu1 %v1104_v17  ;;  %v1097_v31 = vld [vmem:[%s1229_s6 + $0x80] ss:$8 sps:$4 sm:$0xff]   ;;  %v1128_v32 = vld [vmem:[%s1229_s6 + $0x164] ss:$8 sps:$4 sm:$0xff]   ;;  %v1101_v33 = vld [vmem:[%s1229_s6 + $0x94] ss:$8 sps:$4 sm:$0xff]  }
  0x23   : > { %702 = vmatprep.subr.bf16.mxu0 %v1077_v8  ;;  %v395_v34 = vld [vmem:[%s1224_s27] sm:$0xff]  ;;  %v1103_v37 = vld [vmem:[%s1229_s6 + $0x90] ss:$8 sps:$4 sm:$0xff]   ;;  %v1134_v38 = vld [vmem:[%s1229_s6 + $0x174] ss:$8 sps:$4 sm:$0xff]   ;;  %v791_v5 = vshrl.u32 (!%p1036_p7), %v790_v4, 7 }
  0x24   : > { %v986_v35 = vcombine.high %v395_v34, %v395_v34  ;;  %v1130_v36 = vld [vmem:[%s1229_s6 + $0x160] ss:$8 sps:$4 sm:$0xff]   ;;  %v1107_v39 = vld [vmem:[%s1229_s6 + $0xa4] ss:$8 sps:$4 sm:$0xff]   ;;  %v1136_v40 = vld [vmem:[%s1229_s6 + $0x170] ss:$8 sps:$4 sm:$0xff]   ;;  %v985_v53 = vcombine.low %v395_v34, %v395_v34 }
  0x25   : > { %742 = vmatpush1.bf16.msra.mxu1 %v1106_v18  ;;  %v1109_v41 = vld [vmem:[%s1229_s6 + $0xa0] ss:$8 sps:$4 sm:$0xff]   ;;  %v1113_v42 = vld [vmem:[%s1229_s6 + $0xb4] ss:$8 sps:$4 sm:$0xff]   ;;  %v1115_v44 = vld [vmem:[%s1229_s6 + $0xb0] ss:$8 sps:$4 sm:$0xff]  }
  0x26   : > { %703 = vmatpush1.bf16.msra.mxu0 %v1079_v9  ;;  %743 = vmatprep.subr.bf16.mxu1 %v1110_v20  ;;  %v1140_v43 = vld [vmem:[%s1224_s27 + $0x8] ss:$0 sps:$4 sm:$0xff]   ;;  %v1119_v45 = vld [vmem:[%s1229_s6 + $0xc4] ss:$8 sps:$4 sm:$0xff]   ;;  %v1125_v47 = vld [vmem:[%s1229_s6 + $0xd4] ss:$8 sps:$4 sm:$0xff]  }
  0x27   : > { %704 = vmatprep.subr.bf16.mxu0 %v1080_v12  ;;  %728 = vmatprep.mubr.bf16.mxu0 %v986_v35  ;;  %v1121_v46 = vld [vmem:[%s1229_s6 + $0xc0] ss:$8 sps:$4 sm:$0xff]   ;;  %v1127_v48 = vld [vmem:[%s1229_s6 + $0xd0] ss:$8 sps:$4 sm:$0xff]   ;;  %v1131_v49 = vld [vmem:[%s1229_s6 + $0xe4] ss:$8 sps:$4 sm:$0xff]  }
  0x28   : > { %v1133_v50 = vld [vmem:[%s1229_s6 + $0xe0] ss:$8 sps:$4 sm:$0xff]   ;;  %v1137_v51 = vld [vmem:[%s1229_s6 + $0xf4] ss:$8 sps:$4 sm:$0xff]   ;;  %v1139_v52 = vld [vmem:[%s1229_s6 + $0xf0] ss:$8 sps:$4 sm:$0xff]  }
  0x29   : > { %744 = vmatpush1.bf16.msra.mxu1 %v1112_v22  ;;  %v393_v58 = vld [vmem:[#allocation2] sm:$0xff]  ;;  %v394_v61 = vld [vmem:[#allocation2 + $0x8] sm:$0xff]  ;;  %v792_v8 = vsub.s32 (!%p1036_p7), 0, %v791_v5  ;;  %v796_v9 = vsub.s32 (!%p1036_p7), 1, %v791_v5 }
  0x2a   : > { %705 = vmatpush1.bf16.msra.mxu0 %v1082_v15  ;;  %745 = vmatprep.subr.bf16.mxu1 %v1116_v24  ;;  %v788_v6 = vld [vmem:[%s1312_s2] sm:$0x3] (!%p1036_p7) }
  0x2b   : > { %706 = vmatprep.subr.bf16.mxu0 %v1083_v16  ;;  %v802_v7 = vld [vmem:[%s1313_s3] sm:$0x3] (!%p1036_p7)  ;;  %v793_v12 = vrot.slane (!%p1036_p7), %v788_v6, %v792_v8  ;;  %v797_v14 = vrot.slane (!%p1036_p7), %v788_v6, %v796_v9 }
  0x2c   : > { %v807_v13 = vrot.slane (!%p1036_p7), %v802_v7, %v792_v8  ;;  %v811_v15 = vrot.slane (!%p1036_p7), %v802_v7, %v796_v9  ;;  %v816_v18 = vld [vmem:[%s1314_s4] sm:$0xff] (!%p1036_p7) }
  0x2d   : > { %746 = vmatpush1.bf16.msra.mxu1 %v1118_v26 }
  0x2e   : > { %707 = vmatpush1.bf16.msra.mxu0 %v1085_v19  ;;  %747 = vmatprep.subr.bf16.mxu1 %v1122_v28  ;;  %v817_v19 = vld [vmem:[%s1314_s4 + $0x8] sm:$0xff] (!%p1036_p7) }
  0x2f   : > { %708 = vmatprep.subr.bf16.mxu0 %v1086_v21 }
  0x31   : > { %748 = vmatpush1.bf16.msra.mxu1 %v1124_v30 }
  0x32   : > { %709 = vmatpush1.bf16.msra.mxu0 %v1088_v23  ;;  %749 = vmatprep.subr.bf16.mxu1 %v1128_v32 }
  0x33   : > { %710 = vmatprep.subr.bf16.mxu0 %v1089_v25 }
  0x35   : > { %750 = vmatpush1.bf16.msra.mxu1 %v1130_v36 }
  0x36   : > { %711 = vmatpush1.bf16.msra.mxu0 %v1091_v27  ;;  %751 = vmatprep.subr.bf16.mxu1 %v1134_v38 }
  0x37   : > { %712 = vmatprep.subr.bf16.mxu0 %v1095_v29 }
  0x39   : > { %752 = vmatpush1.bf16.msra.mxu1 %v1136_v40 }
  0x3a   : > { %713 = vmatpush1.bf16.msra.mxu0 %v1097_v31 }
  0x3b   : > { %714 = vmatprep.subr.bf16.mxu0 %v1101_v33 }
  0x3c   : > { %770 = vmatmul.mubr.bf16.vlgmr.msra.gmra.mrb[0].mxu1 %v1140_v43 }
  0x3e   : > { %715 = vmatpush1.bf16.msra.mxu0 %v1103_v37 }
  0x3f   : > { %716 = vmatprep.subr.bf16.mxu0 %v1107_v39 }
  0x42   : > { %717 = vmatpush1.bf16.msra.mxu0 %v1109_v41 }
  0x43   : > { %718 = vmatprep.subr.bf16.mxu0 %v1113_v42 }
  0x46   : > { %719 = vmatpush1.bf16.msra.mxu0 %v1115_v44 }
  0x47   : > { %720 = vmatprep.subr.bf16.mxu0 %v1119_v45 }
  0x4a   : > { %721 = vmatpush1.bf16.msra.mxu0 %v1121_v46 }
  0x4b   : > { %722 = vmatprep.subr.bf16.mxu0 %v1125_v47 }
  0x4e   : > { %723 = vmatpush1.bf16.msra.mxu0 %v1127_v48 }
  0x4f   : > { %724 = vmatprep.subr.bf16.mxu0 %v1131_v49 }
  0x52   : > { %725 = vmatpush1.bf16.msra.mxu0 %v1133_v50 }
  0x53   : > { %726 = vmatprep.subr.bf16.mxu0 %v1137_v51 }
  0x56   : > { %727 = vmatpush1.bf16.msra.mxu0 %v1139_v52 }
  0x59   : > { %729 = vmatmul.mubr.bf16.vlgmr.msra.gmra.mrb[0].mxu0 %v985_v53 }
 0x10f   : > { %v771_v54 = vpop.f32.mrb[0].mxu1 }
 0x110   : > { %v773_v55 = vpop.f32.mrb[1].mxu1 }
 0x111   : > { %v775_v56 = vpop.f32.mrb[2].mxu1 }
 0x112   : > { %v776_v57 = vpop.f32.mrb[3].mxu1 }
 0x12c   : > { %v730_v59 = vpop.f32.mrb[0].mxu0  ;;  %785 = sbr.rel (%p1036_p7) target bundleno = 323 (0x143), region = 48 }
 0x12d   : > { %v772_v60 = vadd.f32 %v771_v54, %v730_v59  ;;  %v732_v62 = vpop.f32.mrb[1].mxu0 }
 0x12e   : > { %v774_v63 = vadd.f32 %v773_v55, %v732_v62  ;;  %v734_v0 = vpop.f32.mrb[2].mxu0 }
 0x12f   : > { %v778_v1 = vadd.f32 %v772_v60, %v393_v58  ;;  %v735_v2 = vpop.f32.mrb[3].mxu0 }
 0x130   : > { %v779_v3 = vadd.f32 %v774_v63, %v394_v61 }
 0x131   : > { %780 = vst [vmem:[#allocation2] sm:$0xff] %v778_v1 }
 0x132   : > { %781 = vst [vmem:[#allocation2 + $0x8] sm:$0xff] %v779_v3 }
 0x138   : > { %v786_v10 = vld [vmem:[#allocation2] sm:$0xff] }
 0x139   : > { %v787_v11 = vld [vmem:[#allocation2 + $0x8] sm:$0xff]  ;;  %v800_v16 = vmul.f32 %v793_v12, %v786_v10 }
 0x13a   : > { %v801_v17 = vmul.f32 %v797_v14, %v787_v11 }
 0x13b   : > { %v814_v20 = vadd.f32 %v807_v13, %v800_v16 }
 0x13c   : > { %v815_v21 = vadd.f32 %v811_v15, %v801_v17 }
 0x13d   : > { %v818_v22 = vadd.f32 %v816_v18, %v814_v20 }
 0x13e   : > { %v819_v23 = vadd.f32 %v817_v19, %v815_v21 }
 0x13f   : > { %v820_v24 = vmax.f32 %v818_v22, 0.0 }
 0x140   : > { %v821_v25 = vmax.f32 %v819_v23, 0.0 }
 0x141   : > { %822 = vst [vmem:[%s1315_s5] sm:$0xff] %v820_v24 }
 0x142   : > { %823 = vst [vmem:[%s1315_s5 + $0x8] sm:$0xff] %v821_v25 }
 0x143 PF: > { %s15_s20 = sadd.s32 1, %s1165_s20   ;;  %s1316_s18 = smov %s1161_s19 }
 0x144   : > { %p12_p8 = scmp.ge.s32.totalorder %s15_s20, 8   ;;  %s1317_s19 = smov %s1319_s21 }
 0x146   :  { %14 = sbr.rel (!%p12_p8) target bundleno = 2 (0x2), region = 90 }

// kernel: multimodal_classifier_forward.32
= control target key start
LH: loop header
LB: loop body
LE: loop exit
PB: predicated region body
PF: predicated region fallthrough
CT: control target
= control target key end

     0   :  { %v248_v1 = vmov 0   ;;  %v175_v18 = vlaneseq  ;;  %s337_s1 = inlined_call_operand.vmem [shape: bf16[128,256], index: 1, kind: input, shape index: {}]   ;;  %s338_s0 = inlined_call_operand.vmem [shape: bf16[8,128], index: 0, kind: input, shape index: {}]   ;;  %s339_s2 = inlined_call_operand.vmem [shape: f32[1,256], index: 2, kind: input, shape index: {}]   ;;  %s340_s3 = inlined_call_operand.vmem [shape: f32[1,256], index: 3, kind: input, shape index: {}]   ;;  %s341_s4 = inlined_call_operand.vmem [shape: f32[8,256], index: 4, kind: output, shape index: {}]  }
   0x1   :  { %v224_v0 = vld [vmem:[%s337_s1 + $0x4] ss:$8 sps:$4 sm:$0xff]   ;;  %155 = vmatprep.mubr.bf16.mxu0 %v248_v1  ;;  %v226_v2 = vld [vmem:[%s337_s1] ss:$8 sps:$4 sm:$0xff]   ;;  %v227_v3 = vld [vmem:[%s337_s1 + $0x14] ss:$8 sps:$4 sm:$0xff]  }
   0x2   :  { %123 = vmatprep.subr.bf16.mxu0 %v224_v0  ;;  %v229_v4 = vld [vmem:[%s337_s1 + $0x10] ss:$8 sps:$4 sm:$0xff]   ;;  %v230_v5 = vld [vmem:[%s337_s1 + $0x24] ss:$8 sps:$4 sm:$0xff]   ;;  %v232_v6 = vld [vmem:[%s337_s1 + $0x20] ss:$8 sps:$4 sm:$0xff]  }
   0x3   :  { %124 = vmatpush1.bf16.msra.mxu0 %v226_v2  ;;  %v233_v7 = vld [vmem:[%s337_s1 + $0x34] ss:$8 sps:$4 sm:$0xff]   ;;  %v235_v8 = vld [vmem:[%s337_s1 + $0x30] ss:$8 sps:$4 sm:$0xff]   ;;  %v236_v9 = vld [vmem:[%s337_s1 + $0x44] ss:$8 sps:$4 sm:$0xff]  }
   0x4   :  { %125 = vmatprep.subr.bf16.mxu0 %v227_v3  ;;  %v238_v10 = vld [vmem:[%s337_s1 + $0x40] ss:$8 sps:$4 sm:$0xff]   ;;  %v239_v11 = vld [vmem:[%s337_s1 + $0x54] ss:$8 sps:$4 sm:$0xff]   ;;  %v241_v12 = vld [vmem:[%s337_s1 + $0x50] ss:$8 sps:$4 sm:$0xff]  }
   0x5   :  { %v242_v13 = vld [vmem:[%s337_s1 + $0x64] ss:$8 sps:$4 sm:$0xff]   ;;  %v244_v14 = vld [vmem:[%s337_s1 + $0x60] ss:$8 sps:$4 sm:$0xff]   ;;  %v245_v15 = vld [vmem:[%s337_s1 + $0x74] ss:$8 sps:$4 sm:$0xff]  }
   0x6   :  { %v247_v16 = vld [vmem:[%s337_s1 + $0x70] ss:$8 sps:$4 sm:$0xff]   ;;  %v26_v17 = vld [vmem:[%s338_s0] sm:$0xf]  ;;  %v176_v19 = vshrl.u32 %v175_v18, 7 }
   0x7   :  { %126 = vmatpush1.bf16.msra.mxu0 %v229_v4  ;;  %v173_v21 = vld [vmem:[%s339_s2] sm:$0x3] }
   0x8   :  { %127 = vmatprep.subr.bf16.mxu0 %v230_v5  ;;  %v177_v20 = vsub.s32 0, %v176_v19  ;;  %v181_v22 = vsub.s32 1, %v176_v19  ;;  %v187_v23 = vld [vmem:[%s340_s3] sm:$0x3] }
   0xa   :  { %v178_v24 = vrot.slane %v173_v21, %v177_v20  ;;  %v182_v25 = vrot.slane %v173_v21, %v181_v22  ;;  %v192_v26 = vrot.slane %v187_v23, %v177_v20  ;;  %v196_v28 = vrot.slane %v187_v23, %v181_v22 }
   0xb   :  { %128 = vmatpush1.bf16.msra.mxu0 %v232_v6 }
   0xc   :  { %129 = vmatprep.subr.bf16.mxu0 %v233_v7 }
   0xf   :  { %130 = vmatpush1.bf16.msra.mxu0 %v235_v8 }
  0x10   :  { %131 = vmatprep.subr.bf16.mxu0 %v236_v9 }
  0x13   :  { %132 = vmatpush1.bf16.msra.mxu0 %v238_v10 }
  0x14   :  { %133 = vmatprep.subr.bf16.mxu0 %v239_v11 }
  0x17   :  { %134 = vmatpush1.bf16.msra.mxu0 %v241_v12 }
  0x18   :  { %135 = vmatprep.subr.bf16.mxu0 %v242_v13 }
  0x1b   :  { %136 = vmatpush1.bf16.msra.mxu0 %v244_v14 }
  0x1c   :  { %137 = vmatprep.subr.bf16.mxu0 %v245_v15 }
  0x1f   :  { %138 = vmatpush1.bf16.msra.mxu0 %v247_v16 }
  0x22   :  { %156 = vmatmul.mubr.bf16.vlgmr.msra.gmra.mrb[0].mxu0 %v26_v17 }
  0xf5   :  { %v157_v27 = vpop.f32.mrb[0].mxu0 }
  0xf6   :  { %v185_v29 = vmul.f32 %v178_v24, %v157_v27  ;;  %v159_v30 = vpop.f32.mrb[1].mxu0 }
  0xf7   :  { %v186_v31 = vmul.f32 %v182_v25, %v159_v30  ;;  %v161_v32 = vpop.f32.mrb[2].mxu0 }
  0xf8   :  { %v199_v33 = vadd.f32 %v192_v26, %v185_v29  ;;  %v162_v34 = vpop.f32.mrb[3].mxu0 }
  0xf9   :  { %v200_v35 = vadd.f32 %v196_v28, %v186_v31 }
  0xfa   :  { %201 = vst [vmem:[%s341_s4] sm:$0xff] %v199_v33 }
  0xfb   :  { %202 = vst [vmem:[%s341_s4 + $0x8] sm:$0xff] %v200_v35 }

// kernel: multimodal_classifier_forward.35
= control target key start
LH: loop header
LB: loop body
LE: loop exit
PB: predicated region body
PF: predicated region fallthrough
CT: control target
= control target key end

     0   :  { %s1105_s15 = smov 0   ;;  %s1107_s16 = smov 0   ;;  %s1210_s0 = inlined_call_operand.vmem [shape: bf16[8,2304], index: 0, kind: input, shape index: {}]   ;;  %s1211_s1 = inlined_call_operand.vmem [shape: bf16[2304,256], index: 1, kind: input, shape index: {}]   ;;  %s1212_s2 = inlined_call_operand.vmem [shape: f32[1,256], index: 2, kind: input, shape index: {}]   ;;  %s1213_s3 = inlined_call_operand.vmem [shape: f32[1,256], index: 3, kind: input, shape index: {}]   ;;  %s1214_s4 = inlined_call_operand.vmem [shape: f32[8,256], index: 4, kind: output, shape index: {}]  }
   0x1   :  { %s1109_s17 = smov 0  }
   0x2 LB: > { %s26_s18 = sadd.s32 1, %s1072_s16  ;;  %p891_p0 = scmp.ge.s32.totalorder %s1076_s17, 1  ;;  %s1076_s17 = sphi %s1109_s17, %s14_s17   ;;  %s1072_s16 = sphi %s1107_s16, %s1216_s16   ;;  %s1068_s15 = sphi %s1105_s15, %s1215_s15  }
   0x3   : > { %p27_p1 = scmp.ge.s32.totalorder %s26_s18, 6  ;;  %p229_p2 = scmp.lt.s32.totalorder %s1076_s17, 7 }
   0x5   : > { %s1218_s18 = smov (%p27_p1, %s26_s18), 0  ;;  %p230_p3 = pnand %p891_p0, %p229_p2 }
   0x6   : > { %s281_s19 = smul.u32 (!%p230_p3), 3, %s1068_s15  ;;  %p895_p6 = scmp.ne.s32.totalorder (!%p230_p3), %s1068_s15, 0 }
   0x7   : > { %233 = sbr.rel (%p230_p3) target bundleno = 321 (0x141), region = 36 }
   0x8   : > { %s291_s20 = smul.u32 (!%p230_p3), 48, %s1068_s15  ;;  %p284_p4 = scmp.lt.s32.totalorder (!%p230_p3), %s281_s19, 17 }
   0xa   : > { %p293_p5 = scmp.lt.s32.totalorder (!%p230_p3), %s291_s20, 287 }
   0xe   : > { %s1220_s19 = smov (!%p284_p4, %s281_s19), 17  ;;  %s1222_s20 = smov (!%p293_p5, %s291_s20), 287 }
   0xf   : > { %s892_s21 = sshll.u32 %s1220_s19, 2  ;;  %s952_s25 = sshll.u32 %s1222_s20, 3  ;;  %v1078_v0 = vmov (!%p895_p6), 0.0  }
  0x10   : > { %s1130_s24 = scalar_lea.vmem %s1210_s0, %s892_s21  ;;  %s1135_s28 = scalar_lea.vmem %s1211_s1, %s952_s25  ;;  %328 = vst [vmem:[#allocation2] sm:$0xff] (!%p895_p6), %v1078_v0  ;;  %329 = vst [vmem:[#allocation2 + $0x8] sm:$0xff] (!%p895_p6), %v1078_v0 }
  0x11   : > { %327 = sbr.rel (%p895_p6) target bundleno = 24 (0x18), region = 40 }
  0x18 PF: > { %v979_v1 = vld [vmem:[%s1135_s28 + $0x4] ss:$8 sps:$4 sm:$0xff]   ;;  %v981_v2 = vld [vmem:[%s1135_s28] ss:$8 sps:$4 sm:$0xff]   ;;  %v1079_v3 = vmov 0   ;;  %p947_p7 = scmp.ne.s32.totalorder %s1068_s15, 5 }
  0x19   : > { %706 = vmatprep.mubr.bf16.mxu1 %v1079_v3  ;;  %633 = vmatprep.subr.bf16.mxu0 %v979_v1  ;;  %v982_v4 = vld [vmem:[%s1135_s28 + $0x14] ss:$8 sps:$4 sm:$0xff]   ;;  %v984_v5 = vld [vmem:[%s1135_s28 + $0x10] ss:$8 sps:$4 sm:$0xff]   ;;  %v985_v6 = vld [vmem:[%s1135_s28 + $0x24] ss:$8 sps:$4 sm:$0xff]  }
  0x1a   : > { %634 = vmatpush1.bf16.msra.mxu0 %v981_v2  ;;  %v987_v7 = vld [vmem:[%s1135_s28 + $0x20] ss:$8 sps:$4 sm:$0xff]   ;;  %v988_v8 = vld [vmem:[%s1135_s28 + $0x34] ss:$8 sps:$4 sm:$0xff]   ;;  %v990_v9 = vld [vmem:[%s1135_s28 + $0x30] ss:$8 sps:$4 sm:$0xff]  }
  0x1b   : > { %635 = vmatprep.subr.bf16.mxu0 %v982_v4  ;;  %v1003_v10 = vld [vmem:[%s1135_s28 + $0x104] ss:$8 sps:$4 sm:$0xff]   ;;  %v1005_v11 = vld [vmem:[%s1135_s28 + $0x100] ss:$8 sps:$4 sm:$0xff]   ;;  %v1009_v13 = vld [vmem:[%s1135_s28 + $0x114] ss:$8 sps:$4 sm:$0xff]   ;;  %v727_v4 = vlaneseq (!%p947_p7) }
  0x1c   : > { %v991_v12 = vld [vmem:[%s1135_s28 + $0x44] ss:$8 sps:$4 sm:$0xff]   ;;  %674 = vmatprep.subr.bf16.mxu1 %v1003_v10  ;;  %v1011_v14 = vld [vmem:[%s1135_s28 + $0x110] ss:$8 sps:$4 sm:$0xff]   ;;  %v993_v15 = vld [vmem:[%s1135_s28 + $0x40] ss:$8 sps:$4 sm:$0xff]  }
  0x1d   : > { %675 = vmatpush1.bf16.msra.mxu1 %v1005_v11  ;;  %v994_v16 = vld [vmem:[%s1135_s28 + $0x54] ss:$8 sps:$4 sm:$0xff]   ;;  %v1015_v17 = vld [vmem:[%s1135_s28 + $0x124] ss:$8 sps:$4 sm:$0xff]   ;;  %v1017_v18 = vld [vmem:[%s1135_s28 + $0x120] ss:$8 sps:$4 sm:$0xff]  }
  0x1e   : > { %636 = vmatpush1.bf16.msra.mxu0 %v984_v5  ;;  %676 = vmatprep.subr.bf16.mxu1 %v1009_v13  ;;  %v996_v19 = vld [vmem:[%s1135_s28 + $0x50] ss:$8 sps:$4 sm:$0xff]   ;;  %v1021_v20 = vld [vmem:[%s1135_s28 + $0x134] ss:$8 sps:$4 sm:$0xff]   ;;  %v997_v21 = vld [vmem:[%s1135_s28 + $0x64] ss:$8 sps:$4 sm:$0xff]  }
  0x1f   : > { %637 = vmatprep.subr.bf16.mxu0 %v985_v6  ;;  %v1023_v22 = vld [vmem:[%s1135_s28 + $0x130] ss:$8 sps:$4 sm:$0xff]   ;;  %v999_v23 = vld [vmem:[%s1135_s28 + $0x60] ss:$8 sps:$4 sm:$0xff]   ;;  %v1027_v24 = vld [vmem:[%s1135_s28 + $0x144] ss:$8 sps:$4 sm:$0xff]  }
  0x20   : > { %v1000_v25 = vld [vmem:[%s1135_s28 + $0x74] ss:$8 sps:$4 sm:$0xff]   ;;  %v1029_v26 = vld [vmem:[%s1135_s28 + $0x140] ss:$8 sps:$4 sm:$0xff]   ;;  %v1002_v27 = vld [vmem:[%s1135_s28 + $0x70] ss:$8 sps:$4 sm:$0xff]  }
  0x21   : > { %677 = vmatpush1.bf16.msra.mxu1 %v1011_v14  ;;  %v1033_v28 = vld [vmem:[%s1135_s28 + $0x154] ss:$8 sps:$4 sm:$0xff]   ;;  %v1006_v29 = vld [vmem:[%s1135_s28 + $0x84] ss:$8 sps:$4 sm:$0xff]   ;;  %v1035_v30 = vld [vmem:[%s1135_s28 + $0x150] ss:$8 sps:$4 sm:$0xff]  }
  0x22   : > { %638 = vmatpush1.bf16.msra.mxu0 %v987_v7  ;;  %678 = vmatprep.subr.bf16.mxu1 %v1015_v17  ;;  %v1008_v31 = vld [vmem:[%s1135_s28 + $0x80] ss:$8 sps:$4 sm:$0xff]   ;;  %v1039_v32 = vld [vmem:[%s1135_s28 + $0x164] ss:$8 sps:$4 sm:$0xff]   ;;  %v1012_v33 = vld [vmem:[%s1135_s28 + $0x94] ss:$8 sps:$4 sm:$0xff]  }
  0x23   : > { %639 = vmatprep.subr.bf16.mxu0 %v988_v8  ;;  %v332_v34 = vld [vmem:[%s1130_s24] sm:$0xff]  ;;  %v1014_v37 = vld [vmem:[%s1135_s28 + $0x90] ss:$8 sps:$4 sm:$0xff]   ;;  %v1045_v38 = vld [vmem:[%s1135_s28 + $0x174] ss:$8 sps:$4 sm:$0xff]   ;;  %v728_v5 = vshrl.u32 (!%p947_p7), %v727_v4, 7 }
  0x24   : > { %v897_v35 = vcombine.high %v332_v34, %v332_v34  ;;  %v1041_v36 = vld [vmem:[%s1135_s28 + $0x160] ss:$8 sps:$4 sm:$0xff]   ;;  %v1018_v39 = vld [vmem:[%s1135_s28 + $0xa4] ss:$8 sps:$4 sm:$0xff]   ;;  %v1047_v40 = vld [vmem:[%s1135_s28 + $0x170] ss:$8 sps:$4 sm:$0xff]   ;;  %v896_v53 = vcombine.low %v332_v34, %v332_v34 }
  0x25   : > { %679 = vmatpush1.bf16.msra.mxu1 %v1017_v18  ;;  %v1020_v41 = vld [vmem:[%s1135_s28 + $0xa0] ss:$8 sps:$4 sm:$0xff]   ;;  %v1024_v42 = vld [vmem:[%s1135_s28 + $0xb4] ss:$8 sps:$4 sm:$0xff]   ;;  %v1026_v44 = vld [vmem:[%s1135_s28 + $0xb0] ss:$8 sps:$4 sm:$0xff]  }
  0x26   : > { %640 = vmatpush1.bf16.msra.mxu0 %v990_v9  ;;  %680 = vmatprep.subr.bf16.mxu1 %v1021_v20  ;;  %v1051_v43 = vld [vmem:[%s1130_s24 + $0x8] ss:$0 sps:$4 sm:$0xff]   ;;  %v1030_v45 = vld [vmem:[%s1135_s28 + $0xc4] ss:$8 sps:$4 sm:$0xff]   ;;  %v1036_v47 = vld [vmem:[%s1135_s28 + $0xd4] ss:$8 sps:$4 sm:$0xff]  }
  0x27   : > { %641 = vmatprep.subr.bf16.mxu0 %v991_v12  ;;  %665 = vmatprep.mubr.bf16.mxu0 %v897_v35  ;;  %v1032_v46 = vld [vmem:[%s1135_s28 + $0xc0] ss:$8 sps:$4 sm:$0xff]   ;;  %v1038_v48 = vld [vmem:[%s1135_s28 + $0xd0] ss:$8 sps:$4 sm:$0xff]   ;;  %v1042_v49 = vld [vmem:[%s1135_s28 + $0xe4] ss:$8 sps:$4 sm:$0xff]  }
  0x28   : > { %v1044_v50 = vld [vmem:[%s1135_s28 + $0xe0] ss:$8 sps:$4 sm:$0xff]   ;;  %v1048_v51 = vld [vmem:[%s1135_s28 + $0xf4] ss:$8 sps:$4 sm:$0xff]   ;;  %v1050_v52 = vld [vmem:[%s1135_s28 + $0xf0] ss:$8 sps:$4 sm:$0xff]  }
  0x29   : > { %681 = vmatpush1.bf16.msra.mxu1 %v1023_v22  ;;  %v330_v58 = vld [vmem:[#allocation2] sm:$0xff]  ;;  %v331_v61 = vld [vmem:[#allocation2 + $0x8] sm:$0xff]  ;;  %v729_v8 = vsub.s32 (!%p947_p7), 0, %v728_v5  ;;  %v733_v9 = vsub.s32 (!%p947_p7), 1, %v728_v5 }
  0x2a   : > { %642 = vmatpush1.bf16.msra.mxu0 %v993_v15  ;;  %682 = vmatprep.subr.bf16.mxu1 %v1027_v24  ;;  %v725_v6 = vld [vmem:[%s1212_s2] sm:$0x3] (!%p947_p7) }
  0x2b   : > { %643 = vmatprep.subr.bf16.mxu0 %v994_v16  ;;  %v739_v7 = vld [vmem:[%s1213_s3] sm:$0x3] (!%p947_p7)  ;;  %v730_v12 = vrot.slane (!%p947_p7), %v725_v6, %v729_v8  ;;  %v734_v14 = vrot.slane (!%p947_p7), %v725_v6, %v733_v9 }
  0x2c   : > { %v744_v13 = vrot.slane (!%p947_p7), %v739_v7, %v729_v8  ;;  %v748_v15 = vrot.slane (!%p947_p7), %v739_v7, %v733_v9 }
  0x2d   : > { %683 = vmatpush1.bf16.msra.mxu1 %v1029_v26 }
  0x2e   : > { %644 = vmatpush1.bf16.msra.mxu0 %v996_v19  ;;  %684 = vmatprep.subr.bf16.mxu1 %v1033_v28 }
  0x2f   : > { %645 = vmatprep.subr.bf16.mxu0 %v997_v21 }
  0x31   : > { %685 = vmatpush1.bf16.msra.mxu1 %v1035_v30 }
  0x32   : > { %646 = vmatpush1.bf16.msra.mxu0 %v999_v23  ;;  %686 = vmatprep.subr.bf16.mxu1 %v1039_v32 }
  0x33   : > { %647 = vmatprep.subr.bf16.mxu0 %v1000_v25 }
  0x35   : > { %687 = vmatpush1.bf16.msra.mxu1 %v1041_v36 }
  0x36   : > { %648 = vmatpush1.bf16.msra.mxu0 %v1002_v27  ;;  %688 = vmatprep.subr.bf16.mxu1 %v1045_v38 }
  0x37   : > { %649 = vmatprep.subr.bf16.mxu0 %v1006_v29 }
  0x39   : > { %689 = vmatpush1.bf16.msra.mxu1 %v1047_v40 }
  0x3a   : > { %650 = vmatpush1.bf16.msra.mxu0 %v1008_v31 }
  0x3b   : > { %651 = vmatprep.subr.bf16.mxu0 %v1012_v33 }
  0x3c   : > { %707 = vmatmul.mubr.bf16.vlgmr.msra.gmra.mrb[0].mxu1 %v1051_v43 }
  0x3e   : > { %652 = vmatpush1.bf16.msra.mxu0 %v1014_v37 }
  0x3f   : > { %653 = vmatprep.subr.bf16.mxu0 %v1018_v39 }
  0x42   : > { %654 = vmatpush1.bf16.msra.mxu0 %v1020_v41 }
  0x43   : > { %655 = vmatprep.subr.bf16.mxu0 %v1024_v42 }
  0x46   : > { %656 = vmatpush1.bf16.msra.mxu0 %v1026_v44 }
  0x47   : > { %657 = vmatprep.subr.bf16.mxu0 %v1030_v45 }
  0x4a   : > { %658 = vmatpush1.bf16.msra.mxu0 %v1032_v46 }
  0x4b   : > { %659 = vmatprep.subr.bf16.mxu0 %v1036_v47 }
  0x4e   : > { %660 = vmatpush1.bf16.msra.mxu0 %v1038_v48 }
  0x4f   : > { %661 = vmatprep.subr.bf16.mxu0 %v1042_v49 }
  0x52   : > { %662 = vmatpush1.bf16.msra.mxu0 %v1044_v50 }
  0x53   : > { %663 = vmatprep.subr.bf16.mxu0 %v1048_v51 }
  0x56   : > { %664 = vmatpush1.bf16.msra.mxu0 %v1050_v52 }
  0x59   : > { %666 = vmatmul.mubr.bf16.vlgmr.msra.gmra.mrb[0].mxu0 %v896_v53 }
 0x10f   : > { %v708_v54 = vpop.f32.mrb[0].mxu1 }
 0x110   : > { %v710_v55 = vpop.f32.mrb[1].mxu1 }
 0x111   : > { %v712_v56 = vpop.f32.mrb[2].mxu1 }
 0x112   : > { %v713_v57 = vpop.f32.mrb[3].mxu1 }
 0x12c   : > { %v667_v59 = vpop.f32.mrb[0].mxu0  ;;  %722 = sbr.rel (%p947_p7) target bundleno = 321 (0x141), region = 44 }
 0x12d   : > { %v709_v60 = vadd.f32 %v708_v54, %v667_v59  ;;  %v669_v62 = vpop.f32.mrb[1].mxu0 }
 0x12e   : > { %v711_v63 = vadd.f32 %v710_v55, %v669_v62  ;;  %v671_v0 = vpop.f32.mrb[2].mxu0 }
 0x12f   : > { %v715_v1 = vadd.f32 %v709_v60, %v330_v58  ;;  %v672_v2 = vpop.f32.mrb[3].mxu0 }
 0x130   : > { %v716_v3 = vadd.f32 %v711_v63, %v331_v61 }
 0x131   : > { %717 = vst [vmem:[#allocation2] sm:$0xff] %v715_v1 }
 0x132   : > { %718 = vst [vmem:[#allocation2 + $0x8] sm:$0xff] %v716_v3 }
 0x138   : > { %v723_v10 = vld [vmem:[#allocation2] sm:$0xff] }
 0x139   : > { %v724_v11 = vld [vmem:[#allocation2 + $0x8] sm:$0xff]  ;;  %v737_v16 = vmul.f32 %v730_v12, %v723_v10 }
 0x13a   : > { %v738_v17 = vmul.f32 %v734_v14, %v724_v11 }
 0x13b   : > { %v751_v18 = vadd.f32 %v744_v13, %v737_v16 }
 0x13c   : > { %v752_v19 = vadd.f32 %v748_v15, %v738_v17 }
 0x13d   : > { %v753_v20 = vmax.f32 %v751_v18, 0.0 }
 0x13e   : > { %v754_v21 = vmax.f32 %v752_v19, 0.0 }
 0x13f   : > { %755 = vst [vmem:[%s1214_s4] sm:$0xff] %v753_v20 }
 0x140   : > { %756 = vst [vmem:[%s1214_s4 + $0x8] sm:$0xff] %v754_v21 }
 0x141 PF: > { %s14_s17 = sadd.s32 1, %s1076_s17   ;;  %s1215_s15 = smov %s1072_s16 }
 0x142   : > { %p11_p8 = scmp.ge.s32.totalorder %s14_s17, 8   ;;  %s1216_s16 = smov %s1218_s18 }
 0x144   :  { %13 = sbr.rel (!%p11_p8) target bundleno = 2 (0x2), region = 83 }

// kernel: multimodal_classifier_forward.38
= control target key start
LH: loop header
LB: loop body
LE: loop exit
PB: predicated region body
PF: predicated region fallthrough
CT: control target
= control target key end

     0   :  { %s1385_s15 = smov 0   ;;  %s1387_s16 = smov 0   ;;  %s1658_s0 = inlined_call_operand.vmem [shape: bf16[8,2304], index: 0, kind: input, shape index: {}]   ;;  %s1659_s1 = inlined_call_operand.vmem [shape: bf16[2304,512], index: 1, kind: input, shape index: {}]   ;;  %s1660_s2 = inlined_call_operand.vmem [shape: f32[1,512], index: 2, kind: input, shape index: {}]   ;;  %s1661_s3 = inlined_call_operand.vmem [shape: f32[1,512], index: 3, kind: input, shape index: {}]   ;;  %s1662_s4 = inlined_call_operand.vmem [shape: f32[8,512], index: 4, kind: output, shape index: {}]  }
   0x1   :  { %s1389_s17 = smov 0   ;;  %s1391_s18 = smov 0  }
   0x2   :  { %s1393_s19 = smov 0   ;;  %s1395_s20 = smov 0  }
   0x3   :  { %s1397_s21 = smov 0  }
   0x4 LB: > { %s26_s22 = sadd.s32 1, %s1348_s19  ;;  %s29_s23 = sadd.s32 1, %s1352_s20  ;;  %s1356_s21 = sphi %s1397_s21, %s14_s21   ;;  %s1352_s20 = sphi %s1395_s20, %s1668_s20   ;;  %s1348_s19 = sphi %s1393_s19, %s1667_s19   ;;  %s1344_s18 = sphi %s1391_s18, %s1666_s18   ;;  %s1340_s17 = sphi %s1389_s17, %s1665_s17   ;;  %s1336_s16 = sphi %s1387_s16, %s1664_s16   ;;  %s1332_s15 = sphi %s1385_s15, %s1663_s15  }
   0x5   : > { %p27_p0 = scmp.ge.s32.totalorder %s26_s22, 6  ;;  %p77_p1 = scmp.ne.s32.totalorder %s1336_s16, %s1332_s15 }
   0x6   : > { %p78_p2 = scmp.eq.s32.totalorder %s1356_s21, 0  ;;  %s70_s27 = sadd.s32 1, %s1336_s16 }
   0x7   : > { %s1670_s22 = smov (%p27_p0, %s26_s22), 0  ;;  %s1672_s23 = smov (!%p27_p0, %s29_s23), %s1352_s20 }
   0x8   : > { %p79_p3 = por %p78_p2, %p77_p1  ;;  %p31_p4 = scmp.ge.s32.totalorder %s1672_s23, 2 }
   0x9   : > { %s65_s24 = ssub.s32 %s1348_s19, %s1670_s22  ;;  %p1101_p6 = scmp.ge.s32.totalorder %s1356_s21, 12 }
   0xa   : > { %s1674_s23 = smov (%p31_p4, %s1672_s23), 0 }
   0xb   : > { %s66_s25 = ssub.s32 %s1352_s20, %s1674_s23  ;;  %183 = sbr.rel (%p1101_p6) target bundleno = 50 (0x32), region = 16 }
   0xc   : > { %s67_s26 = sor.u32 %s66_s25, %s65_s24 }
   0xd   : > { %p68_p5 = scmp.eq.s32.totalorder %s67_s26, 0 }
   0xf   : > { %s1436_s28 = scalar_select %p68_p5, %s1336_s16, %s70_s27  }
  0x12   : > { %199 = sbr.rel (!%p79_p3) target bundleno = 50 (0x32), region = 24  ;;  %s201_s29 = sand.u32 (%p79_p3), 1, %s1336_s16  }
  0x13   : > { %s1167_s30 = smul.u32 (%p79_p3), 384, %s201_s29  ;;  %s1102_s5 = sshll.u32 (%p79_p3), %s1352_s20, 1 }
  0x14   : > { %s1166_s6 = smul.u32 (%p79_p3), 192, %s1348_s19 }
  0x15   : > { %s1450_s12 = scalar_lea.vmem (%p79_p3), [#allocation3], %s1167_s30 }
  0x16   : > { %s207_s7 = sadd.s32 (%p79_p3), %s1166_s6, %s1102_s5 }
  0x17   : > { %s1104_s8 = sshll.u32 (%p79_p3), %s207_s7, 2 }
  0x18   : > { %s1445_s11 = scalar_lea.vmem (%p79_p3), %s1659_s1, %s1104_s8 }
  0x19   : > { %v331_v0 = vld [vmem:[%s1445_s11] sm:$0xff]  ;;  %v333_v1 = vld [vmem:[%s1445_s11 + $0x10] sm:$0xff] }
  0x1a   : > { %v335_v2 = vld [vmem:[%s1445_s11 + $0x20] sm:$0xff]  ;;  %332 = vst [vmem:[%s1450_s12] sm:$0xff] %v331_v0  ;;  %334 = vst [vmem:[%s1450_s12 + $0x8] sm:$0xff] %v333_v1  ;;  %v337_v3 = vld [vmem:[%s1445_s11 + $0x30] sm:$0xff] }
  0x1b   : > { %336 = vst [vmem:[%s1450_s12 + $0x10] sm:$0xff] %v335_v2  ;;  %v339_v4 = vld [vmem:[%s1445_s11 + $0x40] sm:$0xff]  ;;  %v341_v5 = vld [vmem:[%s1445_s11 + $0x50] sm:$0xff]  ;;  %338 = vst [vmem:[%s1450_s12 + $0x18] sm:$0xff] %v337_v3 }
  0x1c   : > { %340 = vst [vmem:[%s1450_s12 + $0x20] sm:$0xff] %v339_v4  ;;  %342 = vst [vmem:[%s1450_s12 + $0x28] sm:$0xff] %v341_v5  ;;  %v343_v6 = vld [vmem:[%s1445_s11 + $0x60] sm:$0xff]  ;;  %v345_v7 = vld [vmem:[%s1445_s11 + $0x70] sm:$0xff] }
  0x1d   : > { %v347_v8 = vld [vmem:[%s1445_s11 + $0x80] sm:$0xff]  ;;  %344 = vst [vmem:[%s1450_s12 + $0x30] sm:$0xff] %v343_v6  ;;  %346 = vst [vmem:[%s1450_s12 + $0x38] sm:$0xff] %v345_v7  ;;  %v349_v9 = vld [vmem:[%s1445_s11 + $0x90] sm:$0xff] }
  0x1e   : > { %348 = vst [vmem:[%s1450_s12 + $0x40] sm:$0xff] %v347_v8  ;;  %v351_v10 = vld [vmem:[%s1445_s11 + $0xa0] sm:$0xff]  ;;  %v353_v11 = vld [vmem:[%s1445_s11 + $0xb0] sm:$0xff]  ;;  %350 = vst [vmem:[%s1450_s12 + $0x48] sm:$0xff] %v349_v9 }
  0x1f   : > { %352 = vst [vmem:[%s1450_s12 + $0x50] sm:$0xff] %v351_v10  ;;  %354 = vst [vmem:[%s1450_s12 + $0x58] sm:$0xff] %v353_v11  ;;  %v355_v12 = vld [vmem:[%s1445_s11 + $0xc0] sm:$0xff]  ;;  %v357_v13 = vld [vmem:[%s1445_s11 + $0xd0] sm:$0xff] }
  0x20   : > { %v359_v14 = vld [vmem:[%s1445_s11 + $0xe0] sm:$0xff]  ;;  %356 = vst [vmem:[%s1450_s12 + $0x60] sm:$0xff] %v355_v12  ;;  %358 = vst [vmem:[%s1450_s12 + $0x68] sm:$0xff] %v357_v13  ;;  %v361_v15 = vld [vmem:[%s1445_s11 + $0xf0] sm:$0xff] }
  0x21   : > { %360 = vst [vmem:[%s1450_s12 + $0x70] sm:$0xff] %v359_v14  ;;  %v363_v16 = vld [vmem:[%s1445_s11 + $0x100] sm:$0xff]  ;;  %v365_v17 = vld [vmem:[%s1445_s11 + $0x110] sm:$0xff]  ;;  %362 = vst [vmem:[%s1450_s12 + $0x78] sm:$0xff] %v361_v15 }
  0x22   : > { %364 = vst [vmem:[%s1450_s12 + $0x80] sm:$0xff] %v363_v16  ;;  %366 = vst [vmem:[%s1450_s12 + $0x88] sm:$0xff] %v365_v17  ;;  %v367_v18 = vld [vmem:[%s1445_s11 + $0x120] sm:$0xff]  ;;  %v369_v19 = vld [vmem:[%s1445_s11 + $0x130] sm:$0xff] }
  0x23   : > { %v371_v20 = vld [vmem:[%s1445_s11 + $0x140] sm:$0xff]  ;;  %368 = vst [vmem:[%s1450_s12 + $0x90] sm:$0xff] %v367_v18  ;;  %370 = vst [vmem:[%s1450_s12 + $0x98] sm:$0xff] %v369_v19  ;;  %v373_v21 = vld [vmem:[%s1445_s11 + $0x150] sm:$0xff] }
  0x24   : > { %372 = vst [vmem:[%s1450_s12 + $0xa0] sm:$0xff] %v371_v20  ;;  %v375_v22 = vld [vmem:[%s1445_s11 + $0x160] sm:$0xff]  ;;  %v377_v23 = vld [vmem:[%s1445_s11 + $0x170] sm:$0xff]  ;;  %374 = vst [vmem:[%s1450_s12 + $0xa8] sm:$0xff] %v373_v21 }
  0x25   : > { %376 = vst [vmem:[%s1450_s12 + $0xb0] sm:$0xff] %v375_v22  ;;  %378 = vst [vmem:[%s1450_s12 + $0xb8] sm:$0xff] %v377_v23  ;;  %v379_v24 = vld [vmem:[%s1445_s11 + $0x180] sm:$0xff]  ;;  %v381_v25 = vld [vmem:[%s1445_s11 + $0x190] sm:$0xff] }
  0x26   : > { %v383_v26 = vld [vmem:[%s1445_s11 + $0x1a0] sm:$0xff]  ;;  %380 = vst [vmem:[%s1450_s12 + $0xc0] sm:$0xff] %v379_v24  ;;  %382 = vst [vmem:[%s1450_s12 + $0xc8] sm:$0xff] %v381_v25  ;;  %v385_v27 = vld [vmem:[%s1445_s11 + $0x1b0] sm:$0xff] }
  0x27   : > { %384 = vst [vmem:[%s1450_s12 + $0xd0] sm:$0xff] %v383_v26  ;;  %v387_v28 = vld [vmem:[%s1445_s11 + $0x1c0] sm:$0xff]  ;;  %v389_v29 = vld [vmem:[%s1445_s11 + $0x1d0] sm:$0xff]  ;;  %386 = vst [vmem:[%s1450_s12 + $0xd8] sm:$0xff] %v385_v27 }
  0x28   : > { %388 = vst [vmem:[%s1450_s12 + $0xe0] sm:$0xff] %v387_v28  ;;  %390 = vst [vmem:[%s1450_s12 + $0xe8] sm:$0xff] %v389_v29  ;;  %v391_v30 = vld [vmem:[%s1445_s11 + $0x1e0] sm:$0xff]  ;;  %v393_v31 = vld [vmem:[%s1445_s11 + $0x1f0] sm:$0xff] }
  0x29   : > { %v395_v32 = vld [vmem:[%s1445_s11 + $0x200] sm:$0xff]  ;;  %392 = vst [vmem:[%s1450_s12 + $0xf0] sm:$0xff] %v391_v30  ;;  %394 = vst [vmem:[%s1450_s12 + $0xf8] sm:$0xff] %v393_v31  ;;  %v397_v33 = vld [vmem:[%s1445_s11 + $0x210] sm:$0xff] }
  0x2a   : > { %396 = vst [vmem:[%s1450_s12 + $0x100] sm:$0xff] %v395_v32  ;;  %v399_v34 = vld [vmem:[%s1445_s11 + $0x220] sm:$0xff]  ;;  %v401_v35 = vld [vmem:[%s1445_s11 + $0x230] sm:$0xff]  ;;  %398 = vst [vmem:[%s1450_s12 + $0x108] sm:$0xff] %v397_v33 }
  0x2b   : > { %400 = vst [vmem:[%s1450_s12 + $0x110] sm:$0xff] %v399_v34  ;;  %402 = vst [vmem:[%s1450_s12 + $0x118] sm:$0xff] %v401_v35  ;;  %v403_v36 = vld [vmem:[%s1445_s11 + $0x240] sm:$0xff]  ;;  %v405_v37 = vld [vmem:[%s1445_s11 + $0x250] sm:$0xff] }
  0x2c   : > { %v407_v38 = vld [vmem:[%s1445_s11 + $0x260] sm:$0xff]  ;;  %404 = vst [vmem:[%s1450_s12 + $0x120] sm:$0xff] %v403_v36  ;;  %406 = vst [vmem:[%s1450_s12 + $0x128] sm:$0xff] %v405_v37  ;;  %v409_v39 = vld [vmem:[%s1445_s11 + $0x270] sm:$0xff] }
  0x2d   : > { %408 = vst [vmem:[%s1450_s12 + $0x130] sm:$0xff] %v407_v38  ;;  %v411_v40 = vld [vmem:[%s1445_s11 + $0x280] sm:$0xff]  ;;  %v413_v41 = vld [vmem:[%s1445_s11 + $0x290] sm:$0xff]  ;;  %410 = vst [vmem:[%s1450_s12 + $0x138] sm:$0xff] %v409_v39 }
  0x2e   : > { %412 = vst [vmem:[%s1450_s12 + $0x140] sm:$0xff] %v411_v40  ;;  %414 = vst [vmem:[%s1450_s12 + $0x148] sm:$0xff] %v413_v41  ;;  %v415_v42 = vld [vmem:[%s1445_s11 + $0x2a0] sm:$0xff]  ;;  %v417_v43 = vld [vmem:[%s1445_s11 + $0x2b0] sm:$0xff] }
  0x2f   : > { %v419_v44 = vld [vmem:[%s1445_s11 + $0x2c0] sm:$0xff]  ;;  %416 = vst [vmem:[%s1450_s12 + $0x150] sm:$0xff] %v415_v42  ;;  %418 = vst [vmem:[%s1450_s12 + $0x158] sm:$0xff] %v417_v43  ;;  %v421_v45 = vld [vmem:[%s1445_s11 + $0x2d0] sm:$0xff] }
  0x30   : > { %420 = vst [vmem:[%s1450_s12 + $0x160] sm:$0xff] %v419_v44  ;;  %v423_v46 = vld [vmem:[%s1445_s11 + $0x2e0] sm:$0xff]  ;;  %v425_v47 = vld [vmem:[%s1445_s11 + $0x2f0] sm:$0xff]  ;;  %422 = vst [vmem:[%s1450_s12 + $0x168] sm:$0xff] %v421_v45 }
  0x31   : > { %424 = vst [vmem:[%s1450_s12 + $0x170] sm:$0xff] %v423_v46  ;;  %426 = vst [vmem:[%s1450_s12 + $0x178] sm:$0xff] %v425_v47 }
  0x32 PF: > { %p1105_p7 = scmp.ge.s32.totalorder %s1356_s21, 1  ;;  %p447_p8 = scmp.lt.s32.totalorder %s1356_s21, 13 }
  0x34   : > { %p448_p9 = pnand %p1105_p7, %p447_p8 }
  0x35   : > { %s454_s13 = sand.u32 (!%p448_p9), 1, %s1332_s15   ;;  %s500_s14 = smul.u32 (!%p448_p9), 3, %s1340_s17 }
  0x36   : > { %451 = sbr.rel (%p448_p9) target bundleno = 368 (0x170), region = 70  ;;  %s1107_s25 = sshll.u32 (!%p448_p9), %s1344_s18, 1 }
  0x37   : > { %s1168_s24 = smul.u32 (!%p448_p9), 384, %s454_s13  ;;  %p503_p10 = scmp.lt.s32.totalorder (!%p448_p9), %s500_s14, 17 }
  0x38   : > { %p513_p11 = scmp.lt.s32.totalorder (!%p448_p9), %s1107_s25, 3  ;;  %p1111_p12 = scmp.ne.s32.totalorder (!%p448_p9), %s1340_s17, 0 }
  0x39   : > { %s1571_s13 = scalar_lea.vmem (!%p448_p9), [#allocation3], %s1168_s24 }
  0x3d   : > { %s1676_s14 = smov (!%p503_p10, %s500_s14), 17  ;;  %s1678_s25 = smov (!%p513_p11, %s1107_s25), 3 }
  0x3e   : > { %s1106_s26 = sshll.u32 %s1676_s14, 2  ;;  %s515_s15 = scalar_lea.vmem %s1660_s2, %s1678_s25  ;;  %v1358_v48 = vmov (!%p1111_p12), 0.0  }
  0x3f   : > { %s1555_s30 = scalar_lea.vmem %s1658_s0, %s1106_s26  ;;  %s520_s8 = scalar_lea.vmem %s1661_s3, %s1678_s25  ;;  %537 = vst [vmem:[#allocation2] sm:$0xff] (!%p1111_p12), %v1358_v48  ;;  %538 = vst [vmem:[#allocation2 + $0x8] sm:$0xff] (!%p1111_p12), %v1358_v48 }
  0x40   : > { %s1110_s9 = sshll.u32 %s1678_s25, 3  ;;  %536 = sbr.rel (%p1111_p12) target bundleno = 71 (0x47), region = 78 }
  0x41   : > { %s1569_s12 = scalar_lea.vmem %s1662_s4, %s1110_s9 }
  0x47 PF: > { %v1227_v49 = vld [vmem:[%s1571_s13 + $0x4] ss:$8 sps:$4 sm:$0xff]   ;;  %v1229_v50 = vld [vmem:[%s1571_s13] ss:$8 sps:$4 sm:$0xff]   ;;  %v1359_v51 = vmov 0   ;;  %v541_v18 = vld [vmem:[%s1555_s30] sm:$0xff] }
  0x48   : > { %915 = vmatprep.mubr.bf16.mxu1 %v1359_v51  ;;  %842 = vmatprep.subr.bf16.mxu0 %v1227_v49  ;;  %v1230_v52 = vld [vmem:[%s1571_s13 + $0x14] ss:$8 sps:$4 sm:$0xff]   ;;  %v1232_v53 = vld [vmem:[%s1571_s13 + $0x10] ss:$8 sps:$4 sm:$0xff]   ;;  %v1233_v54 = vld [vmem:[%s1571_s13 + $0x24] ss:$8 sps:$4 sm:$0xff]   ;;  %v1113_v19 = vcombine.high %v541_v18, %v541_v18  ;;  %v1112_v37 = vcombine.low %v541_v18, %v541_v18 }
  0x49   : > { %843 = vmatpush1.bf16.msra.mxu0 %v1229_v50  ;;  %v1235_v55 = vld [vmem:[%s1571_s13 + $0x20] ss:$8 sps:$4 sm:$0xff]   ;;  %v1236_v56 = vld [vmem:[%s1571_s13 + $0x34] ss:$8 sps:$4 sm:$0xff]   ;;  %v1238_v57 = vld [vmem:[%s1571_s13 + $0x30] ss:$8 sps:$4 sm:$0xff]  }
  0x4a   : > { %844 = vmatprep.subr.bf16.mxu0 %v1230_v52  ;;  %v1251_v58 = vld [vmem:[%s1571_s13 + $0x104] ss:$8 sps:$4 sm:$0xff]   ;;  %v1253_v59 = vld [vmem:[%s1571_s13 + $0x100] ss:$8 sps:$4 sm:$0xff]   ;;  %v1257_v61 = vld [vmem:[%s1571_s13 + $0x114] ss:$8 sps:$4 sm:$0xff]   ;;  %874 = vmatprep.mubr.bf16.mxu0 %v1113_v19 }
  0x4b   : > { %v1239_v60 = vld [vmem:[%s1571_s13 + $0x44] ss:$8 sps:$4 sm:$0xff]   ;;  %883 = vmatprep.subr.bf16.mxu1 %v1251_v58  ;;  %v1259_v62 = vld [vmem:[%s1571_s13 + $0x110] ss:$8 sps:$4 sm:$0xff]   ;;  %v1241_v63 = vld [vmem:[%s1571_s13 + $0x40] ss:$8 sps:$4 sm:$0xff]  }
  0x4c   : > { %884 = vmatpush1.bf16.msra.mxu1 %v1253_v59  ;;  %v1242_v0 = vld [vmem:[%s1571_s13 + $0x54] ss:$8 sps:$4 sm:$0xff]   ;;  %v1263_v1 = vld [vmem:[%s1571_s13 + $0x124] ss:$8 sps:$4 sm:$0xff]   ;;  %v1265_v2 = vld [vmem:[%s1571_s13 + $0x120] ss:$8 sps:$4 sm:$0xff]  }
  0x4d   : > { %845 = vmatpush1.bf16.msra.mxu0 %v1232_v53  ;;  %885 = vmatprep.subr.bf16.mxu1 %v1257_v61  ;;  %v1244_v3 = vld [vmem:[%s1571_s13 + $0x50] ss:$8 sps:$4 sm:$0xff]   ;;  %v1269_v4 = vld [vmem:[%s1571_s13 + $0x134] ss:$8 sps:$4 sm:$0xff]   ;;  %v1245_v5 = vld [vmem:[%s1571_s13 + $0x64] ss:$8 sps:$4 sm:$0xff]  }
  0x4e   : > { %846 = vmatprep.subr.bf16.mxu0 %v1233_v54  ;;  %v1271_v6 = vld [vmem:[%s1571_s13 + $0x130] ss:$8 sps:$4 sm:$0xff]   ;;  %v1247_v7 = vld [vmem:[%s1571_s13 + $0x60] ss:$8 sps:$4 sm:$0xff]   ;;  %v1275_v8 = vld [vmem:[%s1571_s13 + $0x144] ss:$8 sps:$4 sm:$0xff]  }
  0x4f   : > { %v1248_v9 = vld [vmem:[%s1571_s13 + $0x74] ss:$8 sps:$4 sm:$0xff]   ;;  %v1277_v10 = vld [vmem:[%s1571_s13 + $0x140] ss:$8 sps:$4 sm:$0xff]   ;;  %v1250_v11 = vld [vmem:[%s1571_s13 + $0x70] ss:$8 sps:$4 sm:$0xff]  }
  0x50   : > { %886 = vmatpush1.bf16.msra.mxu1 %v1259_v62  ;;  %v1281_v12 = vld [vmem:[%s1571_s13 + $0x154] ss:$8 sps:$4 sm:$0xff]   ;;  %v1254_v13 = vld [vmem:[%s1571_s13 + $0x84] ss:$8 sps:$4 sm:$0xff]   ;;  %v1283_v14 = vld [vmem:[%s1571_s13 + $0x150] ss:$8 sps:$4 sm:$0xff]  }
  0x51   : > { %847 = vmatpush1.bf16.msra.mxu0 %v1235_v55  ;;  %887 = vmatprep.subr.bf16.mxu1 %v1263_v1  ;;  %v1256_v15 = vld [vmem:[%s1571_s13 + $0x80] ss:$8 sps:$4 sm:$0xff]   ;;  %v1287_v16 = vld [vmem:[%s1571_s13 + $0x164] ss:$8 sps:$4 sm:$0xff]   ;;  %v1260_v17 = vld [vmem:[%s1571_s13 + $0x94] ss:$8 sps:$4 sm:$0xff]  }
  0x52   : > { %848 = vmatprep.subr.bf16.mxu0 %v1236_v56  ;;  %v1289_v20 = vld [vmem:[%s1571_s13 + $0x160] ss:$8 sps:$4 sm:$0xff]   ;;  %v1262_v21 = vld [vmem:[%s1571_s13 + $0x90] ss:$8 sps:$4 sm:$0xff]   ;;  %v1293_v22 = vld [vmem:[%s1571_s13 + $0x174] ss:$8 sps:$4 sm:$0xff]  }
  0x53   : > { %v1266_v23 = vld [vmem:[%s1571_s13 + $0xa4] ss:$8 sps:$4 sm:$0xff]   ;;  %v1295_v24 = vld [vmem:[%s1571_s13 + $0x170] ss:$8 sps:$4 sm:$0xff]   ;;  %v1268_v25 = vld [vmem:[%s1571_s13 + $0xa0] ss:$8 sps:$4 sm:$0xff]  }
  0x54   : > { %888 = vmatpush1.bf16.msra.mxu1 %v1265_v2  ;;  %v1272_v26 = vld [vmem:[%s1571_s13 + $0xb4] ss:$8 sps:$4 sm:$0xff]   ;;  %v1299_v27 = vld [vmem:[%s1555_s30 + $0x8] ss:$0 sps:$4 sm:$0xff]   ;;  %v1278_v29 = vld [vmem:[%s1571_s13 + $0xc4] ss:$8 sps:$4 sm:$0xff]  }
  0x55   : > { %849 = vmatpush1.bf16.msra.mxu0 %v1238_v57  ;;  %889 = vmatprep.subr.bf16.mxu1 %v1269_v4  ;;  %v1274_v28 = vld [vmem:[%s1571_s13 + $0xb0] ss:$8 sps:$4 sm:$0xff]   ;;  %v1280_v30 = vld [vmem:[%s1571_s13 + $0xc0] ss:$8 sps:$4 sm:$0xff]   ;;  %v1284_v31 = vld [vmem:[%s1571_s13 + $0xd4] ss:$8 sps:$4 sm:$0xff]  }
  0x56   : > { %850 = vmatprep.subr.bf16.mxu0 %v1239_v60  ;;  %v1286_v32 = vld [vmem:[%s1571_s13 + $0xd0] ss:$8 sps:$4 sm:$0xff]   ;;  %v1290_v33 = vld [vmem:[%s1571_s13 + $0xe4] ss:$8 sps:$4 sm:$0xff]   ;;  %v1292_v34 = vld [vmem:[%s1571_s13 + $0xe0] ss:$8 sps:$4 sm:$0xff]  }
  0x57   : > { %v1296_v35 = vld [vmem:[%s1571_s13 + $0xf4] ss:$8 sps:$4 sm:$0xff]   ;;  %v1298_v36 = vld [vmem:[%s1571_s13 + $0xf0] ss:$8 sps:$4 sm:$0xff]   ;;  %p1163_p13 = scmp.ne.s32.totalorder %s1340_s17, 5 }
  0x58   : > { %890 = vmatpush1.bf16.msra.mxu1 %v1271_v6  ;;  %v539_v42 = vld [vmem:[#allocation2] sm:$0xff]  ;;  %v540_v45 = vld [vmem:[#allocation2 + $0x8] sm:$0xff]  ;;  %v936_v52 = vlaneseq (!%p1163_p13) }
  0x59   : > { %851 = vmatpush1.bf16.msra.mxu0 %v1241_v63  ;;  %891 = vmatprep.subr.bf16.mxu1 %v1275_v8  ;;  %v934_v54 = vld [vmem:[%s515_s15] sm:$0x3] (!%p1163_p13) }
  0x5a   : > { %852 = vmatprep.subr.bf16.mxu0 %v1242_v0  ;;  %v937_v53 = vshrl.u32 (!%p1163_p13), %v936_v52, 7  ;;  %v948_v55 = vld [vmem:[%s520_s8] sm:$0x3] (!%p1163_p13) }
  0x5c   : > { %892 = vmatpush1.bf16.msra.mxu1 %v1277_v10  ;;  %v938_v56 = vsub.s32 (!%p1163_p13), 0, %v937_v53  ;;  %v942_v57 = vsub.s32 (!%p1163_p13), 1, %v937_v53 }
  0x5d   : > { %853 = vmatpush1.bf16.msra.mxu0 %v1244_v3  ;;  %893 = vmatprep.subr.bf16.mxu1 %v1281_v12 }
  0x5e   : > { %854 = vmatprep.subr.bf16.mxu0 %v1245_v5  ;;  %v939_v60 = vrot.slane (!%p1163_p13), %v934_v54, %v938_v56  ;;  %v953_v61 = vrot.slane (!%p1163_p13), %v948_v55, %v938_v56  ;;  %v943_v62 = vrot.slane (!%p1163_p13), %v934_v54, %v942_v57  ;;  %v957_v63 = vrot.slane (!%p1163_p13), %v948_v55, %v942_v57 }
  0x60   : > { %894 = vmatpush1.bf16.msra.mxu1 %v1283_v14 }
  0x61   : > { %855 = vmatpush1.bf16.msra.mxu0 %v1247_v7  ;;  %895 = vmatprep.subr.bf16.mxu1 %v1287_v16 }
  0x62   : > { %856 = vmatprep.subr.bf16.mxu0 %v1248_v9 }
  0x64   : > { %896 = vmatpush1.bf16.msra.mxu1 %v1289_v20 }
  0x65   : > { %857 = vmatpush1.bf16.msra.mxu0 %v1250_v11  ;;  %897 = vmatprep.subr.bf16.mxu1 %v1293_v22 }
  0x66   : > { %858 = vmatprep.subr.bf16.mxu0 %v1254_v13 }
  0x68   : > { %898 = vmatpush1.bf16.msra.mxu1 %v1295_v24 }
  0x69   : > { %859 = vmatpush1.bf16.msra.mxu0 %v1256_v15 }
  0x6a   : > { %860 = vmatprep.subr.bf16.mxu0 %v1260_v17 }
  0x6b   : > { %916 = vmatmul.mubr.bf16.vlgmr.msra.gmra.mrb[0].mxu1 %v1299_v27 }
  0x6d   : > { %861 = vmatpush1.bf16.msra.mxu0 %v1262_v21 }
  0x6e   : > { %862 = vmatprep.subr.bf16.mxu0 %v1266_v23 }
  0x71   : > { %863 = vmatpush1.bf16.msra.mxu0 %v1268_v25 }
  0x72   : > { %864 = vmatprep.subr.bf16.mxu0 %v1272_v26 }
  0x75   : > { %865 = vmatpush1.bf16.msra.mxu0 %v1274_v28 }
  0x76   : > { %866 = vmatprep.subr.bf16.mxu0 %v1278_v29 }
  0x79   : > { %867 = vmatpush1.bf16.msra.mxu0 %v1280_v30 }
  0x7a   : > { %868 = vmatprep.subr.bf16.mxu0 %v1284_v31 }
  0x7d   : > { %869 = vmatpush1.bf16.msra.mxu0 %v1286_v32 }
  0x7e   : > { %870 = vmatprep.subr.bf16.mxu0 %v1290_v33 }
  0x81   : > { %871 = vmatpush1.bf16.msra.mxu0 %v1292_v34 }
  0x82   : > { %872 = vmatprep.subr.bf16.mxu0 %v1296_v35 }
  0x85   : > { %873 = vmatpush1.bf16.msra.mxu0 %v1298_v36 }
  0x88   : > { %875 = vmatmul.mubr.bf16.vlgmr.msra.gmra.mrb[0].mxu0 %v1112_v37 }
 0x13e   : > { %v917_v38 = vpop.f32.mrb[0].mxu1 }
 0x13f   : > { %v919_v39 = vpop.f32.mrb[1].mxu1 }
 0x140   : > { %v921_v40 = vpop.f32.mrb[2].mxu1 }
 0x141   : > { %v922_v41 = vpop.f32.mrb[3].mxu1 }
 0x15b   : > { %v876_v43 = vpop.f32.mrb[0].mxu0  ;;  %931 = sbr.rel (%p1163_p13) target bundleno = 368 (0x170), region = 82 }
 0x15c   : > { %v918_v44 = vadd.f32 %v917_v38, %v876_v43  ;;  %v878_v46 = vpop.f32.mrb[1].mxu0 }
 0x15d   : > { %v920_v47 = vadd.f32 %v919_v39, %v878_v46  ;;  %v880_v48 = vpop.f32.mrb[2].mxu0 }
 0x15e   : > { %v924_v49 = vadd.f32 %v918_v44, %v539_v42  ;;  %v881_v50 = vpop.f32.mrb[3].mxu0 }
 0x15f   : > { %v925_v51 = vadd.f32 %v920_v47, %v540_v45 }
 0x160   : > { %926 = vst [vmem:[#allocation2] sm:$0xff] %v924_v49 }
 0x161   : > { %927 = vst [vmem:[#allocation2 + $0x8] sm:$0xff] %v925_v51 }
 0x167   : > { %v932_v58 = vld [vmem:[#allocation2] sm:$0xff] }
 0x168   : > { %v933_v59 = vld [vmem:[#allocation2 + $0x8] sm:$0xff]  ;;  %v946_v0 = vmul.f32 %v939_v60, %v932_v58 }
 0x169   : > { %v947_v1 = vmul.f32 %v943_v62, %v933_v59 }
 0x16a   : > { %v960_v2 = vadd.f32 %v953_v61, %v946_v0 }
 0x16b   : > { %v961_v3 = vadd.f32 %v957_v63, %v947_v1 }
 0x16c   : > { %v962_v4 = vmax.f32 %v960_v2, 0.0 }
 0x16d   : > { %v963_v5 = vmax.f32 %v961_v3, 0.0 }
 0x16e   : > { %964 = vst [vmem:[%s1569_s12] sm:$0xff] %v962_v4 }
 0x16f   : > { %965 = vst [vmem:[%s1569_s12 + $0x8] sm:$0xff] %v963_v5 }
 0x170 PF: > { %s14_s21 = sadd.s32 1, %s1356_s21   ;;  %s1663_s15 = smov %s1336_s16 }
 0x171   : > { %p11_p0 = scmp.ge.s32.totalorder %s14_s21, 14   ;;  %s1664_s16 = smov %s1436_s28 }
 0x172   : > { %s1665_s17 = smov %s1348_s19  ;;  %s1666_s18 = smov %s1352_s20 }
 0x173   : > { %s1667_s19 = smov %s1670_s22  ;;  %s1668_s20 = smov %s1674_s23 }
 0x174   :  { %13 = sbr.rel (!%p11_p0) target bundleno = 4 (0x4), region = 126 }

// kernel: multimodal_classifier_forward.37
= control target key start
LH: loop header
LB: loop body
LE: loop exit
PB: predicated region body
PF: predicated region fallthrough
CT: control target
= control target key end

     0   :  { %s1094_s15 = smov 0   ;;  %s1096_s16 = smov 0   ;;  %s1276_s0 = inlined_call_operand.vmem [shape: bf16[8,256], index: 0, kind: input, shape index: {}]   ;;  %s1277_s1 = inlined_call_operand.vmem [shape: bf16[256,512], index: 1, kind: input, shape index: {}]   ;;  %s1278_s2 = inlined_call_operand.vmem [shape: f32[1,512], index: 2, kind: input, shape index: {}]   ;;  %s1279_s3 = inlined_call_operand.vmem [shape: f32[1,512], index: 3, kind: input, shape index: {}]   ;;  %s1280_s4 = inlined_call_operand.vmem [shape: f32[8,512], index: 4, kind: output, shape index: {}]  }
   0x1   :  { %s1098_s17 = smov 0   ;;  %s1100_s18 = smov 0  }
   0x2   :  { %s1102_s19 = smov 0  }
   0x3 LB: > { %s29_s20 = sadd.s32 1, %s1063_s18  ;;  %p77_p1 = scmp.ne.s32.totalorder %s1055_s16, %s1051_s15  ;;  %s1067_s19 = sphi %s1102_s19, %s14_s19   ;;  %s1063_s18 = sphi %s1100_s18, %s1284_s18   ;;  %s1059_s17 = sphi %s1098_s17, %s1283_s17   ;;  %s1055_s16 = sphi %s1096_s16, %s1282_s16   ;;  %s1051_s15 = sphi %s1094_s15, %s1281_s15  }
   0x4   : > { %p31_p0 = scmp.ge.s32.totalorder %s29_s20, 2  ;;  %p78_p2 = scmp.eq.s32.totalorder %s1067_s19, 0 }
   0x5   : > { %s70_s22 = sadd.s32 1, %s1055_s16  ;;  %p892_p5 = scmp.ge.s32.totalorder %s1067_s19, 2 }
   0x6   : > { %s1286_s20 = smov (%p31_p0, %s29_s20), 0  ;;  %p79_p3 = por %p78_p2, %p77_p1 }
   0x7   : > { %s66_s21 = ssub.s32 %s1063_s18, %s1286_s20  ;;  %196 = sbr.rel (%p892_p5) target bundleno = 34 (0x22), region = 20 }
   0x8   : > { %p68_p4 = scmp.eq.s32.totalorder %s66_s21, 0 }
   0xa   : > { %s1129_s23 = scalar_select %p68_p4, %s1055_s16, %s70_s22  }
   0xe   : > { %199 = sbr.rel (!%p79_p3) target bundleno = 34 (0x22), region = 24  ;;  %s201_s24 = sand.u32 (%p79_p3), 1, %s1055_s16  }
   0xf   : > { %s938_s25 = sshll.u32 (%p79_p3), %s1063_s18, 3  ;;  %s893_s26 = sshll.u32 (%p79_p3), %s201_s24, 8 }
  0x10   : > { %s1137_s29 = scalar_lea.vmem (%p79_p3), %s1277_s1, %s938_s25  ;;  %s1142_s30 = scalar_lea.vmem (%p79_p3), [#allocation3], %s893_s26 }
  0x11   : > { %v299_v0 = vld [vmem:[%s1137_s29] sm:$0xff] (%p79_p3)  ;;  %v301_v1 = vld [vmem:[%s1137_s29 + $0x10] sm:$0xff] (%p79_p3) }
  0x12   : > { %v303_v2 = vld [vmem:[%s1137_s29 + $0x20] sm:$0xff] (%p79_p3)  ;;  %300 = vst [vmem:[%s1142_s30] sm:$0xff] (%p79_p3), %v299_v0  ;;  %302 = vst [vmem:[%s1142_s30 + $0x8] sm:$0xff] (%p79_p3), %v301_v1  ;;  %v305_v3 = vld [vmem:[%s1137_s29 + $0x30] sm:$0xff] (%p79_p3) }
  0x13   : > { %304 = vst [vmem:[%s1142_s30 + $0x10] sm:$0xff] (%p79_p3), %v303_v2  ;;  %v307_v4 = vld [vmem:[%s1137_s29 + $0x40] sm:$0xff] (%p79_p3)  ;;  %v309_v5 = vld [vmem:[%s1137_s29 + $0x50] sm:$0xff] (%p79_p3)  ;;  %306 = vst [vmem:[%s1142_s30 + $0x18] sm:$0xff] (%p79_p3), %v305_v3 }
  0x14   : > { %308 = vst [vmem:[%s1142_s30 + $0x20] sm:$0xff] (%p79_p3), %v307_v4  ;;  %310 = vst [vmem:[%s1142_s30 + $0x28] sm:$0xff] (%p79_p3), %v309_v5  ;;  %v311_v6 = vld [vmem:[%s1137_s29 + $0x60] sm:$0xff] (%p79_p3)  ;;  %v313_v7 = vld [vmem:[%s1137_s29 + $0x70] sm:$0xff] (%p79_p3) }
  0x15   : > { %v315_v8 = vld [vmem:[%s1137_s29 + $0x80] sm:$0xff]  ;;  %312 = vst [vmem:[%s1142_s30 + $0x30] sm:$0xff] %v311_v6  ;;  %314 = vst [vmem:[%s1142_s30 + $0x38] sm:$0xff] %v313_v7  ;;  %v317_v9 = vld [vmem:[%s1137_s29 + $0x90] sm:$0xff] }
  0x16   : > { %316 = vst [vmem:[%s1142_s30 + $0x40] sm:$0xff] %v315_v8  ;;  %v319_v10 = vld [vmem:[%s1137_s29 + $0xa0] sm:$0xff]  ;;  %v321_v11 = vld [vmem:[%s1137_s29 + $0xb0] sm:$0xff]  ;;  %318 = vst [vmem:[%s1142_s30 + $0x48] sm:$0xff] %v317_v9 }
  0x17   : > { %320 = vst [vmem:[%s1142_s30 + $0x50] sm:$0xff] %v319_v10  ;;  %322 = vst [vmem:[%s1142_s30 + $0x58] sm:$0xff] %v321_v11  ;;  %v323_v12 = vld [vmem:[%s1137_s29 + $0xc0] sm:$0xff]  ;;  %v325_v13 = vld [vmem:[%s1137_s29 + $0xd0] sm:$0xff] }
  0x18   : > { %v327_v14 = vld [vmem:[%s1137_s29 + $0xe0] sm:$0xff]  ;;  %324 = vst [vmem:[%s1142_s30 + $0x60] sm:$0xff] %v323_v12  ;;  %326 = vst [vmem:[%s1142_s30 + $0x68] sm:$0xff] %v325_v13  ;;  %v329_v15 = vld [vmem:[%s1137_s29 + $0xf0] sm:$0xff] }
  0x19   : > { %328 = vst [vmem:[%s1142_s30 + $0x70] sm:$0xff] %v327_v14  ;;  %v331_v16 = vld [vmem:[%s1137_s29 + $0x100] sm:$0xff]  ;;  %v333_v17 = vld [vmem:[%s1137_s29 + $0x110] sm:$0xff]  ;;  %330 = vst [vmem:[%s1142_s30 + $0x78] sm:$0xff] %v329_v15 }
  0x1a   : > { %332 = vst [vmem:[%s1142_s30 + $0x80] sm:$0xff] %v331_v16  ;;  %334 = vst [vmem:[%s1142_s30 + $0x88] sm:$0xff] %v333_v17  ;;  %v335_v18 = vld [vmem:[%s1137_s29 + $0x120] sm:$0xff]  ;;  %v337_v19 = vld [vmem:[%s1137_s29 + $0x130] sm:$0xff] }
  0x1b   : > { %v339_v20 = vld [vmem:[%s1137_s29 + $0x140] sm:$0xff]  ;;  %336 = vst [vmem:[%s1142_s30 + $0x90] sm:$0xff] %v335_v18  ;;  %338 = vst [vmem:[%s1142_s30 + $0x98] sm:$0xff] %v337_v19  ;;  %v341_v21 = vld [vmem:[%s1137_s29 + $0x150] sm:$0xff] }
  0x1c   : > { %340 = vst [vmem:[%s1142_s30 + $0xa0] sm:$0xff] %v339_v20  ;;  %v343_v22 = vld [vmem:[%s1137_s29 + $0x160] sm:$0xff]  ;;  %v345_v23 = vld [vmem:[%s1137_s29 + $0x170] sm:$0xff]  ;;  %342 = vst [vmem:[%s1142_s30 + $0xa8] sm:$0xff] %v341_v21 }
  0x1d   : > { %344 = vst [vmem:[%s1142_s30 + $0xb0] sm:$0xff] %v343_v22  ;;  %346 = vst [vmem:[%s1142_s30 + $0xb8] sm:$0xff] %v345_v23  ;;  %v347_v24 = vld [vmem:[%s1137_s29 + $0x180] sm:$0xff]  ;;  %v349_v25 = vld [vmem:[%s1137_s29 + $0x190] sm:$0xff] }
  0x1e   : > { %v351_v26 = vld [vmem:[%s1137_s29 + $0x1a0] sm:$0xff]  ;;  %348 = vst [vmem:[%s1142_s30 + $0xc0] sm:$0xff] %v347_v24  ;;  %350 = vst [vmem:[%s1142_s30 + $0xc8] sm:$0xff] %v349_v25  ;;  %v353_v27 = vld [vmem:[%s1137_s29 + $0x1b0] sm:$0xff] }
  0x1f   : > { %352 = vst [vmem:[%s1142_s30 + $0xd0] sm:$0xff] %v351_v26  ;;  %v355_v28 = vld [vmem:[%s1137_s29 + $0x1c0] sm:$0xff]  ;;  %v357_v29 = vld [vmem:[%s1137_s29 + $0x1d0] sm:$0xff]  ;;  %354 = vst [vmem:[%s1142_s30 + $0xd8] sm:$0xff] %v353_v27 }
  0x20   : > { %356 = vst [vmem:[%s1142_s30 + $0xe0] sm:$0xff] %v355_v28  ;;  %358 = vst [vmem:[%s1142_s30 + $0xe8] sm:$0xff] %v357_v29  ;;  %v359_v30 = vld [vmem:[%s1137_s29 + $0x1e0] sm:$0xff]  ;;  %v361_v31 = vld [vmem:[%s1137_s29 + $0x1f0] sm:$0xff] }
  0x21   : > { %360 = vst [vmem:[%s1142_s30 + $0xf0] sm:$0xff] %v359_v30  ;;  %362 = vst [vmem:[%s1142_s30 + $0xf8] sm:$0xff] %v361_v31 }
  0x22 PF: > { %p896_p6 = scmp.ge.s32.totalorder %s1067_s19, 1  ;;  %p383_p7 = scmp.lt.s32.totalorder %s1067_s19, 3 }
  0x24   : > { %p384_p8 = pnand %p896_p6, %p383_p7 }
  0x25   : > { %s390_s5 = sand.u32 (!%p384_p8), 1, %s1051_s15   ;;  %v1211_v32 = vld [vmem:[%s1276_s0] sm:$0xff] (!%p384_p8)  ;;  %s898_s10 = sshll.u32 (!%p384_p8), %s1059_s17, 1  ;;  %v728_v3 = vlaneseq (!%p384_p8) }
  0x26   : > { %387 = sbr.rel (%p384_p8) target bundleno = 323 (0x143), region = 70  ;;  %s897_s8 = sshll.u32 (!%p384_p8), %s390_s5, 8  ;;  %v903_v33 = vcombine.high (!%p384_p8), %v1211_v32, %v1211_v32  ;;  %v902_v2 = vcombine.low (!%p384_p8), %v1211_v32, %v1211_v32 }
  0x27   : > { %s1215_s9 = scalar_lea.vmem (!%p384_p8), [#allocation3], %s897_s8  ;;  %p449_p9 = scmp.lt.s32.totalorder (!%p384_p8), %s898_s10, 3  ;;  %v729_v4 = vshrl.u32 (!%p384_p8), %v728_v3, 7 }
  0x28   : > { %v979_v34 = vld [vmem:[%s1215_s9 + $0x4] ss:$8 sps:$4 sm:$0xff] (!%p384_p8)   ;;  %708 = vmatprep.mubr.bf16.mxu0 (!%p384_p8), %v903_v33  ;;  %v981_v35 = vld [vmem:[%s1215_s9] ss:$8 sps:$4 sm:$0xff] (!%p384_p8)   ;;  %v982_v36 = vld [vmem:[%s1215_s9 + $0x14] ss:$8 sps:$4 sm:$0xff] (!%p384_p8)  }
  0x29   : > { %676 = vmatprep.subr.bf16.mxu0 (!%p384_p8), %v979_v34  ;;  %v984_v37 = vld [vmem:[%s1215_s9 + $0x10] ss:$8 sps:$4 sm:$0xff] (!%p384_p8)   ;;  %v985_v38 = vld [vmem:[%s1215_s9 + $0x24] ss:$8 sps:$4 sm:$0xff] (!%p384_p8)   ;;  %v987_v39 = vld [vmem:[%s1215_s9 + $0x20] ss:$8 sps:$4 sm:$0xff] (!%p384_p8)  }
  0x2a   : > { %677 = vmatpush1.bf16.msra.mxu0 (!%p384_p8), %v981_v35  ;;  %v988_v40 = vld [vmem:[%s1215_s9 + $0x34] ss:$8 sps:$4 sm:$0xff] (!%p384_p8)   ;;  %v990_v41 = vld [vmem:[%s1215_s9 + $0x30] ss:$8 sps:$4 sm:$0xff] (!%p384_p8)   ;;  %v991_v42 = vld [vmem:[%s1215_s9 + $0x44] ss:$8 sps:$4 sm:$0xff] (!%p384_p8)  }
  0x2b   : > { %678 = vmatprep.subr.bf16.mxu0 (!%p384_p8), %v982_v36  ;;  %v993_v43 = vld [vmem:[%s1215_s9 + $0x40] ss:$8 sps:$4 sm:$0xff] (!%p384_p8)   ;;  %v994_v44 = vld [vmem:[%s1215_s9 + $0x54] ss:$8 sps:$4 sm:$0xff] (!%p384_p8)   ;;  %v996_v45 = vld [vmem:[%s1215_s9 + $0x50] ss:$8 sps:$4 sm:$0xff] (!%p384_p8)  }
  0x2c   : > { %v997_v46 = vld [vmem:[%s1215_s9 + $0x64] ss:$8 sps:$4 sm:$0xff] (!%p384_p8)   ;;  %v999_v47 = vld [vmem:[%s1215_s9 + $0x60] ss:$8 sps:$4 sm:$0xff] (!%p384_p8)   ;;  %v1000_v48 = vld [vmem:[%s1215_s9 + $0x74] ss:$8 sps:$4 sm:$0xff] (!%p384_p8)  }
  0x2d   : > { %v1002_v49 = vld [vmem:[%s1215_s9 + $0x70] ss:$8 sps:$4 sm:$0xff]   ;;  %v1003_v50 = vld [vmem:[%s1215_s9 + $0x84] ss:$8 sps:$4 sm:$0xff]   ;;  %v1005_v51 = vld [vmem:[%s1215_s9 + $0x80] ss:$8 sps:$4 sm:$0xff]  }
  0x2e   : > { %679 = vmatpush1.bf16.msra.mxu0 %v984_v37  ;;  %v1006_v52 = vld [vmem:[%s1215_s9 + $0x94] ss:$8 sps:$4 sm:$0xff]   ;;  %v1008_v53 = vld [vmem:[%s1215_s9 + $0x90] ss:$8 sps:$4 sm:$0xff]   ;;  %v1009_v54 = vld [vmem:[%s1215_s9 + $0xa4] ss:$8 sps:$4 sm:$0xff]  }
  0x2f   : > { %680 = vmatprep.subr.bf16.mxu0 %v985_v38  ;;  %v1011_v55 = vld [vmem:[%s1215_s9 + $0xa0] ss:$8 sps:$4 sm:$0xff]   ;;  %v1012_v56 = vld [vmem:[%s1215_s9 + $0xb4] ss:$8 sps:$4 sm:$0xff]   ;;  %v1014_v57 = vld [vmem:[%s1215_s9 + $0xb0] ss:$8 sps:$4 sm:$0xff]  }
  0x30   : > { %v1015_v58 = vld [vmem:[%s1215_s9 + $0xc4] ss:$8 sps:$4 sm:$0xff]   ;;  %v1017_v59 = vld [vmem:[%s1215_s9 + $0xc0] ss:$8 sps:$4 sm:$0xff]   ;;  %v1018_v60 = vld [vmem:[%s1215_s9 + $0xd4] ss:$8 sps:$4 sm:$0xff]  }
  0x31   : > { %v1020_v61 = vld [vmem:[%s1215_s9 + $0xd0] ss:$8 sps:$4 sm:$0xff]   ;;  %v1021_v62 = vld [vmem:[%s1215_s9 + $0xe4] ss:$8 sps:$4 sm:$0xff]   ;;  %v1023_v63 = vld [vmem:[%s1215_s9 + $0xe0] ss:$8 sps:$4 sm:$0xff]  }
  0x32   : > { %681 = vmatpush1.bf16.msra.mxu0 %v987_v39  ;;  %v1024_v0 = vld [vmem:[%s1215_s9 + $0xf4] ss:$8 sps:$4 sm:$0xff]   ;;  %v1026_v1 = vld [vmem:[%s1215_s9 + $0xf0] ss:$8 sps:$4 sm:$0xff]   ;;  %s1288_s10 = smov (!%p449_p9, %s898_s10), 3  ;;  %v730_v5 = vsub.s32 0, %v729_v4 }
  0x33   : > { %682 = vmatprep.subr.bf16.mxu0 %v988_v40  ;;  %s451_s13 = scalar_lea.vmem %s1278_s2, %s1288_s10  ;;  %s456_s21 = scalar_lea.vmem %s1279_s3, %s1288_s10  ;;  %v734_v7 = vsub.s32 1, %v729_v4 }
  0x34   : > { %v726_v6 = vld [vmem:[%s451_s13] sm:$0x3]  ;;  %s901_s22 = sshll.u32 %s1288_s10, 3 }
  0x35   : > { %v740_v8 = vld [vmem:[%s456_s21] sm:$0x3]  ;;  %v731_v9 = vrot.slane %v726_v6, %v730_v5  ;;  %v735_v10 = vrot.slane %v726_v6, %v734_v7  ;;  %s466_s25 = scalar_lea.vmem %s1280_s4, %s901_s22 }
  0x36   : > { %683 = vmatpush1.bf16.msra.mxu0 %v990_v41  ;;  %v745_v11 = vrot.slane %v740_v8, %v730_v5  ;;  %v749_v13 = vrot.slane %v740_v8, %v734_v7 }
  0x37   : > { %684 = vmatprep.subr.bf16.mxu0 %v991_v42 }
  0x3a   : > { %685 = vmatpush1.bf16.msra.mxu0 %v993_v43 }
  0x3b   : > { %686 = vmatprep.subr.bf16.mxu0 %v994_v44 }
  0x3e   : > { %687 = vmatpush1.bf16.msra.mxu0 %v996_v45 }
  0x3f   : > { %688 = vmatprep.subr.bf16.mxu0 %v997_v46 }
  0x42   : > { %689 = vmatpush1.bf16.msra.mxu0 %v999_v47 }
  0x43   : > { %690 = vmatprep.subr.bf16.mxu0 %v1000_v48 }
  0x46   : > { %691 = vmatpush1.bf16.msra.mxu0 %v1002_v49 }
  0x47   : > { %692 = vmatprep.subr.bf16.mxu0 %v1003_v50 }
  0x4a   : > { %693 = vmatpush1.bf16.msra.mxu0 %v1005_v51 }
  0x4b   : > { %694 = vmatprep.subr.bf16.mxu0 %v1006_v52 }
  0x4e   : > { %695 = vmatpush1.bf16.msra.mxu0 %v1008_v53 }
  0x4f   : > { %696 = vmatprep.subr.bf16.mxu0 %v1009_v54 }
  0x52   : > { %697 = vmatpush1.bf16.msra.mxu0 %v1011_v55 }
  0x53   : > { %698 = vmatprep.subr.bf16.mxu0 %v1012_v56 }
  0x56   : > { %699 = vmatpush1.bf16.msra.mxu0 %v1014_v57 }
  0x57   : > { %700 = vmatprep.subr.bf16.mxu0 %v1015_v58 }
  0x5a   : > { %701 = vmatpush1.bf16.msra.mxu0 %v1017_v59 }
  0x5b   : > { %702 = vmatprep.subr.bf16.mxu0 %v1018_v60 }
  0x5e   : > { %703 = vmatpush1.bf16.msra.mxu0 %v1020_v61 }
  0x5f   : > { %704 = vmatprep.subr.bf16.mxu0 %v1021_v62 }
  0x62   : > { %705 = vmatpush1.bf16.msra.mxu0 %v1023_v63 }
  0x63   : > { %706 = vmatprep.subr.bf16.mxu0 %v1024_v0 }
  0x66   : > { %707 = vmatpush1.bf16.msra.mxu0 %v1026_v1 }
  0x69   : > { %709 = vmatmul.mubr.bf16.vlgmr.msra.gmra.mrb[0].mxu0 %v902_v2 }
 0x13c   : > { %v710_v12 = vpop.f32.mrb[0].mxu0 }
 0x13d   : > { %v738_v14 = vmul.f32 %v731_v9, %v710_v12  ;;  %v712_v15 = vpop.f32.mrb[1].mxu0 }
 0x13e   : > { %v739_v16 = vmul.f32 %v735_v10, %v712_v15  ;;  %v714_v17 = vpop.f32.mrb[2].mxu0 }
 0x13f   : > { %v752_v18 = vadd.f32 %v745_v11, %v738_v14  ;;  %v715_v19 = vpop.f32.mrb[3].mxu0 }
 0x140   : > { %v753_v20 = vadd.f32 %v749_v13, %v739_v16 }
 0x141   : > { %754 = vst [vmem:[%s466_s25] sm:$0xff] %v752_v18 }
 0x142   : > { %755 = vst [vmem:[%s466_s25 + $0x8] sm:$0xff] %v753_v20 }
 0x143 PF: > { %s14_s19 = sadd.s32 1, %s1067_s19   ;;  %s1281_s15 = smov %s1055_s16 }
 0x144   : > { %p11_p10 = scmp.ge.s32.totalorder %s14_s19, 4   ;;  %s1282_s16 = smov %s1129_s23 }
 0x145   : > { %s1283_s17 = smov %s1063_s18  ;;  %s1284_s18 = smov %s1286_s20 }
 0x146   :  { %13 = sbr.rel (!%p11_p10) target bundleno = 3 (0x3), region = 126 }

// kernel: multimodal_classifier_forward.39
= control target key start
LH: loop header
LB: loop body
LE: loop exit
PB: predicated region body
PF: predicated region fallthrough
CT: control target
= control target key end

     0   :  { %s1681_s18 = smov 0   ;;  %s1683_s19 = smov 0   ;;  %s2009_s0 = inlined_call_operand.vmem [shape: bf16[8,4608], index: 0, kind: input, shape index: {}]   ;;  %s2010_s1 = inlined_call_operand.vmem [shape: bf16[4608,512], index: 1, kind: input, shape index: {}]   ;;  %s2011_s2 = inlined_call_operand.vmem [shape: f32[1,512], index: 2, kind: input, shape index: {}]   ;;  %s2012_s3 = inlined_call_operand.vmem [shape: f32[1,512], index: 3, kind: input, shape index: {}]   ;;  %s2013_s4 = inlined_call_operand.vmem [shape: f32[8,512], index: 4, kind: input, shape index: {}]   ;;  %s2014_s5 = inlined_call_operand.vmem [shape: f32[8,512], index: 5, kind: output, shape index: {}]  }
   0x1   :  { %s1685_s20 = smov 0   ;;  %s1687_s21 = smov 0  }
   0x2   :  { %s1689_s22 = smov 0   ;;  %s1691_s23 = smov 0  }
   0x3   :  { %s1693_s24 = smov 0  }
   0x4 LB: > { %s27_s25 = sadd.s32 1, %s1640_s22  ;;  %s30_s26 = sadd.s32 1, %s1644_s23  ;;  %s1648_s24 = sphi %s1693_s24, %s15_s24   ;;  %s1644_s23 = sphi %s1691_s23, %s2020_s23   ;;  %s1640_s22 = sphi %s1689_s22, %s2019_s22   ;;  %s1636_s21 = sphi %s1687_s21, %s2018_s21   ;;  %s1632_s20 = sphi %s1685_s20, %s2017_s20   ;;  %s1628_s19 = sphi %s1683_s19, %s2016_s19   ;;  %s1624_s18 = sphi %s1681_s18, %s2015_s18  }
   0x5   : > { %p28_p0 = scmp.ge.s32.totalorder %s27_s25, 9  ;;  %p78_p1 = scmp.ne.s32.totalorder %s1628_s19, %s1624_s18 }
   0x6   : > { %p79_p2 = scmp.eq.s32.totalorder %s1648_s24, 0  ;;  %s71_s30 = sadd.s32 1, %s1628_s19 }
   0x7   : > { %s2022_s25 = smov (%p28_p0, %s27_s25), 0  ;;  %s2024_s26 = smov (!%p28_p0, %s30_s26), %s1644_s23 }
   0x8   : > { %p80_p3 = por %p79_p2, %p78_p1  ;;  %p32_p4 = scmp.ge.s32.totalorder %s2024_s26, 2 }
   0x9   : > { %s66_s27 = ssub.s32 %s1640_s22, %s2022_s25  ;;  %p1348_p6 = scmp.ge.s32.totalorder %s1648_s24, 18 }
   0xa   : > { %s2026_s26 = smov (%p32_p4, %s2024_s26), 0 }
   0xb   : > { %s67_s28 = ssub.s32 %s1644_s23, %s2026_s26  ;;  %212 = sbr.rel (%p1348_p6) target bundleno = 57 (0x39), region = 16 }
   0xc   : > { %s68_s29 = sor.u32 %s67_s28, %s66_s27 }
   0xd   : > { %p69_p5 = scmp.eq.s32.totalorder %s68_s29, 0 }
   0xf   : > { %s1732_s6 = scalar_select %p69_p5, %s1628_s19, %s71_s30  }
  0x12   : > { %228 = sbr.rel (!%p80_p3) target bundleno = 57 (0x39), region = 24  ;;  %s230_s7 = sand.u32 (%p80_p3), 1, %s1628_s19  }
  0x13   : > { %s1351_s8 = sshll.u32 (%p80_p3), %s1644_s23, 1  ;;  %s1349_s9 = sshll.u32 (%p80_p3), %s230_s7, 9 }
  0x14   : > { %s1436_s10 = sshll.u32 (%p80_p3), %s1640_s22, 8  ;;  %s1746_s16 = scalar_lea.vmem (%p80_p3), [#allocation3], %s1349_s9 }
  0x15   : > { %s236_s11 = sadd.s32 (%p80_p3), %s1436_s10, %s1351_s8 }
  0x16   : > { %s1353_s12 = sshll.u32 (%p80_p3), %s236_s11, 2 }
  0x17   : > { %s1741_s15 = scalar_lea.vmem (%p80_p3), %s2010_s1, %s1353_s12 }
  0x18   : > { %v392_v0 = vld [vmem:[%s1741_s15] sm:$0xff] (%p80_p3)  ;;  %v394_v1 = vld [vmem:[%s1741_s15 + $0x10] sm:$0xff] (%p80_p3) }
  0x19   : > { %v396_v2 = vld [vmem:[%s1741_s15 + $0x20] sm:$0xff]  ;;  %393 = vst [vmem:[%s1746_s16] sm:$0xff] %v392_v0  ;;  %395 = vst [vmem:[%s1746_s16 + $0x8] sm:$0xff] %v394_v1  ;;  %v398_v3 = vld [vmem:[%s1741_s15 + $0x30] sm:$0xff] }
  0x1a   : > { %397 = vst [vmem:[%s1746_s16 + $0x10] sm:$0xff] %v396_v2  ;;  %v400_v4 = vld [vmem:[%s1741_s15 + $0x40] sm:$0xff]  ;;  %v402_v5 = vld [vmem:[%s1741_s15 + $0x50] sm:$0xff]  ;;  %399 = vst [vmem:[%s1746_s16 + $0x18] sm:$0xff] %v398_v3 }
  0x1b   : > { %401 = vst [vmem:[%s1746_s16 + $0x20] sm:$0xff] %v400_v4  ;;  %403 = vst [vmem:[%s1746_s16 + $0x28] sm:$0xff] %v402_v5  ;;  %v404_v6 = vld [vmem:[%s1741_s15 + $0x60] sm:$0xff]  ;;  %v406_v7 = vld [vmem:[%s1741_s15 + $0x70] sm:$0xff] }
  0x1c   : > { %v408_v8 = vld [vmem:[%s1741_s15 + $0x80] sm:$0xff]  ;;  %405 = vst [vmem:[%s1746_s16 + $0x30] sm:$0xff] %v404_v6  ;;  %407 = vst [vmem:[%s1746_s16 + $0x38] sm:$0xff] %v406_v7  ;;  %v410_v9 = vld [vmem:[%s1741_s15 + $0x90] sm:$0xff] }
  0x1d   : > { %409 = vst [vmem:[%s1746_s16 + $0x40] sm:$0xff] %v408_v8  ;;  %v412_v10 = vld [vmem:[%s1741_s15 + $0xa0] sm:$0xff]  ;;  %v414_v11 = vld [vmem:[%s1741_s15 + $0xb0] sm:$0xff]  ;;  %411 = vst [vmem:[%s1746_s16 + $0x48] sm:$0xff] %v410_v9 }
  0x1e   : > { %413 = vst [vmem:[%s1746_s16 + $0x50] sm:$0xff] %v412_v10  ;;  %415 = vst [vmem:[%s1746_s16 + $0x58] sm:$0xff] %v414_v11  ;;  %v416_v12 = vld [vmem:[%s1741_s15 + $0xc0] sm:$0xff]  ;;  %v418_v13 = vld [vmem:[%s1741_s15 + $0xd0] sm:$0xff] }
  0x1f   : > { %v420_v14 = vld [vmem:[%s1741_s15 + $0xe0] sm:$0xff]  ;;  %417 = vst [vmem:[%s1746_s16 + $0x60] sm:$0xff] %v416_v12  ;;  %419 = vst [vmem:[%s1746_s16 + $0x68] sm:$0xff] %v418_v13  ;;  %v422_v15 = vld [vmem:[%s1741_s15 + $0xf0] sm:$0xff] }
  0x20   : > { %421 = vst [vmem:[%s1746_s16 + $0x70] sm:$0xff] %v420_v14  ;;  %v424_v16 = vld [vmem:[%s1741_s15 + $0x100] sm:$0xff]  ;;  %v426_v17 = vld [vmem:[%s1741_s15 + $0x110] sm:$0xff]  ;;  %423 = vst [vmem:[%s1746_s16 + $0x78] sm:$0xff] %v422_v15 }
  0x21   : > { %425 = vst [vmem:[%s1746_s16 + $0x80] sm:$0xff] %v424_v16  ;;  %427 = vst [vmem:[%s1746_s16 + $0x88] sm:$0xff] %v426_v17  ;;  %v428_v18 = vld [vmem:[%s1741_s15 + $0x120] sm:$0xff]  ;;  %v430_v19 = vld [vmem:[%s1741_s15 + $0x130] sm:$0xff] }
  0x22   : > { %v432_v20 = vld [vmem:[%s1741_s15 + $0x140] sm:$0xff]  ;;  %429 = vst [vmem:[%s1746_s16 + $0x90] sm:$0xff] %v428_v18  ;;  %431 = vst [vmem:[%s1746_s16 + $0x98] sm:$0xff] %v430_v19  ;;  %v434_v21 = vld [vmem:[%s1741_s15 + $0x150] sm:$0xff] }
  0x23   : > { %433 = vst [vmem:[%s1746_s16 + $0xa0] sm:$0xff] %v432_v20  ;;  %v436_v22 = vld [vmem:[%s1741_s15 + $0x160] sm:$0xff]  ;;  %v438_v23 = vld [vmem:[%s1741_s15 + $0x170] sm:$0xff]  ;;  %435 = vst [vmem:[%s1746_s16 + $0xa8] sm:$0xff] %v434_v21 }
  0x24   : > { %437 = vst [vmem:[%s1746_s16 + $0xb0] sm:$0xff] %v436_v22  ;;  %439 = vst [vmem:[%s1746_s16 + $0xb8] sm:$0xff] %v438_v23  ;;  %v440_v24 = vld [vmem:[%s1741_s15 + $0x180] sm:$0xff]  ;;  %v442_v25 = vld [vmem:[%s1741_s15 + $0x190] sm:$0xff] }
  0x25   : > { %v444_v26 = vld [vmem:[%s1741_s15 + $0x1a0] sm:$0xff]  ;;  %441 = vst [vmem:[%s1746_s16 + $0xc0] sm:$0xff] %v440_v24  ;;  %443 = vst [vmem:[%s1746_s16 + $0xc8] sm:$0xff] %v442_v25  ;;  %v446_v27 = vld [vmem:[%s1741_s15 + $0x1b0] sm:$0xff] }
  0x26   : > { %445 = vst [vmem:[%s1746_s16 + $0xd0] sm:$0xff] %v444_v26  ;;  %v448_v28 = vld [vmem:[%s1741_s15 + $0x1c0] sm:$0xff]  ;;  %v450_v29 = vld [vmem:[%s1741_s15 + $0x1d0] sm:$0xff]  ;;  %447 = vst [vmem:[%s1746_s16 + $0xd8] sm:$0xff] %v446_v27 }
  0x27   : > { %449 = vst [vmem:[%s1746_s16 + $0xe0] sm:$0xff] %v448_v28  ;;  %451 = vst [vmem:[%s1746_s16 + $0xe8] sm:$0xff] %v450_v29  ;;  %v452_v30 = vld [vmem:[%s1741_s15 + $0x1e0] sm:$0xff]  ;;  %v454_v31 = vld [vmem:[%s1741_s15 + $0x1f0] sm:$0xff] }
  0x28   : > { %v456_v32 = vld [vmem:[%s1741_s15 + $0x200] sm:$0xff]  ;;  %453 = vst [vmem:[%s1746_s16 + $0xf0] sm:$0xff] %v452_v30  ;;  %455 = vst [vmem:[%s1746_s16 + $0xf8] sm:$0xff] %v454_v31  ;;  %v458_v33 = vld [vmem:[%s1741_s15 + $0x210] sm:$0xff] }
  0x29   : > { %457 = vst [vmem:[%s1746_s16 + $0x100] sm:$0xff] %v456_v32  ;;  %v460_v34 = vld [vmem:[%s1741_s15 + $0x220] sm:$0xff]  ;;  %v462_v35 = vld [vmem:[%s1741_s15 + $0x230] sm:$0xff]  ;;  %459 = vst [vmem:[%s1746_s16 + $0x108] sm:$0xff] %v458_v33 }
  0x2a   : > { %461 = vst [vmem:[%s1746_s16 + $0x110] sm:$0xff] %v460_v34  ;;  %463 = vst [vmem:[%s1746_s16 + $0x118] sm:$0xff] %v462_v35  ;;  %v464_v36 = vld [vmem:[%s1741_s15 + $0x240] sm:$0xff]  ;;  %v466_v37 = vld [vmem:[%s1741_s15 + $0x250] sm:$0xff] }
  0x2b   : > { %v468_v38 = vld [vmem:[%s1741_s15 + $0x260] sm:$0xff]  ;;  %465 = vst [vmem:[%s1746_s16 + $0x120] sm:$0xff] %v464_v36  ;;  %467 = vst [vmem:[%s1746_s16 + $0x128] sm:$0xff] %v466_v37  ;;  %v470_v39 = vld [vmem:[%s1741_s15 + $0x270] sm:$0xff] }
  0x2c   : > { %469 = vst [vmem:[%s1746_s16 + $0x130] sm:$0xff] %v468_v38  ;;  %v472_v40 = vld [vmem:[%s1741_s15 + $0x280] sm:$0xff]  ;;  %v474_v41 = vld [vmem:[%s1741_s15 + $0x290] sm:$0xff]  ;;  %471 = vst [vmem:[%s1746_s16 + $0x138] sm:$0xff] %v470_v39 }
  0x2d   : > { %473 = vst [vmem:[%s1746_s16 + $0x140] sm:$0xff] %v472_v40  ;;  %475 = vst [vmem:[%s1746_s16 + $0x148] sm:$0xff] %v474_v41  ;;  %v476_v42 = vld [vmem:[%s1741_s15 + $0x2a0] sm:$0xff]  ;;  %v478_v43 = vld [vmem:[%s1741_s15 + $0x2b0] sm:$0xff] }
  0x2e   : > { %v480_v44 = vld [vmem:[%s1741_s15 + $0x2c0] sm:$0xff]  ;;  %477 = vst [vmem:[%s1746_s16 + $0x150] sm:$0xff] %v476_v42  ;;  %479 = vst [vmem:[%s1746_s16 + $0x158] sm:$0xff] %v478_v43  ;;  %v482_v45 = vld [vmem:[%s1741_s15 + $0x2d0] sm:$0xff] }
  0x2f   : > { %481 = vst [vmem:[%s1746_s16 + $0x160] sm:$0xff] %v480_v44  ;;  %v484_v46 = vld [vmem:[%s1741_s15 + $0x2e0] sm:$0xff]  ;;  %v486_v47 = vld [vmem:[%s1741_s15 + $0x2f0] sm:$0xff]  ;;  %483 = vst [vmem:[%s1746_s16 + $0x168] sm:$0xff] %v482_v45 }
  0x30   : > { %485 = vst [vmem:[%s1746_s16 + $0x170] sm:$0xff] %v484_v46  ;;  %487 = vst [vmem:[%s1746_s16 + $0x178] sm:$0xff] %v486_v47  ;;  %v488_v48 = vld [vmem:[%s1741_s15 + $0x300] sm:$0xff]  ;;  %v490_v49 = vld [vmem:[%s1741_s15 + $0x310] sm:$0xff] }
  0x31   : > { %v492_v50 = vld [vmem:[%s1741_s15 + $0x320] sm:$0xff]  ;;  %489 = vst [vmem:[%s1746_s16 + $0x180] sm:$0xff] %v488_v48  ;;  %491 = vst [vmem:[%s1746_s16 + $0x188] sm:$0xff] %v490_v49  ;;  %v494_v51 = vld [vmem:[%s1741_s15 + $0x330] sm:$0xff] }
  0x32   : > { %493 = vst [vmem:[%s1746_s16 + $0x190] sm:$0xff] %v492_v50  ;;  %v496_v52 = vld [vmem:[%s1741_s15 + $0x340] sm:$0xff]  ;;  %v498_v53 = vld [vmem:[%s1741_s15 + $0x350] sm:$0xff]  ;;  %495 = vst [vmem:[%s1746_s16 + $0x198] sm:$0xff] %v494_v51 }
  0x33   : > { %497 = vst [vmem:[%s1746_s16 + $0x1a0] sm:$0xff] %v496_v52  ;;  %499 = vst [vmem:[%s1746_s16 + $0x1a8] sm:$0xff] %v498_v53  ;;  %v500_v54 = vld [vmem:[%s1741_s15 + $0x360] sm:$0xff]  ;;  %v502_v55 = vld [vmem:[%s1741_s15 + $0x370] sm:$0xff] }
  0x34   : > { %v504_v56 = vld [vmem:[%s1741_s15 + $0x380] sm:$0xff]  ;;  %501 = vst [vmem:[%s1746_s16 + $0x1b0] sm:$0xff] %v500_v54  ;;  %503 = vst [vmem:[%s1746_s16 + $0x1b8] sm:$0xff] %v502_v55  ;;  %v506_v57 = vld [vmem:[%s1741_s15 + $0x390] sm:$0xff] }
  0x35   : > { %505 = vst [vmem:[%s1746_s16 + $0x1c0] sm:$0xff] %v504_v56  ;;  %v508_v58 = vld [vmem:[%s1741_s15 + $0x3a0] sm:$0xff]  ;;  %v510_v59 = vld [vmem:[%s1741_s15 + $0x3b0] sm:$0xff]  ;;  %507 = vst [vmem:[%s1746_s16 + $0x1c8] sm:$0xff] %v506_v57 }
  0x36   : > { %509 = vst [vmem:[%s1746_s16 + $0x1d0] sm:$0xff] %v508_v58  ;;  %511 = vst [vmem:[%s1746_s16 + $0x1d8] sm:$0xff] %v510_v59  ;;  %v512_v60 = vld [vmem:[%s1741_s15 + $0x3c0] sm:$0xff]  ;;  %v514_v61 = vld [vmem:[%s1741_s15 + $0x3d0] sm:$0xff] }
  0x37   : > { %v516_v62 = vld [vmem:[%s1741_s15 + $0x3e0] sm:$0xff]  ;;  %513 = vst [vmem:[%s1746_s16 + $0x1e0] sm:$0xff] %v512_v60  ;;  %515 = vst [vmem:[%s1746_s16 + $0x1e8] sm:$0xff] %v514_v61  ;;  %v518_v63 = vld [vmem:[%s1741_s15 + $0x3f0] sm:$0xff] }
  0x38   : > { %517 = vst [vmem:[%s1746_s16 + $0x1f0] sm:$0xff] %v516_v62  ;;  %519 = vst [vmem:[%s1746_s16 + $0x1f8] sm:$0xff] %v518_v63 }
  0x39 PF: > { %p1354_p7 = scmp.ge.s32.totalorder %s1648_s24, 1  ;;  %p553_p8 = scmp.lt.s32.totalorder %s1648_s24, 19 }
  0x3b   : > { %p554_p9 = pnand %p1354_p7, %p553_p8 }
  0x3c   : > { %s560_s17 = sand.u32 (!%p554_p9), 1, %s1624_s18   ;;  %s1356_s27 = sshll.u32 (!%p554_p9), %s1632_s20, 2 }
  0x3d   : > { %557 = sbr.rel (%p554_p9) target bundleno = 378 (0x17a), region = 74  ;;  %s1355_s28 = sshll.u32 (!%p554_p9), %s560_s17, 9 }
  0x3e   : > { %p620_p10 = scmp.lt.s32.totalorder (!%p554_p9), %s1356_s27, 35  ;;  %s1358_s29 = sshll.u32 (!%p554_p9), %s1636_s21, 1 }
  0x3f   : > { %p630_p11 = scmp.lt.s32.totalorder (!%p554_p9), %s1358_s29, 3  ;;  %s1904_s8 = scalar_lea.vmem (!%p554_p9), [#allocation3], %s1355_s28 }
  0x40   : > { %p1364_p12 = scmp.ne.s32.totalorder (!%p554_p9), %s1632_s20, 0 }
  0x44   : > { %s2028_s27 = smov (!%p620_p10, %s1356_s27), 35  ;;  %s2030_s29 = smov (!%p630_p11, %s1358_s29), 3 }
  0x45   : > { %s1357_s30 = sshll.u32 %s2028_s27, 2  ;;  %s632_s18 = scalar_lea.vmem %s2011_s2, %s2030_s29  ;;  %v1650_v0 = vmov (!%p1364_p12), 0.0  }
  0x46   : > { %s1881_s9 = scalar_lea.vmem %s2009_s0, %s1357_s30  ;;  %s637_s21 = scalar_lea.vmem %s2012_s3, %s2030_s29  ;;  %663 = vst [vmem:[#allocation2] sm:$0xff] (!%p1364_p12), %v1650_v0  ;;  %664 = vst [vmem:[#allocation2 + $0x8] sm:$0xff] (!%p1364_p12), %v1650_v0 }
  0x47   : > { %s1361_s14 = sshll.u32 %s2030_s29, 3  ;;  %662 = sbr.rel (%p1364_p12) target bundleno = 78 (0x4e), region = 82 }
  0x48   : > { %s1897_s17 = scalar_lea.vmem %s2013_s4, %s1361_s14  ;;  %s1902_s7 = scalar_lea.vmem %s2014_s5, %s1361_s14 }
  0x4e PF: > { %v1494_v1 = vld [vmem:[%s1904_s8 + $0x4] ss:$8 sps:$4 sm:$0xff]   ;;  %v1498_v3 = vld [vmem:[%s1904_s8] ss:$8 sps:$4 sm:$0xff]   ;;  %v1500_v5 = vld [vmem:[%s1904_s8 + $0x14] ss:$8 sps:$4 sm:$0xff]  }
  0x4f   : > { %v1496_v2 = vld [vmem:[%s1904_s8 + $0x104] ss:$8 sps:$4 sm:$0xff]   ;;  %1067 = vmatprep.subr.bf16.mxu0 %v1494_v1  ;;  %v1499_v4 = vld [vmem:[%s1904_s8 + $0x100] ss:$8 sps:$4 sm:$0xff]   ;;  %v1502_v6 = vld [vmem:[%s1904_s8 + $0x114] ss:$8 sps:$4 sm:$0xff]  }
  0x50   : > { %1108 = vmatprep.subr.bf16.mxu1 %v1496_v2  ;;  %1068 = vmatpush1.bf16.msra.mxu0 %v1498_v3  ;;  %v1504_v7 = vld [vmem:[%s1904_s8 + $0x10] ss:$8 sps:$4 sm:$0xff]   ;;  %v1506_v9 = vld [vmem:[%s1904_s8 + $0x24] ss:$8 sps:$4 sm:$0xff]   ;;  %v1510_v11 = vld [vmem:[%s1904_s8 + $0x20] ss:$8 sps:$4 sm:$0xff]  }
  0x51   : > { %1109 = vmatpush1.bf16.msra.mxu1 %v1499_v4  ;;  %1069 = vmatprep.subr.bf16.mxu0 %v1500_v5  ;;  %v1505_v8 = vld [vmem:[%s1904_s8 + $0x110] ss:$8 sps:$4 sm:$0xff]   ;;  %v1508_v10 = vld [vmem:[%s1904_s8 + $0x124] ss:$8 sps:$4 sm:$0xff]   ;;  %v1511_v12 = vld [vmem:[%s1904_s8 + $0x120] ss:$8 sps:$4 sm:$0xff]  }
  0x52   : > { %1110 = vmatprep.subr.bf16.mxu1 %v1502_v6  ;;  %v1512_v13 = vld [vmem:[%s1904_s8 + $0x34] ss:$8 sps:$4 sm:$0xff]   ;;  %v1516_v15 = vld [vmem:[%s1904_s8 + $0x30] ss:$8 sps:$4 sm:$0xff]   ;;  %v1518_v17 = vld [vmem:[%s1904_s8 + $0x44] ss:$8 sps:$4 sm:$0xff]  }
  0x53   : > { %v1514_v14 = vld [vmem:[%s1904_s8 + $0x134] ss:$8 sps:$4 sm:$0xff]   ;;  %v1517_v16 = vld [vmem:[%s1904_s8 + $0x130] ss:$8 sps:$4 sm:$0xff]   ;;  %v1520_v18 = vld [vmem:[%s1904_s8 + $0x144] ss:$8 sps:$4 sm:$0xff]  }
  0x54   : > { %1070 = vmatpush1.bf16.msra.mxu0 %v1504_v7  ;;  %v1522_v19 = vld [vmem:[%s1904_s8 + $0x40] ss:$8 sps:$4 sm:$0xff]   ;;  %v1524_v21 = vld [vmem:[%s1904_s8 + $0x54] ss:$8 sps:$4 sm:$0xff]   ;;  %v1528_v23 = vld [vmem:[%s1904_s8 + $0x50] ss:$8 sps:$4 sm:$0xff]  }
  0x55   : > { %1111 = vmatpush1.bf16.msra.mxu1 %v1505_v8  ;;  %1071 = vmatprep.subr.bf16.mxu0 %v1506_v9  ;;  %v1523_v20 = vld [vmem:[%s1904_s8 + $0x140] ss:$8 sps:$4 sm:$0xff]   ;;  %v1526_v22 = vld [vmem:[%s1904_s8 + $0x154] ss:$8 sps:$4 sm:$0xff]   ;;  %v1529_v24 = vld [vmem:[%s1904_s8 + $0x150] ss:$8 sps:$4 sm:$0xff]  }
  0x56   : > { %1112 = vmatprep.subr.bf16.mxu1 %v1508_v10  ;;  %v1530_v25 = vld [vmem:[%s1904_s8 + $0x64] ss:$8 sps:$4 sm:$0xff]   ;;  %v1534_v27 = vld [vmem:[%s1904_s8 + $0x60] ss:$8 sps:$4 sm:$0xff]   ;;  %v1536_v29 = vld [vmem:[%s1904_s8 + $0x74] ss:$8 sps:$4 sm:$0xff]  }
  0x57   : > { %v1532_v26 = vld [vmem:[%s1904_s8 + $0x164] ss:$8 sps:$4 sm:$0xff]   ;;  %v1535_v28 = vld [vmem:[%s1904_s8 + $0x160] ss:$8 sps:$4 sm:$0xff]   ;;  %v1538_v30 = vld [vmem:[%s1904_s8 + $0x174] ss:$8 sps:$4 sm:$0xff]  }
  0x58   : > { %1072 = vmatpush1.bf16.msra.mxu0 %v1510_v11  ;;  %v1540_v31 = vld [vmem:[%s1904_s8 + $0x70] ss:$8 sps:$4 sm:$0xff]   ;;  %v1542_v33 = vld [vmem:[%s1904_s8 + $0x84] ss:$8 sps:$4 sm:$0xff]   ;;  %v1546_v35 = vld [vmem:[%s1904_s8 + $0x80] ss:$8 sps:$4 sm:$0xff]  }
  0x59   : > { %1113 = vmatpush1.bf16.msra.mxu1 %v1511_v12  ;;  %1073 = vmatprep.subr.bf16.mxu0 %v1512_v13  ;;  %v1541_v32 = vld [vmem:[%s1904_s8 + $0x170] ss:$8 sps:$4 sm:$0xff]   ;;  %v1544_v34 = vld [vmem:[%s1904_s8 + $0x184] ss:$8 sps:$4 sm:$0xff]   ;;  %v1547_v36 = vld [vmem:[%s1904_s8 + $0x180] ss:$8 sps:$4 sm:$0xff]  }
  0x5a   : > { %1114 = vmatprep.subr.bf16.mxu1 %v1514_v14  ;;  %v1548_v37 = vld [vmem:[%s1904_s8 + $0x94] ss:$8 sps:$4 sm:$0xff]   ;;  %v1552_v39 = vld [vmem:[%s1904_s8 + $0x90] ss:$8 sps:$4 sm:$0xff]   ;;  %v1554_v41 = vld [vmem:[%s1904_s8 + $0xa4] ss:$8 sps:$4 sm:$0xff]  }
  0x5b   : > { %v1550_v38 = vld [vmem:[%s1904_s8 + $0x194] ss:$8 sps:$4 sm:$0xff]   ;;  %v1553_v40 = vld [vmem:[%s1904_s8 + $0x190] ss:$8 sps:$4 sm:$0xff]   ;;  %v1556_v42 = vld [vmem:[%s1904_s8 + $0x1a4] ss:$8 sps:$4 sm:$0xff]  }
  0x5c   : > { %1074 = vmatpush1.bf16.msra.mxu0 %v1516_v15  ;;  %v1558_v43 = vld [vmem:[%s1904_s8 + $0xa0] ss:$8 sps:$4 sm:$0xff]   ;;  %v1560_v45 = vld [vmem:[%s1904_s8 + $0xb4] ss:$8 sps:$4 sm:$0xff]   ;;  %v1564_v50 = vld [vmem:[%s1904_s8 + $0xb0] ss:$8 sps:$4 sm:$0xff]  }
  0x5d   : > { %1115 = vmatpush1.bf16.msra.mxu1 %v1517_v16  ;;  %1075 = vmatprep.subr.bf16.mxu0 %v1518_v17  ;;  %v1559_v44 = vld [vmem:[%s1904_s8 + $0x1a0] ss:$8 sps:$4 sm:$0xff]   ;;  %v1562_v46 = vld [vmem:[%s1904_s8 + $0x1b4] ss:$8 sps:$4 sm:$0xff]   ;;  %v1565_v51 = vld [vmem:[%s1904_s8 + $0x1b0] ss:$8 sps:$4 sm:$0xff]  }
  0x5e   : > { %1116 = vmatprep.subr.bf16.mxu1 %v1520_v18  ;;  %v667_v47 = vld [vmem:[%s1881_s9] sm:$0xff]  ;;  %v668_v49 = vld [vmem:[%s1881_s9 + $0x8] sm:$0xff]  ;;  %v1566_v53 = vld [vmem:[%s1904_s8 + $0xc4] ss:$8 sps:$4 sm:$0xff]   ;;  %p1433_p13 = scmp.ne.s32.totalorder %s1632_s20, 8 }
  0x5f   : > { %v1366_v48 = vcombine.high %v667_v47, %v667_v47  ;;  %v1368_v52 = vcombine.high %v668_v49, %v668_v49  ;;  %v1568_v54 = vld [vmem:[%s1904_s8 + $0x1c4] ss:$8 sps:$4 sm:$0xff]   ;;  %v1570_v55 = vld [vmem:[%s1904_s8 + $0xc0] ss:$8 sps:$4 sm:$0xff]   ;;  %v1572_v57 = vld [vmem:[%s1904_s8 + $0xd4] ss:$8 sps:$4 sm:$0xff]   ;;  %v1365_v5 = vcombine.low %v667_v47, %v667_v47  ;;  %v1367_v6 = vcombine.low %v668_v49, %v668_v49 }
  0x60   : > { %1076 = vmatpush1.bf16.msra.mxu0 %v1522_v19  ;;  %v1571_v56 = vld [vmem:[%s1904_s8 + $0x1c0] ss:$8 sps:$4 sm:$0xff]   ;;  %v1574_v58 = vld [vmem:[%s1904_s8 + $0x1d4] ss:$8 sps:$4 sm:$0xff]   ;;  %v1576_v59 = vld [vmem:[%s1904_s8 + $0xd0] ss:$8 sps:$4 sm:$0xff]  }
  0x61   : > { %1117 = vmatpush1.bf16.msra.mxu1 %v1523_v20  ;;  %1077 = vmatprep.subr.bf16.mxu0 %v1524_v21  ;;  %v1577_v60 = vld [vmem:[%s1904_s8 + $0x1d0] ss:$8 sps:$4 sm:$0xff]   ;;  %v1578_v61 = vld [vmem:[%s1904_s8 + $0xe4] ss:$8 sps:$4 sm:$0xff]   ;;  %v1582_v63 = vld [vmem:[%s1904_s8 + $0xe0] ss:$8 sps:$4 sm:$0xff]   ;;  %v1161_v21 = vlaneseq (!%p1433_p13) }
  0x62   : > { %1118 = vmatprep.subr.bf16.mxu1 %v1526_v22  ;;  %1099 = vmatprep.mubr.bf16.mxu0 %v1366_v48  ;;  %v1580_v62 = vld [vmem:[%s1904_s8 + $0x1e4] ss:$8 sps:$4 sm:$0xff]   ;;  %v1583_v0 = vld [vmem:[%s1904_s8 + $0x1e0] ss:$8 sps:$4 sm:$0xff]   ;;  %v1584_v1 = vld [vmem:[%s1904_s8 + $0xf4] ss:$8 sps:$4 sm:$0xff]  }
  0x63   : > { %1140 = vmatprep.mubr.bf16.mxu1 %v1368_v52  ;;  %v1586_v2 = vld [vmem:[%s1904_s8 + $0x1f4] ss:$8 sps:$4 sm:$0xff]   ;;  %v1588_v3 = vld [vmem:[%s1904_s8 + $0xf0] ss:$8 sps:$4 sm:$0xff]   ;;  %v1162_v22 = vshrl.u32 (!%p1433_p13), %v1161_v21, 7 }
  0x64   : > { %1078 = vmatpush1.bf16.msra.mxu0 %v1528_v23  ;;  %v1589_v4 = vld [vmem:[%s1904_s8 + $0x1f0] ss:$8 sps:$4 sm:$0xff]  }
  0x65   : > { %1119 = vmatpush1.bf16.msra.mxu1 %v1529_v24  ;;  %1079 = vmatprep.subr.bf16.mxu0 %v1530_v25  ;;  %v665_v8 = vld [vmem:[#allocation2] sm:$0xff]  ;;  %v666_v12 = vld [vmem:[#allocation2 + $0x8] sm:$0xff]  ;;  %v1163_v25 = vsub.s32 (!%p1433_p13), 0, %v1162_v22 }
  0x66   : > { %1120 = vmatprep.subr.bf16.mxu1 %v1532_v26  ;;  %v1159_v23 = vld [vmem:[%s632_s18] sm:$0x3] (!%p1433_p13)  ;;  %v1167_v26 = vsub.s32 (!%p1433_p13), 1, %v1162_v22 }
  0x67   : > { %v1173_v24 = vld [vmem:[%s637_s21] sm:$0x3] (!%p1433_p13) }
  0x68   : > { %1080 = vmatpush1.bf16.msra.mxu0 %v1534_v27 }
  0x69   : > { %1121 = vmatpush1.bf16.msra.mxu1 %v1535_v28  ;;  %1081 = vmatprep.subr.bf16.mxu0 %v1536_v29  ;;  %v1164_v29 = vrot.slane (!%p1433_p13), %v1159_v23, %v1163_v25 }
  0x6a   : > { %1122 = vmatprep.subr.bf16.mxu1 %v1538_v30  ;;  %v1178_v30 = vrot.slane (!%p1433_p13), %v1173_v24, %v1163_v25 }
  0x6c   : > { %1082 = vmatpush1.bf16.msra.mxu0 %v1540_v31  ;;  %v1168_v31 = vrot.slane (!%p1433_p13), %v1159_v23, %v1167_v26 }
  0x6d   : > { %1123 = vmatpush1.bf16.msra.mxu1 %v1541_v32  ;;  %1083 = vmatprep.subr.bf16.mxu0 %v1542_v33  ;;  %v1182_v32 = vrot.slane (!%p1433_p13), %v1173_v24, %v1167_v26 }
  0x6e   : > { %1124 = vmatprep.subr.bf16.mxu1 %v1544_v34 }
  0x70   : > { %1084 = vmatpush1.bf16.msra.mxu0 %v1546_v35  ;;  %v1187_v35 = vld [vmem:[%s1897_s17] sm:$0xff] (!%p1433_p13) }
  0x71   : > { %1125 = vmatpush1.bf16.msra.mxu1 %v1547_v36  ;;  %1085 = vmatprep.subr.bf16.mxu0 %v1548_v37  ;;  %v1188_v36 = vld [vmem:[%s1897_s17 + $0x8] sm:$0xff] (!%p1433_p13) }
  0x72   : > { %1126 = vmatprep.subr.bf16.mxu1 %v1550_v38 }
  0x74   : > { %1086 = vmatpush1.bf16.msra.mxu0 %v1552_v39 }
  0x75   : > { %1127 = vmatpush1.bf16.msra.mxu1 %v1553_v40  ;;  %1087 = vmatprep.subr.bf16.mxu0 %v1554_v41 }
  0x76   : > { %1128 = vmatprep.subr.bf16.mxu1 %v1556_v42 }
  0x78   : > { %1088 = vmatpush1.bf16.msra.mxu0 %v1558_v43 }
  0x79   : > { %1129 = vmatpush1.bf16.msra.mxu1 %v1559_v44  ;;  %1089 = vmatprep.subr.bf16.mxu0 %v1560_v45 }
  0x7a   : > { %1130 = vmatprep.subr.bf16.mxu1 %v1562_v46 }
  0x7c   : > { %1090 = vmatpush1.bf16.msra.mxu0 %v1564_v50 }
  0x7d   : > { %1131 = vmatpush1.bf16.msra.mxu1 %v1565_v51  ;;  %1091 = vmatprep.subr.bf16.mxu0 %v1566_v53 }
  0x7e   : > { %1132 = vmatprep.subr.bf16.mxu1 %v1568_v54 }
  0x80   : > { %1092 = vmatpush1.bf16.msra.mxu0 %v1570_v55 }
  0x81   : > { %1133 = vmatpush1.bf16.msra.mxu1 %v1571_v56  ;;  %1093 = vmatprep.subr.bf16.mxu0 %v1572_v57 }
  0x82   : > { %1134 = vmatprep.subr.bf16.mxu1 %v1574_v58 }
  0x84   : > { %1094 = vmatpush1.bf16.msra.mxu0 %v1576_v59 }
  0x85   : > { %1135 = vmatpush1.bf16.msra.mxu1 %v1577_v60  ;;  %1095 = vmatprep.subr.bf16.mxu0 %v1578_v61 }
  0x86   : > { %1136 = vmatprep.subr.bf16.mxu1 %v1580_v62 }
  0x88   : > { %1096 = vmatpush1.bf16.msra.mxu0 %v1582_v63 }
  0x89   : > { %1137 = vmatpush1.bf16.msra.mxu1 %v1583_v0  ;;  %1097 = vmatprep.subr.bf16.mxu0 %v1584_v1 }
  0x8a   : > { %1138 = vmatprep.subr.bf16.mxu1 %v1586_v2 }
  0x8c   : > { %1098 = vmatpush1.bf16.msra.mxu0 %v1588_v3 }
  0x8d   : > { %1139 = vmatpush1.bf16.msra.mxu1 %v1589_v4 }
  0x8f   : > { %1100 = vmatmul.mubr.bf16.vlgmr.msra.gmra.mrb[0].mxu0 %v1365_v5 }
  0x90   : > { %1141 = vmatmul.mubr.bf16.vlgmr.msra.gmra.mrb[0].mxu1 %v1367_v6 }
 0x162   : > { %v1101_v7 = vpop.f32.mrb[0].mxu0 }
 0x163   : > { %v1142_v9 = vpop.f32.mrb[0].mxu1  ;;  %v1103_v11 = vpop.f32.mrb[1].mxu0  ;;  %1156 = sbr.rel (%p1433_p13) target bundleno = 378 (0x17a), region = 86 }
 0x164   : > { %v1143_v10 = vadd.f32 %v1142_v9, %v1101_v7  ;;  %v1144_v13 = vpop.f32.mrb[1].mxu1  ;;  %v1105_v15 = vpop.f32.mrb[2].mxu0 }
 0x165   : > { %v1145_v14 = vadd.f32 %v1144_v13, %v1103_v11  ;;  %v1146_v16 = vpop.f32.mrb[2].mxu1  ;;  %v1106_v18 = vpop.f32.mrb[3].mxu0 }
 0x166   : > { %v1149_v17 = vadd.f32 %v1143_v10, %v665_v8  ;;  %v1147_v19 = vpop.f32.mrb[3].mxu1 }
 0x167   : > { %v1150_v20 = vadd.f32 %v1145_v14, %v666_v12 }
 0x168   : > { %1151 = vst [vmem:[#allocation2] sm:$0xff] %v1149_v17 }
 0x169   : > { %1152 = vst [vmem:[#allocation2 + $0x8] sm:$0xff] %v1150_v20 }
 0x16f   : > { %v1157_v27 = vld [vmem:[#allocation2] sm:$0xff] }
 0x170   : > { %v1158_v28 = vld [vmem:[#allocation2 + $0x8] sm:$0xff]  ;;  %v1171_v33 = vmul.f32 %v1164_v29, %v1157_v27 }
 0x171   : > { %v1172_v34 = vmul.f32 %v1168_v31, %v1158_v28 }
 0x172   : > { %v1185_v37 = vadd.f32 %v1178_v30, %v1171_v33 }
 0x173   : > { %v1186_v38 = vadd.f32 %v1182_v32, %v1172_v34 }
 0x174   : > { %v1189_v39 = vadd.f32 %v1187_v35, %v1185_v37 }
 0x175   : > { %v1190_v40 = vadd.f32 %v1188_v36, %v1186_v38 }
 0x176   : > { %v1191_v41 = vmax.f32 %v1189_v39, 0.0 }
 0x177   : > { %v1192_v42 = vmax.f32 %v1190_v40, 0.0 }
 0x178   : > { %1193 = vst [vmem:[%s1902_s7] sm:$0xff] %v1191_v41 }
 0x179   : > { %1194 = vst [vmem:[%s1902_s7 + $0x8] sm:$0xff] %v1192_v42 }
 0x17a PF: > { %s15_s24 = sadd.s32 1, %s1648_s24   ;;  %s2015_s18 = smov %s1628_s19 }
 0x17b   : > { %p12_p0 = scmp.ge.s32.totalorder %s15_s24, 20   ;;  %s2016_s19 = smov %s1732_s6 }
 0x17c   : > { %s2017_s20 = smov %s1640_s22  ;;  %s2018_s21 = smov %s1644_s23 }
 0x17d   : > { %s2019_s22 = smov %s2022_s25  ;;  %s2020_s23 = smov %s2026_s26 }
 0x17e   :  { %14 = sbr.rel (!%p12_p0) target bundleno = 4 (0x4), region = 133 }

// kernel: multimodal_classifier_forward.40
= control target key start
LH: loop header
LB: loop body
LE: loop exit
PB: predicated region body
PF: predicated region fallthrough
CT: control target
= control target key end

     0   :  { %s1589_s15 = smov 0   ;;  %s1591_s16 = smov 0   ;;  %s1910_s0 = inlined_call_operand.vmem [shape: bf16[8,4608], index: 0, kind: input, shape index: {}]   ;;  %s1911_s1 = inlined_call_operand.vmem [shape: bf16[4608,512], index: 1, kind: input, shape index: {}]   ;;  %s1912_s2 = inlined_call_operand.vmem [shape: f32[1,512], index: 2, kind: input, shape index: {}]   ;;  %s1913_s3 = inlined_call_operand.vmem [shape: f32[1,512], index: 3, kind: input, shape index: {}]   ;;  %s1914_s4 = inlined_call_operand.vmem [shape: f32[8,512], index: 4, kind: output, shape index: {}]  }
   0x1   :  { %s1593_s17 = smov 0   ;;  %s1595_s18 = smov 0  }
   0x2   :  { %s1597_s19 = smov 0   ;;  %s1599_s20 = smov 0  }
   0x3   :  { %s1601_s21 = smov 0  }
   0x4 LB: > { %s26_s22 = sadd.s32 1, %s1553_s19  ;;  %s29_s23 = sadd.s32 1, %s1557_s20  ;;  %s1561_s21 = sphi %s1601_s21, %s14_s21   ;;  %s1557_s20 = sphi %s1599_s20, %s1920_s20   ;;  %s1553_s19 = sphi %s1597_s19, %s1919_s19   ;;  %s1549_s18 = sphi %s1595_s18, %s1918_s18   ;;  %s1545_s17 = sphi %s1593_s17, %s1917_s17   ;;  %s1541_s16 = sphi %s1591_s16, %s1916_s16   ;;  %s1537_s15 = sphi %s1589_s15, %s1915_s15  }
   0x5   : > { %p27_p0 = scmp.ge.s32.totalorder %s26_s22, 9  ;;  %p77_p1 = scmp.ne.s32.totalorder %s1541_s16, %s1537_s15 }
   0x6   : > { %p78_p2 = scmp.eq.s32.totalorder %s1561_s21, 0  ;;  %s70_s27 = sadd.s32 1, %s1541_s16 }
   0x7   : > { %s1922_s22 = smov (%p27_p0, %s26_s22), 0  ;;  %s1924_s23 = smov (!%p27_p0, %s29_s23), %s1557_s20 }
   0x8   : > { %p79_p3 = por %p78_p2, %p77_p1  ;;  %p31_p4 = scmp.ge.s32.totalorder %s1924_s23, 2 }
   0x9   : > { %s65_s24 = ssub.s32 %s1553_s19, %s1922_s22  ;;  %p1263_p6 = scmp.ge.s32.totalorder %s1561_s21, 18 }
   0xa   : > { %s1926_s23 = smov (%p31_p4, %s1924_s23), 0 }
   0xb   : > { %s66_s25 = ssub.s32 %s1557_s20, %s1926_s23  ;;  %183 = sbr.rel (%p1263_p6) target bundleno = 57 (0x39), region = 16 }
   0xc   : > { %s67_s26 = sor.u32 %s66_s25, %s65_s24 }
   0xd   : > { %p68_p5 = scmp.eq.s32.totalorder %s67_s26, 0 }
   0xf   : > { %s1640_s28 = scalar_select %p68_p5, %s1541_s16, %s70_s27  }
  0x12   : > { %199 = sbr.rel (!%p79_p3) target bundleno = 57 (0x39), region = 24  ;;  %s201_s29 = sand.u32 (%p79_p3), 1, %s1541_s16  }
  0x13   : > { %s1266_s30 = sshll.u32 (%p79_p3), %s1557_s20, 1  ;;  %s1264_s5 = sshll.u32 (%p79_p3), %s201_s29, 9 }
  0x14   : > { %s1349_s6 = sshll.u32 (%p79_p3), %s1553_s19, 8  ;;  %s1654_s12 = scalar_lea.vmem (%p79_p3), [#allocation3], %s1264_s5 }
  0x15   : > { %s207_s7 = sadd.s32 (%p79_p3), %s1349_s6, %s1266_s30 }
  0x16   : > { %s1268_s8 = sshll.u32 (%p79_p3), %s207_s7, 2 }
  0x17   : > { %s1649_s11 = scalar_lea.vmem (%p79_p3), %s1911_s1, %s1268_s8 }
  0x18   : > { %v363_v0 = vld [vmem:[%s1649_s11] sm:$0xff] (%p79_p3)  ;;  %v365_v1 = vld [vmem:[%s1649_s11 + $0x10] sm:$0xff] (%p79_p3) }
  0x19   : > { %v367_v2 = vld [vmem:[%s1649_s11 + $0x20] sm:$0xff]  ;;  %364 = vst [vmem:[%s1654_s12] sm:$0xff] %v363_v0  ;;  %366 = vst [vmem:[%s1654_s12 + $0x8] sm:$0xff] %v365_v1  ;;  %v369_v3 = vld [vmem:[%s1649_s11 + $0x30] sm:$0xff] }
  0x1a   : > { %368 = vst [vmem:[%s1654_s12 + $0x10] sm:$0xff] %v367_v2  ;;  %v371_v4 = vld [vmem:[%s1649_s11 + $0x40] sm:$0xff]  ;;  %v373_v5 = vld [vmem:[%s1649_s11 + $0x50] sm:$0xff]  ;;  %370 = vst [vmem:[%s1654_s12 + $0x18] sm:$0xff] %v369_v3 }
  0x1b   : > { %372 = vst [vmem:[%s1654_s12 + $0x20] sm:$0xff] %v371_v4  ;;  %374 = vst [vmem:[%s1654_s12 + $0x28] sm:$0xff] %v373_v5  ;;  %v375_v6 = vld [vmem:[%s1649_s11 + $0x60] sm:$0xff]  ;;  %v377_v7 = vld [vmem:[%s1649_s11 + $0x70] sm:$0xff] }
  0x1c   : > { %v379_v8 = vld [vmem:[%s1649_s11 + $0x80] sm:$0xff]  ;;  %376 = vst [vmem:[%s1654_s12 + $0x30] sm:$0xff] %v375_v6  ;;  %378 = vst [vmem:[%s1654_s12 + $0x38] sm:$0xff] %v377_v7  ;;  %v381_v9 = vld [vmem:[%s1649_s11 + $0x90] sm:$0xff] }
  0x1d   : > { %380 = vst [vmem:[%s1654_s12 + $0x40] sm:$0xff] %v379_v8  ;;  %v383_v10 = vld [vmem:[%s1649_s11 + $0xa0] sm:$0xff]  ;;  %v385_v11 = vld [vmem:[%s1649_s11 + $0xb0] sm:$0xff]  ;;  %382 = vst [vmem:[%s1654_s12 + $0x48] sm:$0xff] %v381_v9 }
  0x1e   : > { %384 = vst [vmem:[%s1654_s12 + $0x50] sm:$0xff] %v383_v10  ;;  %386 = vst [vmem:[%s1654_s12 + $0x58] sm:$0xff] %v385_v11  ;;  %v387_v12 = vld [vmem:[%s1649_s11 + $0xc0] sm:$0xff]  ;;  %v389_v13 = vld [vmem:[%s1649_s11 + $0xd0] sm:$0xff] }
  0x1f   : > { %v391_v14 = vld [vmem:[%s1649_s11 + $0xe0] sm:$0xff]  ;;  %388 = vst [vmem:[%s1654_s12 + $0x60] sm:$0xff] %v387_v12  ;;  %390 = vst [vmem:[%s1654_s12 + $0x68] sm:$0xff] %v389_v13  ;;  %v393_v15 = vld [vmem:[%s1649_s11 + $0xf0] sm:$0xff] }
  0x20   : > { %392 = vst [vmem:[%s1654_s12 + $0x70] sm:$0xff] %v391_v14  ;;  %v395_v16 = vld [vmem:[%s1649_s11 + $0x100] sm:$0xff]  ;;  %v397_v17 = vld [vmem:[%s1649_s11 + $0x110] sm:$0xff]  ;;  %394 = vst [vmem:[%s1654_s12 + $0x78] sm:$0xff] %v393_v15 }
  0x21   : > { %396 = vst [vmem:[%s1654_s12 + $0x80] sm:$0xff] %v395_v16  ;;  %398 = vst [vmem:[%s1654_s12 + $0x88] sm:$0xff] %v397_v17  ;;  %v399_v18 = vld [vmem:[%s1649_s11 + $0x120] sm:$0xff]  ;;  %v401_v19 = vld [vmem:[%s1649_s11 + $0x130] sm:$0xff] }
  0x22   : > { %v403_v20 = vld [vmem:[%s1649_s11 + $0x140] sm:$0xff]  ;;  %400 = vst [vmem:[%s1654_s12 + $0x90] sm:$0xff] %v399_v18  ;;  %402 = vst [vmem:[%s1654_s12 + $0x98] sm:$0xff] %v401_v19  ;;  %v405_v21 = vld [vmem:[%s1649_s11 + $0x150] sm:$0xff] }
  0x23   : > { %404 = vst [vmem:[%s1654_s12 + $0xa0] sm:$0xff] %v403_v20  ;;  %v407_v22 = vld [vmem:[%s1649_s11 + $0x160] sm:$0xff]  ;;  %v409_v23 = vld [vmem:[%s1649_s11 + $0x170] sm:$0xff]  ;;  %406 = vst [vmem:[%s1654_s12 + $0xa8] sm:$0xff] %v405_v21 }
  0x24   : > { %408 = vst [vmem:[%s1654_s12 + $0xb0] sm:$0xff] %v407_v22  ;;  %410 = vst [vmem:[%s1654_s12 + $0xb8] sm:$0xff] %v409_v23  ;;  %v411_v24 = vld [vmem:[%s1649_s11 + $0x180] sm:$0xff]  ;;  %v413_v25 = vld [vmem:[%s1649_s11 + $0x190] sm:$0xff] }
  0x25   : > { %v415_v26 = vld [vmem:[%s1649_s11 + $0x1a0] sm:$0xff]  ;;  %412 = vst [vmem:[%s1654_s12 + $0xc0] sm:$0xff] %v411_v24  ;;  %414 = vst [vmem:[%s1654_s12 + $0xc8] sm:$0xff] %v413_v25  ;;  %v417_v27 = vld [vmem:[%s1649_s11 + $0x1b0] sm:$0xff] }
  0x26   : > { %416 = vst [vmem:[%s1654_s12 + $0xd0] sm:$0xff] %v415_v26  ;;  %v419_v28 = vld [vmem:[%s1649_s11 + $0x1c0] sm:$0xff]  ;;  %v421_v29 = vld [vmem:[%s1649_s11 + $0x1d0] sm:$0xff]  ;;  %418 = vst [vmem:[%s1654_s12 + $0xd8] sm:$0xff] %v417_v27 }
  0x27   : > { %420 = vst [vmem:[%s1654_s12 + $0xe0] sm:$0xff] %v419_v28  ;;  %422 = vst [vmem:[%s1654_s12 + $0xe8] sm:$0xff] %v421_v29  ;;  %v423_v30 = vld [vmem:[%s1649_s11 + $0x1e0] sm:$0xff]  ;;  %v425_v31 = vld [vmem:[%s1649_s11 + $0x1f0] sm:$0xff] }
  0x28   : > { %v427_v32 = vld [vmem:[%s1649_s11 + $0x200] sm:$0xff]  ;;  %424 = vst [vmem:[%s1654_s12 + $0xf0] sm:$0xff] %v423_v30  ;;  %426 = vst [vmem:[%s1654_s12 + $0xf8] sm:$0xff] %v425_v31  ;;  %v429_v33 = vld [vmem:[%s1649_s11 + $0x210] sm:$0xff] }
  0x29   : > { %428 = vst [vmem:[%s1654_s12 + $0x100] sm:$0xff] %v427_v32  ;;  %v431_v34 = vld [vmem:[%s1649_s11 + $0x220] sm:$0xff]  ;;  %v433_v35 = vld [vmem:[%s1649_s11 + $0x230] sm:$0xff]  ;;  %430 = vst [vmem:[%s1654_s12 + $0x108] sm:$0xff] %v429_v33 }
  0x2a   : > { %432 = vst [vmem:[%s1654_s12 + $0x110] sm:$0xff] %v431_v34  ;;  %434 = vst [vmem:[%s1654_s12 + $0x118] sm:$0xff] %v433_v35  ;;  %v435_v36 = vld [vmem:[%s1649_s11 + $0x240] sm:$0xff]  ;;  %v437_v37 = vld [vmem:[%s1649_s11 + $0x250] sm:$0xff] }
  0x2b   : > { %v439_v38 = vld [vmem:[%s1649_s11 + $0x260] sm:$0xff]  ;;  %436 = vst [vmem:[%s1654_s12 + $0x120] sm:$0xff] %v435_v36  ;;  %438 = vst [vmem:[%s1654_s12 + $0x128] sm:$0xff] %v437_v37  ;;  %v441_v39 = vld [vmem:[%s1649_s11 + $0x270] sm:$0xff] }
  0x2c   : > { %440 = vst [vmem:[%s1654_s12 + $0x130] sm:$0xff] %v439_v38  ;;  %v443_v40 = vld [vmem:[%s1649_s11 + $0x280] sm:$0xff]  ;;  %v445_v41 = vld [vmem:[%s1649_s11 + $0x290] sm:$0xff]  ;;  %442 = vst [vmem:[%s1654_s12 + $0x138] sm:$0xff] %v441_v39 }
  0x2d   : > { %444 = vst [vmem:[%s1654_s12 + $0x140] sm:$0xff] %v443_v40  ;;  %446 = vst [vmem:[%s1654_s12 + $0x148] sm:$0xff] %v445_v41  ;;  %v447_v42 = vld [vmem:[%s1649_s11 + $0x2a0] sm:$0xff]  ;;  %v449_v43 = vld [vmem:[%s1649_s11 + $0x2b0] sm:$0xff] }
  0x2e   : > { %v451_v44 = vld [vmem:[%s1649_s11 + $0x2c0] sm:$0xff]  ;;  %448 = vst [vmem:[%s1654_s12 + $0x150] sm:$0xff] %v447_v42  ;;  %450 = vst [vmem:[%s1654_s12 + $0x158] sm:$0xff] %v449_v43  ;;  %v453_v45 = vld [vmem:[%s1649_s11 + $0x2d0] sm:$0xff] }
  0x2f   : > { %452 = vst [vmem:[%s1654_s12 + $0x160] sm:$0xff] %v451_v44  ;;  %v455_v46 = vld [vmem:[%s1649_s11 + $0x2e0] sm:$0xff]  ;;  %v457_v47 = vld [vmem:[%s1649_s11 + $0x2f0] sm:$0xff]  ;;  %454 = vst [vmem:[%s1654_s12 + $0x168] sm:$0xff] %v453_v45 }
  0x30   : > { %456 = vst [vmem:[%s1654_s12 + $0x170] sm:$0xff] %v455_v46  ;;  %458 = vst [vmem:[%s1654_s12 + $0x178] sm:$0xff] %v457_v47  ;;  %v459_v48 = vld [vmem:[%s1649_s11 + $0x300] sm:$0xff]  ;;  %v461_v49 = vld [vmem:[%s1649_s11 + $0x310] sm:$0xff] }
  0x31   : > { %v463_v50 = vld [vmem:[%s1649_s11 + $0x320] sm:$0xff]  ;;  %460 = vst [vmem:[%s1654_s12 + $0x180] sm:$0xff] %v459_v48  ;;  %462 = vst [vmem:[%s1654_s12 + $0x188] sm:$0xff] %v461_v49  ;;  %v465_v51 = vld [vmem:[%s1649_s11 + $0x330] sm:$0xff] }
  0x32   : > { %464 = vst [vmem:[%s1654_s12 + $0x190] sm:$0xff] %v463_v50  ;;  %v467_v52 = vld [vmem:[%s1649_s11 + $0x340] sm:$0xff]  ;;  %v469_v53 = vld [vmem:[%s1649_s11 + $0x350] sm:$0xff]  ;;  %466 = vst [vmem:[%s1654_s12 + $0x198] sm:$0xff] %v465_v51 }
  0x33   : > { %468 = vst [vmem:[%s1654_s12 + $0x1a0] sm:$0xff] %v467_v52  ;;  %470 = vst [vmem:[%s1654_s12 + $0x1a8] sm:$0xff] %v469_v53  ;;  %v471_v54 = vld [vmem:[%s1649_s11 + $0x360] sm:$0xff]  ;;  %v473_v55 = vld [vmem:[%s1649_s11 + $0x370] sm:$0xff] }
  0x34   : > { %v475_v56 = vld [vmem:[%s1649_s11 + $0x380] sm:$0xff]  ;;  %472 = vst [vmem:[%s1654_s12 + $0x1b0] sm:$0xff] %v471_v54  ;;  %474 = vst [vmem:[%s1654_s12 + $0x1b8] sm:$0xff] %v473_v55  ;;  %v477_v57 = vld [vmem:[%s1649_s11 + $0x390] sm:$0xff] }
  0x35   : > { %476 = vst [vmem:[%s1654_s12 + $0x1c0] sm:$0xff] %v475_v56  ;;  %v479_v58 = vld [vmem:[%s1649_s11 + $0x3a0] sm:$0xff]  ;;  %v481_v59 = vld [vmem:[%s1649_s11 + $0x3b0] sm:$0xff]  ;;  %478 = vst [vmem:[%s1654_s12 + $0x1c8] sm:$0xff] %v477_v57 }
  0x36   : > { %480 = vst [vmem:[%s1654_s12 + $0x1d0] sm:$0xff] %v479_v58  ;;  %482 = vst [vmem:[%s1654_s12 + $0x1d8] sm:$0xff] %v481_v59  ;;  %v483_v60 = vld [vmem:[%s1649_s11 + $0x3c0] sm:$0xff]  ;;  %v485_v61 = vld [vmem:[%s1649_s11 + $0x3d0] sm:$0xff] }
  0x37   : > { %v487_v62 = vld [vmem:[%s1649_s11 + $0x3e0] sm:$0xff]  ;;  %484 = vst [vmem:[%s1654_s12 + $0x1e0] sm:$0xff] %v483_v60  ;;  %486 = vst [vmem:[%s1654_s12 + $0x1e8] sm:$0xff] %v485_v61  ;;  %v489_v63 = vld [vmem:[%s1649_s11 + $0x3f0] sm:$0xff] }
  0x38   : > { %488 = vst [vmem:[%s1654_s12 + $0x1f0] sm:$0xff] %v487_v62  ;;  %490 = vst [vmem:[%s1654_s12 + $0x1f8] sm:$0xff] %v489_v63 }
  0x39 PF: > { %p1269_p7 = scmp.ge.s32.totalorder %s1561_s21, 1  ;;  %p511_p8 = scmp.lt.s32.totalorder %s1561_s21, 19 }
  0x3b   : > { %p512_p9 = pnand %p1269_p7, %p511_p8 }
  0x3c   : > { %s518_s13 = sand.u32 (!%p512_p9), 1, %s1537_s15   ;;  %s1271_s14 = sshll.u32 (!%p512_p9), %s1545_s17, 2 }
  0x3d   : > { %515 = sbr.rel (%p512_p9) target bundleno = 376 (0x178), region = 70  ;;  %s1270_s24 = sshll.u32 (!%p512_p9), %s518_s13, 9 }
  0x3e   : > { %p567_p10 = scmp.lt.s32.totalorder (!%p512_p9), %s1271_s14, 35  ;;  %s1273_s25 = sshll.u32 (!%p512_p9), %s1549_s18, 1 }
  0x3f   : > { %p577_p11 = scmp.lt.s32.totalorder (!%p512_p9), %s1273_s25, 3  ;;  %s1807_s13 = scalar_lea.vmem (!%p512_p9), [#allocation3], %s1270_s24 }
  0x40   : > { %p1277_p12 = scmp.ne.s32.totalorder (!%p512_p9), %s1545_s17, 0 }
  0x44   : > { %s1928_s14 = smov (!%p567_p10, %s1271_s14), 35  ;;  %s1930_s25 = smov (!%p577_p11, %s1273_s25), 3 }
  0x45   : > { %s1272_s26 = sshll.u32 %s1928_s14, 2  ;;  %s579_s15 = scalar_lea.vmem %s1912_s2, %s1930_s25  ;;  %v1563_v0 = vmov (!%p1277_p12), 0.0  }
  0x46   : > { %s1789_s30 = scalar_lea.vmem %s1910_s0, %s1272_s26  ;;  %s584_s18 = scalar_lea.vmem %s1913_s3, %s1930_s25  ;;  %600 = vst [vmem:[#allocation2] sm:$0xff] (!%p1277_p12), %v1563_v0  ;;  %601 = vst [vmem:[#allocation2 + $0x8] sm:$0xff] (!%p1277_p12), %v1563_v0 }
  0x47   : > { %s1276_s9 = sshll.u32 %s1930_s25, 3  ;;  %599 = sbr.rel (%p1277_p12) target bundleno = 78 (0x4e), region = 78 }
  0x48   : > { %s1805_s12 = scalar_lea.vmem %s1914_s4, %s1276_s9 }
  0x4e PF: > { %v1407_v1 = vld [vmem:[%s1807_s13 + $0x4] ss:$8 sps:$4 sm:$0xff]   ;;  %v1411_v3 = vld [vmem:[%s1807_s13] ss:$8 sps:$4 sm:$0xff]   ;;  %v1413_v5 = vld [vmem:[%s1807_s13 + $0x14] ss:$8 sps:$4 sm:$0xff]  }
  0x4f   : > { %v1409_v2 = vld [vmem:[%s1807_s13 + $0x104] ss:$8 sps:$4 sm:$0xff]   ;;  %1004 = vmatprep.subr.bf16.mxu0 %v1407_v1  ;;  %v1412_v4 = vld [vmem:[%s1807_s13 + $0x100] ss:$8 sps:$4 sm:$0xff]   ;;  %v1415_v6 = vld [vmem:[%s1807_s13 + $0x114] ss:$8 sps:$4 sm:$0xff]  }
  0x50   : > { %1045 = vmatprep.subr.bf16.mxu1 %v1409_v2  ;;  %1005 = vmatpush1.bf16.msra.mxu0 %v1411_v3  ;;  %v1417_v7 = vld [vmem:[%s1807_s13 + $0x10] ss:$8 sps:$4 sm:$0xff]   ;;  %v1419_v9 = vld [vmem:[%s1807_s13 + $0x24] ss:$8 sps:$4 sm:$0xff]   ;;  %v1423_v11 = vld [vmem:[%s1807_s13 + $0x20] ss:$8 sps:$4 sm:$0xff]  }
  0x51   : > { %1046 = vmatpush1.bf16.msra.mxu1 %v1412_v4  ;;  %1006 = vmatprep.subr.bf16.mxu0 %v1413_v5  ;;  %v1418_v8 = vld [vmem:[%s1807_s13 + $0x110] ss:$8 sps:$4 sm:$0xff]   ;;  %v1421_v10 = vld [vmem:[%s1807_s13 + $0x124] ss:$8 sps:$4 sm:$0xff]   ;;  %v1424_v12 = vld [vmem:[%s1807_s13 + $0x120] ss:$8 sps:$4 sm:$0xff]  }
  0x52   : > { %1047 = vmatprep.subr.bf16.mxu1 %v1415_v6  ;;  %v1425_v13 = vld [vmem:[%s1807_s13 + $0x34] ss:$8 sps:$4 sm:$0xff]   ;;  %v1429_v15 = vld [vmem:[%s1807_s13 + $0x30] ss:$8 sps:$4 sm:$0xff]   ;;  %v1431_v17 = vld [vmem:[%s1807_s13 + $0x44] ss:$8 sps:$4 sm:$0xff]  }
  0x53   : > { %v1427_v14 = vld [vmem:[%s1807_s13 + $0x134] ss:$8 sps:$4 sm:$0xff]   ;;  %v1430_v16 = vld [vmem:[%s1807_s13 + $0x130] ss:$8 sps:$4 sm:$0xff]   ;;  %v1433_v18 = vld [vmem:[%s1807_s13 + $0x144] ss:$8 sps:$4 sm:$0xff]  }
  0x54   : > { %1007 = vmatpush1.bf16.msra.mxu0 %v1417_v7  ;;  %v1435_v19 = vld [vmem:[%s1807_s13 + $0x40] ss:$8 sps:$4 sm:$0xff]   ;;  %v1437_v21 = vld [vmem:[%s1807_s13 + $0x54] ss:$8 sps:$4 sm:$0xff]   ;;  %v1441_v23 = vld [vmem:[%s1807_s13 + $0x50] ss:$8 sps:$4 sm:$0xff]  }
  0x55   : > { %1048 = vmatpush1.bf16.msra.mxu1 %v1418_v8  ;;  %1008 = vmatprep.subr.bf16.mxu0 %v1419_v9  ;;  %v1436_v20 = vld [vmem:[%s1807_s13 + $0x140] ss:$8 sps:$4 sm:$0xff]   ;;  %v1439_v22 = vld [vmem:[%s1807_s13 + $0x154] ss:$8 sps:$4 sm:$0xff]   ;;  %v1442_v24 = vld [vmem:[%s1807_s13 + $0x150] ss:$8 sps:$4 sm:$0xff]  }
  0x56   : > { %1049 = vmatprep.subr.bf16.mxu1 %v1421_v10  ;;  %v1443_v25 = vld [vmem:[%s1807_s13 + $0x64] ss:$8 sps:$4 sm:$0xff]   ;;  %v1447_v27 = vld [vmem:[%s1807_s13 + $0x60] ss:$8 sps:$4 sm:$0xff]   ;;  %v1449_v29 = vld [vmem:[%s1807_s13 + $0x74] ss:$8 sps:$4 sm:$0xff]  }
  0x57   : > { %v1445_v26 = vld [vmem:[%s1807_s13 + $0x164] ss:$8 sps:$4 sm:$0xff]   ;;  %v1448_v28 = vld [vmem:[%s1807_s13 + $0x160] ss:$8 sps:$4 sm:$0xff]   ;;  %v1451_v30 = vld [vmem:[%s1807_s13 + $0x174] ss:$8 sps:$4 sm:$0xff]  }
  0x58   : > { %1009 = vmatpush1.bf16.msra.mxu0 %v1423_v11  ;;  %v1453_v31 = vld [vmem:[%s1807_s13 + $0x70] ss:$8 sps:$4 sm:$0xff]   ;;  %v1455_v33 = vld [vmem:[%s1807_s13 + $0x84] ss:$8 sps:$4 sm:$0xff]   ;;  %v1459_v35 = vld [vmem:[%s1807_s13 + $0x80] ss:$8 sps:$4 sm:$0xff]  }
  0x59   : > { %1050 = vmatpush1.bf16.msra.mxu1 %v1424_v12  ;;  %1010 = vmatprep.subr.bf16.mxu0 %v1425_v13  ;;  %v1454_v32 = vld [vmem:[%s1807_s13 + $0x170] ss:$8 sps:$4 sm:$0xff]   ;;  %v1457_v34 = vld [vmem:[%s1807_s13 + $0x184] ss:$8 sps:$4 sm:$0xff]   ;;  %v1460_v36 = vld [vmem:[%s1807_s13 + $0x180] ss:$8 sps:$4 sm:$0xff]  }
  0x5a   : > { %1051 = vmatprep.subr.bf16.mxu1 %v1427_v14  ;;  %v1461_v37 = vld [vmem:[%s1807_s13 + $0x94] ss:$8 sps:$4 sm:$0xff]   ;;  %v1465_v39 = vld [vmem:[%s1807_s13 + $0x90] ss:$8 sps:$4 sm:$0xff]   ;;  %v1467_v41 = vld [vmem:[%s1807_s13 + $0xa4] ss:$8 sps:$4 sm:$0xff]  }
  0x5b   : > { %v1463_v38 = vld [vmem:[%s1807_s13 + $0x194] ss:$8 sps:$4 sm:$0xff]   ;;  %v1466_v40 = vld [vmem:[%s1807_s13 + $0x190] ss:$8 sps:$4 sm:$0xff]   ;;  %v1469_v42 = vld [vmem:[%s1807_s13 + $0x1a4] ss:$8 sps:$4 sm:$0xff]  }
  0x5c   : > { %1011 = vmatpush1.bf16.msra.mxu0 %v1429_v15  ;;  %v1471_v43 = vld [vmem:[%s1807_s13 + $0xa0] ss:$8 sps:$4 sm:$0xff]   ;;  %v1473_v45 = vld [vmem:[%s1807_s13 + $0xb4] ss:$8 sps:$4 sm:$0xff]   ;;  %v1477_v50 = vld [vmem:[%s1807_s13 + $0xb0] ss:$8 sps:$4 sm:$0xff]  }
  0x5d   : > { %1052 = vmatpush1.bf16.msra.mxu1 %v1430_v16  ;;  %1012 = vmatprep.subr.bf16.mxu0 %v1431_v17  ;;  %v1472_v44 = vld [vmem:[%s1807_s13 + $0x1a0] ss:$8 sps:$4 sm:$0xff]   ;;  %v1475_v46 = vld [vmem:[%s1807_s13 + $0x1b4] ss:$8 sps:$4 sm:$0xff]   ;;  %v1478_v51 = vld [vmem:[%s1807_s13 + $0x1b0] ss:$8 sps:$4 sm:$0xff]  }
  0x5e   : > { %1053 = vmatprep.subr.bf16.mxu1 %v1433_v18  ;;  %v604_v47 = vld [vmem:[%s1789_s30] sm:$0xff]  ;;  %v605_v49 = vld [vmem:[%s1789_s30 + $0x8] sm:$0xff]  ;;  %v1479_v53 = vld [vmem:[%s1807_s13 + $0xc4] ss:$8 sps:$4 sm:$0xff]   ;;  %p1346_p13 = scmp.ne.s32.totalorder %s1545_s17, 8 }
  0x5f   : > { %v1279_v48 = vcombine.high %v604_v47, %v604_v47  ;;  %v1281_v52 = vcombine.high %v605_v49, %v605_v49  ;;  %v1481_v54 = vld [vmem:[%s1807_s13 + $0x1c4] ss:$8 sps:$4 sm:$0xff]   ;;  %v1483_v55 = vld [vmem:[%s1807_s13 + $0xc0] ss:$8 sps:$4 sm:$0xff]   ;;  %v1485_v57 = vld [vmem:[%s1807_s13 + $0xd4] ss:$8 sps:$4 sm:$0xff]   ;;  %v1278_v5 = vcombine.low %v604_v47, %v604_v47  ;;  %v1280_v6 = vcombine.low %v605_v49, %v605_v49 }
  0x60   : > { %1013 = vmatpush1.bf16.msra.mxu0 %v1435_v19  ;;  %v1484_v56 = vld [vmem:[%s1807_s13 + $0x1c0] ss:$8 sps:$4 sm:$0xff]   ;;  %v1487_v58 = vld [vmem:[%s1807_s13 + $0x1d4] ss:$8 sps:$4 sm:$0xff]   ;;  %v1489_v59 = vld [vmem:[%s1807_s13 + $0xd0] ss:$8 sps:$4 sm:$0xff]  }
  0x61   : > { %1054 = vmatpush1.bf16.msra.mxu1 %v1436_v20  ;;  %1014 = vmatprep.subr.bf16.mxu0 %v1437_v21  ;;  %v1490_v60 = vld [vmem:[%s1807_s13 + $0x1d0] ss:$8 sps:$4 sm:$0xff]   ;;  %v1491_v61 = vld [vmem:[%s1807_s13 + $0xe4] ss:$8 sps:$4 sm:$0xff]   ;;  %v1495_v63 = vld [vmem:[%s1807_s13 + $0xe0] ss:$8 sps:$4 sm:$0xff]   ;;  %v1098_v21 = vlaneseq (!%p1346_p13) }
  0x62   : > { %1055 = vmatprep.subr.bf16.mxu1 %v1439_v22  ;;  %1036 = vmatprep.mubr.bf16.mxu0 %v1279_v48  ;;  %v1493_v62 = vld [vmem:[%s1807_s13 + $0x1e4] ss:$8 sps:$4 sm:$0xff]   ;;  %v1496_v0 = vld [vmem:[%s1807_s13 + $0x1e0] ss:$8 sps:$4 sm:$0xff]   ;;  %v1497_v1 = vld [vmem:[%s1807_s13 + $0xf4] ss:$8 sps:$4 sm:$0xff]  }
  0x63   : > { %1077 = vmatprep.mubr.bf16.mxu1 %v1281_v52  ;;  %v1499_v2 = vld [vmem:[%s1807_s13 + $0x1f4] ss:$8 sps:$4 sm:$0xff]   ;;  %v1501_v3 = vld [vmem:[%s1807_s13 + $0xf0] ss:$8 sps:$4 sm:$0xff]   ;;  %v1099_v22 = vshrl.u32 (!%p1346_p13), %v1098_v21, 7 }
  0x64   : > { %1015 = vmatpush1.bf16.msra.mxu0 %v1441_v23  ;;  %v1502_v4 = vld [vmem:[%s1807_s13 + $0x1f0] ss:$8 sps:$4 sm:$0xff]  }
  0x65   : > { %1056 = vmatpush1.bf16.msra.mxu1 %v1442_v24  ;;  %1016 = vmatprep.subr.bf16.mxu0 %v1443_v25  ;;  %v602_v8 = vld [vmem:[#allocation2] sm:$0xff]  ;;  %v603_v12 = vld [vmem:[#allocation2 + $0x8] sm:$0xff]  ;;  %v1100_v25 = vsub.s32 (!%p1346_p13), 0, %v1099_v22 }
  0x66   : > { %1057 = vmatprep.subr.bf16.mxu1 %v1445_v26  ;;  %v1096_v23 = vld [vmem:[%s579_s15] sm:$0x3] (!%p1346_p13)  ;;  %v1104_v26 = vsub.s32 (!%p1346_p13), 1, %v1099_v22 }
  0x67   : > { %v1110_v24 = vld [vmem:[%s584_s18] sm:$0x3] (!%p1346_p13) }
  0x68   : > { %1017 = vmatpush1.bf16.msra.mxu0 %v1447_v27 }
  0x69   : > { %1058 = vmatpush1.bf16.msra.mxu1 %v1448_v28  ;;  %1018 = vmatprep.subr.bf16.mxu0 %v1449_v29  ;;  %v1101_v29 = vrot.slane (!%p1346_p13), %v1096_v23, %v1100_v25 }
  0x6a   : > { %1059 = vmatprep.subr.bf16.mxu1 %v1451_v30  ;;  %v1115_v30 = vrot.slane (!%p1346_p13), %v1110_v24, %v1100_v25 }
  0x6c   : > { %1019 = vmatpush1.bf16.msra.mxu0 %v1453_v31  ;;  %v1105_v31 = vrot.slane (!%p1346_p13), %v1096_v23, %v1104_v26 }
  0x6d   : > { %1060 = vmatpush1.bf16.msra.mxu1 %v1454_v32  ;;  %1020 = vmatprep.subr.bf16.mxu0 %v1455_v33  ;;  %v1119_v32 = vrot.slane (!%p1346_p13), %v1110_v24, %v1104_v26 }
  0x6e   : > { %1061 = vmatprep.subr.bf16.mxu1 %v1457_v34 }
  0x70   : > { %1021 = vmatpush1.bf16.msra.mxu0 %v1459_v35 }
  0x71   : > { %1062 = vmatpush1.bf16.msra.mxu1 %v1460_v36  ;;  %1022 = vmatprep.subr.bf16.mxu0 %v1461_v37 }
  0x72   : > { %1063 = vmatprep.subr.bf16.mxu1 %v1463_v38 }
  0x74   : > { %1023 = vmatpush1.bf16.msra.mxu0 %v1465_v39 }
  0x75   : > { %1064 = vmatpush1.bf16.msra.mxu1 %v1466_v40  ;;  %1024 = vmatprep.subr.bf16.mxu0 %v1467_v41 }
  0x76   : > { %1065 = vmatprep.subr.bf16.mxu1 %v1469_v42 }
  0x78   : > { %1025 = vmatpush1.bf16.msra.mxu0 %v1471_v43 }
  0x79   : > { %1066 = vmatpush1.bf16.msra.mxu1 %v1472_v44  ;;  %1026 = vmatprep.subr.bf16.mxu0 %v1473_v45 }
  0x7a   : > { %1067 = vmatprep.subr.bf16.mxu1 %v1475_v46 }
  0x7c   : > { %1027 = vmatpush1.bf16.msra.mxu0 %v1477_v50 }
  0x7d   : > { %1068 = vmatpush1.bf16.msra.mxu1 %v1478_v51  ;;  %1028 = vmatprep.subr.bf16.mxu0 %v1479_v53 }
  0x7e   : > { %1069 = vmatprep.subr.bf16.mxu1 %v1481_v54 }
  0x80   : > { %1029 = vmatpush1.bf16.msra.mxu0 %v1483_v55 }
  0x81   : > { %1070 = vmatpush1.bf16.msra.mxu1 %v1484_v56  ;;  %1030 = vmatprep.subr.bf16.mxu0 %v1485_v57 }
  0x82   : > { %1071 = vmatprep.subr.bf16.mxu1 %v1487_v58 }
  0x84   : > { %1031 = vmatpush1.bf16.msra.mxu0 %v1489_v59 }
  0x85   : > { %1072 = vmatpush1.bf16.msra.mxu1 %v1490_v60  ;;  %1032 = vmatprep.subr.bf16.mxu0 %v1491_v61 }
  0x86   : > { %1073 = vmatprep.subr.bf16.mxu1 %v1493_v62 }
  0x88   : > { %1033 = vmatpush1.bf16.msra.mxu0 %v1495_v63 }
  0x89   : > { %1074 = vmatpush1.bf16.msra.mxu1 %v1496_v0  ;;  %1034 = vmatprep.subr.bf16.mxu0 %v1497_v1 }
  0x8a   : > { %1075 = vmatprep.subr.bf16.mxu1 %v1499_v2 }
  0x8c   : > { %1035 = vmatpush1.bf16.msra.mxu0 %v1501_v3 }
  0x8d   : > { %1076 = vmatpush1.bf16.msra.mxu1 %v1502_v4 }
  0x8f   : > { %1037 = vmatmul.mubr.bf16.vlgmr.msra.gmra.mrb[0].mxu0 %v1278_v5 }
  0x90   : > { %1078 = vmatmul.mubr.bf16.vlgmr.msra.gmra.mrb[0].mxu1 %v1280_v6 }
 0x162   : > { %v1038_v7 = vpop.f32.mrb[0].mxu0 }
 0x163   : > { %v1079_v9 = vpop.f32.mrb[0].mxu1  ;;  %v1040_v11 = vpop.f32.mrb[1].mxu0  ;;  %1093 = sbr.rel (%p1346_p13) target bundleno = 376 (0x178), region = 82 }
 0x164   : > { %v1080_v10 = vadd.f32 %v1079_v9, %v1038_v7  ;;  %v1081_v13 = vpop.f32.mrb[1].mxu1  ;;  %v1042_v15 = vpop.f32.mrb[2].mxu0 }
 0x165   : > { %v1082_v14 = vadd.f32 %v1081_v13, %v1040_v11  ;;  %v1083_v16 = vpop.f32.mrb[2].mxu1  ;;  %v1043_v18 = vpop.f32.mrb[3].mxu0 }
 0x166   : > { %v1086_v17 = vadd.f32 %v1080_v10, %v602_v8  ;;  %v1084_v19 = vpop.f32.mrb[3].mxu1 }
 0x167   : > { %v1087_v20 = vadd.f32 %v1082_v14, %v603_v12 }
 0x168   : > { %1088 = vst [vmem:[#allocation2] sm:$0xff] %v1086_v17 }
 0x169   : > { %1089 = vst [vmem:[#allocation2 + $0x8] sm:$0xff] %v1087_v20 }
 0x16f   : > { %v1094_v27 = vld [vmem:[#allocation2] sm:$0xff] }
 0x170   : > { %v1095_v28 = vld [vmem:[#allocation2 + $0x8] sm:$0xff]  ;;  %v1108_v33 = vmul.f32 %v1101_v29, %v1094_v27 }
 0x171   : > { %v1109_v34 = vmul.f32 %v1105_v31, %v1095_v28 }
 0x172   : > { %v1122_v35 = vadd.f32 %v1115_v30, %v1108_v33 }
 0x173   : > { %v1123_v36 = vadd.f32 %v1119_v32, %v1109_v34 }
 0x174   : > { %v1124_v37 = vmax.f32 %v1122_v35, 0.0 }
 0x175   : > { %v1125_v38 = vmax.f32 %v1123_v36, 0.0 }
 0x176   : > { %1126 = vst [vmem:[%s1805_s12] sm:$0xff] %v1124_v37 }
 0x177   : > { %1127 = vst [vmem:[%s1805_s12 + $0x8] sm:$0xff] %v1125_v38 }
 0x178 PF: > { %s14_s21 = sadd.s32 1, %s1561_s21   ;;  %s1915_s15 = smov %s1541_s16 }
 0x179   : > { %p11_p0 = scmp.ge.s32.totalorder %s14_s21, 20   ;;  %s1916_s16 = smov %s1640_s28 }
 0x17a   : > { %s1917_s17 = smov %s1553_s19  ;;  %s1918_s18 = smov %s1557_s20 }
 0x17b   : > { %s1919_s19 = smov %s1922_s22  ;;  %s1920_s20 = smov %s1926_s23 }
 0x17c   :  { %13 = sbr.rel (!%p11_p0) target bundleno = 4 (0x4), region = 126 }

// kernel: multimodal_classifier_forward.43
= control target key start
LH: loop header
LB: loop body
LE: loop exit
PB: predicated region body
PF: predicated region fallthrough
CT: control target
= control target key end

     0   :  { %v753_v0 = vmov 0.0|0.0   ;;  %vm754_vm0 = vmmov 0   ;;  %v755_v4 = vmov 0.0   ;;  %v756_v30 = vmov 1966171168   ;;  %s1125_s3 = inlined_call_operand.vmem [shape: f32[128,128], index: 3, kind: input, shape index: {}]   ;;  %s1126_s2 = inlined_call_operand.vmem [shape: f32[512,128], index: 2, kind: input, shape index: {}]   ;;  %s1127_s0 = inlined_call_operand.vmem [shape: f32[2,1,512], index: 0, kind: input, shape index: {}]   ;;  %s1128_s1 = inlined_call_operand.vmem [shape: f32[2,128], index: 1, kind: input, shape index: {}]   ;;  %s1129_s5 = inlined_call_operand.vmem [shape: f32[128,128], index: 5, kind: input, shape index: {}]   ;;  %s1130_s4 = inlined_call_operand.vmem [shape: f32[1,128], index: 4, kind: input, shape index: {}]   ;;  %s1131_s6 = inlined_call_operand.vmem [shape: f32[1,128], index: 6, kind: input, shape index: {}]   ;;  %s1132_s7 = inlined_call_operand.vmem [shape: f32[2,128], index: 7, kind: output, shape index: {}]  }
   0x1   :  { %635 = vmatprep.subr.bf16.mxu0 %v753_v0  ;;  %v95_v1 = vld [vmem:[%s1125_s3] sm:$0xff]  ;;  %v96_v2 = vld [vmem:[%s1125_s3 + $0x8] sm:$0xff]  ;;  %597 = vmatprep.mubr.msk.f32.mxu0 %vm754_vm0, %v755_v4  ;;  %v97_v11 = vld [vmem:[%s1125_s3 + $0x10] sm:$0xff]  ;;  %v185_v31 = vunpack.c.l.s4 %v756_v30  ;;  %v187_v32 = vlaneseq }
   0x2   :  { %v46_v3 = vld [vmem:[%s1126_s2 + $0x80] sm:$0xff]  ;;  %v636_v5 = vpack.c.bf16 %v96_v2, %v95_v1  ;;  %v47_v6 = vld [vmem:[%s1126_s2 + $0x88] sm:$0xff]  ;;  %v98_v12 = vld [vmem:[%s1125_s3 + $0x18] sm:$0xff] }
   0x3   :  { %v30_v7 = vld [vmem:[%s1126_s2] sm:$0xff]  ;;  %v31_v8 = vld [vmem:[%s1126_s2 + $0x8] sm:$0xff]  ;;  %v659_v9 = vpack.c.bf16 %v47_v6, %v46_v3  ;;  %v48_v13 = vld [vmem:[%s1126_s2 + $0x90] sm:$0xff]  ;;  %v639_v14 = vpack.c.bf16 %v98_v12, %v97_v11  ;;  %v186_v42 = vunpack.c.0.s8 %v185_v31  ;;  %v188_v43 = vshrl.u32 %v187_v32, 7 }
   0x4   :  { %v661_v10 = vpack.c.bf16 %v31_v8, %v30_v7  ;;  %637 = vmatpush3.bf16.msra.mxu0 %v636_v5  ;;  %v49_v15 = vld [vmem:[%s1126_s2 + $0x98] sm:$0xff]  ;;  %v32_v16 = vld [vmem:[%s1126_s2 + $0x10] sm:$0xff]  ;;  %v99_v19 = vld [vmem:[%s1125_s3 + $0x20] sm:$0xff] }
   0x5   :  { %v33_v17 = vld [vmem:[%s1126_s2 + $0x18] sm:$0xff]  ;;  %660 = vmatprep.subr.bf16.mxu1 %v659_v9  ;;  %638 = vmatprep.subr.bf16.mxu0 %v753_v0  ;;  %v663_v18 = vpack.c.bf16 %v49_v15, %v48_v13  ;;  %v100_v20 = vld [vmem:[%s1125_s3 + $0x28] sm:$0xff]  ;;  %v50_v21 = vld [vmem:[%s1126_s2 + $0xa0] sm:$0xff]  ;;  %v189_v54 = vsub.s32 %v186_v42, %v188_v43 }
   0x6   :  { %662 = vmatpush3.bf16.msra.mxu1 %v661_v10  ;;  %v665_v22 = vpack.c.bf16 %v33_v17, %v32_v16  ;;  %v51_v23 = vld [vmem:[%s1126_s2 + $0xa8] sm:$0xff]  ;;  %v34_v25 = vld [vmem:[%s1126_s2 + $0x20] sm:$0xff]  ;;  %v642_v27 = vpack.c.bf16 %v100_v20, %v99_v19  ;;  %v52_v28 = vld [vmem:[%s1126_s2 + $0xb0] sm:$0xff] }
   0x7   :  { %664 = vmatprep.subr.bf16.mxu1 %v663_v18  ;;  %v667_v24 = vpack.c.bf16 %v51_v23, %v50_v21  ;;  %v35_v26 = vld [vmem:[%s1126_s2 + $0x28] sm:$0xff]  ;;  %v53_v29 = vld [vmem:[%s1126_s2 + $0xb8] sm:$0xff]  ;;  %v101_v33 = vld [vmem:[%s1125_s3 + $0x30] sm:$0xff] }
   0x8   :  { %640 = vmatpush3.bf16.msra.mxu0 %v639_v14  ;;  %v102_v34 = vld [vmem:[%s1125_s3 + $0x38] sm:$0xff]  ;;  %v669_v35 = vpack.c.bf16 %v35_v26, %v34_v25  ;;  %v671_v36 = vpack.c.bf16 %v53_v29, %v52_v28  ;;  %v36_v37 = vld [vmem:[%s1126_s2 + $0x30] sm:$0xff]  ;;  %v54_v40 = vld [vmem:[%s1126_s2 + $0xc0] sm:$0xff] }
   0x9   :  { %641 = vmatprep.subr.bf16.mxu0 %v753_v0  ;;  %v37_v38 = vld [vmem:[%s1126_s2 + $0x38] sm:$0xff]  ;;  %v645_v39 = vpack.c.bf16 %v102_v34, %v101_v33  ;;  %v55_v41 = vld [vmem:[%s1126_s2 + $0xc8] sm:$0xff]  ;;  %v103_v44 = vld [vmem:[%s1125_s3 + $0x40] sm:$0xff] }
   0xa   :  { %666 = vmatpush3.bf16.msra.mxu1 %v665_v22  ;;  %v104_v45 = vld [vmem:[%s1125_s3 + $0x48] sm:$0xff]  ;;  %v673_v46 = vpack.c.bf16 %v37_v38, %v36_v37  ;;  %v675_v47 = vpack.c.bf16 %v55_v41, %v54_v40  ;;  %v38_v48 = vld [vmem:[%s1126_s2 + $0x40] sm:$0xff]  ;;  %v105_v51 = vld [vmem:[%s1125_s3 + $0x50] sm:$0xff] }
   0xb   :  { %668 = vmatprep.subr.bf16.mxu1 %v667_v24  ;;  %v39_v49 = vld [vmem:[%s1126_s2 + $0x48] sm:$0xff]  ;;  %v648_v50 = vpack.c.bf16 %v104_v45, %v103_v44  ;;  %v56_v52 = vld [vmem:[%s1126_s2 + $0xd0] sm:$0xff]  ;;  %v57_v53 = vld [vmem:[%s1126_s2 + $0xd8] sm:$0xff] }
   0xc   :  { %643 = vmatpush3.bf16.msra.mxu0 %v642_v27  ;;  %v106_v55 = vld [vmem:[%s1125_s3 + $0x58] sm:$0xff]  ;;  %v677_v56 = vpack.c.bf16 %v39_v49, %v38_v48  ;;  %v752_v57 = vld.sshfl [vmem:[%s1127_s0] sm:$0xff pattern:$0x75316420]  ;;  %v679_v58 = vpack.c.bf16 %v57_v53, %v56_v52  ;;  %v40_v59 = vld [vmem:[%s1126_s2 + $0x50] sm:$0xff] }
   0xd   :  { %644 = vmatprep.subr.bf16.mxu0 %v753_v0  ;;  %v41_v60 = vld [vmem:[%s1126_s2 + $0x58] sm:$0xff]  ;;  %v651_v61 = vpack.c.bf16 %v106_v55, %v105_v51  ;;  %v58_v62 = vld [vmem:[%s1126_s2 + $0xe0] sm:$0xff]  ;;  %v59_v63 = vld [vmem:[%s1126_s2 + $0xe8] sm:$0xff]  ;;  %v191_v5 = vcombine.high %v752_v57, %v752_v57  ;;  %v975_v31 = vrot.slane %v752_v57, %v189_v54 }
   0xe   :  { %670 = vmatpush3.bf16.msra.mxu1 %v669_v35  ;;  %v107_v1 = vld [vmem:[%s1125_s3 + $0x60] sm:$0xff]  ;;  %v108_v2 = vld [vmem:[%s1125_s3 + $0x68] sm:$0xff]  ;;  %v681_v3 = vpack.c.bf16 %v41_v60, %v40_v59  ;;  %v683_v6 = vpack.c.bf16 %v59_v63, %v58_v62  ;;  %v60_v10 = vld [vmem:[%s1126_s2 + $0xf0] sm:$0xff] }
   0xf   :  { %672 = vmatprep.subr.bf16.mxu1 %v671_v36  ;;  %v42_v7 = vld [vmem:[%s1126_s2 + $0x60] sm:$0xff]  ;;  %v43_v8 = vld [vmem:[%s1126_s2 + $0x68] sm:$0xff]  ;;  %v654_v9 = vpack.c.bf16 %v108_v2, %v107_v1  ;;  %v61_v11 = vld [vmem:[%s1126_s2 + $0xf8] sm:$0xff]  ;;  %v205_v12 = vrot.slane %v191_v5, %v189_v54 }
  0x10   :  { %646 = vmatpush3.bf16.msra.mxu0 %v645_v39  ;;  %v109_v13 = vld [vmem:[%s1125_s3 + $0x70] sm:$0xff]  ;;  %v110_v14 = vld [vmem:[%s1125_s3 + $0x78] sm:$0xff]  ;;  %v685_v15 = vpack.c.bf16 %v43_v8, %v42_v7  ;;  %v78_v16 = vld [vmem:[%s1126_s2 + $0x180] sm:$0xff]  ;;  %v687_v18 = vpack.c.bf16 %v61_v11, %v60_v10 }
  0x11   :  { %647 = vmatprep.subr.bf16.mxu0 %v753_v0  ;;  %276 = vmatprep.mubr.f32.mxu1 %v205_v12  ;;  %v79_v17 = vld [vmem:[%s1126_s2 + $0x188] sm:$0xff]  ;;  %v44_v19 = vld [vmem:[%s1126_s2 + $0x70] sm:$0xff]  ;;  %v45_v20 = vld [vmem:[%s1126_s2 + $0x78] sm:$0xff]  ;;  %v657_v21 = vpack.c.bf16 %v110_v14, %v109_v13  ;;  %v207_v29 = vcombine.high %v205_v12, %v205_v12 }
  0x12   :  { %674 = vmatpush3.bf16.msra.mxu1 %v673_v46  ;;  %v691_v22 = vpack.c.bf16 %v79_v17, %v78_v16  ;;  %v62_v23 = vld [vmem:[%s1126_s2 + $0x100] sm:$0xff]  ;;  %v63_v24 = vld [vmem:[%s1126_s2 + $0x108] sm:$0xff]  ;;  %v689_v25 = vpack.c.bf16 %v45_v20, %v44_v19  ;;  %v80_v26 = vld [vmem:[%s1126_s2 + $0x190] sm:$0xff] }
  0x13   :  { %676 = vmatprep.subr.bf16.mxu1 %v675_v47  ;;  %v81_v27 = vld [vmem:[%s1126_s2 + $0x198] sm:$0xff]  ;;  %v94_v28 = vld [vmem:[%s1128_s1] sm:$0x3]  ;;  %v693_v30 = vpack.c.bf16 %v63_v24, %v62_v23  ;;  %v64_v33 = vld [vmem:[%s1126_s2 + $0x110] sm:$0xff] }
  0x14   :  { %649 = vmatpush3.bf16.msra.mxu0 %v648_v50  ;;  %v695_v32 = vpack.c.bf16 %v81_v27, %v80_v26  ;;  %v65_v34 = vld [vmem:[%s1126_s2 + $0x118] sm:$0xff]  ;;  %v82_v35 = vld [vmem:[%s1126_s2 + $0x1a0] sm:$0xff]  ;;  %v83_v36 = vld [vmem:[%s1126_s2 + $0x1a8] sm:$0xff] }
  0x15   :  { %650 = vmatprep.subr.bf16.mxu0 %v753_v0  ;;  %v697_v37 = vpack.c.bf16 %v65_v34, %v64_v33  ;;  %v699_v38 = vpack.c.bf16 %v83_v36, %v82_v35  ;;  %v66_v39 = vld [vmem:[%s1126_s2 + $0x120] sm:$0xff]  ;;  %v67_v40 = vld [vmem:[%s1126_s2 + $0x128] sm:$0xff]  ;;  %v84_v41 = vld [vmem:[%s1126_s2 + $0x1b0] sm:$0xff] }
  0x16   :  { %678 = vmatpush3.bf16.msra.mxu1 %v677_v56  ;;  %v85_v42 = vld [vmem:[%s1126_s2 + $0x1b8] sm:$0xff]  ;;  %v701_v43 = vpack.c.bf16 %v67_v40, %v66_v39  ;;  %v68_v45 = vld [vmem:[%s1126_s2 + $0x130] sm:$0xff]  ;;  %v86_v47 = vld [vmem:[%s1126_s2 + $0x1c0] sm:$0xff] }
  0x17   :  { %680 = vmatprep.subr.bf16.mxu1 %v679_v58  ;;  %v703_v44 = vpack.c.bf16 %v85_v42, %v84_v41  ;;  %v69_v46 = vld [vmem:[%s1126_s2 + $0x138] sm:$0xff]  ;;  %v70_v50 = vld [vmem:[%s1126_s2 + $0x140] sm:$0xff]  ;;  %v71_v51 = vld [vmem:[%s1126_s2 + $0x148] sm:$0xff] }
  0x18   :  { %652 = vmatpush3.bf16.msra.mxu0 %v651_v61  ;;  %v705_v48 = vpack.c.bf16 %v69_v46, %v68_v45  ;;  %v88_v52 = vld [vmem:[%s1126_s2 + $0x1d0] sm:$0xff]  ;;  %v89_v53 = vld [vmem:[%s1126_s2 + $0x1d8] sm:$0xff]  ;;  %v709_v54 = vpack.c.bf16 %v71_v51, %v70_v50  ;;  %v90_v58 = vld [vmem:[%s1126_s2 + $0x1e0] sm:$0xff] }
  0x19   :  { %653 = vmatprep.subr.bf16.mxu0 %v753_v0  ;;  %v711_v55 = vpack.c.bf16 %v89_v53, %v88_v52  ;;  %v72_v56 = vld [vmem:[%s1126_s2 + $0x150] sm:$0xff]  ;;  %v73_v57 = vld [vmem:[%s1126_s2 + $0x158] sm:$0xff]  ;;  %v91_v59 = vld [vmem:[%s1126_s2 + $0x1e8] sm:$0xff] }
  0x1a   :  { %682 = vmatpush3.bf16.msra.mxu1 %v681_v3  ;;  %v713_v60 = vpack.c.bf16 %v73_v57, %v72_v56  ;;  %v715_v61 = vpack.c.bf16 %v91_v59, %v90_v58  ;;  %v74_v62 = vld [vmem:[%s1126_s2 + $0x160] sm:$0xff]  ;;  %v75_v63 = vld [vmem:[%s1126_s2 + $0x168] sm:$0xff]  ;;  %v92_v1 = vld [vmem:[%s1126_s2 + $0x1f0] sm:$0xff] }
  0x1b   :  { %684 = vmatprep.subr.bf16.mxu1 %v683_v6  ;;  %v93_v2 = vld [vmem:[%s1126_s2 + $0x1f8] sm:$0xff]  ;;  %v717_v3 = vpack.c.bf16 %v75_v63, %v74_v62  ;;  %v76_v6 = vld [vmem:[%s1126_s2 + $0x170] sm:$0xff]  ;;  %v361_v10 = vld [vmem:[%s1129_s5] sm:$0xff] }
  0x1c   :  { %655 = vmatpush3.bf16.msra.mxu0 %v654_v9  ;;  %v719_v5 = vpack.c.bf16 %v93_v2, %v92_v1  ;;  %v77_v7 = vld [vmem:[%s1126_s2 + $0x178] sm:$0xff]  ;;  %v206_v9 = vcombine.high %v975_v31, %v975_v31  ;;  %v362_v11 = vld [vmem:[%s1129_s5 + $0x8] sm:$0xff]  ;;  %v363_v12 = vld [vmem:[%s1129_s5 + $0x10] sm:$0xff] }
  0x1d   :  { %656 = vmatprep.subr.bf16.mxu0 %v753_v0  ;;  %v721_v8 = vpack.c.bf16 %v77_v7, %v76_v6  ;;  %v724_v13 = vpack.c.bf16 %v362_v11, %v361_v10  ;;  %v364_v14 = vld [vmem:[%s1129_s5 + $0x18] sm:$0xff]  ;;  %v365_v16 = vld [vmem:[%s1129_s5 + $0x20] sm:$0xff]  ;;  %v366_v17 = vld [vmem:[%s1129_s5 + $0x28] sm:$0xff] }
  0x1e   :  { %686 = vmatpush3.bf16.msra.mxu1 %v685_v15  ;;  %v727_v15 = vpack.c.bf16 %v364_v14, %v363_v12  ;;  %v367_v19 = vld [vmem:[%s1129_s5 + $0x30] sm:$0xff]  ;;  %v368_v20 = vld [vmem:[%s1129_s5 + $0x38] sm:$0xff]  ;;  %v370_v23 = vld [vmem:[%s1129_s5 + $0x48] sm:$0xff] }
  0x1f   :  { %688 = vmatprep.subr.bf16.mxu1 %v687_v18  ;;  %v730_v18 = vpack.c.bf16 %v366_v17, %v365_v16  ;;  %v372_v26 = vld [vmem:[%s1129_s5 + $0x58] sm:$0xff]  ;;  %v460_v46 = vld [vmem:[%s1131_s6] ss:$0 sm:$0xff] }
  0x20   :  { %658 = vmatpush3.bf16.msra.mxu0 %v657_v21  ;;  %v733_v21 = vpack.c.bf16 %v368_v20, %v367_v19 }
  0x21   :  { %692 = vmatprep.subr.bf16.mxu0 %v691_v22  ;;  %v369_v22 = vld [vmem:[%s1129_s5 + $0x40] sm:$0xff] }
  0x22   :  { %690 = vmatpush3.bf16.msra.mxu1 %v689_v25  ;;  %v736_v24 = vpack.c.bf16 %v370_v23, %v369_v22  ;;  %v371_v25 = vld [vmem:[%s1129_s5 + $0x50] sm:$0xff] }
  0x23   :  { %598 = vmatmul.mubr.f32.vlgmr.msra.gmra.mrb[0].mxu0 %v94_v28  ;;  %723 = vmatprep.subr.bf16.mxu1 %v753_v0  ;;  %v739_v27 = vpack.c.bf16 %v372_v26, %v371_v25  ;;  %v373_v28 = vld [vmem:[%s1129_s5 + $0x60] sm:$0xff] }
  0x24   :  { %694 = vmatpush3.bf16.msra.mxu0 %v693_v30  ;;  %346 = vmatprep.mubr.f32.mxu0 %v207_v29  ;;  %v374_v29 = vld [vmem:[%s1129_s5 + $0x68] sm:$0xff] }
  0x25   :  { %277 = vmatmul.mubr.f32.vlgmr.msra.gmra.mrb[0].mxu1 %v975_v31  ;;  %696 = vmatprep.subr.bf16.mxu0 %v695_v32  ;;  %v742_v30 = vpack.c.bf16 %v374_v29, %v373_v28  ;;  %v375_v31 = vld [vmem:[%s1129_s5 + $0x70] sm:$0xff]  ;;  %v376_v32 = vld [vmem:[%s1129_s5 + $0x78] sm:$0xff] }
  0x26   :  { %632 = vmatprep.mubr.msk.f32.mxu1 %vm754_vm0, %v755_v4  ;;  %v87_v4 = vld [vmem:[%s1126_s2 + $0x1c8] sm:$0xff]  ;;  %725 = vmatpush3.bf16.msra.mxu1 %v724_v13  ;;  %v745_v33 = vpack.c.bf16 %v376_v32, %v375_v31 }
  0x27   :  { %v707_v49 = vpack.c.bf16 %v87_v4, %v86_v47  ;;  %726 = vmatprep.subr.bf16.mxu1 %v753_v0 }
  0x28   :  { %698 = vmatpush3.bf16.msra.mxu0 %v697_v37 }
  0x29   :  { %700 = vmatprep.subr.bf16.mxu0 %v699_v38 }
  0x2a   :  { %728 = vmatpush3.bf16.msra.mxu1 %v727_v15 }
  0x2b   :  { %729 = vmatprep.subr.bf16.mxu1 %v753_v0 }
  0x2c   :  { %702 = vmatpush3.bf16.msra.mxu0 %v701_v43 }
  0x2d   :  { %704 = vmatprep.subr.bf16.mxu0 %v703_v44 }
  0x2e   :  { %731 = vmatpush3.bf16.msra.mxu1 %v730_v18 }
  0x2f   :  { %732 = vmatprep.subr.bf16.mxu1 %v753_v0 }
  0x30   :  { %706 = vmatpush3.bf16.msra.mxu0 %v705_v48 }
  0x31   :  { %708 = vmatprep.subr.bf16.mxu0 %v707_v49 }
  0x32   :  { %734 = vmatpush3.bf16.msra.mxu1 %v733_v21 }
  0x33   :  { %735 = vmatprep.subr.bf16.mxu1 %v753_v0 }
  0x34   :  { %710 = vmatpush3.bf16.msra.mxu0 %v709_v54 }
  0x35   :  { %712 = vmatprep.subr.bf16.mxu0 %v711_v55 }
  0x36   :  { %737 = vmatpush3.bf16.msra.mxu1 %v736_v24 }
  0x37   :  { %738 = vmatprep.subr.bf16.mxu1 %v753_v0 }
  0x38   :  { %714 = vmatpush3.bf16.msra.mxu0 %v713_v60 }
  0x39   :  { %716 = vmatprep.subr.bf16.mxu0 %v715_v61 }
  0x3a   :  { %740 = vmatpush3.bf16.msra.mxu1 %v739_v27 }
  0x3b   :  { %741 = vmatprep.subr.bf16.mxu1 %v753_v0 }
  0x3c   :  { %718 = vmatpush3.bf16.msra.mxu0 %v717_v3 }
  0x3d   :  { %720 = vmatprep.subr.bf16.mxu0 %v719_v5 }
  0x3e   :  { %743 = vmatpush3.bf16.msra.mxu1 %v742_v30 }
  0x3f   :  { %744 = vmatprep.subr.bf16.mxu1 %v753_v0  ;;  %v459_v0 = vld [vmem:[%s1130_s4] ss:$0 sm:$0xff] }
  0x40   :  { %722 = vmatpush3.bf16.msra.mxu0 %v721_v8 }
  0x42   :  { %746 = vmatpush3.bf16.msra.mxu1 %v745_v33 }
  0x43   :  { %347 = vmatmul.mubr.f32.vlgmr.msra.gmra.mrb[2].mxu0 %v206_v9 }
  0xf6   :  { %v177_v34 = vpop.f32.mrb[0].mxu0 }
  0xf7   :  { %v599_v35 = vpop.f32.mrb[1].mxu0 }
  0xf8   :  { %v510_v36 = vpop.f32.mrb[0].mxu1 }
  0xf9   :  { %v511_v37 = vpop.f32.mrb[1].mxu1 }
  0xfa   :  { %v512_v38 = vadd.f32 %v511_v37, %v510_v36 }
  0xfc   :  { %v279_v39 = vadd.f32 %v512_v38, %v177_v34 }
 0x116   :  { %v545_v40 = vpop.f32.mrb[2].mxu0 }
 0x117   :  { %v546_v41 = vpop.f32.mrb[3].mxu0 }
 0x118   :  { %v547_v42 = vadd.f32 %v546_v41, %v545_v40 }
 0x11a   :  { %v349_v43 = vadd.f32 %v547_v42, %v279_v39 }
 0x11c   :  { %v359_v44 = vadd.f32 %v459_v0, %v349_v43 }
 0x11e   :  { %v360_v45 = vmax.f32 %v359_v44, 0.0 }
 0x120   :  { %633 = vmatmul.mubr.f32.vlgmr.msra.gmra.mrb[2].mxu1 %v360_v45 }
 0x1f3   :  { %v450_v47 = vpop.f32.mrb[2].mxu1 }
 0x1f4   :  { %v451_v4 = vadd.f32 %v460_v46, %v450_v47  ;;  %v634_v48 = vpop.f32.mrb[3].mxu1 }
 0x1f6   :  { %454 = vst [vmem:[%s1132_s7] sm:$0x3] %v451_v4 }

// kernel: multimodal_classifier_forward.42
= control target key start
LH: loop header
LB: loop body
LE: loop exit
PB: predicated region body
PF: predicated region fallthrough
CT: control target
= control target key end

     0   :  { %v768_v3 = vmov 0.0   ;;  %vm57_vm0 = vcmask 261120   ;;  %v37_v27 = vlaneseq  ;;  %v769_v31 = vmov 1983009808   ;;  %s1086_s1 = inlined_call_operand.vmem [shape: f32[32,512], index: 1, kind: input, shape index: {}]   ;;  %s1087_s2 = inlined_call_operand.vmem [shape: f32[128,512], index: 2, kind: input, shape index: {}]   ;;  %s1088_s4 = inlined_call_operand.vmem [shape: f32[2,128], index: 4, kind: output, shape index: {}]   ;;  %s1089_s0 = inlined_call_operand.vmem [shape: f32[16,32], index: 0, kind: input, shape index: {}]   ;;  %s1090_s3 = inlined_call_operand.vmem [shape: f32[1,512], index: 3, kind: input, shape index: {}]  }
   0x1   :  { %v20_v0 = vld [vmem:[%s1086_s1 + $0x8] sm:$0xff]  ;;  %v22_v2 = vld [vmem:[%s1086_s1 + $0x18] sm:$0xff]  ;;  %128 = vmatprep.mubr.f32.mxu0 %v768_v3  ;;  %205 = vmatprep.mubr.f32.mxu1 %v768_v3  ;;  %v19_v6 = vld [vmem:[%s1086_s1] sm:$0xff]  ;;  %v225_v32 = vunpack.c.l.s4 %v769_v31 }
   0x2   :  { %v24_v1 = vld [vmem:[%s1086_s1 + $0x28] sm:$0xff]  ;;  %v26_v5 = vld [vmem:[%s1086_s1 + $0x38] sm:$0xff]  ;;  %v23_v7 = vld [vmem:[%s1086_s1 + $0x20] sm:$0xff]  ;;  %v38_v28 = vshrl.u32 %v37_v27, 7 }
   0x3   :  { %v621_v4 = vpack.c.bf16 %v24_v1, %v20_v0  ;;  %v629_v8 = vpack.c.bf16 %v26_v5, %v22_v2  ;;  %v623_v9 = vpack.c.bf16 %v23_v7, %v19_v6  ;;  %v21_v10 = vld [vmem:[%s1086_s1 + $0x10] sm:$0xff]  ;;  %v28_v12 = vld [vmem:[%s1086_s1 + $0x48] sm:$0xff]  ;;  %v30_v15 = vld [vmem:[%s1086_s1 + $0x58] sm:$0xff]  ;;  %v226_v37 = vunpack.c.0.s8 %v225_v32 }
   0x4   :  { %v25_v11 = vld [vmem:[%s1086_s1 + $0x30] sm:$0xff]  ;;  %v32_v14 = vld [vmem:[%s1086_s1 + $0x68] sm:$0xff]  ;;  %v34_v16 = vld [vmem:[%s1086_s1 + $0x78] sm:$0xff]  ;;  %v39_v29 = vsub.s32 0, %v38_v28  ;;  %v47_v33 = vsub.s32 2, %v38_v28  ;;  %v43_v34 = vsub.s32 1, %v38_v28 }
   0x5   :  { %622 = vmatprep.subr.bf16.mxu0 %v621_v4  ;;  %v631_v13 = vpack.c.bf16 %v25_v11, %v21_v10  ;;  %630 = vmatprep.subr.bf16.mxu1 %v629_v8  ;;  %v625_v17 = vpack.c.bf16 %v32_v14, %v28_v12  ;;  %v633_v18 = vpack.c.bf16 %v34_v16, %v30_v15  ;;  %v27_v19 = vld [vmem:[%s1086_s1 + $0x40] sm:$0xff]  ;;  %v29_v21 = vld [vmem:[%s1086_s1 + $0x50] sm:$0xff]  ;;  %v18_v26 = vld [vmem:[%s1089_s0 + $0x8] sm:$0xff]  ;;  %v51_v35 = vsub.s32 3, %v38_v28 }
   0x6   :  { %624 = vmatpush1.bf16.msra.mxu0 %v623_v9  ;;  %v31_v20 = vld [vmem:[%s1086_s1 + $0x60] sm:$0xff]  ;;  %v33_v23 = vld [vmem:[%s1086_s1 + $0x70] sm:$0xff]  ;;  %v853_v45 = vsub.s32 %v226_v37, %v38_v28 }
   0x7   :  { %632 = vmatpush1.bf16.msra.mxu1 %v631_v13  ;;  %v627_v22 = vpack.c.bf16 %v31_v20, %v27_v19  ;;  %626 = vmatprep.subr.bf16.mxu0 %v625_v17  ;;  %v635_v24 = vpack.c.bf16 %v33_v23, %v29_v21  ;;  %v17_v25 = vld [vmem:[%s1089_s0] sm:$0xff]  ;;  %v865_v19 = vmov 0.0   ;;  %s867_s0 = smov 0  }
   0x8   :  { %634 = vmatprep.subr.bf16.mxu1 %v633_v18  ;;  %v35_v30 = vld [vmem:[%s1090_s3] sm:$0xf]  ;;  %v863_v18 = vmov 0.0  }
   0x9   :  { %v40_v36 = vrot.slane %v35_v30, %v39_v29  ;;  %v48_v38 = vrot.slane %v35_v30, %v47_v33  ;;  %v44_v39 = vrot.slane %v35_v30, %v43_v34  ;;  %v52_v40 = vrot.slane %v35_v30, %v51_v35 }
   0xa   :  { %628 = vmatpush1.bf16.msra.mxu0 %v627_v22 }
   0xb   :  { %636 = vmatpush1.bf16.msra.mxu1 %v635_v24 }
   0xd   :  { %611 = vmatmul.mubr.msk.f32.vlgmr.msra.gmra.mrb[0].mxu0 %vm57_vm0, %v17_v25 }
   0xe   :  { %613 = vmatmul.mubr.msk.f32.vlgmr.msra.gmra.mrb[0].mxu1 %vm57_vm0, %v17_v25  ;;  %134 = vmatprep.mubr.f32.mxu0 %v768_v3 }
   0xf   :  { %211 = vmatprep.mubr.f32.mxu1 %v768_v3 }
  0x11   :  { %612 = vmatmul.mubr.msk.f32.gmra.mrb[2].mxu0 %vm57_vm0, %v18_v26 }
  0x12   :  { %614 = vmatmul.mubr.msk.f32.gmra.mrb[2].mxu1 %vm57_vm0, %v18_v26 }
  0xe0   :  { %v130_v41 = vpop.f32.mrb[0].mxu0 }
  0xe1   :  { %v131_v42 = vadd.f32 %v130_v41, %v40_v36  ;;  %v207_v43 = vpop.f32.mrb[0].mxu1  ;;  %v132_v44 = vpop.f32.mrb[1].mxu0 }
  0xe2   :  { %v208_v46 = vadd.f32 %v207_v43, %v48_v38  ;;  %v133_v47 = vadd.f32 %v132_v44, %v44_v39  ;;  %v209_v48 = vpop.f32.mrb[1].mxu1 }
  0xe3   :  { %v210_v49 = vadd.f32 %v209_v48, %v52_v40 }
  0xe4   :  { %v222_v50 = vcombine.low %v131_v42, %v133_v47  ;;  %v245_v51 = vcombine.high %v131_v42, %v133_v47  ;;  %v136_v52 = vpop.f32.mrb[2].mxu0 }
  0xe5   :  { %v223_v53 = vcombine.low %v208_v46, %v210_v49  ;;  %v246_v54 = vcombine.high %v208_v46, %v210_v49  ;;  %v137_v55 = vadd.f32 %v136_v52, %v40_v36  ;;  %v213_v56 = vpop.f32.mrb[2].mxu1  ;;  %v138_v57 = vpop.f32.mrb[3].mxu0 }
  0xe6   :  { %v230_v58 = vrot.slane %v222_v50, %v853_v45  ;;  %v253_v59 = vrot.slane %v245_v51, %v853_v45  ;;  %v214_v60 = vadd.f32 %v213_v56, %v48_v38  ;;  %v139_v61 = vadd.f32 %v138_v57, %v44_v39  ;;  %v215_v62 = vpop.f32.mrb[3].mxu1 }
  0xe7   :  { %v237_v63 = vrot.slane %v223_v53, %v853_v45  ;;  %v260_v0 = vrot.slane %v246_v54, %v853_v45  ;;  %v216_v1 = vadd.f32 %v215_v62, %v52_v40 }
  0xe8   :  { %v273_v2 = vcombine.low %v137_v55, %v139_v61  ;;  %v297_v3 = vcombine.high %v137_v55, %v139_v61 }
  0xe9   :  { %v238_v4 = vcombine.low %v230_v58, %v237_v63  ;;  %v241_v5 = vcombine.high %v230_v58, %v237_v63  ;;  %v261_v6 = vcombine.low %v253_v59, %v260_v0  ;;  %v265_v7 = vcombine.high %v253_v59, %v260_v0 }
  0xea   :  { %v281_v8 = vrot.slane %v273_v2, %v853_v45  ;;  %v305_v9 = vrot.slane %v297_v3, %v853_v45  ;;  %v274_v10 = vcombine.low %v214_v60, %v216_v1  ;;  %v298_v11 = vcombine.high %v214_v60, %v216_v1 }
  0xeb   :  { %240 = vst [vmem:[#allocation2] sm:$0xff] %v238_v4  ;;  %244 = vst [vmem:[#allocation2 + $0x8] sm:$0xff] %v241_v5 }
  0xec   :  { %264 = vst [vmem:[#allocation2 + $0x10] sm:$0xff] %v261_v6  ;;  %268 = vst [vmem:[#allocation2 + $0x18] sm:$0xff] %v265_v7  ;;  %v288_v12 = vrot.slane %v274_v10, %v853_v45  ;;  %v312_v13 = vrot.slane %v298_v11, %v853_v45 }
  0xee   :  { %v289_v14 = vcombine.low %v281_v8, %v288_v12  ;;  %v293_v15 = vcombine.high %v281_v8, %v288_v12  ;;  %v313_v16 = vcombine.low %v305_v9, %v312_v13  ;;  %v317_v17 = vcombine.high %v305_v9, %v312_v13 }
  0xf0   :  { %292 = vst [vmem:[#allocation2 + $0x20] sm:$0xff] %v289_v14  ;;  %296 = vst [vmem:[#allocation2 + $0x28] sm:$0xff] %v293_v15 }
  0xf1   :  { %316 = vst [vmem:[#allocation2 + $0x30] sm:$0xff] %v313_v16  ;;  %320 = vst [vmem:[#allocation2 + $0x38] sm:$0xff] %v317_v17 }
  0xf2 LB: > { %v334_v20 = vld [vmem:[%s1087_s2 + $0x8] sm:$0xff]  ;;  %v336_v22 = vld [vmem:[%s1087_s2 + $0x18] sm:$0xff]  ;;  %v333_v25 = vld [vmem:[%s1087_s2] sm:$0xff]  ;;  %v770_v27 = vmov 0.0   ;;  %s620_s15 = sshll.u32 %s766_s0, 3  ;;  %s326_s0 = sadd.s32 1, %s766_s0   ;;  %s766_s0 = sphi %s867_s0, %s326_s0   ;;  %v762_v19 = vphi %v865_v19, %v1091_v19   ;;  %v758_v18 = vphi %v863_v18, %v590_v18  }
  0xf3   : > { %v338_v21 = vld [vmem:[%s1087_s2 + $0x28] sm:$0xff]  ;;  %v340_v24 = vld [vmem:[%s1087_s2 + $0x38] sm:$0xff]  ;;  %v337_v26 = vld [vmem:[%s1087_s2 + $0x20] sm:$0xff]  ;;  %461 = vmatprep.mubr.f32.mxu0 %v770_v27  ;;  %532 = vmatprep.mubr.f32.mxu1 %v770_v27  ;;  %s331_s16 = scalar_lea.vmem [#allocation2], %s620_s15  ;;  %p323_p0 = scmp.ge.s32.totalorder %s326_s0, 8  }
  0xf4   : > { %v637_v23 = vpack.c.bf16 %v338_v21, %v334_v20  ;;  %v669_v28 = vpack.c.bf16 %v340_v24, %v336_v22  ;;  %v639_v29 = vpack.c.bf16 %v337_v26, %v333_v25  ;;  %v335_v30 = vld [vmem:[%s1087_s2 + $0x10] sm:$0xff]  ;;  %v342_v32 = vld [vmem:[%s1087_s2 + $0x48] sm:$0xff]  ;;  %v344_v35 = vld [vmem:[%s1087_s2 + $0x58] sm:$0xff] }
  0xf5   : > { %v339_v31 = vld [vmem:[%s1087_s2 + $0x30] sm:$0xff]  ;;  %v346_v34 = vld [vmem:[%s1087_s2 + $0x68] sm:$0xff]  ;;  %v348_v36 = vld [vmem:[%s1087_s2 + $0x78] sm:$0xff] }
  0xf6   : > { %638 = vmatprep.subr.bf16.mxu0 %v637_v23  ;;  %v671_v33 = vpack.c.bf16 %v339_v31, %v335_v30  ;;  %670 = vmatprep.subr.bf16.mxu1 %v669_v28  ;;  %v641_v37 = vpack.c.bf16 %v346_v34, %v342_v32  ;;  %v673_v38 = vpack.c.bf16 %v348_v36, %v344_v35  ;;  %v341_v39 = vld [vmem:[%s1087_s2 + $0x40] sm:$0xff]  ;;  %v343_v41 = vld [vmem:[%s1087_s2 + $0x50] sm:$0xff]  ;;  %v350_v44 = vld [vmem:[%s1087_s2 + $0x88] sm:$0xff] }
  0xf7   : > { %640 = vmatpush1.bf16.msra.mxu0 %v639_v29  ;;  %v345_v40 = vld [vmem:[%s1087_s2 + $0x60] sm:$0xff]  ;;  %v347_v43 = vld [vmem:[%s1087_s2 + $0x70] sm:$0xff]  ;;  %v354_v46 = vld [vmem:[%s1087_s2 + $0xa8] sm:$0xff] }
  0xf8   : > { %672 = vmatpush1.bf16.msra.mxu1 %v671_v33  ;;  %v643_v42 = vpack.c.bf16 %v345_v40, %v341_v39  ;;  %642 = vmatprep.subr.bf16.mxu0 %v641_v37  ;;  %v675_v47 = vpack.c.bf16 %v347_v43, %v343_v41  ;;  %v645_v48 = vpack.c.bf16 %v354_v46, %v350_v44  ;;  %v352_v49 = vld [vmem:[%s1087_s2 + $0x98] sm:$0xff]  ;;  %v349_v51 = vld [vmem:[%s1087_s2 + $0x80] sm:$0xff]  ;;  %v351_v54 = vld [vmem:[%s1087_s2 + $0x90] sm:$0xff] }
  0xf9   : > { %674 = vmatprep.subr.bf16.mxu1 %v673_v38  ;;  %v356_v50 = vld [vmem:[%s1087_s2 + $0xb8] sm:$0xff]  ;;  %v353_v53 = vld [vmem:[%s1087_s2 + $0xa0] sm:$0xff]  ;;  %v355_v55 = vld [vmem:[%s1087_s2 + $0xb0] sm:$0xff] }
  0xfa   : > { %v677_v52 = vpack.c.bf16 %v356_v50, %v352_v49  ;;  %v647_v56 = vpack.c.bf16 %v353_v53, %v349_v51  ;;  %v358_v57 = vld [vmem:[%s1087_s2 + $0xc8] sm:$0xff]  ;;  %v360_v59 = vld [vmem:[%s1087_s2 + $0xd8] sm:$0xff]  ;;  %v679_v60 = vpack.c.bf16 %v355_v55, %v351_v54  ;;  %v357_v63 = vld [vmem:[%s1087_s2 + $0xc0] sm:$0xff] }
  0xfb   : > { %644 = vmatpush1.bf16.msra.mxu0 %v643_v42  ;;  %v362_v58 = vld [vmem:[%s1087_s2 + $0xe8] sm:$0xff]  ;;  %v364_v62 = vld [vmem:[%s1087_s2 + $0xf8] sm:$0xff]  ;;  %v361_v0 = vld [vmem:[%s1087_s2 + $0xe0] sm:$0xff] }
  0xfc   : > { %676 = vmatpush1.bf16.msra.mxu1 %v675_v47  ;;  %646 = vmatprep.subr.bf16.mxu0 %v645_v48  ;;  %v649_v61 = vpack.c.bf16 %v362_v58, %v358_v57  ;;  %v681_v1 = vpack.c.bf16 %v364_v62, %v360_v59  ;;  %v359_v2 = vld [vmem:[%s1087_s2 + $0xd0] sm:$0xff]  ;;  %v366_v4 = vld [vmem:[%s1087_s2 + $0x108] sm:$0xff]  ;;  %v368_v6 = vld [vmem:[%s1087_s2 + $0x118] sm:$0xff]  ;;  %v651_v8 = vpack.c.bf16 %v361_v0, %v357_v63 }
  0xfd   : > { %678 = vmatprep.subr.bf16.mxu1 %v677_v52  ;;  %v363_v3 = vld [vmem:[%s1087_s2 + $0xf0] sm:$0xff]  ;;  %v370_v5 = vld [vmem:[%s1087_s2 + $0x128] sm:$0xff]  ;;  %v372_v7 = vld [vmem:[%s1087_s2 + $0x138] sm:$0xff] }
  0xfe   : > { %v683_v9 = vpack.c.bf16 %v363_v3, %v359_v2  ;;  %v653_v10 = vpack.c.bf16 %v370_v5, %v366_v4  ;;  %v365_v11 = vld [vmem:[%s1087_s2 + $0x100] sm:$0xff]  ;;  %v367_v13 = vld [vmem:[%s1087_s2 + $0x110] sm:$0xff]  ;;  %v685_v14 = vpack.c.bf16 %v372_v7, %v368_v6  ;;  %v374_v16 = vld [vmem:[%s1087_s2 + $0x148] sm:$0xff] }
  0xff   : > { %648 = vmatpush1.bf16.msra.mxu0 %v647_v56  ;;  %v369_v12 = vld [vmem:[%s1087_s2 + $0x120] sm:$0xff]  ;;  %v371_v15 = vld [vmem:[%s1087_s2 + $0x130] sm:$0xff]  ;;  %v378_v17 = vld [vmem:[%s1087_s2 + $0x168] sm:$0xff] }
 0x100   : > { %680 = vmatpush1.bf16.msra.mxu1 %v679_v60  ;;  %650 = vmatprep.subr.bf16.mxu0 %v649_v61  ;;  %v376_v20 = vld [vmem:[%s1087_s2 + $0x158] sm:$0xff]  ;;  %v655_v22 = vpack.c.bf16 %v369_v12, %v365_v11  ;;  %v687_v23 = vpack.c.bf16 %v371_v15, %v367_v13  ;;  %v657_v24 = vpack.c.bf16 %v378_v17, %v374_v16  ;;  %v373_v25 = vld [vmem:[%s1087_s2 + $0x140] sm:$0xff]  ;;  %v375_v27 = vld [vmem:[%s1087_s2 + $0x150] sm:$0xff] }
 0x101   : > { %682 = vmatprep.subr.bf16.mxu1 %v681_v1  ;;  %v380_v21 = vld [vmem:[%s1087_s2 + $0x178] sm:$0xff]  ;;  %v377_v26 = vld [vmem:[%s1087_s2 + $0x160] sm:$0xff]  ;;  %v379_v29 = vld [vmem:[%s1087_s2 + $0x170] sm:$0xff] }
 0x102   : > { %v689_v28 = vpack.c.bf16 %v380_v21, %v376_v20  ;;  %v382_v30 = vld [vmem:[%s1087_s2 + $0x188] sm:$0xff]  ;;  %v384_v32 = vld [vmem:[%s1087_s2 + $0x198] sm:$0xff]  ;;  %v659_v34 = vpack.c.bf16 %v377_v26, %v373_v25  ;;  %v691_v35 = vpack.c.bf16 %v379_v29, %v375_v27  ;;  %v381_v37 = vld [vmem:[%s1087_s2 + $0x180] sm:$0xff] }
 0x103   : > { %652 = vmatpush1.bf16.msra.mxu0 %v651_v8  ;;  %v386_v31 = vld [vmem:[%s1087_s2 + $0x1a8] sm:$0xff]  ;;  %v388_v33 = vld [vmem:[%s1087_s2 + $0x1b8] sm:$0xff]  ;;  %v385_v38 = vld [vmem:[%s1087_s2 + $0x1a0] sm:$0xff] }
 0x104   : > { %684 = vmatpush1.bf16.msra.mxu1 %v683_v9  ;;  %654 = vmatprep.subr.bf16.mxu0 %v653_v10  ;;  %v661_v36 = vpack.c.bf16 %v386_v31, %v382_v30  ;;  %v383_v39 = vld [vmem:[%s1087_s2 + $0x190] sm:$0xff]  ;;  %v693_v40 = vpack.c.bf16 %v388_v33, %v384_v32  ;;  %v390_v42 = vld [vmem:[%s1087_s2 + $0x1c8] sm:$0xff]  ;;  %v392_v44 = vld [vmem:[%s1087_s2 + $0x1d8] sm:$0xff]  ;;  %v663_v47 = vpack.c.bf16 %v385_v38, %v381_v37 }
 0x105   : > { %686 = vmatprep.subr.bf16.mxu1 %v685_v14  ;;  %v387_v41 = vld [vmem:[%s1087_s2 + $0x1b0] sm:$0xff]  ;;  %v394_v43 = vld [vmem:[%s1087_s2 + $0x1e8] sm:$0xff]  ;;  %v396_v46 = vld [vmem:[%s1087_s2 + $0x1f8] sm:$0xff] }
 0x106   : > { %v695_v48 = vpack.c.bf16 %v387_v41, %v383_v39  ;;  %v665_v49 = vpack.c.bf16 %v394_v43, %v390_v42  ;;  %v389_v50 = vld [vmem:[%s1087_s2 + $0x1c0] sm:$0xff]  ;;  %v697_v52 = vpack.c.bf16 %v396_v46, %v392_v44  ;;  %v391_v53 = vld [vmem:[%s1087_s2 + $0x1d0] sm:$0xff] }
 0x107   : > { %656 = vmatpush1.bf16.msra.mxu0 %v655_v22  ;;  %v393_v51 = vld [vmem:[%s1087_s2 + $0x1e0] sm:$0xff]  ;;  %v395_v54 = vld [vmem:[%s1087_s2 + $0x1f0] sm:$0xff] }
 0x108   : > { %688 = vmatpush1.bf16.msra.mxu1 %v687_v23  ;;  %658 = vmatprep.subr.bf16.mxu0 %v657_v24  ;;  %v667_v55 = vpack.c.bf16 %v393_v51, %v389_v50  ;;  %v699_v56 = vpack.c.bf16 %v395_v54, %v391_v53  ;;  %v332_v1 = vld [vmem:[%s331_s16] sm:$0xff] }
 0x109   : > { %690 = vmatprep.subr.bf16.mxu1 %v689_v28 }
 0x10b   : > { %660 = vmatpush1.bf16.msra.mxu0 %v659_v34 }
 0x10c   : > { %692 = vmatpush1.bf16.msra.mxu1 %v691_v35  ;;  %662 = vmatprep.subr.bf16.mxu0 %v661_v36 }
 0x10d   : > { %694 = vmatprep.subr.bf16.mxu1 %v693_v40 }
 0x10f   : > { %664 = vmatpush1.bf16.msra.mxu0 %v663_v47 }
 0x110   : > { %696 = vmatpush1.bf16.msra.mxu1 %v695_v48  ;;  %666 = vmatprep.subr.bf16.mxu0 %v665_v49 }
 0x111   : > { %698 = vmatprep.subr.bf16.mxu1 %v697_v52 }
 0x113   : > { %668 = vmatpush1.bf16.msra.mxu0 %v667_v55 }
 0x114   : > { %700 = vmatpush1.bf16.msra.mxu1 %v699_v56 }
 0x116   : > { %462 = vmatmul.mubr.f32.vlgmr.msra.gmra.mrb[0].mxu0 %v762_v19 }
 0x117   : > { %533 = vmatmul.mubr.f32.vlgmr.msra.gmra.mrb[0].mxu1 %v762_v19 }
 0x1e9   : > { %v463_v57 = vpop.f32.mrb[0].mxu0 }
 0x1ea   : > { %v534_v58 = vpop.f32.mrb[0].mxu1  ;;  %v465_v59 = vpop.f32.mrb[1].mxu0 }
 0x1eb   : > { %v543_v60 = vcombine.low %v463_v57, %v465_v59  ;;  %v536_v61 = vpop.f32.mrb[1].mxu1 }
 0x1ec   : > { %v544_v62 = vcombine.low %v534_v58, %v536_v61 }
 0x1ed   : > { %v551_v63 = vrot.slane %v543_v60, %v853_v45 }
 0x1ee   : > { %v558_v0 = vrot.slane %v544_v62, %v853_v45 }
 0x1f0   : > { %v559_v2 = vcombine.low %v551_v63, %v558_v0 }
 0x1f2   : > { %v561_v3 = vadd.f32 %v559_v2, %v332_v1 }
 0x1f4   : > { %v617_v4 = vmul.f32 -1.442695, %v561_v3  ;;  %v569_v5 = vrot.slane %v561_v3, 2  ;;  %v580_v19 = vrot.slane %v561_v3, 6  ;;  %v577_v9 = vrot.slane %v561_v3, 4 }
 0x1f6   : > { %728 = vpow2.f32 %v617_v4  ;;  %v618_v6 = vmul.f32 -1.442695, %v569_v5  ;;  %v619_v7 = vmul.f32 -1.442695, %v580_v19 }
 0x1f8   : > { %730 = vpow2.f32 %v618_v6 }
 0x1f9   : > { %732 = vpow2.f32 %v619_v7 }
 0x200   : > { %v729_v8 = vpop.eup %728 }
 0x201   : > { %v565_v10 = vadd.f32 1.0, %v729_v8 }
 0x202   : > { %v731_v11 = vpop.eup %730 }
 0x203   : > { %734 = vrcp.f32 %v565_v10  ;;  %v574_v12 = vadd.f32 1.0, %v731_v11  ;;  %v733_v13 = vpop.eup %732 }
 0x204   : > { %736 = vtanh.f32 %v577_v9  ;;  %v585_v17 = vadd.f32 1.0, %v733_v13 }
 0x205   : > { %738 = vrcp.f32 %v574_v12 }
 0x206   : > { %740 = vrcp.f32 %v585_v17 }
 0x20d   : > { %v735_v14 = vpop.eup %734 }
 0x20e   : > { %v737_v15 = vpop.eup %736 }
 0x20f   : > { %v739_v16 = vpop.eup %738  ;;  %v589_v21 = vmul.f32 %v737_v15, %v735_v14 }
 0x210   : > { %v588_v20 = vmul.f32 %v758_v18, %v739_v16  ;;  %v741_v22 = vpop.eup %740 }
 0x212   : > { %v590_v18 = vadd.f32 %v589_v21, %v588_v20  }
 0x214   : > { %742 = vtanh.f32 %v590_v18 }
 0x21b   :  { %325 = sbr.rel (!%p323_p0) target bundleno = 242 (0xf2), region = 51 }
 0x21e   : > { %v743_v23 = vpop.eup %742 }
 0x21f   : > { %v592_v24 = vmul.f32 %v743_v23, %v741_v22  }
 0x221   : > { %v1091_v19 = vmov %v592_v24  ;;  %593 = vst [vmem:[%s1088_s4] sm:$0x3] (%p323_p0), %v592_v24 }

</bundles_post_ra>
